<compile_context>
chip_gen: v5e
topology: v5e:2x2
jax: 0.10.0
libtpu: 0.0.40
codegen_flags: <defaults>
</compile_context>

<pallas_src>
import functools

import jax
import jax.numpy as jnp
import numpy as np
from jax import lax
from jax.experimental import pallas as pl
from jax.experimental.pallas import tpu as pltpu


def _round_up(n, m):
    return -(-n // m) * m


def digit_caps_kernel(w_ref, x_ref, o_ref, uhat_ref, b_ref, *,
                      out_dim, out_cap, out_cap_pad, num_routing):
    E, O, Op = out_dim, out_cap, out_cap_pad
    I = x_ref.shape[0]
    Bt = x_ref.shape[2]

    W = w_ref[...].astype(jnp.float32)            # (I, E*Op, D)
    x = x_ref[...].astype(jnp.float32)            # (I, D, Bt)

    # u_hat[i, e, o, b] = sum_d W[o, i, e, d] * x[b, i, d]  (MXU, batched over i)
    u_flat = lax.dot_general(
        W, x,
        dimension_numbers=(((2,), (1,)), ((0,), (0,))),
        preferred_element_type=jnp.float32,
    )                                             # (I, E*Op, Bt)
    u_hat0 = u_flat.reshape(I, E, Op, Bt)
    uhat_ref[...] = u_hat0

    # Routing logits: 0 for real out-capsules, -1e9 for padded ones so the
    # softmax over out_cap ignores the padding (their u_hat is exactly 0, so
    # their agreement update is 0 and they stay masked).
    o_ids = lax.broadcasted_iota(jnp.int32, (1, Op, Bt), 1)
    b0 = jnp.where(o_ids < O, jnp.float32(0.0), jnp.float32(-1e9))
    b_ref[...] = jnp.broadcast_to(b0, (I, Op, Bt))

    def squash(s):                                # s: (E, Op, Bt), squash over E
        sqn = jnp.sum(s * s, axis=0, keepdims=True)            # (1, Op, Bt)
        # coef = [sqn/(1+sqn)] * [1/(sqrt(sqn)+1e-8)]  folded into one EUP recip
        coef = sqn * pl.reciprocal((1.0 + sqn) * (jnp.sqrt(sqn) + 1e-8),
                                   approx=True)
        return coef * s

    # ---- iteration 0: logits are uniform over real capsules, so the coupling
    # is the constant 1/out_cap and s = (1/out_cap) * sum_i u_hat.  Padded
    # capsules contribute exactly 0, so no masking of c is needed here.
    s = jnp.sum(u_hat0, axis=0) * jnp.float32(1.0 / O)          # (E, Op, Bt)
    v = squash(s)

    # ---- remaining iterations: fuse the agreement update (with v from the
    # previous iteration) with this iteration's coupling + s accumulation,
    # streaming u_hat once per iteration, one input capsule at a time.
    for _ in range(1, num_routing):
        def body(i, s_acc):
            u_i = uhat_ref[i]                                   # (E, Op, Bt)
            agree = jnp.sum(u_i * v, axis=0)                    # (Op, Bt)
            b_i = b_ref[i] + agree
            b_ref[i] = b_i
            m_i = jnp.max(b_i, axis=0, keepdims=True)           # (1, Bt)
            p_i = jnp.exp(b_i - m_i)                            # (Op, Bt)
            inv = pl.reciprocal(jnp.sum(p_i, axis=0, keepdims=True),
                                approx=True)                    # (1, Bt)
            c_i = p_i * inv                                     # (Op, Bt)
            return s_acc + c_i[None, :, :] * u_i
        s = lax.fori_loop(0, I, body, jnp.zeros((E, Op, Bt), jnp.float32))
        v = squash(s)

    o_ref[...] = v.astype(o_ref.dtype)


def digit_caps_pallas(x, W, num_routing, block_b=None):
    """x: (B, in_cap, in_dim); W: (1, out_cap, in_cap, out_dim, in_dim)."""
    B, I, D = x.shape
    _, O, I2, E, D2 = W.shape
    assert (I2, D2) == (I, D)

    Op = _round_up(O, 8)                 # pad out_cap to a sublane multiple
    if block_b is None:
        # 128 is safe everywhere (VMEM ~18 MiB incl. the padded W block); with
        # this loop-accumulated routing, 256 (v7x) / 512 (v6e) also fit under
        # the 64 MiB limit set below and amortize grid overhead better.
        block_b = 128
    block_b = max(128, _round_up(block_b, 128))
    Bp = _round_up(max(B, 1), block_b)
    n_tiles = Bp // block_b

    # W -> (in_cap, out_dim*out_cap_pad, in_dim), zero-padded over out_cap.
    W_k = jnp.transpose(W[0], (1, 2, 0, 3))              # (I, E, O, D)
    W_k = jnp.pad(W_k, ((0, 0), (0, 0), (0, Op - O), (0, 0)))
    W_k = W_k.reshape(I, E * Op, D)

    # x -> (in_cap, in_dim, B_pad): batch on the lane axis.
    x_t = jnp.transpose(x, (1, 2, 0))
    x_t = jnp.pad(x_t, ((0, 0), (0, 0), (0, Bp - B)))

    kernel = functools.partial(
        digit_caps_kernel, out_dim=E, out_cap=O, out_cap_pad=Op,
        num_routing=num_routing)

    flops = 2 * Bp * I * E * Op * D + 4 * num_routing * Bp * I * E * Op
    transcendentals = num_routing * Bp * I * Op
    bytes_accessed = 4 * (Bp * (I * D + E * Op) + I * E * Op * D)

    out = pl.pallas_call(
        kernel,
        out_shape=jax.ShapeDtypeStruct((E, Op, Bp), x.dtype),
        grid_spec=pltpu.PrefetchScalarGridSpec(
            num_scalar_prefetch=0,
            grid=(n_tiles,),
            in_specs=[
                pl.BlockSpec((I, E * Op, D), lambda t: (0, 0, 0)),   # W (constant block)
                pl.BlockSpec((I, D, block_b), lambda t: (0, 0, t)),  # batch tile
            ],
            out_specs=pl.BlockSpec((E, Op, block_b), lambda t: (0, 0, t)),
            scratch_shapes=[
                pltpu.VMEM((I, E, Op, block_b), jnp.float32),        # u_hat
                pltpu.VMEM((I, Op, block_b), jnp.float32),           # routing logits b
            ],
        ),
        compiler_params=pltpu.CompilerParams(
            dimension_semantics=("parallel",),
            vmem_limit_bytes=64 * 1024 * 1024,
        ),
        cost_estimate=pl.CostEstimate(
            flops=flops, transcendentals=transcendentals,
            bytes_accessed=bytes_accessed),
    )(W_k, x_t)

    v = out[:, :O, :B]                                    # (E, O, B)
    return jnp.transpose(v, (2, 1, 0))                    # (B, out_cap, out_dim)


# ----------------------- pure-JAX reference (mirrors PyTorch) -----------------
def _squash_ref(x, axis=-1):
    sqn = jnp.sum(x * x, axis=axis, keepdims=True)
    scale = sqn / (1.0 + sqn)
    return scale * x / (jnp.sqrt(sqn) + 1e-8)


def digit_caps_ref(x, W, num_routing):
    hp = jax.lax.Precision.HIGHEST
    u_hat = jnp.matmul(W, x[:, None, :, :, None], precision=hp)[..., 0]  # (B,O,I,E)
    B, O, I, E = u_hat.shape
    b = jnp.zeros((B, O, I, 1), x.dtype)
    for _ in range(num_routing - 1):
        c = jax.nn.softmax(b, axis=1)
        s = jnp.sum(c * u_hat, axis=2)
        v = _squash_ref(s)
        agree = jnp.matmul(u_hat, v[..., None], precision=hp)
        b = b + agree
    c = jax.nn.softmax(b, axis=1)
    s = jnp.sum(c * u_hat, axis=2)
    return _squash_ref(s)


if __name__ == "__main__":
    # small, module-consistent shapes
    in_dim, in_cap, out_cap, out_dim, num_routing = 8, 32, 10, 16, 3
    batch = 2

    key = jax.random.PRNGKey(0)
    kw, kx = jax.random.split(key)
    # W = 0.01 * rand(1, out_cap, in_cap, out_dim, in_dim)   (deterministic init)
    W = 0.01 * jax.random.uniform(
        kw, (1, out_cap, in_cap, out_dim, in_dim), dtype=jnp.float32)
    x = jax.random.normal(kx, (batch, in_cap, in_dim), dtype=jnp.float32)

    digit_caps = jax.jit(functools.partial(digit_caps_pallas,
                                           num_routing=num_routing))
    v = digit_caps(x, W)
    v = jax.block_until_ready(v)

    v_ref = digit_caps_ref(x, W, num_routing)
    # Tolerance loosened vs. a pure-f32 check because the kernel uses the EUP
    # approximate reciprocal (softmax denominator and squash coefficient).
    np.testing.assert_allclose(np.asarray(v), np.asarray(v_ref),
                               rtol=1e-2, atol=2e-5)
    print("KERNEL_OK")
</pallas_src>

<mosaic_0001>
module attributes {stable_mosaic.version = 11 : i64} {
  func.func @digit_caps_kernel(%arg0: i32, %arg1: memref<32x256x8xf32, #tpu.memory_space<vmem>>, %arg2: memref<32x8x128xf32, #tpu.memory_space<vmem>>, %arg3: memref<16x16x128xf32, #tpu.memory_space<vmem>>, %arg4: memref<32x16x16x128xf32, #tpu.memory_space<vmem>>, %arg5: memref<32x16x128xf32, #tpu.memory_space<vmem>>) attributes {dimension_semantics = [#tpu.dimension_semantics<parallel>], iteration_bounds = array<i64: 1>, scalar_prefetch = 0 : i64, scratch_operands = 2 : i64, tpu.core_type = #tpu.core_type<tc>, window_params = [{pipeline_mode = #tpu.pipeline_mode<synchronous>, transform_indices = @transform_0, window_bounds = array<i64: 32, 256, 8>}, {transform_indices = @transform_1, window_bounds = array<i64: 32, 8, 128>}, {transform_indices = @transform_2, window_bounds = array<i64: 16, 16, 128>}]} {
    %c0 = arith.constant 0 : index
    %c0_0 = arith.constant 0 : index
    %c0_1 = arith.constant 0 : index
    %0 = vector.load %arg1[%c0, %c0_0, %c0_1] : memref<32x256x8xf32, #tpu.memory_space<vmem>>, vector<32x256x8xf32>
    %c0_2 = arith.constant 0 : index
    %c0_3 = arith.constant 0 : index
    %c0_4 = arith.constant 0 : index
    %1 = vector.load %arg2[%c0_2, %c0_3, %c0_4] : memref<32x8x128xf32, #tpu.memory_space<vmem>>, vector<32x8x128xf32>
    %cst = arith.constant dense<0.000000e+00> : vector<32x256x128xf32>
    %2 = tpu.matmul %0, %1, %cst {dimension_numbers = #tpu.dot_dimension_numbers<[2], [1], [1], [2], [0, 0, 0, 1, 1, 2], [0], [0]>} : vector<32x256x8xf32>, vector<32x8x128xf32>, vector<32x256x128xf32> -> vector<32x256x128xf32>
    %3 = vector.shape_cast %2 : vector<32x256x128xf32> to vector<32x16x16x128xf32>
    %c0_5 = arith.constant 0 : index
    %c0_6 = arith.constant 0 : index
    %c0_7 = arith.constant 0 : index
    %c0_8 = arith.constant 0 : index
    %4 = vector.load %arg4[%c0_5, %c0_6, %c0_7, %c0_8] : memref<32x16x16x128xf32, #tpu.memory_space<vmem>>, vector<32x16x16x128xf32>
    tpu.vector_store %arg4[%c0_5, %c0_6, %c0_7, %c0_8], %3 {strides = array<i32>} : memref<32x16x16x128xf32, #tpu.memory_space<vmem>>, vector<32x16x16x128xf32>,
    %5 = tpu.iota {dimensions = array<i32: 1>} : vector<1x16x128xi32>
    %c10_i32 = arith.constant 10 : i32
    %6 = vector.broadcast %c10_i32 : i32 to vector<1x16x128xi32>
    %7 = arith.cmpi slt, %5, %6 : vector<1x16x128xi32>
    %cst_9 = arith.constant 0.000000e+00 : f32
    %cst_10 = arith.constant -1.000000e+09 : f32
    %8 = vector.broadcast %cst_9 : f32 to vector<1x16x128xf32>
    %9 = vector.broadcast %cst_10 : f32 to vector<1x16x128xf32>
    %10 = arith.select %7, %8, %9 : vector<1x16x128xi1>, vector<1x16x128xf32>
    %11 = vector.shape_cast %10 : vector<1x16x128xf32> to vector<1x16x128xf32>
    %12 = vector.broadcast %11 : vector<1x16x128xf32> to vector<32x16x128xf32>
    %c0_11 = arith.constant 0 : index
    %c0_12 = arith.constant 0 : index
    %c0_13 = arith.constant 0 : index
    %13 = vector.load %arg5[%c0_11, %c0_12, %c0_13] : memref<32x16x128xf32, #tpu.memory_space<vmem>>, vector<32x16x128xf32>
    tpu.vector_store %arg5[%c0_11, %c0_12, %c0_13], %12 {strides = array<i32>} : memref<32x16x128xf32, #tpu.memory_space<vmem>>, vector<32x16x128xf32>,
    %cst_14 = arith.constant dense<0.000000e+00> : vector<16x16x128xf32>
    %14 = vector.multi_reduction <add>, %3, %cst_14 [0] : vector<32x16x16x128xf32> to vector<16x16x128xf32>
    %cst_15 = arith.constant 1.000000e-01 : f32
    %15 = vector.broadcast %cst_15 : f32 to vector<16x16x128xf32>
    %16 = arith.mulf %14, %15 : vector<16x16x128xf32>
    %17 = arith.mulf %16, %16 : vector<16x16x128xf32>
    %cst_16 = arith.constant dense<0.000000e+00> : vector<16x128xf32>
    %18 = vector.multi_reduction <add>, %17, %cst_16 [0] : vector<16x16x128xf32> to vector<16x128xf32>
    %19 = vector.shape_cast %18 : vector<16x128xf32> to vector<1x16x128xf32>
    %cst_17 = arith.constant 1.000000e+00 : f32
    %20 = vector.broadcast %cst_17 : f32 to vector<1x16x128xf32>
    %21 = arith.addf %20, %19 : vector<1x16x128xf32>
    %22 = math.sqrt %19 : vector<1x16x128xf32>
    %cst_18 = arith.constant 9.99999993E-9 : f32
    %23 = vector.broadcast %cst_18 : f32 to vector<1x16x128xf32>
    %24 = arith.addf %22, %23 : vector<1x16x128xf32>
    %25 = arith.mulf %21, %24 : vector<1x16x128xf32>
    %26 = tpu.reciprocal %25 {approx = true} : vector<1x16x128xf32> -> vector<1x16x128xf32>
    %27 = arith.mulf %19, %26 : vector<1x16x128xf32>
    %28 = vector.broadcast %27 : vector<1x16x128xf32> to vector<16x16x128xf32>
    %29 = arith.mulf %28, %16 : vector<16x16x128xf32>
    %cst_19 = arith.constant 0.000000e+00 : f32
    %30 = vector.broadcast %cst_19 : f32 to vector<16x16x128xf32>
    %c0_i32 = arith.constant 0 : i32
    %c32_i32 = arith.constant 32 : i32
    %31 = arith.addi %c0_i32, %c32_i32 : i32
    %c1_i32 = arith.constant 1 : i32
    %32 = scf.for %arg6 = %c0_i32 to %31 step %c1_i32 iter_args(%arg7 = %30) -> (vector<16x16x128xf32>)  : i32 {
      %63 = arith.index_cast %arg6 : i32 to index
      %c0_35 = arith.constant 0 : index
      %c0_36 = arith.constant 0 : index
      %c0_37 = arith.constant 0 : index
      %64 = vector.load %arg4[%63, %c0_35, %c0_36, %c0_37] : memref<32x16x16x128xf32, #tpu.memory_space<vmem>>, vector<1x16x16x128xf32>
      %65 = vector.shape_cast %64 : vector<1x16x16x128xf32> to vector<16x16x128xf32>
      %66 = arith.mulf %65, %29 : vector<16x16x128xf32>
      %cst_38 = arith.constant dense<0.000000e+00> : vector<16x128xf32>
      %67 = vector.multi_reduction <add>, %66, %cst_38 [0] : vector<16x16x128xf32> to vector<16x128xf32>
      %68 = arith.index_cast %arg6 : i32 to index
      %c0_39 = arith.constant 0 : index
      %c0_40 = arith.constant 0 : index
      %69 = vector.load %arg5[%68, %c0_39, %c0_40] : memref<32x16x128xf32, #tpu.memory_space<vmem>>, vector<1x16x128xf32>
      %70 = vector.shape_cast %69 : vector<1x16x128xf32> to vector<16x128xf32>
      %71 = arith.addf %70, %67 : vector<16x128xf32>
      %72 = arith.index_cast %arg6 : i32 to index
      %c0_41 = arith.constant 0 : index
      %c0_42 = arith.constant 0 : index
      %73 = vector.load %arg5[%72, %c0_41, %c0_42] : memref<32x16x128xf32, #tpu.memory_space<vmem>>, vector<1x16x128xf32>
      %74 = vector.shape_cast %73 : vector<1x16x128xf32> to vector<16x128xf32>
      %75 = vector.shape_cast %71 : vector<16x128xf32> to vector<1x16x128xf32>
      tpu.vector_store %arg5[%72, %c0_41, %c0_42], %75 {strides = array<i32>} : memref<32x16x128xf32, #tpu.memory_space<vmem>>, vector<1x16x128xf32>,
      %cst_43 = arith.constant dense<0xFF800000> : vector<128xf32>
      %76 = vector.multi_reduction <maximumf>, %71, %cst_43 [0] : vector<16x128xf32> to vector<128xf32>
      %77 = vector.shape_cast %76 : vector<128xf32> to vector<1x128xf32>
      %78 = vector.broadcast %77 : vector<1x128xf32> to vector<16x128xf32>
      %79 = arith.subf %71, %78 : vector<16x128xf32>
      %80 = math.exp %79 : vector<16x128xf32>
      %cst_44 = arith.constant dense<0.000000e+00> : vector<128xf32>
      %81 = vector.multi_reduction <add>, %80, %cst_44 [0] : vector<16x128xf32> to vector<128xf32>
      %82 = vector.shape_cast %81 : vector<128xf32> to vector<1x128xf32>
      %83 = tpu.reciprocal %82 {approx = true} : vector<1x128xf32> -> vector<1x128xf32>
      %84 = vector.broadcast %83 : vector<1x128xf32> to vector<16x128xf32>
      %85 = arith.mulf %80, %84 : vector<16x128xf32>
      %86 = vector.shape_cast %85 : vector<16x128xf32> to vector<1x16x128xf32>
      %87 = vector.broadcast %86 : vector<1x16x128xf32> to vector<16x16x128xf32>
      %88 = arith.mulf %87, %65 : vector<16x16x128xf32>
      %89 = arith.addf %arg7, %88 : vector<16x16x128xf32>
      scf.yield %89 : vector<16x16x128xf32>
    }
    %c32_i32_20 = arith.constant 32 : i32
    %33 = arith.mulf %32, %32 : vector<16x16x128xf32>
    %cst_21 = arith.constant dense<0.000000e+00> : vector<16x128xf32>
    %34 = vector.multi_reduction <add>, %33, %cst_21 [0] : vector<16x16x128xf32> to vector<16x128xf32>
    %35 = vector.shape_cast %34 : vector<16x128xf32> to vector<1x16x128xf32>
    %cst_22 = arith.constant 1.000000e+00 : f32
    %36 = vector.broadcast %cst_22 : f32 to vector<1x16x128xf32>
    %37 = arith.addf %36, %35 : vector<1x16x128xf32>
    %38 = math.sqrt %35 : vector<1x16x128xf32>
    %cst_23 = arith.constant 9.99999993E-9 : f32
    %39 = vector.broadcast %cst_23 : f32 to vector<1x16x128xf32>
    %40 = arith.addf %38, %39 : vector<1x16x128xf32>
    %41 = arith.mulf %37, %40 : vector<1x16x128xf32>
    %42 = tpu.reciprocal %41 {approx = true} : vector<1x16x128xf32> -> vector<1x16x128xf32>
    %43 = arith.mulf %35, %42 : vector<1x16x128xf32>
    %44 = vector.broadcast %43 : vector<1x16x128xf32> to vector<16x16x128xf32>
    %45 = arith.mulf %44, %32 : vector<16x16x128xf32>
    %cst_24 = arith.constant 0.000000e+00 : f32
    %46 = vector.broadcast %cst_24 : f32 to vector<16x16x128xf32>
    %c0_i32_25 = arith.constant 0 : i32
    %c32_i32_26 = arith.constant 32 : i32
    %47 = arith.addi %c0_i32_25, %c32_i32_26 : i32
    %c1_i32_27 = arith.constant 1 : i32
    %48 = scf.for %arg6 = %c0_i32_25 to %47 step %c1_i32_27 iter_args(%arg7 = %46) -> (vector<16x16x128xf32>)  : i32 {
      %63 = arith.index_cast %arg6 : i32 to index
      %c0_35 = arith.constant 0 : index
      %c0_36 = arith.constant 0 : index
      %c0_37 = arith.constant 0 : index
      %64 = vector.load %arg4[%63, %c0_35, %c0_36, %c0_37] : memref<32x16x16x128xf32, #tpu.memory_space<vmem>>, vector<1x16x16x128xf32>
      %65 = vector.shape_cast %64 : vector<1x16x16x128xf32> to vector<16x16x128xf32>
      %66 = arith.mulf %65, %45 : vector<16x16x128xf32>
      %cst_38 = arith.constant dense<0.000000e+00> : vector<16x128xf32>
      %67 = vector.multi_reduction <add>, %66, %cst_38 [0] : vector<16x16x128xf32> to vector<16x128xf32>
      %68 = arith.index_cast %arg6 : i32 to index
      %c0_39 = arith.constant 0 : index
      %c0_40 = arith.constant 0 : index
      %69 = vector.load %arg5[%68, %c0_39, %c0_40] : memref<32x16x128xf32, #tpu.memory_space<vmem>>, vector<1x16x128xf32>
      %70 = vector.shape_cast %69 : vector<1x16x128xf32> to vector<16x128xf32>
      %71 = arith.addf %70, %67 : vector<16x128xf32>
      %72 = arith.index_cast %arg6 : i32 to index
      %c0_41 = arith.constant 0 : index
      %c0_42 = arith.constant 0 : index
      %73 = vector.load %arg5[%72, %c0_41, %c0_42] : memref<32x16x128xf32, #tpu.memory_space<vmem>>, vector<1x16x128xf32>
      %74 = vector.shape_cast %73 : vector<1x16x128xf32> to vector<16x128xf32>
      %75 = vector.shape_cast %71 : vector<16x128xf32> to vector<1x16x128xf32>
      tpu.vector_store %arg5[%72, %c0_41, %c0_42], %75 {strides = array<i32>} : memref<32x16x128xf32, #tpu.memory_space<vmem>>, vector<1x16x128xf32>,
      %cst_43 = arith.constant dense<0xFF800000> : vector<128xf32>
      %76 = vector.multi_reduction <maximumf>, %71, %cst_43 [0] : vector<16x128xf32> to vector<128xf32>
      %77 = vector.shape_cast %76 : vector<128xf32> to vector<1x128xf32>
      %78 = vector.broadcast %77 : vector<1x128xf32> to vector<16x128xf32>
      %79 = arith.subf %71, %78 : vector<16x128xf32>
      %80 = math.exp %79 : vector<16x128xf32>
      %cst_44 = arith.constant dense<0.000000e+00> : vector<128xf32>
      %81 = vector.multi_reduction <add>, %80, %cst_44 [0] : vector<16x128xf32> to vector<128xf32>
      %82 = vector.shape_cast %81 : vector<128xf32> to vector<1x128xf32>
      %83 = tpu.reciprocal %82 {approx = true} : vector<1x128xf32> -> vector<1x128xf32>
      %84 = vector.broadcast %83 : vector<1x128xf32> to vector<16x128xf32>
      %85 = arith.mulf %80, %84 : vector<16x128xf32>
      %86 = vector.shape_cast %85 : vector<16x128xf32> to vector<1x16x128xf32>
      %87 = vector.broadcast %86 : vector<1x16x128xf32> to vector<16x16x128xf32>
      %88 = arith.mulf %87, %65 : vector<16x16x128xf32>
      %89 = arith.addf %arg7, %88 : vector<16x16x128xf32>
      scf.yield %89 : vector<16x16x128xf32>
    }
    %c32_i32_28 = arith.constant 32 : i32
    %49 = arith.mulf %48, %48 : vector<16x16x128xf32>
    %cst_29 = arith.constant dense<0.000000e+00> : vector<16x128xf32>
    %50 = vector.multi_reduction <add>, %49, %cst_29 [0] : vector<16x16x128xf32> to vector<16x128xf32>
    %51 = vector.shape_cast %50 : vector<16x128xf32> to vector<1x16x128xf32>
    %cst_30 = arith.constant 1.000000e+00 : f32
    %52 = vector.broadcast %cst_30 : f32 to vector<1x16x128xf32>
    %53 = arith.addf %52, %51 : vector<1x16x128xf32>
    %54 = math.sqrt %51 : vector<1x16x128xf32>
    %cst_31 = arith.constant 9.99999993E-9 : f32
    %55 = vector.broadcast %cst_31 : f32 to vector<1x16x128xf32>
    %56 = arith.addf %54, %55 : vector<1x16x128xf32>
    %57 = arith.mulf %53, %56 : vector<1x16x128xf32>
    %58 = tpu.reciprocal %57 {approx = true} : vector<1x16x128xf32> -> vector<1x16x128xf32>
    %59 = arith.mulf %51, %58 : vector<1x16x128xf32>
    %60 = vector.broadcast %59 : vector<1x16x128xf32> to vector<16x16x128xf32>
    %61 = arith.mulf %60, %48 : vector<16x16x128xf32>
    %c0_32 = arith.constant 0 : index
    %c0_33 = arith.constant 0 : index
    %c0_34 = arith.constant 0 : index
    %62 = vector.load %arg3[%c0_32, %c0_33, %c0_34] : memref<16x16x128xf32, #tpu.memory_space<vmem>>, vector<16x16x128xf32>
    tpu.vector_store %arg3[%c0_32, %c0_33, %c0_34], %61 {strides = array<i32>} : memref<16x16x128xf32, #tpu.memory_space<vmem>>, vector<16x16x128xf32>,
    return
  }
  func.func @transform_0(%arg0: i32) -> (i32, i32, i32) {
    %c0_i32 = arith.constant 0 : i32
    %c0_i32_0 = arith.constant 0 : i32
    %c0_i32_1 = arith.constant 0 : i32
    %c0_i32_2 = arith.constant 0 : i32
    return %c0_i32, %c0_i32_0, %c0_i32_1 : i32, i32, i32
  }
  func.func @transform_1(%arg0: i32) -> (i32, i32, i32) {
    %c0_i32 = arith.constant 0 : i32
    %c0_i32_0 = arith.constant 0 : i32
    %c0_i32_1 = arith.constant 0 : i32
    return %c0_i32, %c0_i32_0, %arg0 : i32, i32, i32
  }
  func.func @transform_2(%arg0: i32) -> (i32, i32, i32) {
    %c0_i32 = arith.constant 0 : i32
    %c0_i32_0 = arith.constant 0 : i32
    %c0_i32_1 = arith.constant 0 : i32
    return %c0_i32, %c0_i32_0, %arg0 : i32, i32, i32
  }
}

</mosaic_0001>

<bundles_post_ra>
// kernel: digit_caps_pallas.1
= control target key start
LH: loop header
LB: loop body
LE: loop exit
PB: predicated region body
PF: predicated region fallthrough
CT: control target
= control target key end

     0   :  { %vm1067_vm0 = vcmask 64512   ;;  %s19763_s1 = inlined_call_operand.vmem [shape: f32[32,8,128], index: 1, kind: input, shape index: {}]   ;;  %s19764_s2 = inlined_call_operand.vmem [shape: f32[16,16,128], index: 2, kind: output, shape index: {}]   ;;  %s19765_s0 = inlined_call_operand.vmem [shape: f32[32,256,8], index: 0, kind: input, shape index: {}]  }
   0x1   :  { %v1035_v0 = vld [vmem:[%s19763_s1] sm:$0xff]  ;;  %v1037_v1 = vld [vmem:[%s19763_s1 + $0x10] sm:$0xff]  ;;  %v1036_v5 = vld [vmem:[%s19763_s1 + $0x8] sm:$0xff] }
   0x2   :  { %v11_v2 = vld [vmem:[%s19765_s0] sm:$0xff]  ;;  %1179 = vmatpush.msra.mxu0 %v1035_v0  ;;  %1597 = vmatpush.msra.mxu2 %v1037_v1  ;;  %v1041_v4 = vld [vmem:[%s19763_s1 + $0x30] sm:$0xff]  ;;  %v1038_v6 = vld [vmem:[%s19763_s1 + $0x18] sm:$0xff] }
   0x3   :  { %v75_v3 = vld [vmem:[%s19765_s0 + $0x200] sm:$0xff]  ;;  %10963 = vmatmul.msk.f32.vlgmr.msra.gmra.mxu0 %vm1067_vm0, %v11_v2  ;;  %1388 = vmatpush.msra.mxu1 %v1036_v5  ;;  %v1042_v10 = vld [vmem:[%s19763_s1 + $0x38] sm:$0xff]  ;;  %v1040_v11 = vld [vmem:[%s19763_s1 + $0x28] sm:$0xff] }
   0x4   :  { %11027 = vmatmul.msk.f32.vlgmr.msra.gmra.mxu2 %vm1067_vm0, %v75_v3  ;;  %v43_v7 = vld [vmem:[%s19765_s0 + $0x100] sm:$0xff]  ;;  %1806 = vmatpush.msra.mxu3 %v1038_v6  ;;  %v12_v12 = vld [vmem:[%s19765_s0 + $0x8] sm:$0xff]  ;;  %v13_v16 = vld [vmem:[%s19765_s0 + $0x10] sm:$0xff] }
   0x5   :  { %v107_v8 = vld [vmem:[%s19765_s0 + $0x300] sm:$0xff]  ;;  %2433 = vmatpush.msrb.mxu2 %v1041_v4  ;;  %10995 = vmatmul.msk.f32.vlgmr.msra.gmra.mxu1 %vm1067_vm0, %v43_v7  ;;  %v76_v13 = vld [vmem:[%s19765_s0 + $0x208] sm:$0xff]  ;;  %v77_v17 = vld [vmem:[%s19765_s0 + $0x210] sm:$0xff] }
   0x6   :  { %v1039_v9 = vld [vmem:[%s19763_s1 + $0x20] sm:$0xff]  ;;  %11059 = vmatmul.msk.f32.vlgmr.msra.gmra.mxu3 %vm1067_vm0, %v107_v8  ;;  %2224 = vmatpush.msrb.mxu1 %v1040_v11  ;;  %v44_v14 = vld [vmem:[%s19765_s0 + $0x108] sm:$0xff]  ;;  %v45_v18 = vld [vmem:[%s19765_s0 + $0x110] sm:$0xff] }
   0x7   :  { %2015 = vmatpush.msrb.mxu0 %v1039_v9  ;;  %2642 = vmatpush.msrb.mxu3 %v1042_v10  ;;  %v108_v15 = vld [vmem:[%s19765_s0 + $0x308] sm:$0xff]  ;;  %v109_v19 = vld [vmem:[%s19765_s0 + $0x310] sm:$0xff]  ;;  %v14_v20 = vld [vmem:[%s19765_s0 + $0x18] sm:$0xff] }
   0x8   :  { %v78_v21 = vld [vmem:[%s19765_s0 + $0x218] sm:$0xff]  ;;  %v15_v24 = vld [vmem:[%s19765_s0 + $0x20] sm:$0xff]  ;;  %v16_v28 = vld [vmem:[%s19765_s0 + $0x28] sm:$0xff] }
   0x9   :  { %v46_v22 = vld [vmem:[%s19765_s0 + $0x118] sm:$0xff]  ;;  %v79_v25 = vld [vmem:[%s19765_s0 + $0x220] sm:$0xff]  ;;  %v80_v29 = vld [vmem:[%s19765_s0 + $0x228] sm:$0xff] }
   0xa   :  { %v110_v23 = vld [vmem:[%s19765_s0 + $0x318] sm:$0xff]  ;;  %v47_v26 = vld [vmem:[%s19765_s0 + $0x120] sm:$0xff]  ;;  %v48_v30 = vld [vmem:[%s19765_s0 + $0x128] sm:$0xff] }
   0xb   :  { %10964 = vmatmul.msk.f32.gmra.mxu0 %vm1067_vm0, %v12_v12  ;;  %v111_v27 = vld [vmem:[%s19765_s0 + $0x320] sm:$0xff]  ;;  %v112_v31 = vld [vmem:[%s19765_s0 + $0x328] sm:$0xff]  ;;  %v17_v32 = vld [vmem:[%s19765_s0 + $0x30] sm:$0xff] }
   0xc   :  { %11028 = vmatmul.msk.f32.gmra.mxu2 %vm1067_vm0, %v76_v13  ;;  %v81_v33 = vld [vmem:[%s19765_s0 + $0x230] sm:$0xff]  ;;  %v18_v36 = vld [vmem:[%s19765_s0 + $0x38] sm:$0xff]  ;;  %v19_v40 = vld [vmem:[%s19765_s0 + $0x40] sm:$0xff] }
   0xd   :  { %10996 = vmatmul.msk.f32.gmra.mxu1 %vm1067_vm0, %v44_v14  ;;  %v49_v34 = vld [vmem:[%s19765_s0 + $0x130] sm:$0xff]  ;;  %v82_v37 = vld [vmem:[%s19765_s0 + $0x238] sm:$0xff]  ;;  %v83_v41 = vld [vmem:[%s19765_s0 + $0x240] sm:$0xff] }
   0xe   :  { %11060 = vmatmul.msk.f32.gmra.mxu3 %vm1067_vm0, %v108_v15  ;;  %v113_v35 = vld [vmem:[%s19765_s0 + $0x330] sm:$0xff]  ;;  %v50_v38 = vld [vmem:[%s19765_s0 + $0x138] sm:$0xff]  ;;  %v51_v42 = vld [vmem:[%s19765_s0 + $0x140] sm:$0xff] }
   0xf   :  { %v114_v39 = vld [vmem:[%s19765_s0 + $0x338] sm:$0xff]  ;;  %v115_v43 = vld [vmem:[%s19765_s0 + $0x340] sm:$0xff]  ;;  %v20_v44 = vld [vmem:[%s19765_s0 + $0x48] sm:$0xff] }
  0x10   :  { %v84_v45 = vld [vmem:[%s19765_s0 + $0x248] sm:$0xff]  ;;  %v21_v48 = vld [vmem:[%s19765_s0 + $0x50] sm:$0xff]  ;;  %v22_v52 = vld [vmem:[%s19765_s0 + $0x58] sm:$0xff] }
  0x11   :  { %v52_v46 = vld [vmem:[%s19765_s0 + $0x148] sm:$0xff]  ;;  %v85_v49 = vld [vmem:[%s19765_s0 + $0x250] sm:$0xff]  ;;  %v86_v53 = vld [vmem:[%s19765_s0 + $0x258] sm:$0xff] }
  0x12   :  { %v116_v47 = vld [vmem:[%s19765_s0 + $0x348] sm:$0xff]  ;;  %v53_v50 = vld [vmem:[%s19765_s0 + $0x150] sm:$0xff]  ;;  %v54_v54 = vld [vmem:[%s19765_s0 + $0x158] sm:$0xff] }
  0x13   :  { %10965 = vmatmul.msk.f32.gmra.mxu0 %vm1067_vm0, %v13_v16  ;;  %v117_v51 = vld [vmem:[%s19765_s0 + $0x350] sm:$0xff]  ;;  %v118_v55 = vld [vmem:[%s19765_s0 + $0x358] sm:$0xff]  ;;  %v23_v56 = vld [vmem:[%s19765_s0 + $0x60] sm:$0xff] }
  0x14   :  { %11029 = vmatmul.msk.f32.gmra.mxu2 %vm1067_vm0, %v77_v17  ;;  %v87_v57 = vld [vmem:[%s19765_s0 + $0x260] sm:$0xff]  ;;  %v24_v60 = vld [vmem:[%s19765_s0 + $0x68] sm:$0xff]  ;;  %v25_v0 = vld [vmem:[%s19765_s0 + $0x70] sm:$0xff] }
  0x15   :  { %10997 = vmatmul.msk.f32.gmra.mxu1 %vm1067_vm0, %v45_v18  ;;  %v55_v58 = vld [vmem:[%s19765_s0 + $0x160] sm:$0xff]  ;;  %v88_v61 = vld [vmem:[%s19765_s0 + $0x268] sm:$0xff]  ;;  %v89_v1 = vld [vmem:[%s19765_s0 + $0x270] sm:$0xff] }
  0x16   :  { %11061 = vmatmul.msk.f32.gmra.mxu3 %vm1067_vm0, %v109_v19  ;;  %v119_v59 = vld [vmem:[%s19765_s0 + $0x360] sm:$0xff]  ;;  %v56_v62 = vld [vmem:[%s19765_s0 + $0x168] sm:$0xff]  ;;  %v57_v2 = vld [vmem:[%s19765_s0 + $0x170] sm:$0xff] }
  0x17   :  { %v120_v63 = vld [vmem:[%s19765_s0 + $0x368] sm:$0xff]  ;;  %v121_v3 = vld [vmem:[%s19765_s0 + $0x370] sm:$0xff]  ;;  %v26_v4 = vld [vmem:[%s19765_s0 + $0x78] sm:$0xff] }
  0x18   :  { %v90_v5 = vld [vmem:[%s19765_s0 + $0x278] sm:$0xff]  ;;  %v27_v9 = vld [vmem:[%s19765_s0 + $0x80] sm:$0xff]  ;;  %v28_v18 = vld [vmem:[%s19765_s0 + $0x88] sm:$0xff] }
  0x19   :  { %v58_v6 = vld [vmem:[%s19765_s0 + $0x178] sm:$0xff]  ;;  %v91_v10 = vld [vmem:[%s19765_s0 + $0x280] sm:$0xff]  ;;  %v92_v19 = vld [vmem:[%s19765_s0 + $0x288] sm:$0xff] }
  0x1a   :  { %v122_v7 = vld [vmem:[%s19765_s0 + $0x378] sm:$0xff]  ;;  %v59_v12 = vld [vmem:[%s19765_s0 + $0x180] sm:$0xff] }
  0x1b   :  { %10966 = vmatmul.msk.f32.gmra.mxu0 %vm1067_vm0, %v14_v20  ;;  %v123_v13 = vld [vmem:[%s19765_s0 + $0x380] sm:$0xff] }
  0x1c   :  { %11030 = vmatmul.msk.f32.gmra.mxu2 %vm1067_vm0, %v78_v21 }
  0x1d   :  { %10998 = vmatmul.msk.f32.gmra.mxu1 %vm1067_vm0, %v46_v22 }
  0x1e   :  { %11062 = vmatmul.msk.f32.gmra.mxu3 %vm1067_vm0, %v110_v23  ;;  %v60_v23 = vld [vmem:[%s19765_s0 + $0x188] sm:$0xff] }
  0x23   :  { %10967 = vmatmul.msk.f32.gmra.mxu0 %vm1067_vm0, %v15_v24  ;;  %v124_v24 = vld [vmem:[%s19765_s0 + $0x388] sm:$0xff] }
  0x24   :  { %11031 = vmatmul.msk.f32.gmra.mxu2 %vm1067_vm0, %v79_v25 }
  0x25   :  { %10999 = vmatmul.msk.f32.gmra.mxu1 %vm1067_vm0, %v47_v26 }
  0x26   :  { %11063 = vmatmul.msk.f32.gmra.mxu3 %vm1067_vm0, %v111_v27 }
  0x2b   :  { %10968 = vmatmul.msk.f32.gmra.mxu0 %vm1067_vm0, %v16_v28 }
  0x2c   :  { %11032 = vmatmul.msk.f32.gmra.mxu2 %vm1067_vm0, %v80_v29  ;;  %v29_v29 = vld [vmem:[%s19765_s0 + $0x90] sm:$0xff] }
  0x2d   :  { %11000 = vmatmul.msk.f32.gmra.mxu1 %vm1067_vm0, %v48_v30  ;;  %v93_v30 = vld [vmem:[%s19765_s0 + $0x290] sm:$0xff] }
  0x2e   :  { %11064 = vmatmul.msk.f32.gmra.mxu3 %vm1067_vm0, %v112_v31 }
  0x33   :  { %10969 = vmatmul.msk.f32.gmra.mxu0 %vm1067_vm0, %v17_v32 }
  0x34   :  { %11033 = vmatmul.msk.f32.gmra.mxu2 %vm1067_vm0, %v81_v33 }
  0x35   :  { %11001 = vmatmul.msk.f32.gmra.mxu1 %vm1067_vm0, %v49_v34  ;;  %v61_v34 = vld [vmem:[%s19765_s0 + $0x190] sm:$0xff] }
  0x36   :  { %11065 = vmatmul.msk.f32.gmra.mxu3 %vm1067_vm0, %v113_v35  ;;  %v125_v35 = vld [vmem:[%s19765_s0 + $0x390] sm:$0xff] }
  0x3b   :  { %10970 = vmatmul.msk.f32.gmra.mxu0 %vm1067_vm0, %v18_v36 }
  0x3c   :  { %11034 = vmatmul.msk.f32.gmra.mxu2 %vm1067_vm0, %v82_v37 }
  0x3d   :  { %11002 = vmatmul.msk.f32.gmra.mxu1 %vm1067_vm0, %v50_v38 }
  0x3e   :  { %11066 = vmatmul.msk.f32.gmra.mxu3 %vm1067_vm0, %v114_v39 }
  0x43   :  { %10971 = vmatmul.msk.f32.gmra.mxu0 %vm1067_vm0, %v19_v40  ;;  %v30_v40 = vld [vmem:[%s19765_s0 + $0x98] sm:$0xff] }
  0x44   :  { %11035 = vmatmul.msk.f32.gmra.mxu2 %vm1067_vm0, %v83_v41  ;;  %v94_v41 = vld [vmem:[%s19765_s0 + $0x298] sm:$0xff] }
  0x45   :  { %11003 = vmatmul.msk.f32.gmra.mxu1 %vm1067_vm0, %v51_v42 }
  0x46   :  { %11067 = vmatmul.msk.f32.gmra.mxu3 %vm1067_vm0, %v115_v43 }
  0x4b   :  { %10972 = vmatmul.msk.f32.gmra.mxu0 %vm1067_vm0, %v20_v44 }
  0x4c   :  { %11036 = vmatmul.msk.f32.gmra.mxu2 %vm1067_vm0, %v84_v45  ;;  %v62_v45 = vld [vmem:[%s19765_s0 + $0x198] sm:$0xff] }
  0x4d   :  { %11004 = vmatmul.msk.f32.gmra.mxu1 %vm1067_vm0, %v52_v46  ;;  %v126_v46 = vld [vmem:[%s19765_s0 + $0x398] sm:$0xff] }
  0x4e   :  { %11068 = vmatmul.msk.f32.gmra.mxu3 %vm1067_vm0, %v116_v47 }
  0x53   :  { %10973 = vmatmul.msk.f32.gmra.mxu0 %vm1067_vm0, %v21_v48 }
  0x54   :  { %11037 = vmatmul.msk.f32.gmra.mxu2 %vm1067_vm0, %v85_v49 }
  0x55   :  { %11005 = vmatmul.msk.f32.gmra.mxu1 %vm1067_vm0, %v53_v50 }
  0x56   :  { %11069 = vmatmul.msk.f32.gmra.mxu3 %vm1067_vm0, %v117_v51  ;;  %v31_v51 = vld [vmem:[%s19765_s0 + $0xa0] sm:$0xff] }
  0x5b   :  { %10974 = vmatmul.msk.f32.gmra.mxu0 %vm1067_vm0, %v22_v52  ;;  %v95_v52 = vld [vmem:[%s19765_s0 + $0x2a0] sm:$0xff] }
  0x5c   :  { %11038 = vmatmul.msk.f32.gmra.mxu2 %vm1067_vm0, %v86_v53 }
  0x5d   :  { %11006 = vmatmul.msk.f32.gmra.mxu1 %vm1067_vm0, %v54_v54 }
  0x5e   :  { %11070 = vmatmul.msk.f32.gmra.mxu3 %vm1067_vm0, %v118_v55 }
  0x63   :  { %10975 = vmatmul.msk.f32.gmra.mxu0 %vm1067_vm0, %v23_v56  ;;  %v63_v56 = vld [vmem:[%s19765_s0 + $0x1a0] sm:$0xff] }
  0x64   :  { %11039 = vmatmul.msk.f32.gmra.mxu2 %vm1067_vm0, %v87_v57  ;;  %v127_v57 = vld [vmem:[%s19765_s0 + $0x3a0] sm:$0xff] }
  0x65   :  { %11007 = vmatmul.msk.f32.gmra.mxu1 %vm1067_vm0, %v55_v58 }
  0x66   :  { %11071 = vmatmul.msk.f32.gmra.mxu3 %vm1067_vm0, %v119_v59 }
  0x6b   :  { %10976 = vmatmul.msk.f32.gmra.mxu0 %vm1067_vm0, %v24_v60 }
  0x6c   :  { %11040 = vmatmul.msk.f32.gmra.mxu2 %vm1067_vm0, %v88_v61 }
  0x6d   :  { %11008 = vmatmul.msk.f32.gmra.mxu1 %vm1067_vm0, %v56_v62  ;;  %v32_v62 = vld [vmem:[%s19765_s0 + $0xa8] sm:$0xff] }
  0x6e   :  { %11072 = vmatmul.msk.f32.gmra.mxu3 %vm1067_vm0, %v120_v63  ;;  %v96_v63 = vld [vmem:[%s19765_s0 + $0x2a8] sm:$0xff] }
  0x73   :  { %10977 = vmatmul.msk.f32.gmra.mxu0 %vm1067_vm0, %v25_v0 }
  0x74   :  { %11041 = vmatmul.msk.f32.gmra.mxu2 %vm1067_vm0, %v89_v1 }
  0x75   :  { %11009 = vmatmul.msk.f32.gmra.mxu1 %vm1067_vm0, %v57_v2 }
  0x76   :  { %11073 = vmatmul.msk.f32.gmra.mxu3 %vm1067_vm0, %v121_v3  ;;  %v64_v3 = vld [vmem:[%s19765_s0 + $0x1a8] sm:$0xff] }
  0x7b   :  { %10978 = vmatmul.msk.f32.gmra.mxu0 %vm1067_vm0, %v26_v4  ;;  %v128_v4 = vld [vmem:[%s19765_s0 + $0x3a8] sm:$0xff] }
  0x7c   :  { %11042 = vmatmul.msk.f32.gmra.mxu2 %vm1067_vm0, %v90_v5 }
  0x7d   :  { %11010 = vmatmul.msk.f32.gmra.mxu1 %vm1067_vm0, %v58_v6 }
  0x7e   :  { %11074 = vmatmul.msk.f32.gmra.mxu3 %vm1067_vm0, %v122_v7 }
  0x80   :  { %v1181_v8 = vpop.f32.mrf.mxu0 }
  0x81   :  { %7756 = vst [vmem:[#allocation2] sm:$0xff] %v1181_v8 }
  0x82   :  { %v1390_v11 = vpop.f32.mrf.mxu1 }
  0x83   :  { %7788 = vst [vmem:[#allocation2 + $0x100] sm:$0xff] %v1390_v11  ;;  %10979 = vmatmul.msk.f32.gmra.mxu0 %vm1067_vm0, %v27_v9  ;;  %v8851_v14 = vadd.f32 %v1390_v11, %v1181_v8  ;;  %v33_v9 = vld [vmem:[%s19765_s0 + $0xb0] sm:$0xff] }
  0x84   :  { %11043 = vmatmul.msk.f32.gmra.mxu2 %vm1067_vm0, %v91_v10  ;;  %v97_v10 = vld [vmem:[%s19765_s0 + $0x2b0] sm:$0xff] }
  0x85   :  { %11011 = vmatmul.msk.f32.gmra.mxu1 %vm1067_vm0, %v59_v12 }
  0x86   :  { %11075 = vmatmul.msk.f32.gmra.mxu3 %vm1067_vm0, %v123_v13 }
  0x87   :  { %v1599_v15 = vpop.f32.mrf.mxu2 }
  0x88   :  { %7820 = vst [vmem:[#allocation2 + $0x200] sm:$0xff] %v1599_v15  ;;  %v8852_v16 = vadd.f32 %v8851_v14, %v1599_v15  ;;  %v1184_v17 = vpop.f32.mrf.mxu0  ;;  %v65_v14 = vld [vmem:[%s19765_s0 + $0x1b0] sm:$0xff] }
  0x89   :  { %7757 = vst [vmem:[#allocation2 + $0x8] sm:$0xff] %v1184_v17  ;;  %v1808_v20 = vpop.f32.mrf.mxu3  ;;  %v129_v15 = vld [vmem:[%s19765_s0 + $0x3b0] sm:$0xff] }
  0x8a   :  { %7852 = vst [vmem:[#allocation2 + $0x300] sm:$0xff] %v1808_v20  ;;  %v13404_v21 = vadd.f32 %v8852_v16, %v1808_v20  ;;  %v1393_v22 = vpop.f32.mrf.mxu1  ;;  %v34_v20 = vld [vmem:[%s19765_s0 + $0xb8] sm:$0xff] }
  0x8b   :  { %7789 = vst [vmem:[#allocation2 + $0x108] sm:$0xff] %v1393_v22  ;;  %10980 = vmatmul.msk.f32.gmra.mxu0 %vm1067_vm0, %v28_v18  ;;  %v8882_v25 = vadd.f32 %v1393_v22, %v1184_v17  ;;  %v98_v22 = vld [vmem:[%s19765_s0 + $0x2b8] sm:$0xff] }
  0x8c   :  { %11044 = vmatmul.msk.f32.gmra.mxu2 %vm1067_vm0, %v92_v19 }
  0x8d   :  { %11012 = vmatmul.msk.f32.gmra.mxu1 %vm1067_vm0, %v60_v23 }
  0x8e   :  { %11076 = vmatmul.msk.f32.gmra.mxu3 %vm1067_vm0, %v124_v24 }
  0x8f   :  { %v1602_v26 = vpop.f32.mrf.mxu2 }
  0x90   :  { %7821 = vst [vmem:[#allocation2 + $0x208] sm:$0xff] %v1602_v26  ;;  %v8883_v27 = vadd.f32 %v8882_v25, %v1602_v26  ;;  %v1187_v28 = vpop.f32.mrf.mxu0  ;;  %v66_v26 = vld [vmem:[%s19765_s0 + $0x1b8] sm:$0xff] }
  0x91   :  { %7758 = vst [vmem:[#allocation2 + $0x10] sm:$0xff] %v1187_v28  ;;  %v1811_v31 = vpop.f32.mrf.mxu3 }
  0x92   :  { %7853 = vst [vmem:[#allocation2 + $0x308] sm:$0xff] %v1811_v31  ;;  %v13422_v32 = vadd.f32 %v8883_v27, %v1811_v31  ;;  %v1396_v33 = vpop.f32.mrf.mxu1  ;;  %v130_v27 = vld [vmem:[%s19765_s0 + $0x3b8] sm:$0xff] }
  0x93   :  { %7790 = vst [vmem:[#allocation2 + $0x110] sm:$0xff] %v1396_v33  ;;  %10981 = vmatmul.msk.f32.gmra.mxu0 %vm1067_vm0, %v29_v29  ;;  %v8913_v36 = vadd.f32 %v1396_v33, %v1187_v28  ;;  %v35_v33 = vld [vmem:[%s19765_s0 + $0xc0] sm:$0xff] }
  0x94   :  { %11045 = vmatmul.msk.f32.gmra.mxu2 %vm1067_vm0, %v93_v30 }
  0x95   :  { %11013 = vmatmul.msk.f32.gmra.mxu1 %vm1067_vm0, %v61_v34  ;;  %v99_v34 = vld [vmem:[%s19765_s0 + $0x2c0] sm:$0xff] }
  0x96   :  { %11077 = vmatmul.msk.f32.gmra.mxu3 %vm1067_vm0, %v125_v35 }
  0x97   :  { %v1605_v37 = vpop.f32.mrf.mxu2 }
  0x98   :  { %7822 = vst [vmem:[#allocation2 + $0x210] sm:$0xff] %v1605_v37  ;;  %v8914_v38 = vadd.f32 %v8913_v36, %v1605_v37  ;;  %v1190_v39 = vpop.f32.mrf.mxu0 }
  0x99   :  { %7759 = vst [vmem:[#allocation2 + $0x18] sm:$0xff] %v1190_v39  ;;  %v1814_v42 = vpop.f32.mrf.mxu3 }
  0x9a   :  { %7854 = vst [vmem:[#allocation2 + $0x310] sm:$0xff] %v1814_v42  ;;  %v13440_v43 = vadd.f32 %v8914_v38, %v1814_v42  ;;  %v1399_v44 = vpop.f32.mrf.mxu1  ;;  %v67_v38 = vld [vmem:[%s19765_s0 + $0x1c0] sm:$0xff] }
  0x9b   :  { %7791 = vst [vmem:[#allocation2 + $0x118] sm:$0xff] %v1399_v44  ;;  %10982 = vmatmul.msk.f32.gmra.mxu0 %vm1067_vm0, %v30_v40  ;;  %v8944_v47 = vadd.f32 %v1399_v44, %v1190_v39  ;;  %v131_v39 = vld [vmem:[%s19765_s0 + $0x3c0] sm:$0xff] }
  0x9c   :  { %11046 = vmatmul.msk.f32.gmra.mxu2 %vm1067_vm0, %v94_v41 }
  0x9d   :  { %11014 = vmatmul.msk.f32.gmra.mxu1 %vm1067_vm0, %v62_v45  ;;  %v36_v45 = vld [vmem:[%s19765_s0 + $0xc8] sm:$0xff] }
  0x9e   :  { %11078 = vmatmul.msk.f32.gmra.mxu3 %vm1067_vm0, %v126_v46  ;;  %v100_v46 = vld [vmem:[%s19765_s0 + $0x2c8] sm:$0xff] }
  0x9f   :  { %v1608_v48 = vpop.f32.mrf.mxu2 }
  0xa0   :  { %7823 = vst [vmem:[#allocation2 + $0x218] sm:$0xff] %v1608_v48  ;;  %v8945_v49 = vadd.f32 %v8944_v47, %v1608_v48  ;;  %v1193_v50 = vpop.f32.mrf.mxu0 }
  0xa1   :  { %7760 = vst [vmem:[#allocation2 + $0x20] sm:$0xff] %v1193_v50  ;;  %v1817_v53 = vpop.f32.mrf.mxu3 }
  0xa2   :  { %7855 = vst [vmem:[#allocation2 + $0x318] sm:$0xff] %v1817_v53  ;;  %v13458_v54 = vadd.f32 %v8945_v49, %v1817_v53  ;;  %v1402_v55 = vpop.f32.mrf.mxu1 }
  0xa3   :  { %7792 = vst [vmem:[#allocation2 + $0x120] sm:$0xff] %v1402_v55  ;;  %10983 = vmatmul.msk.f32.gmra.mxu0 %vm1067_vm0, %v31_v51  ;;  %v8975_v58 = vadd.f32 %v1402_v55, %v1193_v50  ;;  %v68_v50 = vld [vmem:[%s19765_s0 + $0x1c8] sm:$0xff] }
  0xa4   :  { %11047 = vmatmul.msk.f32.gmra.mxu2 %vm1067_vm0, %v95_v52  ;;  %v132_v51 = vld [vmem:[%s19765_s0 + $0x3c8] sm:$0xff] }
  0xa5   :  { %11015 = vmatmul.msk.f32.gmra.mxu1 %vm1067_vm0, %v63_v56 }
  0xa6   :  { %11079 = vmatmul.msk.f32.gmra.mxu3 %vm1067_vm0, %v127_v57  ;;  %v37_v57 = vld [vmem:[%s19765_s0 + $0xd0] sm:$0xff] }
  0xa7   :  { %v1611_v59 = vpop.f32.mrf.mxu2 }
  0xa8   :  { %7824 = vst [vmem:[#allocation2 + $0x220] sm:$0xff] %v1611_v59  ;;  %v8976_v60 = vadd.f32 %v8975_v58, %v1611_v59  ;;  %v1196_v61 = vpop.f32.mrf.mxu0  ;;  %v101_v58 = vld [vmem:[%s19765_s0 + $0x2d0] sm:$0xff] }
  0xa9   :  { %7761 = vst [vmem:[#allocation2 + $0x28] sm:$0xff] %v1196_v61  ;;  %v1820_v0 = vpop.f32.mrf.mxu3 }
  0xaa   :  { %7856 = vst [vmem:[#allocation2 + $0x320] sm:$0xff] %v1820_v0  ;;  %v13476_v1 = vadd.f32 %v8976_v60, %v1820_v0  ;;  %v1405_v2 = vpop.f32.mrf.mxu1 }
  0xab   :  { %7793 = vst [vmem:[#allocation2 + $0x128] sm:$0xff] %v1405_v2  ;;  %10984 = vmatmul.msk.f32.gmra.mxu0 %vm1067_vm0, %v32_v62  ;;  %v9006_v5 = vadd.f32 %v1405_v2, %v1196_v61  ;;  %v69_v62 = vld [vmem:[%s19765_s0 + $0x1d0] sm:$0xff] }
  0xac   :  { %11048 = vmatmul.msk.f32.gmra.mxu2 %vm1067_vm0, %v96_v63  ;;  %v133_v63 = vld [vmem:[%s19765_s0 + $0x3d0] sm:$0xff] }
  0xad   :  { %11016 = vmatmul.msk.f32.gmra.mxu1 %vm1067_vm0, %v64_v3 }
  0xae   :  { %11080 = vmatmul.msk.f32.gmra.mxu3 %vm1067_vm0, %v128_v4 }
  0xaf   :  { %v1614_v6 = vpop.f32.mrf.mxu2 }
  0xb0   :  { %7825 = vst [vmem:[#allocation2 + $0x228] sm:$0xff] %v1614_v6  ;;  %v9007_v7 = vadd.f32 %v9006_v5, %v1614_v6  ;;  %v1199_v8 = vpop.f32.mrf.mxu0  ;;  %v38_v5 = vld [vmem:[%s19765_s0 + $0xd8] sm:$0xff] }
  0xb1   :  { %7762 = vst [vmem:[#allocation2 + $0x30] sm:$0xff] %v1199_v8  ;;  %v1823_v11 = vpop.f32.mrf.mxu3  ;;  %v102_v6 = vld [vmem:[%s19765_s0 + $0x2d8] sm:$0xff] }
  0xb2   :  { %7857 = vst [vmem:[#allocation2 + $0x328] sm:$0xff] %v1823_v11  ;;  %v13494_v12 = vadd.f32 %v9007_v7, %v1823_v11  ;;  %v1408_v13 = vpop.f32.mrf.mxu1  ;;  %v134_v11 = vld [vmem:[%s19765_s0 + $0x3d8] sm:$0xff] }
  0xb3   :  { %7794 = vst [vmem:[#allocation2 + $0x130] sm:$0xff] %v1408_v13  ;;  %10985 = vmatmul.msk.f32.gmra.mxu0 %vm1067_vm0, %v33_v9  ;;  %v9037_v16 = vadd.f32 %v1408_v13, %v1199_v8 }
  0xb4   :  { %11049 = vmatmul.msk.f32.gmra.mxu2 %vm1067_vm0, %v97_v10  ;;  %v70_v10 = vld [vmem:[%s19765_s0 + $0x1d8] sm:$0xff] }
  0xb5   :  { %11017 = vmatmul.msk.f32.gmra.mxu1 %vm1067_vm0, %v65_v14 }
  0xb6   :  { %11081 = vmatmul.msk.f32.gmra.mxu3 %vm1067_vm0, %v129_v15 }
  0xb7   :  { %v1617_v17 = vpop.f32.mrf.mxu2 }
  0xb8   :  { %7826 = vst [vmem:[#allocation2 + $0x230] sm:$0xff] %v1617_v17  ;;  %v9038_v18 = vadd.f32 %v9037_v16, %v1617_v17  ;;  %v1202_v19 = vpop.f32.mrf.mxu0  ;;  %v39_v17 = vld [vmem:[%s19765_s0 + $0xe0] sm:$0xff] }
  0xb9   :  { %7763 = vst [vmem:[#allocation2 + $0x38] sm:$0xff] %v1202_v19  ;;  %v1826_v23 = vpop.f32.mrf.mxu3 }
  0xba   :  { %7858 = vst [vmem:[#allocation2 + $0x330] sm:$0xff] %v1826_v23  ;;  %v13512_v24 = vadd.f32 %v9038_v18, %v1826_v23  ;;  %v1411_v25 = vpop.f32.mrf.mxu1  ;;  %v103_v18 = vld [vmem:[%s19765_s0 + $0x2e0] sm:$0xff] }
  0xbb   :  { %7795 = vst [vmem:[#allocation2 + $0x138] sm:$0xff] %v1411_v25  ;;  %10986 = vmatmul.msk.f32.gmra.mxu0 %vm1067_vm0, %v34_v20  ;;  %v9068_v28 = vadd.f32 %v1411_v25, %v1202_v19  ;;  %v71_v23 = vld [vmem:[%s19765_s0 + $0x1e0] sm:$0xff] }
  0xbc   :  { %11050 = vmatmul.msk.f32.gmra.mxu2 %vm1067_vm0, %v98_v22  ;;  %v135_v25 = vld [vmem:[%s19765_s0 + $0x3e0] sm:$0xff] }
  0xbd   :  { %11018 = vmatmul.msk.f32.gmra.mxu1 %vm1067_vm0, %v66_v26  ;;  %v1045_v26 = vld [vmem:[%s19763_s1 + $0x50] sm:$0xff] }
  0xbe   :  { %11082 = vmatmul.msk.f32.gmra.mxu3 %vm1067_vm0, %v130_v27  ;;  %3269 = vmatpush.msra.mxu2 %v1045_v26  ;;  %v140_v26 = vld [vmem:[%s19765_s0 + $0x408] sm:$0xff] }
  0xbf   :  { %v1620_v29 = vpop.f32.mrf.mxu2 }
  0xc0   :  { %7827 = vst [vmem:[#allocation2 + $0x238] sm:$0xff] %v1620_v29  ;;  %v9069_v30 = vadd.f32 %v9068_v28, %v1620_v29  ;;  %v1205_v31 = vpop.f32.mrf.mxu0  ;;  %v1043_v29 = vld [vmem:[%s19763_s1 + $0x40] sm:$0xff] }
  0xc1   :  { %7764 = vst [vmem:[#allocation2 + $0x40] sm:$0xff] %v1205_v31  ;;  %v1829_v35 = vpop.f32.mrf.mxu3  ;;  %2851 = vmatpush.msra.mxu0 %v1043_v29 }
  0xc2   :  { %7859 = vst [vmem:[#allocation2 + $0x338] sm:$0xff] %v1829_v35  ;;  %v13530_v36 = vadd.f32 %v9069_v30, %v1829_v35  ;;  %v1414_v37 = vpop.f32.mrf.mxu1  ;;  %v1046_v30 = vld [vmem:[%s19763_s1 + $0x58] sm:$0xff]  ;;  %v40_v35 = vld [vmem:[%s19765_s0 + $0xe8] sm:$0xff] }
  0xc3   :  { %7796 = vst [vmem:[#allocation2 + $0x140] sm:$0xff] %v1414_v37  ;;  %10987 = vmatmul.msk.f32.gmra.mxu0 %vm1067_vm0, %v35_v33  ;;  %v9099_v40 = vadd.f32 %v1414_v37, %v1205_v31  ;;  %3478 = vmatpush.msra.mxu3 %v1046_v30  ;;  %v1044_v33 = vld [vmem:[%s19763_s1 + $0x48] sm:$0xff] }
  0xc4   :  { %11051 = vmatmul.msk.f32.gmra.mxu2 %vm1067_vm0, %v99_v34  ;;  %v104_v37 = vld [vmem:[%s19765_s0 + $0x2e8] sm:$0xff]  ;;  %3060 = vmatpush.msra.mxu1 %v1044_v33 }
  0xc5   :  { %11019 = vmatmul.msk.f32.gmra.mxu1 %vm1067_vm0, %v67_v38  ;;  %v236_v33 = vld [vmem:[%s19765_s0 + $0x708] sm:$0xff] }
  0xc6   :  { %11083 = vmatmul.msk.f32.gmra.mxu3 %vm1067_vm0, %v131_v39 }
  0xc7   :  { %v1623_v41 = vpop.f32.mrf.mxu2 }
  0xc8   :  { %7828 = vst [vmem:[#allocation2 + $0x240] sm:$0xff] %v1623_v41  ;;  %v9100_v42 = vadd.f32 %v9099_v40, %v1623_v41  ;;  %v1208_v44 = vpop.f32.mrf.mxu0  ;;  %v72_v41 = vld [vmem:[%s19765_s0 + $0x1e8] sm:$0xff] }
  0xc9   :  { %7765 = vst [vmem:[#allocation2 + $0x48] sm:$0xff] %v1208_v44  ;;  %v1832_v47 = vpop.f32.mrf.mxu3 }
  0xca   :  { %7860 = vst [vmem:[#allocation2 + $0x340] sm:$0xff] %v1832_v47  ;;  %v13548_v48 = vadd.f32 %v9100_v42, %v1832_v47  ;;  %v1417_v49 = vpop.f32.mrf.mxu1  ;;  %v136_v42 = vld [vmem:[%s19765_s0 + $0x3e8] sm:$0xff] }
  0xcb   :  { %7797 = vst [vmem:[#allocation2 + $0x148] sm:$0xff] %v1417_v49  ;;  %10988 = vmatmul.msk.f32.gmra.mxu0 %vm1067_vm0, %v36_v45  ;;  %v9130_v52 = vadd.f32 %v1417_v49, %v1208_v44  ;;  %v41_v49 = vld [vmem:[%s19765_s0 + $0xf0] sm:$0xff] }
  0xcc   :  { %11052 = vmatmul.msk.f32.gmra.mxu2 %vm1067_vm0, %v100_v46 }
  0xcd   :  { %11020 = vmatmul.msk.f32.gmra.mxu1 %vm1067_vm0, %v68_v50  ;;  %v105_v50 = vld [vmem:[%s19765_s0 + $0x2f0] sm:$0xff] }
  0xce   :  { %11084 = vmatmul.msk.f32.gmra.mxu3 %vm1067_vm0, %v132_v51 }
  0xcf   :  { %v1626_v53 = vpop.f32.mrf.mxu2 }
  0xd0   :  { %7829 = vst [vmem:[#allocation2 + $0x248] sm:$0xff] %v1626_v53  ;;  %v9131_v55 = vadd.f32 %v9130_v52, %v1626_v53  ;;  %v1211_v56 = vpop.f32.mrf.mxu0 }
  0xd1   :  { %7766 = vst [vmem:[#allocation2 + $0x50] sm:$0xff] %v1211_v56  ;;  %v1835_v59 = vpop.f32.mrf.mxu3 }
  0xd2   :  { %7861 = vst [vmem:[#allocation2 + $0x348] sm:$0xff] %v1835_v59  ;;  %v13566_v60 = vadd.f32 %v9131_v55, %v1835_v59  ;;  %v1420_v61 = vpop.f32.mrf.mxu1  ;;  %v73_v55 = vld [vmem:[%s19765_s0 + $0x1f0] sm:$0xff] }
  0xd3   :  { %7798 = vst [vmem:[#allocation2 + $0x150] sm:$0xff] %v1420_v61  ;;  %10989 = vmatmul.msk.f32.gmra.mxu0 %vm1067_vm0, %v37_v57  ;;  %v9161_v0 = vadd.f32 %v1420_v61, %v1211_v56  ;;  %v137_v56 = vld [vmem:[%s19765_s0 + $0x3f0] sm:$0xff] }
  0xd4   :  { %11053 = vmatmul.msk.f32.gmra.mxu2 %vm1067_vm0, %v101_v58 }
  0xd5   :  { %11021 = vmatmul.msk.f32.gmra.mxu1 %vm1067_vm0, %v69_v62  ;;  %v42_v62 = vld [vmem:[%s19765_s0 + $0xf8] sm:$0xff] }
  0xd6   :  { %11085 = vmatmul.msk.f32.gmra.mxu3 %vm1067_vm0, %v133_v63  ;;  %v106_v63 = vld [vmem:[%s19765_s0 + $0x2f8] sm:$0xff] }
  0xd7   :  { %v1629_v2 = vpop.f32.mrf.mxu2 }
  0xd8   :  { %7830 = vst [vmem:[#allocation2 + $0x250] sm:$0xff] %v1629_v2  ;;  %v9162_v3 = vadd.f32 %v9161_v0, %v1629_v2  ;;  %v1214_v4 = vpop.f32.mrf.mxu0 }
  0xd9   :  { %7767 = vst [vmem:[#allocation2 + $0x58] sm:$0xff] %v1214_v4  ;;  %v1838_v7 = vpop.f32.mrf.mxu3 }
  0xda   :  { %7862 = vst [vmem:[#allocation2 + $0x350] sm:$0xff] %v1838_v7  ;;  %v13584_v8 = vadd.f32 %v9162_v3, %v1838_v7  ;;  %v1423_v9 = vpop.f32.mrf.mxu1 }
  0xdb   :  { %7799 = vst [vmem:[#allocation2 + $0x158] sm:$0xff] %v1423_v9  ;;  %10990 = vmatmul.msk.f32.gmra.mxu0 %vm1067_vm0, %v38_v5  ;;  %v9192_v13 = vadd.f32 %v1423_v9, %v1214_v4  ;;  %v74_v4 = vld [vmem:[%s19765_s0 + $0x1f8] sm:$0xff] }
  0xdc   :  { %11054 = vmatmul.msk.f32.gmra.mxu2 %vm1067_vm0, %v102_v6  ;;  %v138_v5 = vld [vmem:[%s19765_s0 + $0x3f8] sm:$0xff] }
  0xdd   :  { %11022 = vmatmul.msk.f32.gmra.mxu1 %vm1067_vm0, %v70_v10 }
  0xde   :  { %11086 = vmatmul.msk.f32.gmra.mxu3 %vm1067_vm0, %v134_v11  ;;  %v139_v11 = vld [vmem:[%s19765_s0 + $0x400] sm:$0xff] }
  0xdf   :  { %v1632_v14 = vpop.f32.mrf.mxu2 }
  0xe0   :  { %7831 = vst [vmem:[#allocation2 + $0x258] sm:$0xff] %v1632_v14  ;;  %v9193_v15 = vadd.f32 %v9192_v13, %v1632_v14  ;;  %v1217_v16 = vpop.f32.mrf.mxu0  ;;  %v203_v13 = vld [vmem:[%s19765_s0 + $0x600] sm:$0xff] }
  0xe1   :  { %7768 = vst [vmem:[#allocation2 + $0x60] sm:$0xff] %v1217_v16  ;;  %v1841_v19 = vpop.f32.mrf.mxu3 }
  0xe2   :  { %7863 = vst [vmem:[#allocation2 + $0x358] sm:$0xff] %v1841_v19  ;;  %v13602_v20 = vadd.f32 %v9193_v15, %v1841_v19  ;;  %v1426_v22 = vpop.f32.mrf.mxu1 }
  0xe3   :  { %7800 = vst [vmem:[#allocation2 + $0x160] sm:$0xff] %v1426_v22  ;;  %10991 = vmatmul.msk.f32.gmra.mxu0 %vm1067_vm0, %v39_v17  ;;  %v9223_v27 = vadd.f32 %v1426_v22, %v1217_v16  ;;  %v171_v17 = vld [vmem:[%s19765_s0 + $0x500] sm:$0xff] }
  0xe4   :  { %11055 = vmatmul.msk.f32.gmra.mxu2 %vm1067_vm0, %v103_v18  ;;  %v235_v18 = vld [vmem:[%s19765_s0 + $0x700] sm:$0xff] }
  0xe5   :  { %11023 = vmatmul.msk.f32.gmra.mxu1 %vm1067_vm0, %v71_v23 }
  0xe6   :  { %11087 = vmatmul.msk.f32.gmra.mxu3 %vm1067_vm0, %v135_v25 }
  0xe7   :  { %v1635_v28 = vpop.f32.mrf.mxu2 }
  0xe8   :  { %7832 = vst [vmem:[#allocation2 + $0x260] sm:$0xff] %v1635_v28  ;;  %v9224_v31 = vadd.f32 %v9223_v27, %v1635_v28  ;;  %v1220_v34 = vpop.f32.mrf.mxu0  ;;  %v204_v27 = vld [vmem:[%s19765_s0 + $0x608] sm:$0xff] }
  0xe9   :  { %7769 = vst [vmem:[#allocation2 + $0x68] sm:$0xff] %v1220_v34  ;;  %v1844_v38 = vpop.f32.mrf.mxu3 }
  0xea   :  { %7864 = vst [vmem:[#allocation2 + $0x360] sm:$0xff] %v1844_v38  ;;  %v13632_v39 = vadd.f32 %v9224_v31, %v1844_v38  ;;  %v1429_v40 = vpop.f32.mrf.mxu1  ;;  %v172_v31 = vld [vmem:[%s19765_s0 + $0x508] sm:$0xff] }
  0xeb   :  { %7801 = vst [vmem:[#allocation2 + $0x168] sm:$0xff] %v1429_v40  ;;  %10992 = vmatmul.msk.f32.gmra.mxu0 %vm1067_vm0, %v40_v35  ;;  %v9254_v44 = vadd.f32 %v1429_v40, %v1220_v34  ;;  %v141_v40 = vld [vmem:[%s19765_s0 + $0x410] sm:$0xff] }
  0xec   :  { %11056 = vmatmul.msk.f32.gmra.mxu2 %vm1067_vm0, %v104_v37 }
  0xed   :  { %11024 = vmatmul.msk.f32.gmra.mxu1 %vm1067_vm0, %v72_v41  ;;  %v205_v41 = vld [vmem:[%s19765_s0 + $0x610] sm:$0xff] }
  0xee   :  { %11088 = vmatmul.msk.f32.gmra.mxu3 %vm1067_vm0, %v136_v42 }
  0xef   :  { %v1638_v45 = vpop.f32.mrf.mxu2 }
  0xf0   :  { %7833 = vst [vmem:[#allocation2 + $0x268] sm:$0xff] %v1638_v45  ;;  %v9255_v46 = vadd.f32 %v9254_v44, %v1638_v45  ;;  %v1223_v47 = vpop.f32.mrf.mxu0 }
  0xf1   :  { %7770 = vst [vmem:[#allocation2 + $0x70] sm:$0xff] %v1223_v47  ;;  %v1847_v51 = vpop.f32.mrf.mxu3 }
  0xf2   :  { %7865 = vst [vmem:[#allocation2 + $0x368] sm:$0xff] %v1847_v51  ;;  %v13650_v52 = vadd.f32 %v9255_v46, %v1847_v51  ;;  %v1432_v53 = vpop.f32.mrf.mxu1  ;;  %v173_v46 = vld [vmem:[%s19765_s0 + $0x510] sm:$0xff] }
  0xf3   :  { %7802 = vst [vmem:[#allocation2 + $0x170] sm:$0xff] %v1432_v53  ;;  %10993 = vmatmul.msk.f32.gmra.mxu0 %vm1067_vm0, %v41_v49  ;;  %v9285_v57 = vadd.f32 %v1432_v53, %v1223_v47  ;;  %v237_v47 = vld [vmem:[%s19765_s0 + $0x710] sm:$0xff] }
  0xf4   :  { %11057 = vmatmul.msk.f32.gmra.mxu2 %vm1067_vm0, %v105_v50 }
  0xf5   :  { %11025 = vmatmul.msk.f32.gmra.mxu1 %vm1067_vm0, %v73_v55  ;;  %v142_v55 = vld [vmem:[%s19765_s0 + $0x418] sm:$0xff] }
  0xf6   :  { %11089 = vmatmul.msk.f32.gmra.mxu3 %vm1067_vm0, %v137_v56  ;;  %v206_v56 = vld [vmem:[%s19765_s0 + $0x618] sm:$0xff] }
  0xf7   :  { %v1641_v58 = vpop.f32.mrf.mxu2 }
  0xf8   :  { %7834 = vst [vmem:[#allocation2 + $0x270] sm:$0xff] %v1641_v58  ;;  %v9286_v59 = vadd.f32 %v9285_v57, %v1641_v58  ;;  %v1226_v61 = vpop.f32.mrf.mxu0 }
  0xf9   :  { %7771 = vst [vmem:[#allocation2 + $0x78] sm:$0xff] %v1226_v61  ;;  %v1850_v0 = vpop.f32.mrf.mxu3 }
  0xfa   :  { %7866 = vst [vmem:[#allocation2 + $0x370] sm:$0xff] %v1850_v0  ;;  %v13668_v2 = vadd.f32 %v9286_v59, %v1850_v0  ;;  %v1435_v3 = vpop.f32.mrf.mxu1 }
  0xfb   :  { %7803 = vst [vmem:[#allocation2 + $0x178] sm:$0xff] %v1435_v3  ;;  %10994 = vmatmul.msk.f32.gmra.mxu0 %vm1067_vm0, %v42_v62  ;;  %v9316_v6 = vadd.f32 %v1435_v3, %v1226_v61  ;;  %v174_v61 = vld [vmem:[%s19765_s0 + $0x518] sm:$0xff] }
  0xfc   :  { %11058 = vmatmul.msk.f32.gmra.mxu2 %vm1067_vm0, %v106_v63  ;;  %v238_v62 = vld [vmem:[%s19765_s0 + $0x718] sm:$0xff] }
  0xfd   :  { %11026 = vmatmul.msk.f32.gmra.mxu1 %vm1067_vm0, %v74_v4 }
  0xfe   :  { %11090 = vmatmul.msk.f32.gmra.mxu3 %vm1067_vm0, %v138_v5  ;;  %v143_v5 = vld [vmem:[%s19765_s0 + $0x420] sm:$0xff] }
  0xff   :  { %v1644_v7 = vpop.f32.mrf.mxu2 }
 0x100   :  { %7835 = vst [vmem:[#allocation2 + $0x278] sm:$0xff] %v1644_v7  ;;  %v9317_v9 = vadd.f32 %v9316_v6, %v1644_v7  ;;  %v1229_v10 = vpop.f32.mrf.mxu0  ;;  %v207_v6 = vld [vmem:[%s19765_s0 + $0x620] sm:$0xff] }
 0x101   :  { %7772 = vst [vmem:[#allocation2 + $0x80] sm:$0xff] %v1229_v10  ;;  %v1853_v14 = vpop.f32.mrf.mxu3 }
 0x102   :  { %7867 = vst [vmem:[#allocation2 + $0x378] sm:$0xff] %v1853_v14  ;;  %v13686_v15 = vadd.f32 %v9317_v9, %v1853_v14  ;;  %v1438_v16 = vpop.f32.mrf.mxu1 }
 0x103   :  { %7804 = vst [vmem:[#allocation2 + $0x180] sm:$0xff] %v1438_v16  ;;  %11091 = vmatmul.msk.f32.vlgmr.msrb.gmra.mxu0 %vm1067_vm0, %v139_v11  ;;  %v9347_v19 = vadd.f32 %v1438_v16, %v1229_v10  ;;  %v175_v11 = vld [vmem:[%s19765_s0 + $0x520] sm:$0xff] }
 0x104   :  { %11155 = vmatmul.msk.f32.vlgmr.msrb.gmra.mxu2 %vm1067_vm0, %v203_v13  ;;  %v239_v13 = vld [vmem:[%s19765_s0 + $0x720] sm:$0xff] }
 0x105   :  { %11123 = vmatmul.msk.f32.vlgmr.msrb.gmra.mxu1 %vm1067_vm0, %v171_v17 }
 0x106   :  { %11187 = vmatmul.msk.f32.vlgmr.msrb.gmra.mxu3 %vm1067_vm0, %v235_v18 }
 0x107   :  { %v1647_v22 = vpop.f32.mrf.mxu2 }
 0x108   :  { %7836 = vst [vmem:[#allocation2 + $0x280] sm:$0xff] %v1647_v22  ;;  %v9348_v23 = vadd.f32 %v9347_v19, %v1647_v22  ;;  %v1232_v25 = vpop.f32.mrf.mxu0  ;;  %v144_v19 = vld [vmem:[%s19765_s0 + $0x428] sm:$0xff] }
 0x109   :  { %7773 = vst [vmem:[#allocation2 + $0x88] sm:$0xff] %v1232_v25  ;;  %v1856_v28 = vpop.f32.mrf.mxu3  ;;  %v208_v22 = vld [vmem:[%s19765_s0 + $0x628] sm:$0xff] }
 0x10a   :  { %7868 = vst [vmem:[#allocation2 + $0x380] sm:$0xff] %v1856_v28  ;;  %v13704_v29 = vadd.f32 %v9348_v23, %v1856_v28  ;;  %v1441_v30 = vpop.f32.mrf.mxu1  ;;  %v240_v28 = vld [vmem:[%s19765_s0 + $0x728] sm:$0xff] }
 0x10b   :  { %7805 = vst [vmem:[#allocation2 + $0x188] sm:$0xff] %v1441_v30  ;;  %11092 = vmatmul.msk.f32.gmra.mxu0 %vm1067_vm0, %v140_v26  ;;  %v9378_v34 = vadd.f32 %v1441_v30, %v1232_v25 }
 0x10c   :  { %11156 = vmatmul.msk.f32.gmra.mxu2 %vm1067_vm0, %v204_v27  ;;  %v176_v27 = vld [vmem:[%s19765_s0 + $0x528] sm:$0xff] }
 0x10d   :  { %11124 = vmatmul.msk.f32.gmra.mxu1 %vm1067_vm0, %v172_v31 }
 0x10e   :  { %11188 = vmatmul.msk.f32.gmra.mxu3 %vm1067_vm0, %v236_v33 }
 0x10f   :  { %v1650_v35 = vpop.f32.mrf.mxu2 }
 0x110   :  { %7837 = vst [vmem:[#allocation2 + $0x288] sm:$0xff] %v1650_v35  ;;  %v9379_v37 = vadd.f32 %v9378_v34, %v1650_v35  ;;  %v1235_v38 = vpop.f32.mrf.mxu0  ;;  %v145_v35 = vld [vmem:[%s19765_s0 + $0x430] sm:$0xff] }
 0x111   :  { %7774 = vst [vmem:[#allocation2 + $0x90] sm:$0xff] %v1235_v38  ;;  %v1859_v42 = vpop.f32.mrf.mxu3 }
 0x112   :  { %7869 = vst [vmem:[#allocation2 + $0x388] sm:$0xff] %v1859_v42  ;;  %v13722_v44 = vadd.f32 %v9379_v37, %v1859_v42  ;;  %v1444_v45 = vpop.f32.mrf.mxu1  ;;  %v209_v37 = vld [vmem:[%s19765_s0 + $0x630] sm:$0xff] }
 0x113   :  { %7806 = vst [vmem:[#allocation2 + $0x190] sm:$0xff] %v1444_v45  ;;  %11093 = vmatmul.msk.f32.gmra.mxu0 %vm1067_vm0, %v141_v40  ;;  %v9409_v49 = vadd.f32 %v1444_v45, %v1235_v38  ;;  %v177_v42 = vld [vmem:[%s19765_s0 + $0x530] sm:$0xff] }
 0x114   :  { %11157 = vmatmul.msk.f32.gmra.mxu2 %vm1067_vm0, %v205_v41  ;;  %v241_v45 = vld [vmem:[%s19765_s0 + $0x730] sm:$0xff] }
 0x115   :  { %11125 = vmatmul.msk.f32.gmra.mxu1 %vm1067_vm0, %v173_v46 }
 0x116   :  { %11189 = vmatmul.msk.f32.gmra.mxu3 %vm1067_vm0, %v237_v47 }
 0x117   :  { %v1653_v50 = vpop.f32.mrf.mxu2 }
 0x118   :  { %7838 = vst [vmem:[#allocation2 + $0x290] sm:$0xff] %v1653_v50  ;;  %v9410_v51 = vadd.f32 %v9409_v49, %v1653_v50  ;;  %v1238_v53 = vpop.f32.mrf.mxu0 }
 0x119   :  { %7775 = vst [vmem:[#allocation2 + $0x98] sm:$0xff] %v1238_v53  ;;  %v1862_v57 = vpop.f32.mrf.mxu3 }
 0x11a   :  { %7870 = vst [vmem:[#allocation2 + $0x390] sm:$0xff] %v1862_v57  ;;  %v13740_v58 = vadd.f32 %v9410_v51, %v1862_v57  ;;  %v1447_v59 = vpop.f32.mrf.mxu1  ;;  %v146_v51 = vld [vmem:[%s19765_s0 + $0x438] sm:$0xff] }
 0x11b   :  { %7807 = vst [vmem:[#allocation2 + $0x198] sm:$0xff] %v1447_v59  ;;  %11094 = vmatmul.msk.f32.gmra.mxu0 %vm1067_vm0, %v142_v55  ;;  %v9440_v63 = vadd.f32 %v1447_v59, %v1238_v53  ;;  %v210_v53 = vld [vmem:[%s19765_s0 + $0x638] sm:$0xff] }
 0x11c   :  { %11158 = vmatmul.msk.f32.gmra.mxu2 %vm1067_vm0, %v206_v56  ;;  %v178_v59 = vld [vmem:[%s19765_s0 + $0x538] sm:$0xff] }
 0x11d   :  { %11126 = vmatmul.msk.f32.gmra.mxu1 %vm1067_vm0, %v174_v61  ;;  %v242_v61 = vld [vmem:[%s19765_s0 + $0x738] sm:$0xff] }
 0x11e   :  { %11190 = vmatmul.msk.f32.gmra.mxu3 %vm1067_vm0, %v238_v62 }
 0x11f   :  { %v1656_v0 = vpop.f32.mrf.mxu2 }
 0x120   :  { %7839 = vst [vmem:[#allocation2 + $0x298] sm:$0xff] %v1656_v0  ;;  %v9441_v3 = vadd.f32 %v9440_v63, %v1656_v0  ;;  %v1241_v4 = vpop.f32.mrf.mxu0 }
 0x121   :  { %7776 = vst [vmem:[#allocation2 + $0xa0] sm:$0xff] %v1241_v4  ;;  %v1865_v7 = vpop.f32.mrf.mxu3 }
 0x122   :  { %7871 = vst [vmem:[#allocation2 + $0x398] sm:$0xff] %v1865_v7  ;;  %v13758_v9 = vadd.f32 %v9441_v3, %v1865_v7  ;;  %v1450_v10 = vpop.f32.mrf.mxu1 }
 0x123   :  { %7808 = vst [vmem:[#allocation2 + $0x1a0] sm:$0xff] %v1450_v10  ;;  %11095 = vmatmul.msk.f32.gmra.mxu0 %vm1067_vm0, %v143_v5  ;;  %v9471_v14 = vadd.f32 %v1450_v10, %v1241_v4  ;;  %v147_v4 = vld [vmem:[%s19765_s0 + $0x440] sm:$0xff] }
 0x124   :  { %11159 = vmatmul.msk.f32.gmra.mxu2 %vm1067_vm0, %v207_v6  ;;  %v211_v5 = vld [vmem:[%s19765_s0 + $0x640] sm:$0xff] }
 0x125   :  { %11127 = vmatmul.msk.f32.gmra.mxu1 %vm1067_vm0, %v175_v11  ;;  %v179_v11 = vld [vmem:[%s19765_s0 + $0x540] sm:$0xff] }
 0x126   :  { %11191 = vmatmul.msk.f32.gmra.mxu3 %vm1067_vm0, %v239_v13  ;;  %v243_v13 = vld [vmem:[%s19765_s0 + $0x740] sm:$0xff] }
 0x127   :  { %v1659_v16 = vpop.f32.mrf.mxu2 }
 0x128   :  { %7840 = vst [vmem:[#allocation2 + $0x2a0] sm:$0xff] %v1659_v16  ;;  %v9472_v17 = vadd.f32 %v9471_v14, %v1659_v16  ;;  %v1244_v18 = vpop.f32.mrf.mxu0 }
 0x129   :  { %7777 = vst [vmem:[#allocation2 + $0xa8] sm:$0xff] %v1244_v18  ;;  %v1868_v23 = vpop.f32.mrf.mxu3 }
 0x12a   :  { %7872 = vst [vmem:[#allocation2 + $0x3a0] sm:$0xff] %v1868_v23  ;;  %v13776_v25 = vadd.f32 %v9472_v17, %v1868_v23  ;;  %v1453_v26 = vpop.f32.mrf.mxu1 }
 0x12b   :  { %7809 = vst [vmem:[#allocation2 + $0x1a8] sm:$0xff] %v1453_v26  ;;  %11096 = vmatmul.msk.f32.gmra.mxu0 %vm1067_vm0, %v144_v19  ;;  %v9502_v30 = vadd.f32 %v1453_v26, %v1244_v18  ;;  %v148_v19 = vld [vmem:[%s19765_s0 + $0x448] sm:$0xff] }
 0x12c   :  { %11160 = vmatmul.msk.f32.gmra.mxu2 %vm1067_vm0, %v208_v22  ;;  %v212_v22 = vld [vmem:[%s19765_s0 + $0x648] sm:$0xff] }
 0x12d   :  { %11128 = vmatmul.msk.f32.gmra.mxu1 %vm1067_vm0, %v176_v27 }
 0x12e   :  { %11192 = vmatmul.msk.f32.gmra.mxu3 %vm1067_vm0, %v240_v28  ;;  %v180_v28 = vld [vmem:[%s19765_s0 + $0x548] sm:$0xff] }
 0x12f   :  { %v1662_v31 = vpop.f32.mrf.mxu2 }
 0x130   :  { %7841 = vst [vmem:[#allocation2 + $0x2a8] sm:$0xff] %v1662_v31  ;;  %v9503_v33 = vadd.f32 %v9502_v30, %v1662_v31  ;;  %v1247_v34 = vpop.f32.mrf.mxu0  ;;  %v244_v30 = vld [vmem:[%s19765_s0 + $0x748] sm:$0xff] }
 0x131   :  { %7778 = vst [vmem:[#allocation2 + $0xb0] sm:$0xff] %v1247_v34  ;;  %v1871_v38 = vpop.f32.mrf.mxu3 }
 0x132   :  { %7873 = vst [vmem:[#allocation2 + $0x3a8] sm:$0xff] %v1871_v38  ;;  %v13794_v40 = vadd.f32 %v9503_v33, %v1871_v38  ;;  %v1456_v41 = vpop.f32.mrf.mxu1  ;;  %v213_v38 = vld [vmem:[%s19765_s0 + $0x650] sm:$0xff] }
 0x133   :  { %7810 = vst [vmem:[#allocation2 + $0x1b0] sm:$0xff] %v1456_v41  ;;  %11097 = vmatmul.msk.f32.gmra.mxu0 %vm1067_vm0, %v145_v35  ;;  %v9533_v46 = vadd.f32 %v1456_v41, %v1247_v34 }
 0x134   :  { %11161 = vmatmul.msk.f32.gmra.mxu2 %vm1067_vm0, %v209_v37  ;;  %v149_v37 = vld [vmem:[%s19765_s0 + $0x450] sm:$0xff] }
 0x135   :  { %11129 = vmatmul.msk.f32.gmra.mxu1 %vm1067_vm0, %v177_v42 }
 0x136   :  { %11193 = vmatmul.msk.f32.gmra.mxu3 %vm1067_vm0, %v241_v45 }
 0x137   :  { %v1665_v47 = vpop.f32.mrf.mxu2 }
 0x138   :  { %7842 = vst [vmem:[#allocation2 + $0x2b0] sm:$0xff] %v1665_v47  ;;  %v9534_v49 = vadd.f32 %v9533_v46, %v1665_v47  ;;  %v1250_v50 = vpop.f32.mrf.mxu0  ;;  %v181_v46 = vld [vmem:[%s19765_s0 + $0x550] sm:$0xff] }
 0x139   :  { %7779 = vst [vmem:[#allocation2 + $0xb8] sm:$0xff] %v1250_v50  ;;  %v1874_v55 = vpop.f32.mrf.mxu3  ;;  %v245_v47 = vld [vmem:[%s19765_s0 + $0x750] sm:$0xff] }
 0x13a   :  { %7874 = vst [vmem:[#allocation2 + $0x3b0] sm:$0xff] %v1874_v55  ;;  %v13812_v56 = vadd.f32 %v9534_v49, %v1874_v55  ;;  %v1459_v57 = vpop.f32.mrf.mxu1  ;;  %v150_v55 = vld [vmem:[%s19765_s0 + $0x458] sm:$0xff] }
 0x13b   :  { %7811 = vst [vmem:[#allocation2 + $0x1b8] sm:$0xff] %v1459_v57  ;;  %11098 = vmatmul.msk.f32.gmra.mxu0 %vm1067_vm0, %v146_v51  ;;  %v9564_v62 = vadd.f32 %v1459_v57, %v1250_v50  ;;  %v214_v57 = vld [vmem:[%s19765_s0 + $0x658] sm:$0xff] }
 0x13c   :  { %11162 = vmatmul.msk.f32.gmra.mxu2 %vm1067_vm0, %v210_v53 }
 0x13d   :  { %11130 = vmatmul.msk.f32.gmra.mxu1 %vm1067_vm0, %v178_v59 }
 0x13e   :  { %11194 = vmatmul.msk.f32.gmra.mxu3 %vm1067_vm0, %v242_v61 }
 0x13f   :  { %v1668_v63 = vpop.f32.mrf.mxu2 }
 0x140   :  { %7843 = vst [vmem:[#allocation2 + $0x2b8] sm:$0xff] %v1668_v63  ;;  %v9565_v0 = vadd.f32 %v9564_v62, %v1668_v63  ;;  %v1253_v3 = vpop.f32.mrf.mxu0  ;;  %v182_v63 = vld [vmem:[%s19765_s0 + $0x558] sm:$0xff] }
 0x141   :  { %7780 = vst [vmem:[#allocation2 + $0xc0] sm:$0xff] %v1253_v3  ;;  %v1877_v6 = vpop.f32.mrf.mxu3 }
 0x142   :  { %7875 = vst [vmem:[#allocation2 + $0x3b8] sm:$0xff] %v1877_v6  ;;  %v13830_v7 = vadd.f32 %v9565_v0, %v1877_v6  ;;  %v1462_v10 = vpop.f32.mrf.mxu1  ;;  %v246_v0 = vld [vmem:[%s19765_s0 + $0x758] sm:$0xff] }
 0x143   :  { %7812 = vst [vmem:[#allocation2 + $0x1c0] sm:$0xff] %v1462_v10  ;;  %11099 = vmatmul.msk.f32.gmra.mxu0 %vm1067_vm0, %v147_v4  ;;  %v9595_v14 = vadd.f32 %v1462_v10, %v1253_v3  ;;  %v151_v10 = vld [vmem:[%s19765_s0 + $0x460] sm:$0xff] }
 0x144   :  { %11163 = vmatmul.msk.f32.gmra.mxu2 %vm1067_vm0, %v211_v5 }
 0x145   :  { %11131 = vmatmul.msk.f32.gmra.mxu1 %vm1067_vm0, %v179_v11  ;;  %v215_v11 = vld [vmem:[%s19765_s0 + $0x660] sm:$0xff] }
 0x146   :  { %11195 = vmatmul.msk.f32.gmra.mxu3 %vm1067_vm0, %v243_v13 }
 0x147   :  { %v1671_v16 = vpop.f32.mrf.mxu2 }
 0x148   :  { %7844 = vst [vmem:[#allocation2 + $0x2c0] sm:$0xff] %v1671_v16  ;;  %v9596_v17 = vadd.f32 %v9595_v14, %v1671_v16  ;;  %v1256_v18 = vpop.f32.mrf.mxu0 }
 0x149   :  { %7781 = vst [vmem:[#allocation2 + $0xc8] sm:$0xff] %v1256_v18  ;;  %v1880_v23 = vpop.f32.mrf.mxu3 }
 0x14a   :  { %7876 = vst [vmem:[#allocation2 + $0x3c0] sm:$0xff] %v1880_v23  ;;  %v13848_v26 = vadd.f32 %v9596_v17, %v1880_v23  ;;  %v1465_v27 = vpop.f32.mrf.mxu1  ;;  %v183_v17 = vld [vmem:[%s19765_s0 + $0x560] sm:$0xff] }
 0x14b   :  { %7813 = vst [vmem:[#allocation2 + $0x1c8] sm:$0xff] %v1465_v27  ;;  %11100 = vmatmul.msk.f32.gmra.mxu0 %vm1067_vm0, %v148_v19  ;;  %v9626_v31 = vadd.f32 %v1465_v27, %v1256_v18  ;;  %v247_v18 = vld [vmem:[%s19765_s0 + $0x760] sm:$0xff] }
 0x14c   :  { %11164 = vmatmul.msk.f32.gmra.mxu2 %vm1067_vm0, %v212_v22 }
 0x14d   :  { %11132 = vmatmul.msk.f32.gmra.mxu1 %vm1067_vm0, %v180_v28  ;;  %v152_v28 = vld [vmem:[%s19765_s0 + $0x468] sm:$0xff] }
 0x14e   :  { %11196 = vmatmul.msk.f32.gmra.mxu3 %vm1067_vm0, %v244_v30  ;;  %v216_v30 = vld [vmem:[%s19765_s0 + $0x668] sm:$0xff] }
 0x14f   :  { %v1674_v33 = vpop.f32.mrf.mxu2 }
 0x150   :  { %7845 = vst [vmem:[#allocation2 + $0x2c8] sm:$0xff] %v1674_v33  ;;  %v9627_v34 = vadd.f32 %v9626_v31, %v1674_v33  ;;  %v1259_v35 = vpop.f32.mrf.mxu0 }
 0x151   :  { %7782 = vst [vmem:[#allocation2 + $0xd0] sm:$0xff] %v1259_v35  ;;  %v1883_v41 = vpop.f32.mrf.mxu3 }
 0x152   :  { %7877 = vst [vmem:[#allocation2 + $0x3c8] sm:$0xff] %v1883_v41  ;;  %v13866_v42 = vadd.f32 %v9627_v34, %v1883_v41  ;;  %v1468_v45 = vpop.f32.mrf.mxu1 }
 0x153   :  { %7814 = vst [vmem:[#allocation2 + $0x1d0] sm:$0xff] %v1468_v45  ;;  %11101 = vmatmul.msk.f32.gmra.mxu0 %vm1067_vm0, %v149_v37  ;;  %v9657_v49 = vadd.f32 %v1468_v45, %v1259_v35  ;;  %v184_v35 = vld [vmem:[%s19765_s0 + $0x568] sm:$0xff] }
 0x154   :  { %11165 = vmatmul.msk.f32.gmra.mxu2 %vm1067_vm0, %v213_v38  ;;  %v248_v37 = vld [vmem:[%s19765_s0 + $0x768] sm:$0xff] }
 0x155   :  { %11133 = vmatmul.msk.f32.gmra.mxu1 %vm1067_vm0, %v181_v46 }
 0x156   :  { %11197 = vmatmul.msk.f32.gmra.mxu3 %vm1067_vm0, %v245_v47  ;;  %v153_v47 = vld [vmem:[%s19765_s0 + $0x470] sm:$0xff] }
 0x157   :  { %v1677_v50 = vpop.f32.mrf.mxu2 }
 0x158   :  { %7846 = vst [vmem:[#allocation2 + $0x2d0] sm:$0xff] %v1677_v50  ;;  %v9658_v51 = vadd.f32 %v9657_v49, %v1677_v50  ;;  %v1262_v53 = vpop.f32.mrf.mxu0  ;;  %v217_v49 = vld [vmem:[%s19765_s0 + $0x670] sm:$0xff] }
 0x159   :  { %7783 = vst [vmem:[#allocation2 + $0xd8] sm:$0xff] %v1262_v53  ;;  %v1886_v59 = vpop.f32.mrf.mxu3 }
 0x15a   :  { %7878 = vst [vmem:[#allocation2 + $0x3d0] sm:$0xff] %v1886_v59  ;;  %v13884_v61 = vadd.f32 %v9658_v51, %v1886_v59  ;;  %v1471_v62 = vpop.f32.mrf.mxu1 }
 0x15b   :  { %7815 = vst [vmem:[#allocation2 + $0x1d8] sm:$0xff] %v1471_v62  ;;  %11102 = vmatmul.msk.f32.gmra.mxu0 %vm1067_vm0, %v150_v55  ;;  %v9688_v3 = vadd.f32 %v1471_v62, %v1262_v53  ;;  %v185_v55 = vld [vmem:[%s19765_s0 + $0x570] sm:$0xff] }
 0x15c   :  { %11166 = vmatmul.msk.f32.gmra.mxu2 %vm1067_vm0, %v214_v57  ;;  %v249_v57 = vld [vmem:[%s19765_s0 + $0x770] sm:$0xff] }
 0x15d   :  { %11134 = vmatmul.msk.f32.gmra.mxu1 %vm1067_vm0, %v182_v63 }
 0x15e   :  { %11198 = vmatmul.msk.f32.gmra.mxu3 %vm1067_vm0, %v246_v0 }
 0x15f   :  { %v1680_v4 = vpop.f32.mrf.mxu2 }
 0x160   :  { %7847 = vst [vmem:[#allocation2 + $0x2d8] sm:$0xff] %v1680_v4  ;;  %v9689_v5 = vadd.f32 %v9688_v3, %v1680_v4  ;;  %v1265_v6 = vpop.f32.mrf.mxu0  ;;  %v154_v3 = vld [vmem:[%s19765_s0 + $0x478] sm:$0xff] }
 0x161   :  { %7784 = vst [vmem:[#allocation2 + $0xe0] sm:$0xff] %v1265_v6  ;;  %v1889_v13 = vpop.f32.mrf.mxu3  ;;  %v218_v4 = vld [vmem:[%s19765_s0 + $0x678] sm:$0xff] }
 0x162   :  { %7879 = vst [vmem:[#allocation2 + $0x3d8] sm:$0xff] %v1889_v13  ;;  %v13902_v14 = vadd.f32 %v9689_v5, %v1889_v13  ;;  %v1474_v16 = vpop.f32.mrf.mxu1  ;;  %v250_v13 = vld [vmem:[%s19765_s0 + $0x778] sm:$0xff] }
 0x163   :  { %7816 = vst [vmem:[#allocation2 + $0x1e0] sm:$0xff] %v1474_v16  ;;  %11103 = vmatmul.msk.f32.gmra.mxu0 %vm1067_vm0, %v151_v10  ;;  %v9719_v19 = vadd.f32 %v1474_v16, %v1265_v6 }
 0x164   :  { %11167 = vmatmul.msk.f32.gmra.mxu2 %vm1067_vm0, %v215_v11  ;;  %v186_v11 = vld [vmem:[%s19765_s0 + $0x578] sm:$0xff] }
 0x165   :  { %11135 = vmatmul.msk.f32.gmra.mxu1 %vm1067_vm0, %v183_v17 }
 0x166   :  { %11199 = vmatmul.msk.f32.gmra.mxu3 %vm1067_vm0, %v247_v18 }
 0x167   :  { %v1683_v22 = vpop.f32.mrf.mxu2 }
 0x168   :  { %7848 = vst [vmem:[#allocation2 + $0x2e0] sm:$0xff] %v1683_v22  ;;  %v9720_v23 = vadd.f32 %v9719_v19, %v1683_v22  ;;  %v1268_v27 = vpop.f32.mrf.mxu0  ;;  %v155_v22 = vld [vmem:[%s19765_s0 + $0x480] sm:$0xff] }
 0x169   :  { %7785 = vst [vmem:[#allocation2 + $0xe8] sm:$0xff] %v1268_v27  ;;  %v1892_v31 = vpop.f32.mrf.mxu3 }
 0x16a   :  { %7880 = vst [vmem:[#allocation2 + $0x3e0] sm:$0xff] %v1892_v31  ;;  %v13920_v33 = vadd.f32 %v9720_v23, %v1892_v31  ;;  %v1477_v34 = vpop.f32.mrf.mxu1  ;;  %v219_v23 = vld [vmem:[%s19765_s0 + $0x680] sm:$0xff] }
 0x16b   :  { %7817 = vst [vmem:[#allocation2 + $0x1e8] sm:$0xff] %v1477_v34  ;;  %11104 = vmatmul.msk.f32.gmra.mxu0 %vm1067_vm0, %v152_v28  ;;  %v9750_v38 = vadd.f32 %v1477_v34, %v1268_v27  ;;  %v187_v34 = vld [vmem:[%s19765_s0 + $0x580] sm:$0xff] }
 0x16c   :  { %11168 = vmatmul.msk.f32.gmra.mxu2 %vm1067_vm0, %v216_v30 }
 0x16d   :  { %11136 = vmatmul.msk.f32.gmra.mxu1 %vm1067_vm0, %v184_v35  ;;  %v251_v35 = vld [vmem:[%s19765_s0 + $0x780] sm:$0xff] }
 0x16e   :  { %11200 = vmatmul.msk.f32.gmra.mxu3 %vm1067_vm0, %v248_v37 }
 0x16f   :  { %v1686_v41 = vpop.f32.mrf.mxu2 }
 0x170   :  { %7849 = vst [vmem:[#allocation2 + $0x2e8] sm:$0xff] %v1686_v41  ;;  %v9751_v45 = vadd.f32 %v9750_v38, %v1686_v41  ;;  %v1271_v46 = vpop.f32.mrf.mxu0 }
 0x171   :  { %7786 = vst [vmem:[#allocation2 + $0xf0] sm:$0xff] %v1271_v46  ;;  %v1895_v50 = vpop.f32.mrf.mxu3 }
 0x172   :  { %7881 = vst [vmem:[#allocation2 + $0x3e8] sm:$0xff] %v1895_v50  ;;  %v13938_v51 = vadd.f32 %v9751_v45, %v1895_v50  ;;  %v1480_v53 = vpop.f32.mrf.mxu1  ;;  %v156_v45 = vld [vmem:[%s19765_s0 + $0x488] sm:$0xff] }
 0x173   :  { %7818 = vst [vmem:[#allocation2 + $0x1f0] sm:$0xff] %v1480_v53  ;;  %11105 = vmatmul.msk.f32.gmra.mxu0 %vm1067_vm0, %v153_v47  ;;  %v9781_v59 = vadd.f32 %v1480_v53, %v1271_v46  ;;  %v220_v46 = vld [vmem:[%s19765_s0 + $0x688] sm:$0xff] }
 0x174   :  { %11169 = vmatmul.msk.f32.gmra.mxu2 %vm1067_vm0, %v217_v49 }
 0x175   :  { %11137 = vmatmul.msk.f32.gmra.mxu1 %vm1067_vm0, %v185_v55  ;;  %v188_v55 = vld [vmem:[%s19765_s0 + $0x588] sm:$0xff] }
 0x176   :  { %11201 = vmatmul.msk.f32.gmra.mxu3 %vm1067_vm0, %v249_v57  ;;  %v252_v57 = vld [vmem:[%s19765_s0 + $0x788] sm:$0xff] }
 0x177   :  { %v1689_v62 = vpop.f32.mrf.mxu2 }
 0x178   :  { %7850 = vst [vmem:[#allocation2 + $0x2f0] sm:$0xff] %v1689_v62  ;;  %v9782_v63 = vadd.f32 %v9781_v59, %v1689_v62  ;;  %v1274_v0 = vpop.f32.mrf.mxu0 }
 0x179   :  { %7787 = vst [vmem:[#allocation2 + $0xf8] sm:$0xff] %v1274_v0  ;;  %v1898_v5 = vpop.f32.mrf.mxu3 }
 0x17a   :  { %7882 = vst [vmem:[#allocation2 + $0x3f0] sm:$0xff] %v1898_v5  ;;  %v13956_v6 = vadd.f32 %v9782_v63, %v1898_v5  ;;  %v1483_v10 = vpop.f32.mrf.mxu1 }
 0x17b   :  { %7819 = vst [vmem:[#allocation2 + $0x1f8] sm:$0xff] %v1483_v10  ;;  %11106 = vmatmul.msk.f32.gmra.mxu0 %vm1067_vm0, %v154_v3  ;;  %v9812_v16 = vadd.f32 %v1483_v10, %v1274_v0  ;;  %v157_v0 = vld [vmem:[%s19765_s0 + $0x490] sm:$0xff] }
 0x17c   :  { %11170 = vmatmul.msk.f32.gmra.mxu2 %vm1067_vm0, %v218_v4  ;;  %v221_v3 = vld [vmem:[%s19765_s0 + $0x690] sm:$0xff] }
 0x17d   :  { %11138 = vmatmul.msk.f32.gmra.mxu1 %vm1067_vm0, %v186_v11 }
 0x17e   :  { %11202 = vmatmul.msk.f32.gmra.mxu3 %vm1067_vm0, %v250_v13  ;;  %v189_v13 = vld [vmem:[%s19765_s0 + $0x590] sm:$0xff] }
 0x17f   :  { %v1692_v17 = vpop.f32.mrf.mxu2 }
 0x180   :  { %7851 = vst [vmem:[#allocation2 + $0x2f8] sm:$0xff] %v1692_v17  ;;  %v9813_v18 = vadd.f32 %v9812_v16, %v1692_v17  ;;  %v2017_v19 = vpop.f32.mrf.mxu0  ;;  %v253_v16 = vld [vmem:[%s19765_s0 + $0x790] sm:$0xff] }
 0x181   :  { %v1901_v27 = vpop.f32.mrf.mxu3  ;;  %7884 = vst [vmem:[#allocation2 + $0x400] sm:$0xff] %v2017_v19  ;;  %v8854_v28 = vadd.f32 %v13404_v21, %v2017_v19 }
 0x182   :  { %7883 = vst [vmem:[#allocation2 + $0x3f8] sm:$0xff] %v1901_v27  ;;  %v13975_v30 = vadd.f32 %v9813_v18, %v1901_v27  ;;  %v2226_v31 = vpop.f32.mrf.mxu1 }
 0x183   :  { %7916 = vst [vmem:[#allocation2 + $0x500] sm:$0xff] %v2226_v31  ;;  %11107 = vmatmul.msk.f32.gmra.mxu0 %vm1067_vm0, %v155_v22  ;;  %v8855_v37 = vadd.f32 %v8854_v28, %v2226_v31  ;;  %v158_v22 = vld [vmem:[%s19765_s0 + $0x498] sm:$0xff] }
 0x184   :  { %11171 = vmatmul.msk.f32.gmra.mxu2 %vm1067_vm0, %v219_v23  ;;  %v222_v23 = vld [vmem:[%s19765_s0 + $0x698] sm:$0xff] }
 0x185   :  { %11139 = vmatmul.msk.f32.gmra.mxu1 %vm1067_vm0, %v187_v34 }
 0x186   :  { %11203 = vmatmul.msk.f32.gmra.mxu3 %vm1067_vm0, %v251_v35  ;;  %v190_v35 = vld [vmem:[%s19765_s0 + $0x598] sm:$0xff] }
 0x187   :  { %v2435_v21 = vpop.f32.mrf.mxu2 }
 0x188   :  { %7948 = vst [vmem:[#allocation2 + $0x600] sm:$0xff] %v2435_v21  ;;  %v8856_v38 = vadd.f32 %v8855_v37, %v2435_v21  ;;  %v2020_v41 = vpop.f32.mrf.mxu0  ;;  %v254_v37 = vld [vmem:[%s19765_s0 + $0x798] sm:$0xff] }
 0x189   :  { %7885 = vst [vmem:[#allocation2 + $0x408] sm:$0xff] %v2020_v41  ;;  %v8885_v47 = vadd.f32 %v13422_v32, %v2020_v41  ;;  %v2644_v49 = vpop.f32.mrf.mxu3 }
 0x18a   :  { %7980 = vst [vmem:[#allocation2 + $0x700] sm:$0xff] %v2644_v49  ;;  %v13994_v50 = vadd.f32 %v8856_v38, %v2644_v49  ;;  %v2229_v53 = vpop.f32.mrf.mxu1 }
 0x18b   :  { %7917 = vst [vmem:[#allocation2 + $0x508] sm:$0xff] %v2229_v53  ;;  %11108 = vmatmul.msk.f32.gmra.mxu0 %vm1067_vm0, %v156_v45  ;;  %v8886_v59 = vadd.f32 %v8885_v47, %v2229_v53  ;;  %v159_v45 = vld [vmem:[%s19765_s0 + $0x4a0] sm:$0xff] }
 0x18c   :  { %11172 = vmatmul.msk.f32.gmra.mxu2 %vm1067_vm0, %v220_v46  ;;  %v223_v46 = vld [vmem:[%s19765_s0 + $0x6a0] sm:$0xff] }
 0x18d   :  { %11140 = vmatmul.msk.f32.gmra.mxu1 %vm1067_vm0, %v188_v55 }
 0x18e   :  { %11204 = vmatmul.msk.f32.gmra.mxu3 %vm1067_vm0, %v252_v57  ;;  %v191_v57 = vld [vmem:[%s19765_s0 + $0x5a0] sm:$0xff] }
 0x18f   :  { %v2438_v32 = vpop.f32.mrf.mxu2 }
 0x190   :  { %7949 = vst [vmem:[#allocation2 + $0x608] sm:$0xff] %v2438_v32  ;;  %v8887_v62 = vadd.f32 %v8886_v59, %v2438_v32  ;;  %v2023_v63 = vpop.f32.mrf.mxu0  ;;  %v255_v59 = vld [vmem:[%s19765_s0 + $0x7a0] sm:$0xff] }
 0x191   :  { %7886 = vst [vmem:[#allocation2 + $0x410] sm:$0xff] %v2023_v63  ;;  %v8916_v4 = vadd.f32 %v13440_v43, %v2023_v63  ;;  %v2647_v5 = vpop.f32.mrf.mxu3 }
 0x192   :  { %7981 = vst [vmem:[#allocation2 + $0x708] sm:$0xff] %v2647_v5  ;;  %v14013_v10 = vadd.f32 %v8887_v62, %v2647_v5  ;;  %v2232_v11 = vpop.f32.mrf.mxu1 }
 0x193   :  { %7918 = vst [vmem:[#allocation2 + $0x510] sm:$0xff] %v2232_v11  ;;  %11109 = vmatmul.msk.f32.gmra.mxu0 %vm1067_vm0, %v157_v0  ;;  %v8917_v17 = vadd.f32 %v8916_v4, %v2232_v11  ;;  %v160_v0 = vld [vmem:[%s19765_s0 + $0x4a8] sm:$0xff] }
 0x194   :  { %11173 = vmatmul.msk.f32.gmra.mxu2 %vm1067_vm0, %v221_v3  ;;  %v224_v3 = vld [vmem:[%s19765_s0 + $0x6a8] sm:$0xff] }
 0x195   :  { %11141 = vmatmul.msk.f32.gmra.mxu1 %vm1067_vm0, %v189_v13 }
 0x196   :  { %11205 = vmatmul.msk.f32.gmra.mxu3 %vm1067_vm0, %v253_v16  ;;  %v192_v16 = vld [vmem:[%s19765_s0 + $0x5a8] sm:$0xff] }
 0x197   :  { %v2441_v43 = vpop.f32.mrf.mxu2 }
 0x198   :  { %7950 = vst [vmem:[#allocation2 + $0x610] sm:$0xff] %v2441_v43  ;;  %v8918_v18 = vadd.f32 %v8917_v17, %v2441_v43  ;;  %v2026_v19 = vpop.f32.mrf.mxu0  ;;  %v256_v17 = vld [vmem:[%s19765_s0 + $0x7a8] sm:$0xff] }
 0x199   :  { %7887 = vst [vmem:[#allocation2 + $0x418] sm:$0xff] %v2026_v19  ;;  %v8947_v27 = vadd.f32 %v13458_v54, %v2026_v19  ;;  %v2650_v28 = vpop.f32.mrf.mxu3 }
 0x19a   :  { %7982 = vst [vmem:[#allocation2 + $0x710] sm:$0xff] %v2650_v28  ;;  %v14032_v31 = vadd.f32 %v8918_v18, %v2650_v28  ;;  %v2235_v34 = vpop.f32.mrf.mxu1 }
 0x19b   :  { %7919 = vst [vmem:[#allocation2 + $0x518] sm:$0xff] %v2235_v34  ;;  %11110 = vmatmul.msk.f32.gmra.mxu0 %vm1067_vm0, %v158_v22  ;;  %v8948_v21 = vadd.f32 %v8947_v27, %v2235_v34  ;;  %v161_v22 = vld [vmem:[%s19765_s0 + $0x4b0] sm:$0xff] }
 0x19c   :  { %11174 = vmatmul.msk.f32.gmra.mxu2 %vm1067_vm0, %v222_v23  ;;  %v225_v23 = vld [vmem:[%s19765_s0 + $0x6b0] sm:$0xff] }
 0x19d   :  { %11142 = vmatmul.msk.f32.gmra.mxu1 %vm1067_vm0, %v190_v35 }
 0x19e   :  { %11206 = vmatmul.msk.f32.gmra.mxu3 %vm1067_vm0, %v254_v37  ;;  %v193_v37 = vld [vmem:[%s19765_s0 + $0x5b0] sm:$0xff] }
 0x19f   :  { %v2444_v54 = vpop.f32.mrf.mxu2 }
 0x1a0   :  { %7951 = vst [vmem:[#allocation2 + $0x618] sm:$0xff] %v2444_v54  ;;  %v8949_v38 = vadd.f32 %v8948_v21, %v2444_v54  ;;  %v2029_v41 = vpop.f32.mrf.mxu0  ;;  %v257_v21 = vld [vmem:[%s19765_s0 + $0x7b0] sm:$0xff] }
 0x1a1   :  { %7888 = vst [vmem:[#allocation2 + $0x420] sm:$0xff] %v2029_v41  ;;  %v8978_v47 = vadd.f32 %v13476_v1, %v2029_v41  ;;  %v2653_v49 = vpop.f32.mrf.mxu3 }
 0x1a2   :  { %7983 = vst [vmem:[#allocation2 + $0x718] sm:$0xff] %v2653_v49  ;;  %v14051_v53 = vadd.f32 %v8949_v38, %v2653_v49  ;;  %v2238_v55 = vpop.f32.mrf.mxu1 }
 0x1a3   :  { %7920 = vst [vmem:[#allocation2 + $0x520] sm:$0xff] %v2238_v55  ;;  %11111 = vmatmul.msk.f32.gmra.mxu0 %vm1067_vm0, %v159_v45  ;;  %v8979_v32 = vadd.f32 %v8978_v47, %v2238_v55  ;;  %v162_v45 = vld [vmem:[%s19765_s0 + $0x4b8] sm:$0xff] }
 0x1a4   :  { %11175 = vmatmul.msk.f32.gmra.mxu2 %vm1067_vm0, %v223_v46  ;;  %v226_v46 = vld [vmem:[%s19765_s0 + $0x6b8] sm:$0xff] }
 0x1a5   :  { %11143 = vmatmul.msk.f32.gmra.mxu1 %vm1067_vm0, %v191_v57 }
 0x1a6   :  { %11207 = vmatmul.msk.f32.gmra.mxu3 %vm1067_vm0, %v255_v59  ;;  %v194_v59 = vld [vmem:[%s19765_s0 + $0x5b8] sm:$0xff] }
 0x1a7   :  { %v2447_v1 = vpop.f32.mrf.mxu2 }
 0x1a8   :  { %7952 = vst [vmem:[#allocation2 + $0x620] sm:$0xff] %v2447_v1  ;;  %v8980_v62 = vadd.f32 %v8979_v32, %v2447_v1  ;;  %v2032_v63 = vpop.f32.mrf.mxu0  ;;  %v258_v32 = vld [vmem:[%s19765_s0 + $0x7b8] sm:$0xff] }
 0x1a9   :  { %7889 = vst [vmem:[#allocation2 + $0x428] sm:$0xff] %v2032_v63  ;;  %v9009_v4 = vadd.f32 %v13494_v12, %v2032_v63  ;;  %v2656_v5 = vpop.f32.mrf.mxu3 }
 0x1aa   :  { %7984 = vst [vmem:[#allocation2 + $0x720] sm:$0xff] %v2656_v5  ;;  %v14070_v11 = vadd.f32 %v8980_v62, %v2656_v5  ;;  %v2241_v13 = vpop.f32.mrf.mxu1 }
 0x1ab   :  { %7921 = vst [vmem:[#allocation2 + $0x528] sm:$0xff] %v2241_v13  ;;  %11112 = vmatmul.msk.f32.gmra.mxu0 %vm1067_vm0, %v160_v0  ;;  %v9010_v43 = vadd.f32 %v9009_v4, %v2241_v13  ;;  %v163_v0 = vld [vmem:[%s19765_s0 + $0x4c0] sm:$0xff] }
 0x1ac   :  { %11176 = vmatmul.msk.f32.gmra.mxu2 %vm1067_vm0, %v224_v3  ;;  %v227_v3 = vld [vmem:[%s19765_s0 + $0x6c0] sm:$0xff] }
 0x1ad   :  { %11144 = vmatmul.msk.f32.gmra.mxu1 %vm1067_vm0, %v192_v16 }
 0x1ae   :  { %11208 = vmatmul.msk.f32.gmra.mxu3 %vm1067_vm0, %v256_v17  ;;  %v195_v17 = vld [vmem:[%s19765_s0 + $0x5c0] sm:$0xff] }
 0x1af   :  { %v2450_v12 = vpop.f32.mrf.mxu2 }
 0x1b0   :  { %7953 = vst [vmem:[#allocation2 + $0x628] sm:$0xff] %v2450_v12  ;;  %v9011_v18 = vadd.f32 %v9010_v43, %v2450_v12  ;;  %v2035_v19 = vpop.f32.mrf.mxu0  ;;  %v259_v43 = vld [vmem:[%s19765_s0 + $0x7c0] sm:$0xff] }
 0x1b1   :  { %7890 = vst [vmem:[#allocation2 + $0x430] sm:$0xff] %v2035_v19  ;;  %v9040_v27 = vadd.f32 %v13512_v24, %v2035_v19  ;;  %v2659_v28 = vpop.f32.mrf.mxu3 }
 0x1b2   :  { %7985 = vst [vmem:[#allocation2 + $0x728] sm:$0xff] %v2659_v28  ;;  %v14089_v34 = vadd.f32 %v9011_v18, %v2659_v28  ;;  %v2244_v35 = vpop.f32.mrf.mxu1 }
 0x1b3   :  { %7922 = vst [vmem:[#allocation2 + $0x530] sm:$0xff] %v2244_v35  ;;  %11113 = vmatmul.msk.f32.gmra.mxu0 %vm1067_vm0, %v161_v22  ;;  %v9041_v54 = vadd.f32 %v9040_v27, %v2244_v35  ;;  %v164_v22 = vld [vmem:[%s19765_s0 + $0x4c8] sm:$0xff] }
 0x1b4   :  { %11177 = vmatmul.msk.f32.gmra.mxu2 %vm1067_vm0, %v225_v23  ;;  %v228_v23 = vld [vmem:[%s19765_s0 + $0x6c8] sm:$0xff] }
 0x1b5   :  { %11145 = vmatmul.msk.f32.gmra.mxu1 %vm1067_vm0, %v193_v37 }
 0x1b6   :  { %11209 = vmatmul.msk.f32.gmra.mxu3 %vm1067_vm0, %v257_v21  ;;  %v196_v21 = vld [vmem:[%s19765_s0 + $0x5c8] sm:$0xff] }
 0x1b7   :  { %v2453_v24 = vpop.f32.mrf.mxu2 }
 0x1b8   :  { %7954 = vst [vmem:[#allocation2 + $0x630] sm:$0xff] %v2453_v24  ;;  %v9042_v38 = vadd.f32 %v9041_v54, %v2453_v24  ;;  %v2038_v41 = vpop.f32.mrf.mxu0  ;;  %v260_v54 = vld [vmem:[%s19765_s0 + $0x7c8] sm:$0xff] }
 0x1b9   :  { %7891 = vst [vmem:[#allocation2 + $0x438] sm:$0xff] %v2038_v41  ;;  %v9071_v47 = vadd.f32 %v13530_v36, %v2038_v41  ;;  %v2662_v49 = vpop.f32.mrf.mxu3 }
 0x1ba   :  { %7986 = vst [vmem:[#allocation2 + $0x730] sm:$0xff] %v2662_v49  ;;  %v14108_v55 = vadd.f32 %v9042_v38, %v2662_v49  ;;  %v2247_v57 = vpop.f32.mrf.mxu1 }
 0x1bb   :  { %7923 = vst [vmem:[#allocation2 + $0x538] sm:$0xff] %v2247_v57  ;;  %11114 = vmatmul.msk.f32.gmra.mxu0 %vm1067_vm0, %v162_v45  ;;  %v9072_v1 = vadd.f32 %v9071_v47, %v2247_v57  ;;  %v165_v45 = vld [vmem:[%s19765_s0 + $0x4d0] sm:$0xff] }
 0x1bc   :  { %11178 = vmatmul.msk.f32.gmra.mxu2 %vm1067_vm0, %v226_v46  ;;  %v229_v46 = vld [vmem:[%s19765_s0 + $0x6d0] sm:$0xff] }
 0x1bd   :  { %11146 = vmatmul.msk.f32.gmra.mxu1 %vm1067_vm0, %v194_v59 }
 0x1be   :  { %11210 = vmatmul.msk.f32.gmra.mxu3 %vm1067_vm0, %v258_v32  ;;  %v197_v32 = vld [vmem:[%s19765_s0 + $0x5d0] sm:$0xff] }
 0x1bf   :  { %v2456_v36 = vpop.f32.mrf.mxu2 }
 0x1c0   :  { %7955 = vst [vmem:[#allocation2 + $0x638] sm:$0xff] %v2456_v36  ;;  %v9073_v62 = vadd.f32 %v9072_v1, %v2456_v36  ;;  %v2041_v63 = vpop.f32.mrf.mxu0  ;;  %v261_v1 = vld [vmem:[%s19765_s0 + $0x7d0] sm:$0xff] }
 0x1c1   :  { %7892 = vst [vmem:[#allocation2 + $0x440] sm:$0xff] %v2041_v63  ;;  %v9102_v4 = vadd.f32 %v13548_v48, %v2041_v63  ;;  %v2665_v5 = vpop.f32.mrf.mxu3 }
 0x1c2   :  { %7987 = vst [vmem:[#allocation2 + $0x738] sm:$0xff] %v2665_v5  ;;  %v14127_v13 = vadd.f32 %v9073_v62, %v2665_v5  ;;  %v2250_v16 = vpop.f32.mrf.mxu1 }
 0x1c3   :  { %7924 = vst [vmem:[#allocation2 + $0x540] sm:$0xff] %v2250_v16  ;;  %11115 = vmatmul.msk.f32.gmra.mxu0 %vm1067_vm0, %v163_v0  ;;  %v9103_v12 = vadd.f32 %v9102_v4, %v2250_v16  ;;  %v166_v0 = vld [vmem:[%s19765_s0 + $0x4d8] sm:$0xff] }
 0x1c4   :  { %11179 = vmatmul.msk.f32.gmra.mxu2 %vm1067_vm0, %v227_v3  ;;  %v230_v3 = vld [vmem:[%s19765_s0 + $0x6d8] sm:$0xff] }
 0x1c5   :  { %11147 = vmatmul.msk.f32.gmra.mxu1 %vm1067_vm0, %v195_v17 }
 0x1c6   :  { %11211 = vmatmul.msk.f32.gmra.mxu3 %vm1067_vm0, %v259_v43  ;;  %v198_v43 = vld [vmem:[%s19765_s0 + $0x5d8] sm:$0xff] }
 0x1c7   :  { %v2459_v48 = vpop.f32.mrf.mxu2 }
 0x1c8   :  { %7956 = vst [vmem:[#allocation2 + $0x640] sm:$0xff] %v2459_v48  ;;  %v9104_v18 = vadd.f32 %v9103_v12, %v2459_v48  ;;  %v2044_v19 = vpop.f32.mrf.mxu0  ;;  %v262_v12 = vld [vmem:[%s19765_s0 + $0x7d8] sm:$0xff] }
 0x1c9   :  { %7893 = vst [vmem:[#allocation2 + $0x448] sm:$0xff] %v2044_v19  ;;  %v9133_v27 = vadd.f32 %v13566_v60, %v2044_v19  ;;  %v2668_v28 = vpop.f32.mrf.mxu3 }
 0x1ca   :  { %7988 = vst [vmem:[#allocation2 + $0x740] sm:$0xff] %v2668_v28  ;;  %v14146_v35 = vadd.f32 %v9104_v18, %v2668_v28  ;;  %v2253_v37 = vpop.f32.mrf.mxu1 }
 0x1cb   :  { %7925 = vst [vmem:[#allocation2 + $0x548] sm:$0xff] %v2253_v37  ;;  %11116 = vmatmul.msk.f32.gmra.mxu0 %vm1067_vm0, %v164_v22  ;;  %v9134_v24 = vadd.f32 %v9133_v27, %v2253_v37  ;;  %v167_v22 = vld [vmem:[%s19765_s0 + $0x4e0] sm:$0xff] }
 0x1cc   :  { %11180 = vmatmul.msk.f32.gmra.mxu2 %vm1067_vm0, %v228_v23  ;;  %v231_v23 = vld [vmem:[%s19765_s0 + $0x6e0] sm:$0xff] }
 0x1cd   :  { %11148 = vmatmul.msk.f32.gmra.mxu1 %vm1067_vm0, %v196_v21 }
 0x1ce   :  { %11212 = vmatmul.msk.f32.gmra.mxu3 %vm1067_vm0, %v260_v54  ;;  %v199_v54 = vld [vmem:[%s19765_s0 + $0x5e0] sm:$0xff] }
 0x1cf   :  { %v2462_v60 = vpop.f32.mrf.mxu2 }
 0x1d0   :  { %7957 = vst [vmem:[#allocation2 + $0x648] sm:$0xff] %v2462_v60  ;;  %v9135_v38 = vadd.f32 %v9134_v24, %v2462_v60  ;;  %v2047_v41 = vpop.f32.mrf.mxu0  ;;  %v263_v24 = vld [vmem:[%s19765_s0 + $0x7e0] sm:$0xff] }
 0x1d1   :  { %7894 = vst [vmem:[#allocation2 + $0x450] sm:$0xff] %v2047_v41  ;;  %v9164_v47 = vadd.f32 %v13584_v8, %v2047_v41  ;;  %v2671_v49 = vpop.f32.mrf.mxu3  ;;  %v1047_v41 = vld [vmem:[%s19763_s1 + $0x60] sm:$0xff] }
 0x1d2   :  { %7989 = vst [vmem:[#allocation2 + $0x748] sm:$0xff] %v2671_v49  ;;  %v14165_v57 = vadd.f32 %v9135_v38, %v2671_v49  ;;  %v2256_v59 = vpop.f32.mrf.mxu1  ;;  %3687 = vmatpush.msrb.mxu0 %v1047_v41  ;;  %v202_v41 = vld [vmem:[%s19765_s0 + $0x5f8] sm:$0xff] }
 0x1d3   :  { %7926 = vst [vmem:[#allocation2 + $0x550] sm:$0xff] %v2256_v59  ;;  %11117 = vmatmul.msk.f32.gmra.mxu0 %vm1067_vm0, %v165_v45  ;;  %v9165_v36 = vadd.f32 %v9164_v47, %v2256_v59  ;;  %v1050_v45 = vld [vmem:[%s19763_s1 + $0x78] sm:$0xff]  ;;  %v1048_v47 = vld [vmem:[%s19763_s1 + $0x68] sm:$0xff] }
 0x1d4   :  { %11181 = vmatmul.msk.f32.gmra.mxu2 %vm1067_vm0, %v229_v46  ;;  %4314 = vmatpush.msrb.mxu3 %v1050_v45  ;;  %v168_v59 = vld [vmem:[%s19765_s0 + $0x4e8] sm:$0xff]  ;;  %v266_v45 = vld [vmem:[%s19765_s0 + $0x7f8] sm:$0xff] }
 0x1d5   :  { %11149 = vmatmul.msk.f32.gmra.mxu1 %vm1067_vm0, %v197_v32  ;;  %v232_v32 = vld [vmem:[%s19765_s0 + $0x6e8] sm:$0xff] }
 0x1d6   :  { %11213 = vmatmul.msk.f32.gmra.mxu3 %vm1067_vm0, %v261_v1  ;;  %3896 = vmatpush.msrb.mxu1 %v1048_v47 }
 0x1d7   :  { %v2465_v8 = vpop.f32.mrf.mxu2 }
 0x1d8   :  { %7958 = vst [vmem:[#allocation2 + $0x650] sm:$0xff] %v2465_v8  ;;  %v9166_v62 = vadd.f32 %v9165_v36, %v2465_v8  ;;  %v2050_v63 = vpop.f32.mrf.mxu0 }
 0x1d9   :  { %7895 = vst [vmem:[#allocation2 + $0x458] sm:$0xff] %v2050_v63  ;;  %v9195_v4 = vadd.f32 %v13602_v20, %v2050_v63  ;;  %v2674_v5 = vpop.f32.mrf.mxu3  ;;  %v200_v63 = vld [vmem:[%s19765_s0 + $0x5e8] sm:$0xff] }
 0x1da   :  { %7990 = vst [vmem:[#allocation2 + $0x750] sm:$0xff] %v2674_v5  ;;  %v14184_v16 = vadd.f32 %v9166_v62, %v2674_v5  ;;  %v2259_v17 = vpop.f32.mrf.mxu1 }
 0x1db   :  { %7927 = vst [vmem:[#allocation2 + $0x558] sm:$0xff] %v2259_v17  ;;  %11118 = vmatmul.msk.f32.gmra.mxu0 %vm1067_vm0, %v166_v0  ;;  %v9196_v48 = vadd.f32 %v9195_v4, %v2259_v17  ;;  %v264_v0 = vld [vmem:[%s19765_s0 + $0x7e8] sm:$0xff]  ;;  %v169_v17 = vld [vmem:[%s19765_s0 + $0x4f0] sm:$0xff] }
 0x1dc   :  { %11182 = vmatmul.msk.f32.gmra.mxu2 %vm1067_vm0, %v230_v3 }
 0x1dd   :  { %11150 = vmatmul.msk.f32.gmra.mxu1 %vm1067_vm0, %v198_v43  ;;  %v233_v43 = vld [vmem:[%s19765_s0 + $0x6f0] sm:$0xff] }
 0x1de   :  { %11214 = vmatmul.msk.f32.gmra.mxu3 %vm1067_vm0, %v262_v12 }
 0x1df   :  { %v2468_v20 = vpop.f32.mrf.mxu2 }
 0x1e0   :  { %7959 = vst [vmem:[#allocation2 + $0x658] sm:$0xff] %v2468_v20  ;;  %v9197_v18 = vadd.f32 %v9196_v48, %v2468_v20  ;;  %v2053_v19 = vpop.f32.mrf.mxu0 }
 0x1e1   :  { %7896 = vst [vmem:[#allocation2 + $0x460] sm:$0xff] %v2053_v19  ;;  %v9226_v27 = vadd.f32 %v13632_v39, %v2053_v19  ;;  %v2677_v28 = vpop.f32.mrf.mxu3  ;;  %v1049_v39 = vld [vmem:[%s19763_s1 + $0x70] sm:$0xff] }
 0x1e2   :  { %7991 = vst [vmem:[#allocation2 + $0x758] sm:$0xff] %v2677_v28  ;;  %v14203_v37 = vadd.f32 %v9197_v18, %v2677_v28  ;;  %v2262_v21 = vpop.f32.mrf.mxu1  ;;  %4105 = vmatpush.msrb.mxu2 %v1049_v39  ;;  %v201_v19 = vld [vmem:[%s19765_s0 + $0x5f0] sm:$0xff] }
 0x1e3   :  { %7928 = vst [vmem:[#allocation2 + $0x560] sm:$0xff] %v2262_v21  ;;  %11119 = vmatmul.msk.f32.gmra.mxu0 %vm1067_vm0, %v167_v22  ;;  %v9227_v60 = vadd.f32 %v9226_v27, %v2262_v21  ;;  %v265_v22 = vld [vmem:[%s19765_s0 + $0x7f0] sm:$0xff]  ;;  %v170_v21 = vld [vmem:[%s19765_s0 + $0x4f8] sm:$0xff] }
 0x1e4   :  { %11183 = vmatmul.msk.f32.gmra.mxu2 %vm1067_vm0, %v231_v23 }
 0x1e5   :  { %11151 = vmatmul.msk.f32.gmra.mxu1 %vm1067_vm0, %v199_v54  ;;  %v234_v54 = vld [vmem:[%s19765_s0 + $0x6f8] sm:$0xff] }
 0x1e6   :  { %11215 = vmatmul.msk.f32.gmra.mxu3 %vm1067_vm0, %v263_v24 }
 0x1e7   :  { %v2471_v38 = vpop.f32.mrf.mxu2 }
 0x1e8   :  { %7960 = vst [vmem:[#allocation2 + $0x660] sm:$0xff] %v2471_v38  ;;  %v9228_v46 = vadd.f32 %v9227_v60, %v2471_v38  ;;  %v2056_v49 = vpop.f32.mrf.mxu0 }
 0x1e9   :  { %7897 = vst [vmem:[#allocation2 + $0x468] sm:$0xff] %v2056_v49  ;;  %v9257_v1 = vadd.f32 %v13650_v52, %v2056_v49  ;;  %v2680_v36 = vpop.f32.mrf.mxu3 }
 0x1ea   :  { %7992 = vst [vmem:[#allocation2 + $0x760] sm:$0xff] %v2680_v36  ;;  %v14234_v8 = vadd.f32 %v9228_v46, %v2680_v36  ;;  %v2265_v62 = vpop.f32.mrf.mxu1 }
 0x1eb   :  { %7929 = vst [vmem:[#allocation2 + $0x568] sm:$0xff] %v2265_v62  ;;  %11120 = vmatmul.msk.f32.gmra.mxu0 %vm1067_vm0, %v168_v59  ;;  %v9258_v3 = vadd.f32 %v9257_v1, %v2265_v62  ;;  %v267_v59 = vld [vmem:[%s19765_s0 + $0x800] sm:$0xff] }
 0x1ec   :  { %11184 = vmatmul.msk.f32.gmra.mxu2 %vm1067_vm0, %v232_v32  ;;  %v331_v32 = vld [vmem:[%s19765_s0 + $0xa00] sm:$0xff] }
 0x1ed   :  { %11152 = vmatmul.msk.f32.gmra.mxu1 %vm1067_vm0, %v200_v63 }
 0x1ee   :  { %11216 = vmatmul.msk.f32.gmra.mxu3 %vm1067_vm0, %v264_v0  ;;  %v299_v0 = vld [vmem:[%s19765_s0 + $0x900] sm:$0xff] }
 0x1ef   :  { %v2474_v52 = vpop.f32.mrf.mxu2 }
 0x1f0   :  { %7961 = vst [vmem:[#allocation2 + $0x668] sm:$0xff] %v2474_v52  ;;  %v9259_v4 = vadd.f32 %v9258_v3, %v2474_v52  ;;  %v2059_v5 = vpop.f32.mrf.mxu0  ;;  %v363_v3 = vld [vmem:[%s19765_s0 + $0xb00] sm:$0xff] }
 0x1f1   :  { %7898 = vst [vmem:[#allocation2 + $0x470] sm:$0xff] %v2059_v5  ;;  %v9288_v12 = vadd.f32 %v13668_v2, %v2059_v5  ;;  %v2683_v48 = vpop.f32.mrf.mxu3 }
 0x1f2   :  { %7993 = vst [vmem:[#allocation2 + $0x768] sm:$0xff] %v2683_v48  ;;  %v14253_v20 = vadd.f32 %v9259_v4, %v2683_v48  ;;  %v2268_v18 = vpop.f32.mrf.mxu1 }
 0x1f3   :  { %7930 = vst [vmem:[#allocation2 + $0x570] sm:$0xff] %v2268_v18  ;;  %11121 = vmatmul.msk.f32.gmra.mxu0 %vm1067_vm0, %v169_v17  ;;  %v9289_v23 = vadd.f32 %v9288_v12, %v2268_v18  ;;  %v268_v17 = vld [vmem:[%s19765_s0 + $0x808] sm:$0xff] }
 0x1f4   :  { %11185 = vmatmul.msk.f32.gmra.mxu2 %vm1067_vm0, %v233_v43  ;;  %v332_v43 = vld [vmem:[%s19765_s0 + $0xa08] sm:$0xff] }
 0x1f5   :  { %11153 = vmatmul.msk.f32.gmra.mxu1 %vm1067_vm0, %v201_v19 }
 0x1f6   :  { %11217 = vmatmul.msk.f32.gmra.mxu3 %vm1067_vm0, %v265_v22  ;;  %v300_v22 = vld [vmem:[%s19765_s0 + $0x908] sm:$0xff] }
 0x1f7   :  { %v2477_v2 = vpop.f32.mrf.mxu2 }
 0x1f8   :  { %7962 = vst [vmem:[#allocation2 + $0x670] sm:$0xff] %v2477_v2  ;;  %v9290_v27 = vadd.f32 %v9289_v23, %v2477_v2  ;;  %v2062_v28 = vpop.f32.mrf.mxu0  ;;  %v364_v23 = vld [vmem:[%s19765_s0 + $0xb08] sm:$0xff] }
 0x1f9   :  { %7899 = vst [vmem:[#allocation2 + $0x478] sm:$0xff] %v2062_v28  ;;  %v9319_v24 = vadd.f32 %v13686_v15, %v2062_v28  ;;  %v2686_v39 = vpop.f32.mrf.mxu3 }
 0x1fa   :  { %7994 = vst [vmem:[#allocation2 + $0x770] sm:$0xff] %v2686_v39  ;;  %v14272_v60 = vadd.f32 %v9290_v27, %v2686_v39  ;;  %v2271_v38 = vpop.f32.mrf.mxu1 }
 0x1fb   :  { %7931 = vst [vmem:[#allocation2 + $0x578] sm:$0xff] %v2271_v38  ;;  %11122 = vmatmul.msk.f32.gmra.mxu0 %vm1067_vm0, %v170_v21  ;;  %v9320_v46 = vadd.f32 %v9319_v24, %v2271_v38  ;;  %v269_v21 = vld [vmem:[%s19765_s0 + $0x810] sm:$0xff] }
 0x1fc   :  { %11186 = vmatmul.msk.f32.gmra.mxu2 %vm1067_vm0, %v234_v54  ;;  %v333_v54 = vld [vmem:[%s19765_s0 + $0xa10] sm:$0xff] }
 0x1fd   :  { %11154 = vmatmul.msk.f32.gmra.mxu1 %vm1067_vm0, %v202_v41 }
 0x1fe   :  { %11218 = vmatmul.msk.f32.gmra.mxu3 %vm1067_vm0, %v266_v45  ;;  %v301_v45 = vld [vmem:[%s19765_s0 + $0x910] sm:$0xff] }
 0x1ff   :  { %v2480_v15 = vpop.f32.mrf.mxu2 }
 0x200   :  { %7963 = vst [vmem:[#allocation2 + $0x678] sm:$0xff] %v2480_v15  ;;  %v9321_v47 = vadd.f32 %v9320_v46, %v2480_v15  ;;  %v2065_v49 = vpop.f32.mrf.mxu0  ;;  %v365_v46 = vld [vmem:[%s19765_s0 + $0xb10] sm:$0xff] }
 0x201   :  { %7900 = vst [vmem:[#allocation2 + $0x480] sm:$0xff] %v2065_v49  ;;  %v9350_v1 = vadd.f32 %v13704_v29, %v2065_v49  ;;  %v2689_v36 = vpop.f32.mrf.mxu3 }
 0x202   :  { %7995 = vst [vmem:[#allocation2 + $0x778] sm:$0xff] %v2689_v36  ;;  %v14291_v62 = vadd.f32 %v9321_v47, %v2689_v36  ;;  %v2274_v63 = vpop.f32.mrf.mxu1 }
 0x203   :  { %7932 = vst [vmem:[#allocation2 + $0x580] sm:$0xff] %v2274_v63  ;;  %11219 = vmatmul.msk.f32.vlgmr.msra.gmra.mxu0 %vm1067_vm0, %v267_v59  ;;  %v9351_v52 = vadd.f32 %v9350_v1, %v2274_v63  ;;  %v270_v59 = vld [vmem:[%s19765_s0 + $0x818] sm:$0xff] }
 0x204   :  { %11283 = vmatmul.msk.f32.vlgmr.msra.gmra.mxu2 %vm1067_vm0, %v331_v32  ;;  %v334_v32 = vld [vmem:[%s19765_s0 + $0xa18] sm:$0xff] }
 0x205   :  { %11251 = vmatmul.msk.f32.vlgmr.msra.gmra.mxu1 %vm1067_vm0, %v299_v0 }
 0x206   :  { %11315 = vmatmul.msk.f32.vlgmr.msra.gmra.mxu3 %vm1067_vm0, %v363_v3  ;;  %v302_v3 = vld [vmem:[%s19765_s0 + $0x918] sm:$0xff] }
 0x207   :  { %v2483_v29 = vpop.f32.mrf.mxu2 }
 0x208   :  { %7964 = vst [vmem:[#allocation2 + $0x680] sm:$0xff] %v2483_v29  ;;  %v9352_v4 = vadd.f32 %v9351_v52, %v2483_v29  ;;  %v2068_v5 = vpop.f32.mrf.mxu0  ;;  %v366_v52 = vld [vmem:[%s19765_s0 + $0xb18] sm:$0xff] }
 0x209   :  { %7901 = vst [vmem:[#allocation2 + $0x488] sm:$0xff] %v2068_v5  ;;  %v9381_v12 = vadd.f32 %v13722_v44, %v2068_v5  ;;  %v2692_v48 = vpop.f32.mrf.mxu3 }
 0x20a   :  { %7996 = vst [vmem:[#allocation2 + $0x780] sm:$0xff] %v2692_v48  ;;  %v14310_v18 = vadd.f32 %v9352_v4, %v2692_v48  ;;  %v2277_v19 = vpop.f32.mrf.mxu1 }
 0x20b   :  { %7933 = vst [vmem:[#allocation2 + $0x588] sm:$0xff] %v2277_v19  ;;  %11220 = vmatmul.msk.f32.gmra.mxu0 %vm1067_vm0, %v268_v17  ;;  %v9382_v2 = vadd.f32 %v9381_v12, %v2277_v19  ;;  %v271_v17 = vld [vmem:[%s19765_s0 + $0x820] sm:$0xff] }
 0x20c   :  { %11284 = vmatmul.msk.f32.gmra.mxu2 %vm1067_vm0, %v332_v43  ;;  %v335_v43 = vld [vmem:[%s19765_s0 + $0xa20] sm:$0xff] }
 0x20d   :  { %11252 = vmatmul.msk.f32.gmra.mxu1 %vm1067_vm0, %v300_v22 }
 0x20e   :  { %11316 = vmatmul.msk.f32.gmra.mxu3 %vm1067_vm0, %v364_v23  ;;  %v303_v23 = vld [vmem:[%s19765_s0 + $0x920] sm:$0xff] }
 0x20f   :  { %v2486_v44 = vpop.f32.mrf.mxu2 }
 0x210   :  { %7965 = vst [vmem:[#allocation2 + $0x688] sm:$0xff] %v2486_v44  ;;  %v9383_v27 = vadd.f32 %v9382_v2, %v2486_v44  ;;  %v2071_v28 = vpop.f32.mrf.mxu0  ;;  %v367_v2 = vld [vmem:[%s19765_s0 + $0xb20] sm:$0xff] }
 0x211   :  { %7902 = vst [vmem:[#allocation2 + $0x490] sm:$0xff] %v2071_v28  ;;  %v9412_v24 = vadd.f32 %v13740_v58, %v2071_v28  ;;  %v2695_v39 = vpop.f32.mrf.mxu3 }
 0x212   :  { %7997 = vst [vmem:[#allocation2 + $0x788] sm:$0xff] %v2695_v39  ;;  %v14329_v38 = vadd.f32 %v9383_v27, %v2695_v39  ;;  %v2280_v41 = vpop.f32.mrf.mxu1 }
 0x213   :  { %7934 = vst [vmem:[#allocation2 + $0x590] sm:$0xff] %v2280_v41  ;;  %11221 = vmatmul.msk.f32.gmra.mxu0 %vm1067_vm0, %v269_v21  ;;  %v9413_v15 = vadd.f32 %v9412_v24, %v2280_v41  ;;  %v272_v21 = vld [vmem:[%s19765_s0 + $0x828] sm:$0xff] }
 0x214   :  { %11285 = vmatmul.msk.f32.gmra.mxu2 %vm1067_vm0, %v333_v54  ;;  %v336_v54 = vld [vmem:[%s19765_s0 + $0xa28] sm:$0xff] }
 0x215   :  { %11253 = vmatmul.msk.f32.gmra.mxu1 %vm1067_vm0, %v301_v45 }
 0x216   :  { %11317 = vmatmul.msk.f32.gmra.mxu3 %vm1067_vm0, %v365_v46  ;;  %v304_v46 = vld [vmem:[%s19765_s0 + $0x928] sm:$0xff] }
 0x217   :  { %v2489_v58 = vpop.f32.mrf.mxu2 }
 0x218   :  { %7966 = vst [vmem:[#allocation2 + $0x690] sm:$0xff] %v2489_v58  ;;  %v9414_v47 = vadd.f32 %v9413_v15, %v2489_v58  ;;  %v2074_v49 = vpop.f32.mrf.mxu0  ;;  %v368_v15 = vld [vmem:[%s19765_s0 + $0xb28] sm:$0xff] }
 0x219   :  { %7903 = vst [vmem:[#allocation2 + $0x498] sm:$0xff] %v2074_v49  ;;  %v9443_v1 = vadd.f32 %v13758_v9, %v2074_v49  ;;  %v2698_v36 = vpop.f32.mrf.mxu3 }
 0x21a   :  { %7998 = vst [vmem:[#allocation2 + $0x790] sm:$0xff] %v2698_v36  ;;  %v14348_v63 = vadd.f32 %v9414_v47, %v2698_v36  ;;  %v2283_v0 = vpop.f32.mrf.mxu1 }
 0x21b   :  { %7935 = vst [vmem:[#allocation2 + $0x598] sm:$0xff] %v2283_v0  ;;  %11222 = vmatmul.msk.f32.gmra.mxu0 %vm1067_vm0, %v270_v59  ;;  %v9444_v29 = vadd.f32 %v9443_v1, %v2283_v0  ;;  %v273_v59 = vld [vmem:[%s19765_s0 + $0x830] sm:$0xff] }
 0x21c   :  { %11286 = vmatmul.msk.f32.gmra.mxu2 %vm1067_vm0, %v334_v32  ;;  %v337_v32 = vld [vmem:[%s19765_s0 + $0xa30] sm:$0xff] }
 0x21d   :  { %11254 = vmatmul.msk.f32.gmra.mxu1 %vm1067_vm0, %v302_v3 }
 0x21e   :  { %11318 = vmatmul.msk.f32.gmra.mxu3 %vm1067_vm0, %v366_v52  ;;  %v305_v52 = vld [vmem:[%s19765_s0 + $0x930] sm:$0xff] }
 0x21f   :  { %v2492_v9 = vpop.f32.mrf.mxu2 }
 0x220   :  { %7967 = vst [vmem:[#allocation2 + $0x698] sm:$0xff] %v2492_v9  ;;  %v9445_v4 = vadd.f32 %v9444_v29, %v2492_v9  ;;  %v2077_v5 = vpop.f32.mrf.mxu0  ;;  %v369_v29 = vld [vmem:[%s19765_s0 + $0xb30] sm:$0xff] }
 0x221   :  { %7904 = vst [vmem:[#allocation2 + $0x4a0] sm:$0xff] %v2077_v5  ;;  %v9474_v12 = vadd.f32 %v13776_v25, %v2077_v5  ;;  %v2701_v48 = vpop.f32.mrf.mxu3 }
 0x222   :  { %7999 = vst [vmem:[#allocation2 + $0x798] sm:$0xff] %v2701_v48  ;;  %v14367_v19 = vadd.f32 %v9445_v4, %v2701_v48  ;;  %v2286_v22 = vpop.f32.mrf.mxu1 }
 0x223   :  { %7936 = vst [vmem:[#allocation2 + $0x5a0] sm:$0xff] %v2286_v22  ;;  %11223 = vmatmul.msk.f32.gmra.mxu0 %vm1067_vm0, %v271_v17  ;;  %v9475_v44 = vadd.f32 %v9474_v12, %v2286_v22  ;;  %v274_v17 = vld [vmem:[%s19765_s0 + $0x838] sm:$0xff] }
 0x224   :  { %11287 = vmatmul.msk.f32.gmra.mxu2 %vm1067_vm0, %v335_v43  ;;  %v338_v43 = vld [vmem:[%s19765_s0 + $0xa38] sm:$0xff] }
 0x225   :  { %11255 = vmatmul.msk.f32.gmra.mxu1 %vm1067_vm0, %v303_v23 }
 0x226   :  { %11319 = vmatmul.msk.f32.gmra.mxu3 %vm1067_vm0, %v367_v2  ;;  %v306_v2 = vld [vmem:[%s19765_s0 + $0x938] sm:$0xff] }
 0x227   :  { %v2495_v25 = vpop.f32.mrf.mxu2 }
 0x228   :  { %7968 = vst [vmem:[#allocation2 + $0x6a0] sm:$0xff] %v2495_v25  ;;  %v9476_v27 = vadd.f32 %v9475_v44, %v2495_v25  ;;  %v2080_v28 = vpop.f32.mrf.mxu0  ;;  %v370_v44 = vld [vmem:[%s19765_s0 + $0xb38] sm:$0xff] }
 0x229   :  { %7905 = vst [vmem:[#allocation2 + $0x4a8] sm:$0xff] %v2080_v28  ;;  %v9505_v24 = vadd.f32 %v13794_v40, %v2080_v28  ;;  %v2704_v39 = vpop.f32.mrf.mxu3 }
 0x22a   :  { %8000 = vst [vmem:[#allocation2 + $0x7a0] sm:$0xff] %v2704_v39  ;;  %v14386_v41 = vadd.f32 %v9476_v27, %v2704_v39  ;;  %v2289_v45 = vpop.f32.mrf.mxu1 }
 0x22b   :  { %7937 = vst [vmem:[#allocation2 + $0x5a8] sm:$0xff] %v2289_v45  ;;  %11224 = vmatmul.msk.f32.gmra.mxu0 %vm1067_vm0, %v272_v21  ;;  %v9506_v58 = vadd.f32 %v9505_v24, %v2289_v45  ;;  %v275_v21 = vld [vmem:[%s19765_s0 + $0x840] sm:$0xff] }
 0x22c   :  { %11288 = vmatmul.msk.f32.gmra.mxu2 %vm1067_vm0, %v336_v54  ;;  %v339_v54 = vld [vmem:[%s19765_s0 + $0xa40] sm:$0xff] }
 0x22d   :  { %11256 = vmatmul.msk.f32.gmra.mxu1 %vm1067_vm0, %v304_v46 }
 0x22e   :  { %11320 = vmatmul.msk.f32.gmra.mxu3 %vm1067_vm0, %v368_v15  ;;  %v307_v15 = vld [vmem:[%s19765_s0 + $0x940] sm:$0xff] }
 0x22f   :  { %v2498_v40 = vpop.f32.mrf.mxu2 }
 0x230   :  { %7969 = vst [vmem:[#allocation2 + $0x6a8] sm:$0xff] %v2498_v40  ;;  %v9507_v47 = vadd.f32 %v9506_v58, %v2498_v40  ;;  %v2083_v49 = vpop.f32.mrf.mxu0  ;;  %v371_v58 = vld [vmem:[%s19765_s0 + $0xb40] sm:$0xff] }
 0x231   :  { %7906 = vst [vmem:[#allocation2 + $0x4b0] sm:$0xff] %v2083_v49  ;;  %v9536_v1 = vadd.f32 %v13812_v56, %v2083_v49  ;;  %v2707_v36 = vpop.f32.mrf.mxu3 }
 0x232   :  { %8001 = vst [vmem:[#allocation2 + $0x7a8] sm:$0xff] %v2707_v36  ;;  %v14405_v0 = vadd.f32 %v9507_v47, %v2707_v36  ;;  %v2292_v3 = vpop.f32.mrf.mxu1 }
 0x233   :  { %7938 = vst [vmem:[#allocation2 + $0x5b0] sm:$0xff] %v2292_v3  ;;  %11225 = vmatmul.msk.f32.gmra.mxu0 %vm1067_vm0, %v273_v59  ;;  %v9537_v9 = vadd.f32 %v9536_v1, %v2292_v3  ;;  %v276_v59 = vld [vmem:[%s19765_s0 + $0x848] sm:$0xff] }
 0x234   :  { %11289 = vmatmul.msk.f32.gmra.mxu2 %vm1067_vm0, %v337_v32  ;;  %v340_v32 = vld [vmem:[%s19765_s0 + $0xa48] sm:$0xff] }
 0x235   :  { %11257 = vmatmul.msk.f32.gmra.mxu1 %vm1067_vm0, %v305_v52 }
 0x236   :  { %11321 = vmatmul.msk.f32.gmra.mxu3 %vm1067_vm0, %v369_v29  ;;  %v308_v29 = vld [vmem:[%s19765_s0 + $0x948] sm:$0xff] }
 0x237   :  { %v2501_v56 = vpop.f32.mrf.mxu2 }
 0x238   :  { %7970 = vst [vmem:[#allocation2 + $0x6b0] sm:$0xff] %v2501_v56  ;;  %v9538_v4 = vadd.f32 %v9537_v9, %v2501_v56  ;;  %v2086_v5 = vpop.f32.mrf.mxu0  ;;  %v372_v9 = vld [vmem:[%s19765_s0 + $0xb48] sm:$0xff] }
 0x239   :  { %7907 = vst [vmem:[#allocation2 + $0x4b8] sm:$0xff] %v2086_v5  ;;  %v9567_v12 = vadd.f32 %v13830_v7, %v2086_v5  ;;  %v2710_v48 = vpop.f32.mrf.mxu3 }
 0x23a   :  { %8002 = vst [vmem:[#allocation2 + $0x7b0] sm:$0xff] %v2710_v48  ;;  %v14424_v22 = vadd.f32 %v9538_v4, %v2710_v48  ;;  %v2295_v23 = vpop.f32.mrf.mxu1 }
 0x23b   :  { %7939 = vst [vmem:[#allocation2 + $0x5b8] sm:$0xff] %v2295_v23  ;;  %11226 = vmatmul.msk.f32.gmra.mxu0 %vm1067_vm0, %v274_v17  ;;  %v9568_v25 = vadd.f32 %v9567_v12, %v2295_v23  ;;  %v277_v17 = vld [vmem:[%s19765_s0 + $0x850] sm:$0xff] }
 0x23c   :  { %11290 = vmatmul.msk.f32.gmra.mxu2 %vm1067_vm0, %v338_v43  ;;  %v341_v43 = vld [vmem:[%s19765_s0 + $0xa50] sm:$0xff] }
 0x23d   :  { %11258 = vmatmul.msk.f32.gmra.mxu1 %vm1067_vm0, %v306_v2 }
 0x23e   :  { %11322 = vmatmul.msk.f32.gmra.mxu3 %vm1067_vm0, %v370_v44  ;;  %v309_v44 = vld [vmem:[%s19765_s0 + $0x950] sm:$0xff] }
 0x23f   :  { %v2504_v7 = vpop.f32.mrf.mxu2 }
 0x240   :  { %7971 = vst [vmem:[#allocation2 + $0x6b8] sm:$0xff] %v2504_v7  ;;  %v9569_v27 = vadd.f32 %v9568_v25, %v2504_v7  ;;  %v2089_v28 = vpop.f32.mrf.mxu0  ;;  %v373_v25 = vld [vmem:[%s19765_s0 + $0xb50] sm:$0xff] }
 0x241   :  { %7908 = vst [vmem:[#allocation2 + $0x4c0] sm:$0xff] %v2089_v28  ;;  %v9598_v24 = vadd.f32 %v13848_v26, %v2089_v28  ;;  %v2713_v39 = vpop.f32.mrf.mxu3 }
 0x242   :  { %8003 = vst [vmem:[#allocation2 + $0x7b8] sm:$0xff] %v2713_v39  ;;  %v14443_v45 = vadd.f32 %v9569_v27, %v2713_v39  ;;  %v2298_v46 = vpop.f32.mrf.mxu1 }
 0x243   :  { %7940 = vst [vmem:[#allocation2 + $0x5c0] sm:$0xff] %v2298_v46  ;;  %11227 = vmatmul.msk.f32.gmra.mxu0 %vm1067_vm0, %v275_v21  ;;  %v9599_v40 = vadd.f32 %v9598_v24, %v2298_v46  ;;  %v278_v21 = vld [vmem:[%s19765_s0 + $0x858] sm:$0xff] }
 0x244   :  { %11291 = vmatmul.msk.f32.gmra.mxu2 %vm1067_vm0, %v339_v54  ;;  %v342_v54 = vld [vmem:[%s19765_s0 + $0xa58] sm:$0xff] }
 0x245   :  { %11259 = vmatmul.msk.f32.gmra.mxu1 %vm1067_vm0, %v307_v15 }
 0x246   :  { %11323 = vmatmul.msk.f32.gmra.mxu3 %vm1067_vm0, %v371_v58  ;;  %v310_v58 = vld [vmem:[%s19765_s0 + $0x958] sm:$0xff] }
 0x247   :  { %v2507_v26 = vpop.f32.mrf.mxu2 }
 0x248   :  { %7972 = vst [vmem:[#allocation2 + $0x6c0] sm:$0xff] %v2507_v26  ;;  %v9600_v47 = vadd.f32 %v9599_v40, %v2507_v26  ;;  %v2092_v49 = vpop.f32.mrf.mxu0  ;;  %v374_v40 = vld [vmem:[%s19765_s0 + $0xb58] sm:$0xff] }
 0x249   :  { %7909 = vst [vmem:[#allocation2 + $0x4c8] sm:$0xff] %v2092_v49  ;;  %v9629_v1 = vadd.f32 %v13866_v42, %v2092_v49  ;;  %v2716_v36 = vpop.f32.mrf.mxu3 }
 0x24a   :  { %8004 = vst [vmem:[#allocation2 + $0x7c0] sm:$0xff] %v2716_v36  ;;  %v14462_v3 = vadd.f32 %v9600_v47, %v2716_v36  ;;  %v2301_v52 = vpop.f32.mrf.mxu1 }
 0x24b   :  { %7941 = vst [vmem:[#allocation2 + $0x5c8] sm:$0xff] %v2301_v52  ;;  %11228 = vmatmul.msk.f32.gmra.mxu0 %vm1067_vm0, %v276_v59  ;;  %v9630_v56 = vadd.f32 %v9629_v1, %v2301_v52  ;;  %v279_v59 = vld [vmem:[%s19765_s0 + $0x860] sm:$0xff] }
 0x24c   :  { %11292 = vmatmul.msk.f32.gmra.mxu2 %vm1067_vm0, %v340_v32  ;;  %v343_v32 = vld [vmem:[%s19765_s0 + $0xa60] sm:$0xff] }
 0x24d   :  { %11260 = vmatmul.msk.f32.gmra.mxu1 %vm1067_vm0, %v308_v29 }
 0x24e   :  { %11324 = vmatmul.msk.f32.gmra.mxu3 %vm1067_vm0, %v372_v9  ;;  %v311_v9 = vld [vmem:[%s19765_s0 + $0x960] sm:$0xff] }
 0x24f   :  { %v2510_v42 = vpop.f32.mrf.mxu2 }
 0x250   :  { %7973 = vst [vmem:[#allocation2 + $0x6c8] sm:$0xff] %v2510_v42  ;;  %v9631_v4 = vadd.f32 %v9630_v56, %v2510_v42  ;;  %v2095_v5 = vpop.f32.mrf.mxu0  ;;  %v375_v56 = vld [vmem:[%s19765_s0 + $0xb60] sm:$0xff] }
 0x251   :  { %7910 = vst [vmem:[#allocation2 + $0x4d0] sm:$0xff] %v2095_v5  ;;  %v9660_v12 = vadd.f32 %v13884_v61, %v2095_v5  ;;  %v2719_v48 = vpop.f32.mrf.mxu3 }
 0x252   :  { %8005 = vst [vmem:[#allocation2 + $0x7c8] sm:$0xff] %v2719_v48  ;;  %v14481_v23 = vadd.f32 %v9631_v4, %v2719_v48  ;;  %v2304_v2 = vpop.f32.mrf.mxu1 }
 0x253   :  { %7942 = vst [vmem:[#allocation2 + $0x5d0] sm:$0xff] %v2304_v2  ;;  %11229 = vmatmul.msk.f32.gmra.mxu0 %vm1067_vm0, %v277_v17  ;;  %v9661_v7 = vadd.f32 %v9660_v12, %v2304_v2  ;;  %v280_v17 = vld [vmem:[%s19765_s0 + $0x868] sm:$0xff] }
 0x254   :  { %11293 = vmatmul.msk.f32.gmra.mxu2 %vm1067_vm0, %v341_v43  ;;  %v344_v43 = vld [vmem:[%s19765_s0 + $0xa68] sm:$0xff] }
 0x255   :  { %11261 = vmatmul.msk.f32.gmra.mxu1 %vm1067_vm0, %v309_v44 }
 0x256   :  { %11325 = vmatmul.msk.f32.gmra.mxu3 %vm1067_vm0, %v373_v25  ;;  %v312_v25 = vld [vmem:[%s19765_s0 + $0x968] sm:$0xff] }
 0x257   :  { %v2513_v61 = vpop.f32.mrf.mxu2 }
 0x258   :  { %7974 = vst [vmem:[#allocation2 + $0x6d0] sm:$0xff] %v2513_v61  ;;  %v9662_v27 = vadd.f32 %v9661_v7, %v2513_v61  ;;  %v2098_v28 = vpop.f32.mrf.mxu0  ;;  %v376_v7 = vld [vmem:[%s19765_s0 + $0xb68] sm:$0xff] }
 0x259   :  { %7911 = vst [vmem:[#allocation2 + $0x4d8] sm:$0xff] %v2098_v28  ;;  %v9691_v24 = vadd.f32 %v13902_v14, %v2098_v28  ;;  %v2722_v39 = vpop.f32.mrf.mxu3 }
 0x25a   :  { %8006 = vst [vmem:[#allocation2 + $0x7d0] sm:$0xff] %v2722_v39  ;;  %v14500_v46 = vadd.f32 %v9662_v27, %v2722_v39  ;;  %v2307_v15 = vpop.f32.mrf.mxu1 }
 0x25b   :  { %7943 = vst [vmem:[#allocation2 + $0x5d8] sm:$0xff] %v2307_v15  ;;  %11230 = vmatmul.msk.f32.gmra.mxu0 %vm1067_vm0, %v278_v21  ;;  %v9692_v26 = vadd.f32 %v9691_v24, %v2307_v15  ;;  %v281_v21 = vld [vmem:[%s19765_s0 + $0x870] sm:$0xff] }
 0x25c   :  { %11294 = vmatmul.msk.f32.gmra.mxu2 %vm1067_vm0, %v342_v54  ;;  %v345_v54 = vld [vmem:[%s19765_s0 + $0xa70] sm:$0xff] }
 0x25d   :  { %11262 = vmatmul.msk.f32.gmra.mxu1 %vm1067_vm0, %v310_v58 }
 0x25e   :  { %11326 = vmatmul.msk.f32.gmra.mxu3 %vm1067_vm0, %v374_v40  ;;  %v313_v40 = vld [vmem:[%s19765_s0 + $0x970] sm:$0xff] }
 0x25f   :  { %v2516_v14 = vpop.f32.mrf.mxu2 }
 0x260   :  { %7975 = vst [vmem:[#allocation2 + $0x6d8] sm:$0xff] %v2516_v14  ;;  %v9693_v47 = vadd.f32 %v9692_v26, %v2516_v14  ;;  %v2101_v49 = vpop.f32.mrf.mxu0  ;;  %v377_v26 = vld [vmem:[%s19765_s0 + $0xb70] sm:$0xff] }
 0x261   :  { %7912 = vst [vmem:[#allocation2 + $0x4e0] sm:$0xff] %v2101_v49  ;;  %v9722_v1 = vadd.f32 %v13920_v33, %v2101_v49  ;;  %v2725_v36 = vpop.f32.mrf.mxu3 }
 0x262   :  { %8007 = vst [vmem:[#allocation2 + $0x7d8] sm:$0xff] %v2725_v36  ;;  %v14519_v52 = vadd.f32 %v9693_v47, %v2725_v36  ;;  %v2310_v29 = vpop.f32.mrf.mxu1 }
 0x263   :  { %7944 = vst [vmem:[#allocation2 + $0x5e0] sm:$0xff] %v2310_v29  ;;  %11231 = vmatmul.msk.f32.gmra.mxu0 %vm1067_vm0, %v279_v59  ;;  %v9723_v42 = vadd.f32 %v9722_v1, %v2310_v29  ;;  %v282_v59 = vld [vmem:[%s19765_s0 + $0x878] sm:$0xff] }
 0x264   :  { %11295 = vmatmul.msk.f32.gmra.mxu2 %vm1067_vm0, %v343_v32  ;;  %v346_v32 = vld [vmem:[%s19765_s0 + $0xa78] sm:$0xff] }
 0x265   :  { %11263 = vmatmul.msk.f32.gmra.mxu1 %vm1067_vm0, %v311_v9 }
 0x266   :  { %11327 = vmatmul.msk.f32.gmra.mxu3 %vm1067_vm0, %v375_v56  ;;  %v314_v56 = vld [vmem:[%s19765_s0 + $0x978] sm:$0xff] }
 0x267   :  { %v2519_v33 = vpop.f32.mrf.mxu2 }
 0x268   :  { %7976 = vst [vmem:[#allocation2 + $0x6e0] sm:$0xff] %v2519_v33  ;;  %v9724_v4 = vadd.f32 %v9723_v42, %v2519_v33  ;;  %v2104_v5 = vpop.f32.mrf.mxu0  ;;  %v378_v42 = vld [vmem:[%s19765_s0 + $0xb78] sm:$0xff] }
 0x269   :  { %7913 = vst [vmem:[#allocation2 + $0x4e8] sm:$0xff] %v2104_v5  ;;  %v9753_v12 = vadd.f32 %v13938_v51, %v2104_v5  ;;  %v2728_v48 = vpop.f32.mrf.mxu3 }
 0x26a   :  { %8008 = vst [vmem:[#allocation2 + $0x7e0] sm:$0xff] %v2728_v48  ;;  %v14538_v2 = vadd.f32 %v9724_v4, %v2728_v48  ;;  %v2313_v44 = vpop.f32.mrf.mxu1 }
 0x26b   :  { %7945 = vst [vmem:[#allocation2 + $0x5e8] sm:$0xff] %v2313_v44  ;;  %11232 = vmatmul.msk.f32.gmra.mxu0 %vm1067_vm0, %v280_v17  ;;  %v9754_v61 = vadd.f32 %v9753_v12, %v2313_v44  ;;  %v283_v17 = vld [vmem:[%s19765_s0 + $0x880] sm:$0xff] }
 0x26c   :  { %11296 = vmatmul.msk.f32.gmra.mxu2 %vm1067_vm0, %v344_v43  ;;  %v347_v43 = vld [vmem:[%s19765_s0 + $0xa80] sm:$0xff] }
 0x26d   :  { %11264 = vmatmul.msk.f32.gmra.mxu1 %vm1067_vm0, %v312_v25 }
 0x26e   :  { %11328 = vmatmul.msk.f32.gmra.mxu3 %vm1067_vm0, %v376_v7  ;;  %v315_v7 = vld [vmem:[%s19765_s0 + $0x980] sm:$0xff] }
 0x26f   :  { %v2522_v51 = vpop.f32.mrf.mxu2 }
 0x270   :  { %7977 = vst [vmem:[#allocation2 + $0x6e8] sm:$0xff] %v2522_v51  ;;  %v9755_v27 = vadd.f32 %v9754_v61, %v2522_v51  ;;  %v2107_v28 = vpop.f32.mrf.mxu0  ;;  %v379_v61 = vld [vmem:[%s19765_s0 + $0xb80] sm:$0xff] }
 0x271   :  { %7914 = vst [vmem:[#allocation2 + $0x4f0] sm:$0xff] %v2107_v28  ;;  %v9784_v24 = vadd.f32 %v13956_v6, %v2107_v28  ;;  %v2731_v39 = vpop.f32.mrf.mxu3 }
 0x272   :  { %8009 = vst [vmem:[#allocation2 + $0x7e8] sm:$0xff] %v2731_v39  ;;  %v14557_v15 = vadd.f32 %v9755_v27, %v2731_v39  ;;  %v2316_v58 = vpop.f32.mrf.mxu1 }
 0x273   :  { %7946 = vst [vmem:[#allocation2 + $0x5f0] sm:$0xff] %v2316_v58  ;;  %11233 = vmatmul.msk.f32.gmra.mxu0 %vm1067_vm0, %v281_v21  ;;  %v9785_v14 = vadd.f32 %v9784_v24, %v2316_v58  ;;  %v284_v21 = vld [vmem:[%s19765_s0 + $0x888] sm:$0xff] }
 0x274   :  { %11297 = vmatmul.msk.f32.gmra.mxu2 %vm1067_vm0, %v345_v54  ;;  %v348_v54 = vld [vmem:[%s19765_s0 + $0xa88] sm:$0xff] }
 0x275   :  { %11265 = vmatmul.msk.f32.gmra.mxu1 %vm1067_vm0, %v313_v40 }
 0x276   :  { %11329 = vmatmul.msk.f32.gmra.mxu3 %vm1067_vm0, %v377_v26  ;;  %v316_v26 = vld [vmem:[%s19765_s0 + $0x988] sm:$0xff] }
 0x277   :  { %v2525_v6 = vpop.f32.mrf.mxu2 }
 0x278   :  { %7978 = vst [vmem:[#allocation2 + $0x6f0] sm:$0xff] %v2525_v6  ;;  %v9786_v47 = vadd.f32 %v9785_v14, %v2525_v6  ;;  %v2110_v49 = vpop.f32.mrf.mxu0  ;;  %v380_v14 = vld [vmem:[%s19765_s0 + $0xb88] sm:$0xff] }
 0x279   :  { %7915 = vst [vmem:[#allocation2 + $0x4f8] sm:$0xff] %v2110_v49  ;;  %v9815_v1 = vadd.f32 %v13975_v30, %v2110_v49  ;;  %v2734_v36 = vpop.f32.mrf.mxu3 }
 0x27a   :  { %8010 = vst [vmem:[#allocation2 + $0x7f0] sm:$0xff] %v2734_v36  ;;  %v14576_v29 = vadd.f32 %v9786_v47, %v2734_v36  ;;  %v2319_v9 = vpop.f32.mrf.mxu1 }
 0x27b   :  { %7947 = vst [vmem:[#allocation2 + $0x5f8] sm:$0xff] %v2319_v9  ;;  %11234 = vmatmul.msk.f32.gmra.mxu0 %vm1067_vm0, %v282_v59  ;;  %v9816_v33 = vadd.f32 %v9815_v1, %v2319_v9  ;;  %v285_v59 = vld [vmem:[%s19765_s0 + $0x890] sm:$0xff] }
 0x27c   :  { %11298 = vmatmul.msk.f32.gmra.mxu2 %vm1067_vm0, %v346_v32  ;;  %v349_v32 = vld [vmem:[%s19765_s0 + $0xa90] sm:$0xff] }
 0x27d   :  { %11266 = vmatmul.msk.f32.gmra.mxu1 %vm1067_vm0, %v314_v56 }
 0x27e   :  { %11330 = vmatmul.msk.f32.gmra.mxu3 %vm1067_vm0, %v378_v42  ;;  %v317_v42 = vld [vmem:[%s19765_s0 + $0x990] sm:$0xff] }
 0x27f   :  { %v2528_v30 = vpop.f32.mrf.mxu2 }
 0x280   :  { %7979 = vst [vmem:[#allocation2 + $0x6f8] sm:$0xff] %v2528_v30  ;;  %v9817_v4 = vadd.f32 %v9816_v33, %v2528_v30  ;;  %v2853_v5 = vpop.f32.mrf.mxu0  ;;  %v381_v33 = vld [vmem:[%s19765_s0 + $0xb90] sm:$0xff] }
 0x281   :  { %v2737_v12 = vpop.f32.mrf.mxu3  ;;  %8012 = vst [vmem:[#allocation2 + $0x800] sm:$0xff] %v2853_v5  ;;  %v8858_v48 = vadd.f32 %v13994_v50, %v2853_v5 }
 0x282   :  { %8011 = vst [vmem:[#allocation2 + $0x7f8] sm:$0xff] %v2737_v12  ;;  %v14595_v44 = vadd.f32 %v9817_v4, %v2737_v12  ;;  %v3062_v25 = vpop.f32.mrf.mxu1 }
 0x283   :  { %8044 = vst [vmem:[#allocation2 + $0x900] sm:$0xff] %v3062_v25  ;;  %11235 = vmatmul.msk.f32.gmra.mxu0 %vm1067_vm0, %v283_v17  ;;  %v8859_v51 = vadd.f32 %v8858_v48, %v3062_v25  ;;  %v286_v17 = vld [vmem:[%s19765_s0 + $0x898] sm:$0xff] }
 0x284   :  { %11299 = vmatmul.msk.f32.gmra.mxu2 %vm1067_vm0, %v347_v43  ;;  %v350_v43 = vld [vmem:[%s19765_s0 + $0xa98] sm:$0xff] }
 0x285   :  { %11267 = vmatmul.msk.f32.gmra.mxu1 %vm1067_vm0, %v315_v7 }
 0x286   :  { %11331 = vmatmul.msk.f32.gmra.mxu3 %vm1067_vm0, %v379_v61  ;;  %v318_v61 = vld [vmem:[%s19765_s0 + $0x998] sm:$0xff] }
 0x287   :  { %v3271_v50 = vpop.f32.mrf.mxu2 }
 0x288   :  { %8076 = vst [vmem:[#allocation2 + $0xa00] sm:$0xff] %v3271_v50  ;;  %v8860_v27 = vadd.f32 %v8859_v51, %v3271_v50  ;;  %v2856_v28 = vpop.f32.mrf.mxu0  ;;  %v382_v51 = vld [vmem:[%s19765_s0 + $0xb98] sm:$0xff] }
 0x289   :  { %8013 = vst [vmem:[#allocation2 + $0x808] sm:$0xff] %v2856_v28  ;;  %v8889_v24 = vadd.f32 %v14013_v10, %v2856_v28  ;;  %v3480_v39 = vpop.f32.mrf.mxu3 }
 0x28a   :  { %8108 = vst [vmem:[#allocation2 + $0xb00] sm:$0xff] %v3480_v39  ;;  %v14614_v58 = vadd.f32 %v8860_v27, %v3480_v39  ;;  %v3065_v40 = vpop.f32.mrf.mxu1 }
 0x28b   :  { %8045 = vst [vmem:[#allocation2 + $0x908] sm:$0xff] %v3065_v40  ;;  %11236 = vmatmul.msk.f32.gmra.mxu0 %vm1067_vm0, %v284_v21  ;;  %v8890_v6 = vadd.f32 %v8889_v24, %v3065_v40  ;;  %v287_v21 = vld [vmem:[%s19765_s0 + $0x8a0] sm:$0xff] }
 0x28c   :  { %11300 = vmatmul.msk.f32.gmra.mxu2 %vm1067_vm0, %v348_v54  ;;  %v351_v54 = vld [vmem:[%s19765_s0 + $0xaa0] sm:$0xff] }
 0x28d   :  { %11268 = vmatmul.msk.f32.gmra.mxu1 %vm1067_vm0, %v316_v26 }
 0x28e   :  { %11332 = vmatmul.msk.f32.gmra.mxu3 %vm1067_vm0, %v380_v14  ;;  %v319_v14 = vld [vmem:[%s19765_s0 + $0x9a0] sm:$0xff] }
 0x28f   :  { %v3274_v10 = vpop.f32.mrf.mxu2 }
 0x290   :  { %8077 = vst [vmem:[#allocation2 + $0xa08] sm:$0xff] %v3274_v10  ;;  %v8891_v47 = vadd.f32 %v8890_v6, %v3274_v10  ;;  %v2859_v49 = vpop.f32.mrf.mxu0  ;;  %v383_v6 = vld [vmem:[%s19765_s0 + $0xba0] sm:$0xff] }
 0x291   :  { %8014 = vst [vmem:[#allocation2 + $0x810] sm:$0xff] %v2859_v49  ;;  %v8920_v1 = vadd.f32 %v14032_v31, %v2859_v49  ;;  %v3483_v36 = vpop.f32.mrf.mxu3 }
 0x292   :  { %8109 = vst [vmem:[#allocation2 + $0xb08] sm:$0xff] %v3483_v36  ;;  %v14633_v9 = vadd.f32 %v8891_v47, %v3483_v36  ;;  %v3068_v56 = vpop.f32.mrf.mxu1 }
 0x293   :  { %8046 = vst [vmem:[#allocation2 + $0x910] sm:$0xff] %v3068_v56  ;;  %11237 = vmatmul.msk.f32.gmra.mxu0 %vm1067_vm0, %v285_v59  ;;  %v8921_v30 = vadd.f32 %v8920_v1, %v3068_v56  ;;  %v288_v59 = vld [vmem:[%s19765_s0 + $0x8a8] sm:$0xff] }
 0x294   :  { %11301 = vmatmul.msk.f32.gmra.mxu2 %vm1067_vm0, %v349_v32  ;;  %v352_v32 = vld [vmem:[%s19765_s0 + $0xaa8] sm:$0xff] }
 0x295   :  { %11269 = vmatmul.msk.f32.gmra.mxu1 %vm1067_vm0, %v317_v42 }
 0x296   :  { %11333 = vmatmul.msk.f32.gmra.mxu3 %vm1067_vm0, %v381_v33  ;;  %v320_v33 = vld [vmem:[%s19765_s0 + $0x9a8] sm:$0xff] }
 0x297   :  { %v3277_v31 = vpop.f32.mrf.mxu2 }
 0x298   :  { %8078 = vst [vmem:[#allocation2 + $0xa10] sm:$0xff] %v3277_v31  ;;  %v8922_v4 = vadd.f32 %v8921_v30, %v3277_v31  ;;  %v2862_v5 = vpop.f32.mrf.mxu0  ;;  %v384_v30 = vld [vmem:[%s19765_s0 + $0xba8] sm:$0xff] }
 0x299   :  { %8015 = vst [vmem:[#allocation2 + $0x818] sm:$0xff] %v2862_v5  ;;  %v8951_v12 = vadd.f32 %v14051_v53, %v2862_v5  ;;  %v3486_v48 = vpop.f32.mrf.mxu3 }
 0x29a   :  { %8110 = vst [vmem:[#allocation2 + $0xb10] sm:$0xff] %v3486_v48  ;;  %v14652_v25 = vadd.f32 %v8922_v4, %v3486_v48  ;;  %v3071_v7 = vpop.f32.mrf.mxu1 }
 0x29b   :  { %8047 = vst [vmem:[#allocation2 + $0x918] sm:$0xff] %v3071_v7  ;;  %11238 = vmatmul.msk.f32.gmra.mxu0 %vm1067_vm0, %v286_v17  ;;  %v8952_v50 = vadd.f32 %v8951_v12, %v3071_v7  ;;  %v289_v17 = vld [vmem:[%s19765_s0 + $0x8b0] sm:$0xff] }
 0x29c   :  { %11302 = vmatmul.msk.f32.gmra.mxu2 %vm1067_vm0, %v350_v43  ;;  %v353_v43 = vld [vmem:[%s19765_s0 + $0xab0] sm:$0xff] }
 0x29d   :  { %11270 = vmatmul.msk.f32.gmra.mxu1 %vm1067_vm0, %v318_v61 }
 0x29e   :  { %11334 = vmatmul.msk.f32.gmra.mxu3 %vm1067_vm0, %v382_v51  ;;  %v321_v51 = vld [vmem:[%s19765_s0 + $0x9b0] sm:$0xff] }
 0x29f   :  { %v3280_v53 = vpop.f32.mrf.mxu2 }
 0x2a0   :  { %8079 = vst [vmem:[#allocation2 + $0xa18] sm:$0xff] %v3280_v53  ;;  %v8953_v27 = vadd.f32 %v8952_v50, %v3280_v53  ;;  %v2865_v28 = vpop.f32.mrf.mxu0  ;;  %v385_v50 = vld [vmem:[%s19765_s0 + $0xbb0] sm:$0xff] }
 0x2a1   :  { %8016 = vst [vmem:[#allocation2 + $0x820] sm:$0xff] %v2865_v28  ;;  %v8982_v24 = vadd.f32 %v14070_v11, %v2865_v28  ;;  %v3489_v39 = vpop.f32.mrf.mxu3 }
 0x2a2   :  { %8111 = vst [vmem:[#allocation2 + $0xb18] sm:$0xff] %v3489_v39  ;;  %v14671_v40 = vadd.f32 %v8953_v27, %v3489_v39  ;;  %v3074_v26 = vpop.f32.mrf.mxu1 }
 0x2a3   :  { %8048 = vst [vmem:[#allocation2 + $0x920] sm:$0xff] %v3074_v26  ;;  %11239 = vmatmul.msk.f32.gmra.mxu0 %vm1067_vm0, %v287_v21  ;;  %v8983_v10 = vadd.f32 %v8982_v24, %v3074_v26  ;;  %v290_v21 = vld [vmem:[%s19765_s0 + $0x8b8] sm:$0xff] }
 0x2a4   :  { %11303 = vmatmul.msk.f32.gmra.mxu2 %vm1067_vm0, %v351_v54  ;;  %v354_v54 = vld [vmem:[%s19765_s0 + $0xab8] sm:$0xff] }
 0x2a5   :  { %11271 = vmatmul.msk.f32.gmra.mxu1 %vm1067_vm0, %v319_v14 }
 0x2a6   :  { %11335 = vmatmul.msk.f32.gmra.mxu3 %vm1067_vm0, %v383_v6  ;;  %v322_v6 = vld [vmem:[%s19765_s0 + $0x9b8] sm:$0xff] }
 0x2a7   :  { %v3283_v11 = vpop.f32.mrf.mxu2 }
 0x2a8   :  { %8080 = vst [vmem:[#allocation2 + $0xa20] sm:$0xff] %v3283_v11  ;;  %v8984_v47 = vadd.f32 %v8983_v10, %v3283_v11  ;;  %v2868_v49 = vpop.f32.mrf.mxu0  ;;  %v386_v10 = vld [vmem:[%s19765_s0 + $0xbb8] sm:$0xff] }
 0x2a9   :  { %8017 = vst [vmem:[#allocation2 + $0x828] sm:$0xff] %v2868_v49  ;;  %v9013_v1 = vadd.f32 %v14089_v34, %v2868_v49  ;;  %v3492_v36 = vpop.f32.mrf.mxu3 }
 0x2aa   :  { %8112 = vst [vmem:[#allocation2 + $0xb20] sm:$0xff] %v3492_v36  ;;  %v14690_v56 = vadd.f32 %v8984_v47, %v3492_v36  ;;  %v3077_v42 = vpop.f32.mrf.mxu1 }
 0x2ab   :  { %8049 = vst [vmem:[#allocation2 + $0x928] sm:$0xff] %v3077_v42  ;;  %11240 = vmatmul.msk.f32.gmra.mxu0 %vm1067_vm0, %v288_v59  ;;  %v9014_v31 = vadd.f32 %v9013_v1, %v3077_v42  ;;  %v291_v59 = vld [vmem:[%s19765_s0 + $0x8c0] sm:$0xff] }
 0x2ac   :  { %11304 = vmatmul.msk.f32.gmra.mxu2 %vm1067_vm0, %v352_v32  ;;  %v355_v32 = vld [vmem:[%s19765_s0 + $0xac0] sm:$0xff] }
 0x2ad   :  { %11272 = vmatmul.msk.f32.gmra.mxu1 %vm1067_vm0, %v320_v33 }
 0x2ae   :  { %11336 = vmatmul.msk.f32.gmra.mxu3 %vm1067_vm0, %v384_v30  ;;  %v323_v30 = vld [vmem:[%s19765_s0 + $0x9c0] sm:$0xff] }
 0x2af   :  { %v3286_v34 = vpop.f32.mrf.mxu2 }
 0x2b0   :  { %8081 = vst [vmem:[#allocation2 + $0xa28] sm:$0xff] %v3286_v34  ;;  %v9015_v4 = vadd.f32 %v9014_v31, %v3286_v34  ;;  %v2871_v5 = vpop.f32.mrf.mxu0  ;;  %v387_v31 = vld [vmem:[%s19765_s0 + $0xbc0] sm:$0xff] }
 0x2b1   :  { %8018 = vst [vmem:[#allocation2 + $0x830] sm:$0xff] %v2871_v5  ;;  %v9044_v12 = vadd.f32 %v14108_v55, %v2871_v5  ;;  %v3495_v48 = vpop.f32.mrf.mxu3 }
 0x2b2   :  { %8113 = vst [vmem:[#allocation2 + $0xb28] sm:$0xff] %v3495_v48  ;;  %v14709_v7 = vadd.f32 %v9015_v4, %v3495_v48  ;;  %v3080_v61 = vpop.f32.mrf.mxu1 }
 0x2b3   :  { %8050 = vst [vmem:[#allocation2 + $0x930] sm:$0xff] %v3080_v61  ;;  %11241 = vmatmul.msk.f32.gmra.mxu0 %vm1067_vm0, %v289_v17  ;;  %v9045_v53 = vadd.f32 %v9044_v12, %v3080_v61  ;;  %v292_v17 = vld [vmem:[%s19765_s0 + $0x8c8] sm:$0xff] }
 0x2b4   :  { %11305 = vmatmul.msk.f32.gmra.mxu2 %vm1067_vm0, %v353_v43  ;;  %v356_v43 = vld [vmem:[%s19765_s0 + $0xac8] sm:$0xff] }
 0x2b5   :  { %11273 = vmatmul.msk.f32.gmra.mxu1 %vm1067_vm0, %v321_v51 }
 0x2b6   :  { %11337 = vmatmul.msk.f32.gmra.mxu3 %vm1067_vm0, %v385_v50  ;;  %v324_v50 = vld [vmem:[%s19765_s0 + $0x9c8] sm:$0xff] }
 0x2b7   :  { %v3289_v55 = vpop.f32.mrf.mxu2 }
 0x2b8   :  { %8082 = vst [vmem:[#allocation2 + $0xa30] sm:$0xff] %v3289_v55  ;;  %v9046_v27 = vadd.f32 %v9045_v53, %v3289_v55  ;;  %v2874_v28 = vpop.f32.mrf.mxu0  ;;  %v388_v53 = vld [vmem:[%s19765_s0 + $0xbc8] sm:$0xff] }
 0x2b9   :  { %8019 = vst [vmem:[#allocation2 + $0x838] sm:$0xff] %v2874_v28  ;;  %v9075_v24 = vadd.f32 %v14127_v13, %v2874_v28  ;;  %v3498_v39 = vpop.f32.mrf.mxu3 }
 0x2ba   :  { %8114 = vst [vmem:[#allocation2 + $0xb30] sm:$0xff] %v3498_v39  ;;  %v14728_v26 = vadd.f32 %v9046_v27, %v3498_v39  ;;  %v3083_v14 = vpop.f32.mrf.mxu1 }
 0x2bb   :  { %8051 = vst [vmem:[#allocation2 + $0x938] sm:$0xff] %v3083_v14  ;;  %11242 = vmatmul.msk.f32.gmra.mxu0 %vm1067_vm0, %v290_v21  ;;  %v9076_v11 = vadd.f32 %v9075_v24, %v3083_v14  ;;  %v293_v21 = vld [vmem:[%s19765_s0 + $0x8d0] sm:$0xff] }
 0x2bc   :  { %11306 = vmatmul.msk.f32.gmra.mxu2 %vm1067_vm0, %v354_v54  ;;  %v357_v54 = vld [vmem:[%s19765_s0 + $0xad0] sm:$0xff] }
 0x2bd   :  { %11274 = vmatmul.msk.f32.gmra.mxu1 %vm1067_vm0, %v322_v6 }
 0x2be   :  { %11338 = vmatmul.msk.f32.gmra.mxu3 %vm1067_vm0, %v386_v10  ;;  %v325_v10 = vld [vmem:[%s19765_s0 + $0x9d0] sm:$0xff] }
 0x2bf   :  { %v3292_v13 = vpop.f32.mrf.mxu2 }
 0x2c0   :  { %8083 = vst [vmem:[#allocation2 + $0xa38] sm:$0xff] %v3292_v13  ;;  %v9077_v47 = vadd.f32 %v9076_v11, %v3292_v13  ;;  %v2877_v49 = vpop.f32.mrf.mxu0  ;;  %v389_v11 = vld [vmem:[%s19765_s0 + $0xbd0] sm:$0xff] }
 0x2c1   :  { %8020 = vst [vmem:[#allocation2 + $0x840] sm:$0xff] %v2877_v49  ;;  %v9106_v1 = vadd.f32 %v14146_v35, %v2877_v49  ;;  %v3501_v36 = vpop.f32.mrf.mxu3 }
 0x2c2   :  { %8115 = vst [vmem:[#allocation2 + $0xb38] sm:$0xff] %v3501_v36  ;;  %v14747_v42 = vadd.f32 %v9077_v47, %v3501_v36  ;;  %v3086_v33 = vpop.f32.mrf.mxu1 }
 0x2c3   :  { %8052 = vst [vmem:[#allocation2 + $0x940] sm:$0xff] %v3086_v33  ;;  %11243 = vmatmul.msk.f32.gmra.mxu0 %vm1067_vm0, %v291_v59  ;;  %v9107_v34 = vadd.f32 %v9106_v1, %v3086_v33  ;;  %v294_v59 = vld [vmem:[%s19765_s0 + $0x8d8] sm:$0xff] }
 0x2c4   :  { %11307 = vmatmul.msk.f32.gmra.mxu2 %vm1067_vm0, %v355_v32  ;;  %v358_v32 = vld [vmem:[%s19765_s0 + $0xad8] sm:$0xff] }
 0x2c5   :  { %11275 = vmatmul.msk.f32.gmra.mxu1 %vm1067_vm0, %v323_v30 }
 0x2c6   :  { %11339 = vmatmul.msk.f32.gmra.mxu3 %vm1067_vm0, %v387_v31  ;;  %v326_v31 = vld [vmem:[%s19765_s0 + $0x9d8] sm:$0xff] }
 0x2c7   :  { %v3295_v35 = vpop.f32.mrf.mxu2 }
 0x2c8   :  { %8084 = vst [vmem:[#allocation2 + $0xa40] sm:$0xff] %v3295_v35  ;;  %v9108_v4 = vadd.f32 %v9107_v34, %v3295_v35  ;;  %v2880_v5 = vpop.f32.mrf.mxu0  ;;  %v390_v34 = vld [vmem:[%s19765_s0 + $0xbd8] sm:$0xff] }
 0x2c9   :  { %8021 = vst [vmem:[#allocation2 + $0x848] sm:$0xff] %v2880_v5  ;;  %v9137_v12 = vadd.f32 %v14165_v57, %v2880_v5  ;;  %v3504_v48 = vpop.f32.mrf.mxu3 }
 0x2ca   :  { %8116 = vst [vmem:[#allocation2 + $0xb40] sm:$0xff] %v3504_v48  ;;  %v14766_v61 = vadd.f32 %v9108_v4, %v3504_v48  ;;  %v3089_v51 = vpop.f32.mrf.mxu1 }
 0x2cb   :  { %8053 = vst [vmem:[#allocation2 + $0x948] sm:$0xff] %v3089_v51  ;;  %11244 = vmatmul.msk.f32.gmra.mxu0 %vm1067_vm0, %v292_v17  ;;  %v9138_v55 = vadd.f32 %v9137_v12, %v3089_v51  ;;  %v295_v17 = vld [vmem:[%s19765_s0 + $0x8e0] sm:$0xff] }
 0x2cc   :  { %11308 = vmatmul.msk.f32.gmra.mxu2 %vm1067_vm0, %v356_v43  ;;  %v359_v43 = vld [vmem:[%s19765_s0 + $0xae0] sm:$0xff] }
 0x2cd   :  { %11276 = vmatmul.msk.f32.gmra.mxu1 %vm1067_vm0, %v324_v50 }
 0x2ce   :  { %11340 = vmatmul.msk.f32.gmra.mxu3 %vm1067_vm0, %v388_v53  ;;  %v327_v53 = vld [vmem:[%s19765_s0 + $0x9e0] sm:$0xff] }
 0x2cf   :  { %v3298_v57 = vpop.f32.mrf.mxu2 }
 0x2d0   :  { %8085 = vst [vmem:[#allocation2 + $0xa48] sm:$0xff] %v3298_v57  ;;  %v9139_v27 = vadd.f32 %v9138_v55, %v3298_v57  ;;  %v2883_v28 = vpop.f32.mrf.mxu0  ;;  %v391_v55 = vld [vmem:[%s19765_s0 + $0xbe0] sm:$0xff] }
 0x2d1   :  { %8022 = vst [vmem:[#allocation2 + $0x850] sm:$0xff] %v2883_v28  ;;  %v9168_v24 = vadd.f32 %v14184_v16, %v2883_v28  ;;  %v3507_v39 = vpop.f32.mrf.mxu3  ;;  %v1051_v28 = vld [vmem:[%s19763_s1 + $0x80] sm:$0xff] }
 0x2d2   :  { %8117 = vst [vmem:[#allocation2 + $0xb48] sm:$0xff] %v3507_v39  ;;  %v14785_v14 = vadd.f32 %v9139_v27, %v3507_v39  ;;  %v3092_v6 = vpop.f32.mrf.mxu1  ;;  %4523 = vmatpush.msra.mxu0 %v1051_v28  ;;  %v330_v28 = vld [vmem:[%s19765_s0 + $0x9f8] sm:$0xff] }
 0x2d3   :  { %8054 = vst [vmem:[#allocation2 + $0x950] sm:$0xff] %v3092_v6  ;;  %11245 = vmatmul.msk.f32.gmra.mxu0 %vm1067_vm0, %v293_v21  ;;  %v9169_v13 = vadd.f32 %v9168_v24, %v3092_v6  ;;  %v1054_v21 = vld [vmem:[%s19763_s1 + $0x98] sm:$0xff]  ;;  %v1052_v24 = vld [vmem:[%s19763_s1 + $0x88] sm:$0xff] }
 0x2d4   :  { %11309 = vmatmul.msk.f32.gmra.mxu2 %vm1067_vm0, %v357_v54  ;;  %5150 = vmatpush.msra.mxu3 %v1054_v21  ;;  %v296_v6 = vld [vmem:[%s19765_s0 + $0x8e8] sm:$0xff]  ;;  %v394_v21 = vld [vmem:[%s19765_s0 + $0xbf8] sm:$0xff] }
 0x2d5   :  { %11277 = vmatmul.msk.f32.gmra.mxu1 %vm1067_vm0, %v325_v10  ;;  %v360_v10 = vld [vmem:[%s19765_s0 + $0xae8] sm:$0xff] }
 0x2d6   :  { %11341 = vmatmul.msk.f32.gmra.mxu3 %vm1067_vm0, %v389_v11  ;;  %4732 = vmatpush.msra.mxu1 %v1052_v24 }
 0x2d7   :  { %v3301_v16 = vpop.f32.mrf.mxu2 }
 0x2d8   :  { %8086 = vst [vmem:[#allocation2 + $0xa50] sm:$0xff] %v3301_v16  ;;  %v9170_v47 = vadd.f32 %v9169_v13, %v3301_v16  ;;  %v2886_v49 = vpop.f32.mrf.mxu0 }
 0x2d9   :  { %8023 = vst [vmem:[#allocation2 + $0x858] sm:$0xff] %v2886_v49  ;;  %v9199_v1 = vadd.f32 %v14203_v37, %v2886_v49  ;;  %v3510_v36 = vpop.f32.mrf.mxu3  ;;  %v328_v49 = vld [vmem:[%s19765_s0 + $0x9e8] sm:$0xff] }
 0x2da   :  { %8118 = vst [vmem:[#allocation2 + $0xb50] sm:$0xff] %v3510_v36  ;;  %v14804_v33 = vadd.f32 %v9170_v47, %v3510_v36  ;;  %v3095_v30 = vpop.f32.mrf.mxu1 }
 0x2db   :  { %8055 = vst [vmem:[#allocation2 + $0x958] sm:$0xff] %v3095_v30  ;;  %11246 = vmatmul.msk.f32.gmra.mxu0 %vm1067_vm0, %v294_v59  ;;  %v9200_v35 = vadd.f32 %v9199_v1, %v3095_v30  ;;  %v392_v59 = vld [vmem:[%s19765_s0 + $0xbe8] sm:$0xff]  ;;  %v297_v30 = vld [vmem:[%s19765_s0 + $0x8f0] sm:$0xff] }
 0x2dc   :  { %11310 = vmatmul.msk.f32.gmra.mxu2 %vm1067_vm0, %v358_v32 }
 0x2dd   :  { %11278 = vmatmul.msk.f32.gmra.mxu1 %vm1067_vm0, %v326_v31  ;;  %v361_v31 = vld [vmem:[%s19765_s0 + $0xaf0] sm:$0xff] }
 0x2de   :  { %11342 = vmatmul.msk.f32.gmra.mxu3 %vm1067_vm0, %v390_v34 }
 0x2df   :  { %v3304_v37 = vpop.f32.mrf.mxu2 }
 0x2e0   :  { %8087 = vst [vmem:[#allocation2 + $0xa58] sm:$0xff] %v3304_v37  ;;  %v9201_v4 = vadd.f32 %v9200_v35, %v3304_v37  ;;  %v2889_v5 = vpop.f32.mrf.mxu0 }
 0x2e1   :  { %8024 = vst [vmem:[#allocation2 + $0x860] sm:$0xff] %v2889_v5  ;;  %v9230_v12 = vadd.f32 %v14234_v8, %v2889_v5  ;;  %v3513_v48 = vpop.f32.mrf.mxu3  ;;  %v1053_v8 = vld [vmem:[%s19763_s1 + $0x90] sm:$0xff] }
 0x2e2   :  { %8119 = vst [vmem:[#allocation2 + $0xb58] sm:$0xff] %v3513_v48  ;;  %v14823_v51 = vadd.f32 %v9201_v4, %v3513_v48  ;;  %v3098_v50 = vpop.f32.mrf.mxu1  ;;  %4941 = vmatpush.msra.mxu2 %v1053_v8  ;;  %v329_v5 = vld [vmem:[%s19765_s0 + $0x9f0] sm:$0xff] }
 0x2e3   :  { %8056 = vst [vmem:[#allocation2 + $0x960] sm:$0xff] %v3098_v50  ;;  %11247 = vmatmul.msk.f32.gmra.mxu0 %vm1067_vm0, %v295_v17  ;;  %v9231_v57 = vadd.f32 %v9230_v12, %v3098_v50  ;;  %v393_v17 = vld [vmem:[%s19765_s0 + $0xbf0] sm:$0xff]  ;;  %v298_v50 = vld [vmem:[%s19765_s0 + $0x8f8] sm:$0xff] }
 0x2e4   :  { %11311 = vmatmul.msk.f32.gmra.mxu2 %vm1067_vm0, %v359_v43 }
 0x2e5   :  { %11279 = vmatmul.msk.f32.gmra.mxu1 %vm1067_vm0, %v327_v53  ;;  %v362_v53 = vld [vmem:[%s19765_s0 + $0xaf8] sm:$0xff] }
 0x2e6   :  { %11343 = vmatmul.msk.f32.gmra.mxu3 %vm1067_vm0, %v391_v55 }
 0x2e7   :  { %v3307_v27 = vpop.f32.mrf.mxu2 }
 0x2e8   :  { %8088 = vst [vmem:[#allocation2 + $0xa60] sm:$0xff] %v3307_v27  ;;  %v9232_v54 = vadd.f32 %v9231_v57, %v3307_v27  ;;  %v2892_v39 = vpop.f32.mrf.mxu0 }
 0x2e9   :  { %8025 = vst [vmem:[#allocation2 + $0x868] sm:$0xff] %v2892_v39  ;;  %v9261_v11 = vadd.f32 %v14253_v20, %v2892_v39  ;;  %v3516_v13 = vpop.f32.mrf.mxu3 }
 0x2ea   :  { %8120 = vst [vmem:[#allocation2 + $0xb60] sm:$0xff] %v3516_v13  ;;  %v14854_v16 = vadd.f32 %v9232_v54, %v3516_v13  ;;  %v3101_v47 = vpop.f32.mrf.mxu1 }
 0x2eb   :  { %8057 = vst [vmem:[#allocation2 + $0x968] sm:$0xff] %v3101_v47  ;;  %11248 = vmatmul.msk.f32.gmra.mxu0 %vm1067_vm0, %v296_v6  ;;  %v9262_v32 = vadd.f32 %v9261_v11, %v3101_v47  ;;  %v395_v6 = vld [vmem:[%s19765_s0 + $0xc00] sm:$0xff] }
 0x2ec   :  { %11312 = vmatmul.msk.f32.gmra.mxu2 %vm1067_vm0, %v360_v10  ;;  %v459_v10 = vld [vmem:[%s19765_s0 + $0xe00] sm:$0xff] }
 0x2ed   :  { %11280 = vmatmul.msk.f32.gmra.mxu1 %vm1067_vm0, %v328_v49 }
 0x2ee   :  { %11344 = vmatmul.msk.f32.gmra.mxu3 %vm1067_vm0, %v392_v59  ;;  %v427_v59 = vld [vmem:[%s19765_s0 + $0xd00] sm:$0xff] }
 0x2ef   :  { %v3310_v20 = vpop.f32.mrf.mxu2 }
 0x2f0   :  { %8089 = vst [vmem:[#allocation2 + $0xa68] sm:$0xff] %v3310_v20  ;;  %v9263_v1 = vadd.f32 %v9262_v32, %v3310_v20  ;;  %v2895_v36 = vpop.f32.mrf.mxu0  ;;  %v491_v32 = vld [vmem:[%s19765_s0 + $0xf00] sm:$0xff] }
 0x2f1   :  { %8026 = vst [vmem:[#allocation2 + $0x870] sm:$0xff] %v2895_v36  ;;  %v9292_v34 = vadd.f32 %v14272_v60, %v2895_v36  ;;  %v3519_v35 = vpop.f32.mrf.mxu3 }
 0x2f2   :  { %8121 = vst [vmem:[#allocation2 + $0xb68] sm:$0xff] %v3519_v35  ;;  %v14873_v37 = vadd.f32 %v9263_v1, %v3519_v35  ;;  %v3104_v4 = vpop.f32.mrf.mxu1 }
 0x2f3   :  { %8058 = vst [vmem:[#allocation2 + $0x970] sm:$0xff] %v3104_v4  ;;  %11249 = vmatmul.msk.f32.gmra.mxu0 %vm1067_vm0, %v297_v30  ;;  %v9293_v43 = vadd.f32 %v9292_v34, %v3104_v4  ;;  %v396_v30 = vld [vmem:[%s19765_s0 + $0xc08] sm:$0xff] }
 0x2f4   :  { %11313 = vmatmul.msk.f32.gmra.mxu2 %vm1067_vm0, %v361_v31  ;;  %v460_v31 = vld [vmem:[%s19765_s0 + $0xe08] sm:$0xff] }
 0x2f5   :  { %11281 = vmatmul.msk.f32.gmra.mxu1 %vm1067_vm0, %v329_v5 }
 0x2f6   :  { %11345 = vmatmul.msk.f32.gmra.mxu3 %vm1067_vm0, %v393_v17  ;;  %v428_v17 = vld [vmem:[%s19765_s0 + $0xd08] sm:$0xff] }
 0x2f7   :  { %v3313_v60 = vpop.f32.mrf.mxu2 }
 0x2f8   :  { %8090 = vst [vmem:[#allocation2 + $0xa70] sm:$0xff] %v3313_v60  ;;  %v9294_v12 = vadd.f32 %v9293_v43, %v3313_v60  ;;  %v2898_v48 = vpop.f32.mrf.mxu0  ;;  %v492_v43 = vld [vmem:[%s19765_s0 + $0xf08] sm:$0xff] }
 0x2f9   :  { %8027 = vst [vmem:[#allocation2 + $0x878] sm:$0xff] %v2898_v48  ;;  %v9323_v55 = vadd.f32 %v14291_v62, %v2898_v48  ;;  %v3522_v8 = vpop.f32.mrf.mxu3 }
 0x2fa   :  { %8122 = vst [vmem:[#allocation2 + $0xb70] sm:$0xff] %v3522_v8  ;;  %v14892_v57 = vadd.f32 %v9294_v12, %v3522_v8  ;;  %v3107_v27 = vpop.f32.mrf.mxu1 }
 0x2fb   :  { %8059 = vst [vmem:[#allocation2 + $0x978] sm:$0xff] %v3107_v27  ;;  %11250 = vmatmul.msk.f32.gmra.mxu0 %vm1067_vm0, %v298_v50  ;;  %v9324_v54 = vadd.f32 %v9323_v55, %v3107_v27  ;;  %v397_v50 = vld [vmem:[%s19765_s0 + $0xc10] sm:$0xff] }
 0x2fc   :  { %11314 = vmatmul.msk.f32.gmra.mxu2 %vm1067_vm0, %v362_v53  ;;  %v461_v53 = vld [vmem:[%s19765_s0 + $0xe10] sm:$0xff] }
 0x2fd   :  { %11282 = vmatmul.msk.f32.gmra.mxu1 %vm1067_vm0, %v330_v28 }
 0x2fe   :  { %11346 = vmatmul.msk.f32.gmra.mxu3 %vm1067_vm0, %v394_v21  ;;  %v429_v21 = vld [vmem:[%s19765_s0 + $0xd10] sm:$0xff] }
 0x2ff   :  { %v3316_v62 = vpop.f32.mrf.mxu2 }
 0x300   :  { %8091 = vst [vmem:[#allocation2 + $0xa78] sm:$0xff] %v3316_v62  ;;  %v9325_v24 = vadd.f32 %v9324_v54, %v3316_v62  ;;  %v2901_v39 = vpop.f32.mrf.mxu0  ;;  %v493_v54 = vld [vmem:[%s19765_s0 + $0xf10] sm:$0xff] }
 0x301   :  { %8028 = vst [vmem:[#allocation2 + $0x880] sm:$0xff] %v2901_v39  ;;  %v9354_v11 = vadd.f32 %v14310_v18, %v2901_v39  ;;  %v3525_v13 = vpop.f32.mrf.mxu3 }
 0x302   :  { %8123 = vst [vmem:[#allocation2 + $0xb78] sm:$0xff] %v3525_v13  ;;  %v14911_v47 = vadd.f32 %v9325_v24, %v3525_v13  ;;  %v3110_v49 = vpop.f32.mrf.mxu1 }
 0x303   :  { %8060 = vst [vmem:[#allocation2 + $0x980] sm:$0xff] %v3110_v49  ;;  %11347 = vmatmul.msk.f32.vlgmr.msrb.gmra.mxu0 %vm1067_vm0, %v395_v6  ;;  %v9355_v20 = vadd.f32 %v9354_v11, %v3110_v49  ;;  %v398_v6 = vld [vmem:[%s19765_s0 + $0xc18] sm:$0xff] }
 0x304   :  { %11411 = vmatmul.msk.f32.vlgmr.msrb.gmra.mxu2 %vm1067_vm0, %v459_v10  ;;  %v462_v10 = vld [vmem:[%s19765_s0 + $0xe18] sm:$0xff] }
 0x305   :  { %11379 = vmatmul.msk.f32.vlgmr.msrb.gmra.mxu1 %vm1067_vm0, %v427_v59 }
 0x306   :  { %11443 = vmatmul.msk.f32.vlgmr.msrb.gmra.mxu3 %vm1067_vm0, %v491_v32  ;;  %v430_v32 = vld [vmem:[%s19765_s0 + $0xd18] sm:$0xff] }
 0x307   :  { %v3319_v18 = vpop.f32.mrf.mxu2 }
 0x308   :  { %8092 = vst [vmem:[#allocation2 + $0xa80] sm:$0xff] %v3319_v18  ;;  %v9356_v1 = vadd.f32 %v9355_v20, %v3319_v18  ;;  %v2904_v36 = vpop.f32.mrf.mxu0  ;;  %v494_v20 = vld [vmem:[%s19765_s0 + $0xf18] sm:$0xff] }
 0x309   :  { %8029 = vst [vmem:[#allocation2 + $0x888] sm:$0xff] %v2904_v36  ;;  %v9385_v34 = vadd.f32 %v14329_v38, %v2904_v36  ;;  %v3528_v35 = vpop.f32.mrf.mxu3 }
 0x30a   :  { %8124 = vst [vmem:[#allocation2 + $0xb80] sm:$0xff] %v3528_v35  ;;  %v14930_v4 = vadd.f32 %v9356_v1, %v3528_v35  ;;  %v3113_v5 = vpop.f32.mrf.mxu1 }
 0x30b   :  { %8061 = vst [vmem:[#allocation2 + $0x988] sm:$0xff] %v3113_v5  ;;  %11348 = vmatmul.msk.f32.gmra.mxu0 %vm1067_vm0, %v396_v30  ;;  %v9386_v60 = vadd.f32 %v9385_v34, %v3113_v5  ;;  %v399_v30 = vld [vmem:[%s19765_s0 + $0xc20] sm:$0xff] }
 0x30c   :  { %11412 = vmatmul.msk.f32.gmra.mxu2 %vm1067_vm0, %v460_v31  ;;  %v463_v31 = vld [vmem:[%s19765_s0 + $0xe20] sm:$0xff] }
 0x30d   :  { %11380 = vmatmul.msk.f32.gmra.mxu1 %vm1067_vm0, %v428_v17 }
 0x30e   :  { %11444 = vmatmul.msk.f32.gmra.mxu3 %vm1067_vm0, %v492_v43  ;;  %v431_v43 = vld [vmem:[%s19765_s0 + $0xd20] sm:$0xff] }
 0x30f   :  { %v3322_v38 = vpop.f32.mrf.mxu2 }
 0x310   :  { %8093 = vst [vmem:[#allocation2 + $0xa88] sm:$0xff] %v3322_v38  ;;  %v9387_v12 = vadd.f32 %v9386_v60, %v3322_v38  ;;  %v2907_v48 = vpop.f32.mrf.mxu0  ;;  %v495_v60 = vld [vmem:[%s19765_s0 + $0xf20] sm:$0xff] }
 0x311   :  { %8030 = vst [vmem:[#allocation2 + $0x890] sm:$0xff] %v2907_v48  ;;  %v9416_v55 = vadd.f32 %v14348_v63, %v2907_v48  ;;  %v3531_v8 = vpop.f32.mrf.mxu3 }
 0x312   :  { %8125 = vst [vmem:[#allocation2 + $0xb88] sm:$0xff] %v3531_v8  ;;  %v14949_v27 = vadd.f32 %v9387_v12, %v3531_v8  ;;  %v3116_v28 = vpop.f32.mrf.mxu1 }
 0x313   :  { %8062 = vst [vmem:[#allocation2 + $0x990] sm:$0xff] %v3116_v28  ;;  %11349 = vmatmul.msk.f32.gmra.mxu0 %vm1067_vm0, %v397_v50  ;;  %v9417_v62 = vadd.f32 %v9416_v55, %v3116_v28  ;;  %v400_v50 = vld [vmem:[%s19765_s0 + $0xc28] sm:$0xff] }
 0x314   :  { %11413 = vmatmul.msk.f32.gmra.mxu2 %vm1067_vm0, %v461_v53  ;;  %v464_v53 = vld [vmem:[%s19765_s0 + $0xe28] sm:$0xff] }
 0x315   :  { %11381 = vmatmul.msk.f32.gmra.mxu1 %vm1067_vm0, %v429_v21 }
 0x316   :  { %11445 = vmatmul.msk.f32.gmra.mxu3 %vm1067_vm0, %v493_v54  ;;  %v432_v54 = vld [vmem:[%s19765_s0 + $0xd28] sm:$0xff] }
 0x317   :  { %v3325_v63 = vpop.f32.mrf.mxu2 }
 0x318   :  { %8094 = vst [vmem:[#allocation2 + $0xa90] sm:$0xff] %v3325_v63  ;;  %v9418_v24 = vadd.f32 %v9417_v62, %v3325_v63  ;;  %v2910_v39 = vpop.f32.mrf.mxu0  ;;  %v496_v62 = vld [vmem:[%s19765_s0 + $0xf28] sm:$0xff] }
 0x319   :  { %8031 = vst [vmem:[#allocation2 + $0x898] sm:$0xff] %v2910_v39  ;;  %v9447_v11 = vadd.f32 %v14367_v19, %v2910_v39  ;;  %v3534_v13 = vpop.f32.mrf.mxu3 }
 0x31a   :  { %8126 = vst [vmem:[#allocation2 + $0xb90] sm:$0xff] %v3534_v13  ;;  %v14968_v49 = vadd.f32 %v9418_v24, %v3534_v13  ;;  %v3119_v59 = vpop.f32.mrf.mxu1 }
 0x31b   :  { %8063 = vst [vmem:[#allocation2 + $0x998] sm:$0xff] %v3119_v59  ;;  %11350 = vmatmul.msk.f32.gmra.mxu0 %vm1067_vm0, %v398_v6  ;;  %v9448_v18 = vadd.f32 %v9447_v11, %v3119_v59  ;;  %v401_v6 = vld [vmem:[%s19765_s0 + $0xc30] sm:$0xff] }
 0x31c   :  { %11414 = vmatmul.msk.f32.gmra.mxu2 %vm1067_vm0, %v462_v10  ;;  %v465_v10 = vld [vmem:[%s19765_s0 + $0xe30] sm:$0xff] }
 0x31d   :  { %11382 = vmatmul.msk.f32.gmra.mxu1 %vm1067_vm0, %v430_v32 }
 0x31e   :  { %11446 = vmatmul.msk.f32.gmra.mxu3 %vm1067_vm0, %v494_v20  ;;  %v433_v20 = vld [vmem:[%s19765_s0 + $0xd30] sm:$0xff] }
 0x31f   :  { %v3328_v19 = vpop.f32.mrf.mxu2 }
 0x320   :  { %8095 = vst [vmem:[#allocation2 + $0xa98] sm:$0xff] %v3328_v19  ;;  %v9449_v1 = vadd.f32 %v9448_v18, %v3328_v19  ;;  %v2913_v36 = vpop.f32.mrf.mxu0  ;;  %v497_v18 = vld [vmem:[%s19765_s0 + $0xf30] sm:$0xff] }
 0x321   :  { %8032 = vst [vmem:[#allocation2 + $0x8a0] sm:$0xff] %v2913_v36  ;;  %v9478_v34 = vadd.f32 %v14386_v41, %v2913_v36  ;;  %v3537_v35 = vpop.f32.mrf.mxu3 }
 0x322   :  { %8127 = vst [vmem:[#allocation2 + $0xb98] sm:$0xff] %v3537_v35  ;;  %v14987_v5 = vadd.f32 %v9449_v1, %v3537_v35  ;;  %v3122_v17 = vpop.f32.mrf.mxu1 }
 0x323   :  { %8064 = vst [vmem:[#allocation2 + $0x9a0] sm:$0xff] %v3122_v17  ;;  %11351 = vmatmul.msk.f32.gmra.mxu0 %vm1067_vm0, %v399_v30  ;;  %v9479_v38 = vadd.f32 %v9478_v34, %v3122_v17  ;;  %v402_v30 = vld [vmem:[%s19765_s0 + $0xc38] sm:$0xff] }
 0x324   :  { %11415 = vmatmul.msk.f32.gmra.mxu2 %vm1067_vm0, %v463_v31  ;;  %v466_v31 = vld [vmem:[%s19765_s0 + $0xe38] sm:$0xff] }
 0x325   :  { %11383 = vmatmul.msk.f32.gmra.mxu1 %vm1067_vm0, %v431_v43 }
 0x326   :  { %11447 = vmatmul.msk.f32.gmra.mxu3 %vm1067_vm0, %v495_v60  ;;  %v434_v60 = vld [vmem:[%s19765_s0 + $0xd38] sm:$0xff] }
 0x327   :  { %v3331_v41 = vpop.f32.mrf.mxu2 }
 0x328   :  { %8096 = vst [vmem:[#allocation2 + $0xaa0] sm:$0xff] %v3331_v41  ;;  %v9480_v12 = vadd.f32 %v9479_v38, %v3331_v41  ;;  %v2916_v48 = vpop.f32.mrf.mxu0  ;;  %v498_v38 = vld [vmem:[%s19765_s0 + $0xf38] sm:$0xff] }
 0x329   :  { %8033 = vst [vmem:[#allocation2 + $0x8a8] sm:$0xff] %v2916_v48  ;;  %v9509_v55 = vadd.f32 %v14405_v0, %v2916_v48  ;;  %v3540_v8 = vpop.f32.mrf.mxu3 }
 0x32a   :  { %8128 = vst [vmem:[#allocation2 + $0xba0] sm:$0xff] %v3540_v8  ;;  %v15006_v28 = vadd.f32 %v9480_v12, %v3540_v8  ;;  %v3125_v21 = vpop.f32.mrf.mxu1 }
 0x32b   :  { %8065 = vst [vmem:[#allocation2 + $0x9a8] sm:$0xff] %v3125_v21  ;;  %11352 = vmatmul.msk.f32.gmra.mxu0 %vm1067_vm0, %v400_v50  ;;  %v9510_v63 = vadd.f32 %v9509_v55, %v3125_v21  ;;  %v403_v50 = vld [vmem:[%s19765_s0 + $0xc40] sm:$0xff] }
 0x32c   :  { %11416 = vmatmul.msk.f32.gmra.mxu2 %vm1067_vm0, %v464_v53  ;;  %v467_v53 = vld [vmem:[%s19765_s0 + $0xe40] sm:$0xff] }
 0x32d   :  { %11384 = vmatmul.msk.f32.gmra.mxu1 %vm1067_vm0, %v432_v54 }
 0x32e   :  { %11448 = vmatmul.msk.f32.gmra.mxu3 %vm1067_vm0, %v496_v62  ;;  %v435_v62 = vld [vmem:[%s19765_s0 + $0xd40] sm:$0xff] }
 0x32f   :  { %v3334_v0 = vpop.f32.mrf.mxu2 }
 0x330   :  { %8097 = vst [vmem:[#allocation2 + $0xaa8] sm:$0xff] %v3334_v0  ;;  %v9511_v24 = vadd.f32 %v9510_v63, %v3334_v0  ;;  %v2919_v39 = vpop.f32.mrf.mxu0  ;;  %v499_v63 = vld [vmem:[%s19765_s0 + $0xf40] sm:$0xff] }
 0x331   :  { %8034 = vst [vmem:[#allocation2 + $0x8b0] sm:$0xff] %v2919_v39  ;;  %v9540_v11 = vadd.f32 %v14424_v22, %v2919_v39  ;;  %v3543_v13 = vpop.f32.mrf.mxu3 }
 0x332   :  { %8129 = vst [vmem:[#allocation2 + $0xba8] sm:$0xff] %v3543_v13  ;;  %v15025_v59 = vadd.f32 %v9511_v24, %v3543_v13  ;;  %v3128_v32 = vpop.f32.mrf.mxu1 }
 0x333   :  { %8066 = vst [vmem:[#allocation2 + $0x9b0] sm:$0xff] %v3128_v32  ;;  %11353 = vmatmul.msk.f32.gmra.mxu0 %vm1067_vm0, %v401_v6  ;;  %v9541_v19 = vadd.f32 %v9540_v11, %v3128_v32  ;;  %v404_v6 = vld [vmem:[%s19765_s0 + $0xc48] sm:$0xff] }
 0x334   :  { %11417 = vmatmul.msk.f32.gmra.mxu2 %vm1067_vm0, %v465_v10  ;;  %v468_v10 = vld [vmem:[%s19765_s0 + $0xe48] sm:$0xff] }
 0x335   :  { %11385 = vmatmul.msk.f32.gmra.mxu1 %vm1067_vm0, %v433_v20 }
 0x336   :  { %11449 = vmatmul.msk.f32.gmra.mxu3 %vm1067_vm0, %v497_v18  ;;  %v436_v18 = vld [vmem:[%s19765_s0 + $0xd48] sm:$0xff] }
 0x337   :  { %v3337_v22 = vpop.f32.mrf.mxu2 }
 0x338   :  { %8098 = vst [vmem:[#allocation2 + $0xab0] sm:$0xff] %v3337_v22  ;;  %v9542_v1 = vadd.f32 %v9541_v19, %v3337_v22  ;;  %v2922_v36 = vpop.f32.mrf.mxu0  ;;  %v500_v19 = vld [vmem:[%s19765_s0 + $0xf48] sm:$0xff] }
 0x339   :  { %8035 = vst [vmem:[#allocation2 + $0x8b8] sm:$0xff] %v2922_v36  ;;  %v9571_v34 = vadd.f32 %v14443_v45, %v2922_v36  ;;  %v3546_v35 = vpop.f32.mrf.mxu3 }
 0x33a   :  { %8130 = vst [vmem:[#allocation2 + $0xbb0] sm:$0xff] %v3546_v35  ;;  %v15044_v17 = vadd.f32 %v9542_v1, %v3546_v35  ;;  %v3131_v43 = vpop.f32.mrf.mxu1 }
 0x33b   :  { %8067 = vst [vmem:[#allocation2 + $0x9b8] sm:$0xff] %v3131_v43  ;;  %11354 = vmatmul.msk.f32.gmra.mxu0 %vm1067_vm0, %v402_v30  ;;  %v9572_v41 = vadd.f32 %v9571_v34, %v3131_v43  ;;  %v405_v30 = vld [vmem:[%s19765_s0 + $0xc50] sm:$0xff] }
 0x33c   :  { %11418 = vmatmul.msk.f32.gmra.mxu2 %vm1067_vm0, %v466_v31  ;;  %v469_v31 = vld [vmem:[%s19765_s0 + $0xe50] sm:$0xff] }
 0x33d   :  { %11386 = vmatmul.msk.f32.gmra.mxu1 %vm1067_vm0, %v434_v60 }
 0x33e   :  { %11450 = vmatmul.msk.f32.gmra.mxu3 %vm1067_vm0, %v498_v38  ;;  %v437_v38 = vld [vmem:[%s19765_s0 + $0xd50] sm:$0xff] }
 0x33f   :  { %v3340_v45 = vpop.f32.mrf.mxu2 }
 0x340   :  { %8099 = vst [vmem:[#allocation2 + $0xab8] sm:$0xff] %v3340_v45  ;;  %v9573_v12 = vadd.f32 %v9572_v41, %v3340_v45  ;;  %v2925_v48 = vpop.f32.mrf.mxu0  ;;  %v501_v41 = vld [vmem:[%s19765_s0 + $0xf50] sm:$0xff] }
 0x341   :  { %8036 = vst [vmem:[#allocation2 + $0x8c0] sm:$0xff] %v2925_v48  ;;  %v9602_v55 = vadd.f32 %v14462_v3, %v2925_v48  ;;  %v3549_v8 = vpop.f32.mrf.mxu3 }
 0x342   :  { %8131 = vst [vmem:[#allocation2 + $0xbb8] sm:$0xff] %v3549_v8  ;;  %v15063_v21 = vadd.f32 %v9573_v12, %v3549_v8  ;;  %v3134_v54 = vpop.f32.mrf.mxu1 }
 0x343   :  { %8068 = vst [vmem:[#allocation2 + $0x9c0] sm:$0xff] %v3134_v54  ;;  %11355 = vmatmul.msk.f32.gmra.mxu0 %vm1067_vm0, %v403_v50  ;;  %v9603_v0 = vadd.f32 %v9602_v55, %v3134_v54  ;;  %v406_v50 = vld [vmem:[%s19765_s0 + $0xc58] sm:$0xff] }
 0x344   :  { %11419 = vmatmul.msk.f32.gmra.mxu2 %vm1067_vm0, %v467_v53  ;;  %v470_v53 = vld [vmem:[%s19765_s0 + $0xe58] sm:$0xff] }
 0x345   :  { %11387 = vmatmul.msk.f32.gmra.mxu1 %vm1067_vm0, %v435_v62 }
 0x346   :  { %11451 = vmatmul.msk.f32.gmra.mxu3 %vm1067_vm0, %v499_v63  ;;  %v438_v63 = vld [vmem:[%s19765_s0 + $0xd58] sm:$0xff] }
 0x347   :  { %v3343_v3 = vpop.f32.mrf.mxu2 }
 0x348   :  { %8100 = vst [vmem:[#allocation2 + $0xac0] sm:$0xff] %v3343_v3  ;;  %v9604_v24 = vadd.f32 %v9603_v0, %v3343_v3  ;;  %v2928_v39 = vpop.f32.mrf.mxu0  ;;  %v502_v0 = vld [vmem:[%s19765_s0 + $0xf58] sm:$0xff] }
 0x349   :  { %8037 = vst [vmem:[#allocation2 + $0x8c8] sm:$0xff] %v2928_v39  ;;  %v9633_v11 = vadd.f32 %v14481_v23, %v2928_v39  ;;  %v3552_v13 = vpop.f32.mrf.mxu3 }
 0x34a   :  { %8132 = vst [vmem:[#allocation2 + $0xbc0] sm:$0xff] %v3552_v13  ;;  %v15082_v32 = vadd.f32 %v9604_v24, %v3552_v13  ;;  %v3137_v20 = vpop.f32.mrf.mxu1 }
 0x34b   :  { %8069 = vst [vmem:[#allocation2 + $0x9c8] sm:$0xff] %v3137_v20  ;;  %11356 = vmatmul.msk.f32.gmra.mxu0 %vm1067_vm0, %v404_v6  ;;  %v9634_v22 = vadd.f32 %v9633_v11, %v3137_v20  ;;  %v407_v6 = vld [vmem:[%s19765_s0 + $0xc60] sm:$0xff] }
 0x34c   :  { %11420 = vmatmul.msk.f32.gmra.mxu2 %vm1067_vm0, %v468_v10  ;;  %v471_v10 = vld [vmem:[%s19765_s0 + $0xe60] sm:$0xff] }
 0x34d   :  { %11388 = vmatmul.msk.f32.gmra.mxu1 %vm1067_vm0, %v436_v18 }
 0x34e   :  { %11452 = vmatmul.msk.f32.gmra.mxu3 %vm1067_vm0, %v500_v19  ;;  %v439_v19 = vld [vmem:[%s19765_s0 + $0xd60] sm:$0xff] }
 0x34f   :  { %v3346_v23 = vpop.f32.mrf.mxu2 }
 0x350   :  { %8101 = vst [vmem:[#allocation2 + $0xac8] sm:$0xff] %v3346_v23  ;;  %v9635_v1 = vadd.f32 %v9634_v22, %v3346_v23  ;;  %v2931_v36 = vpop.f32.mrf.mxu0  ;;  %v503_v22 = vld [vmem:[%s19765_s0 + $0xf60] sm:$0xff] }
 0x351   :  { %8038 = vst [vmem:[#allocation2 + $0x8d0] sm:$0xff] %v2931_v36  ;;  %v9664_v34 = vadd.f32 %v14500_v46, %v2931_v36  ;;  %v3555_v35 = vpop.f32.mrf.mxu3 }
 0x352   :  { %8133 = vst [vmem:[#allocation2 + $0xbc8] sm:$0xff] %v3555_v35  ;;  %v15101_v43 = vadd.f32 %v9635_v1, %v3555_v35  ;;  %v3140_v60 = vpop.f32.mrf.mxu1 }
 0x353   :  { %8070 = vst [vmem:[#allocation2 + $0x9d0] sm:$0xff] %v3140_v60  ;;  %11357 = vmatmul.msk.f32.gmra.mxu0 %vm1067_vm0, %v405_v30  ;;  %v9665_v45 = vadd.f32 %v9664_v34, %v3140_v60  ;;  %v408_v30 = vld [vmem:[%s19765_s0 + $0xc68] sm:$0xff] }
 0x354   :  { %11421 = vmatmul.msk.f32.gmra.mxu2 %vm1067_vm0, %v469_v31  ;;  %v472_v31 = vld [vmem:[%s19765_s0 + $0xe68] sm:$0xff] }
 0x355   :  { %11389 = vmatmul.msk.f32.gmra.mxu1 %vm1067_vm0, %v437_v38 }
 0x356   :  { %11453 = vmatmul.msk.f32.gmra.mxu3 %vm1067_vm0, %v501_v41  ;;  %v440_v41 = vld [vmem:[%s19765_s0 + $0xd68] sm:$0xff] }
 0x357   :  { %v3349_v46 = vpop.f32.mrf.mxu2 }
 0x358   :  { %8102 = vst [vmem:[#allocation2 + $0xad0] sm:$0xff] %v3349_v46  ;;  %v9666_v12 = vadd.f32 %v9665_v45, %v3349_v46  ;;  %v2934_v48 = vpop.f32.mrf.mxu0  ;;  %v504_v45 = vld [vmem:[%s19765_s0 + $0xf68] sm:$0xff] }
 0x359   :  { %8039 = vst [vmem:[#allocation2 + $0x8d8] sm:$0xff] %v2934_v48  ;;  %v9695_v55 = vadd.f32 %v14519_v52, %v2934_v48  ;;  %v3558_v8 = vpop.f32.mrf.mxu3 }
 0x35a   :  { %8134 = vst [vmem:[#allocation2 + $0xbd0] sm:$0xff] %v3558_v8  ;;  %v15120_v54 = vadd.f32 %v9666_v12, %v3558_v8  ;;  %v3143_v62 = vpop.f32.mrf.mxu1 }
 0x35b   :  { %8071 = vst [vmem:[#allocation2 + $0x9d8] sm:$0xff] %v3143_v62  ;;  %11358 = vmatmul.msk.f32.gmra.mxu0 %vm1067_vm0, %v406_v50  ;;  %v9696_v3 = vadd.f32 %v9695_v55, %v3143_v62  ;;  %v409_v50 = vld [vmem:[%s19765_s0 + $0xc70] sm:$0xff] }
 0x35c   :  { %11422 = vmatmul.msk.f32.gmra.mxu2 %vm1067_vm0, %v470_v53  ;;  %v473_v53 = vld [vmem:[%s19765_s0 + $0xe70] sm:$0xff] }
 0x35d   :  { %11390 = vmatmul.msk.f32.gmra.mxu1 %vm1067_vm0, %v438_v63 }
 0x35e   :  { %11454 = vmatmul.msk.f32.gmra.mxu3 %vm1067_vm0, %v502_v0  ;;  %v441_v0 = vld [vmem:[%s19765_s0 + $0xd70] sm:$0xff] }
 0x35f   :  { %v3352_v52 = vpop.f32.mrf.mxu2 }
 0x360   :  { %8103 = vst [vmem:[#allocation2 + $0xad8] sm:$0xff] %v3352_v52  ;;  %v9697_v24 = vadd.f32 %v9696_v3, %v3352_v52  ;;  %v2937_v39 = vpop.f32.mrf.mxu0  ;;  %v505_v3 = vld [vmem:[%s19765_s0 + $0xf70] sm:$0xff] }
 0x361   :  { %8040 = vst [vmem:[#allocation2 + $0x8e0] sm:$0xff] %v2937_v39  ;;  %v9726_v11 = vadd.f32 %v14538_v2, %v2937_v39  ;;  %v3561_v13 = vpop.f32.mrf.mxu3 }
 0x362   :  { %8135 = vst [vmem:[#allocation2 + $0xbd8] sm:$0xff] %v3561_v13  ;;  %v15139_v20 = vadd.f32 %v9697_v24, %v3561_v13  ;;  %v3146_v18 = vpop.f32.mrf.mxu1 }
 0x363   :  { %8072 = vst [vmem:[#allocation2 + $0x9e0] sm:$0xff] %v3146_v18  ;;  %11359 = vmatmul.msk.f32.gmra.mxu0 %vm1067_vm0, %v407_v6  ;;  %v9727_v23 = vadd.f32 %v9726_v11, %v3146_v18  ;;  %v410_v6 = vld [vmem:[%s19765_s0 + $0xc78] sm:$0xff] }
 0x364   :  { %11423 = vmatmul.msk.f32.gmra.mxu2 %vm1067_vm0, %v471_v10  ;;  %v474_v10 = vld [vmem:[%s19765_s0 + $0xe78] sm:$0xff] }
 0x365   :  { %11391 = vmatmul.msk.f32.gmra.mxu1 %vm1067_vm0, %v439_v19 }
 0x366   :  { %11455 = vmatmul.msk.f32.gmra.mxu3 %vm1067_vm0, %v503_v22  ;;  %v442_v22 = vld [vmem:[%s19765_s0 + $0xd78] sm:$0xff] }
 0x367   :  { %v3355_v2 = vpop.f32.mrf.mxu2 }
 0x368   :  { %8104 = vst [vmem:[#allocation2 + $0xae0] sm:$0xff] %v3355_v2  ;;  %v9728_v1 = vadd.f32 %v9727_v23, %v3355_v2  ;;  %v2940_v36 = vpop.f32.mrf.mxu0  ;;  %v506_v23 = vld [vmem:[%s19765_s0 + $0xf78] sm:$0xff] }
 0x369   :  { %8041 = vst [vmem:[#allocation2 + $0x8e8] sm:$0xff] %v2940_v36  ;;  %v9757_v34 = vadd.f32 %v14557_v15, %v2940_v36  ;;  %v3564_v35 = vpop.f32.mrf.mxu3 }
 0x36a   :  { %8136 = vst [vmem:[#allocation2 + $0xbe0] sm:$0xff] %v3564_v35  ;;  %v15158_v60 = vadd.f32 %v9728_v1, %v3564_v35  ;;  %v3149_v38 = vpop.f32.mrf.mxu1 }
 0x36b   :  { %8073 = vst [vmem:[#allocation2 + $0x9e8] sm:$0xff] %v3149_v38  ;;  %11360 = vmatmul.msk.f32.gmra.mxu0 %vm1067_vm0, %v408_v30  ;;  %v9758_v46 = vadd.f32 %v9757_v34, %v3149_v38  ;;  %v411_v30 = vld [vmem:[%s19765_s0 + $0xc80] sm:$0xff] }
 0x36c   :  { %11424 = vmatmul.msk.f32.gmra.mxu2 %vm1067_vm0, %v472_v31  ;;  %v475_v31 = vld [vmem:[%s19765_s0 + $0xe80] sm:$0xff] }
 0x36d   :  { %11392 = vmatmul.msk.f32.gmra.mxu1 %vm1067_vm0, %v440_v41 }
 0x36e   :  { %11456 = vmatmul.msk.f32.gmra.mxu3 %vm1067_vm0, %v504_v45  ;;  %v443_v45 = vld [vmem:[%s19765_s0 + $0xd80] sm:$0xff] }
 0x36f   :  { %v3358_v15 = vpop.f32.mrf.mxu2 }
 0x370   :  { %8105 = vst [vmem:[#allocation2 + $0xae8] sm:$0xff] %v3358_v15  ;;  %v9759_v12 = vadd.f32 %v9758_v46, %v3358_v15  ;;  %v2943_v48 = vpop.f32.mrf.mxu0  ;;  %v507_v46 = vld [vmem:[%s19765_s0 + $0xf80] sm:$0xff] }
 0x371   :  { %8042 = vst [vmem:[#allocation2 + $0x8f0] sm:$0xff] %v2943_v48  ;;  %v9788_v55 = vadd.f32 %v14576_v29, %v2943_v48  ;;  %v3567_v8 = vpop.f32.mrf.mxu3 }
 0x372   :  { %8137 = vst [vmem:[#allocation2 + $0xbe8] sm:$0xff] %v3567_v8  ;;  %v15177_v62 = vadd.f32 %v9759_v12, %v3567_v8  ;;  %v3152_v63 = vpop.f32.mrf.mxu1 }
 0x373   :  { %8074 = vst [vmem:[#allocation2 + $0x9f0] sm:$0xff] %v3152_v63  ;;  %11361 = vmatmul.msk.f32.gmra.mxu0 %vm1067_vm0, %v409_v50  ;;  %v9789_v52 = vadd.f32 %v9788_v55, %v3152_v63  ;;  %v412_v50 = vld [vmem:[%s19765_s0 + $0xc88] sm:$0xff] }
 0x374   :  { %11425 = vmatmul.msk.f32.gmra.mxu2 %vm1067_vm0, %v473_v53  ;;  %v476_v53 = vld [vmem:[%s19765_s0 + $0xe88] sm:$0xff] }
 0x375   :  { %11393 = vmatmul.msk.f32.gmra.mxu1 %vm1067_vm0, %v441_v0 }
 0x376   :  { %11457 = vmatmul.msk.f32.gmra.mxu3 %vm1067_vm0, %v505_v3  ;;  %v444_v3 = vld [vmem:[%s19765_s0 + $0xd88] sm:$0xff] }
 0x377   :  { %v3361_v29 = vpop.f32.mrf.mxu2 }
 0x378   :  { %8106 = vst [vmem:[#allocation2 + $0xaf0] sm:$0xff] %v3361_v29  ;;  %v9790_v24 = vadd.f32 %v9789_v52, %v3361_v29  ;;  %v2946_v39 = vpop.f32.mrf.mxu0  ;;  %v508_v52 = vld [vmem:[%s19765_s0 + $0xf88] sm:$0xff] }
 0x379   :  { %8043 = vst [vmem:[#allocation2 + $0x8f8] sm:$0xff] %v2946_v39  ;;  %v9819_v11 = vadd.f32 %v14595_v44, %v2946_v39  ;;  %v3570_v13 = vpop.f32.mrf.mxu3 }
 0x37a   :  { %8138 = vst [vmem:[#allocation2 + $0xbf0] sm:$0xff] %v3570_v13  ;;  %v15196_v18 = vadd.f32 %v9790_v24, %v3570_v13  ;;  %v3155_v19 = vpop.f32.mrf.mxu1 }
 0x37b   :  { %8075 = vst [vmem:[#allocation2 + $0x9f8] sm:$0xff] %v3155_v19  ;;  %11362 = vmatmul.msk.f32.gmra.mxu0 %vm1067_vm0, %v410_v6  ;;  %v9820_v2 = vadd.f32 %v9819_v11, %v3155_v19  ;;  %v413_v6 = vld [vmem:[%s19765_s0 + $0xc90] sm:$0xff] }
 0x37c   :  { %11426 = vmatmul.msk.f32.gmra.mxu2 %vm1067_vm0, %v474_v10  ;;  %v477_v10 = vld [vmem:[%s19765_s0 + $0xe90] sm:$0xff] }
 0x37d   :  { %11394 = vmatmul.msk.f32.gmra.mxu1 %vm1067_vm0, %v442_v22 }
 0x37e   :  { %11458 = vmatmul.msk.f32.gmra.mxu3 %vm1067_vm0, %v506_v23  ;;  %v445_v23 = vld [vmem:[%s19765_s0 + $0xd90] sm:$0xff] }
 0x37f   :  { %v3364_v44 = vpop.f32.mrf.mxu2 }
 0x380   :  { %8107 = vst [vmem:[#allocation2 + $0xaf8] sm:$0xff] %v3364_v44  ;;  %v9821_v1 = vadd.f32 %v9820_v2, %v3364_v44  ;;  %v3689_v36 = vpop.f32.mrf.mxu0  ;;  %v509_v2 = vld [vmem:[%s19765_s0 + $0xf90] sm:$0xff] }
 0x381   :  { %v3573_v34 = vpop.f32.mrf.mxu3  ;;  %8140 = vst [vmem:[#allocation2 + $0xc00] sm:$0xff] %v3689_v36  ;;  %v8862_v35 = vadd.f32 %v14614_v58, %v3689_v36 }
 0x382   :  { %8139 = vst [vmem:[#allocation2 + $0xbf8] sm:$0xff] %v3573_v34  ;;  %v15215_v38 = vadd.f32 %v9821_v1, %v3573_v34  ;;  %v3898_v41 = vpop.f32.mrf.mxu1 }
 0x383   :  { %8172 = vst [vmem:[#allocation2 + $0xd00] sm:$0xff] %v3898_v41  ;;  %11363 = vmatmul.msk.f32.gmra.mxu0 %vm1067_vm0, %v411_v30  ;;  %v8863_v15 = vadd.f32 %v8862_v35, %v3898_v41  ;;  %v414_v30 = vld [vmem:[%s19765_s0 + $0xc98] sm:$0xff] }
 0x384   :  { %11427 = vmatmul.msk.f32.gmra.mxu2 %vm1067_vm0, %v475_v31  ;;  %v478_v31 = vld [vmem:[%s19765_s0 + $0xe98] sm:$0xff] }
 0x385   :  { %11395 = vmatmul.msk.f32.gmra.mxu1 %vm1067_vm0, %v443_v45 }
 0x386   :  { %11459 = vmatmul.msk.f32.gmra.mxu3 %vm1067_vm0, %v507_v46  ;;  %v446_v46 = vld [vmem:[%s19765_s0 + $0xd98] sm:$0xff] }
 0x387   :  { %v4107_v58 = vpop.f32.mrf.mxu2 }
 0x388   :  { %8204 = vst [vmem:[#allocation2 + $0xe00] sm:$0xff] %v4107_v58  ;;  %v8864_v12 = vadd.f32 %v8863_v15, %v4107_v58  ;;  %v3692_v48 = vpop.f32.mrf.mxu0  ;;  %v510_v15 = vld [vmem:[%s19765_s0 + $0xf98] sm:$0xff] }
 0x389   :  { %8141 = vst [vmem:[#allocation2 + $0xc08] sm:$0xff] %v3692_v48  ;;  %v8893_v55 = vadd.f32 %v14633_v9, %v3692_v48  ;;  %v4316_v8 = vpop.f32.mrf.mxu3 }
 0x38a   :  { %8236 = vst [vmem:[#allocation2 + $0xf00] sm:$0xff] %v4316_v8  ;;  %v15234_v63 = vadd.f32 %v8864_v12, %v4316_v8  ;;  %v3901_v0 = vpop.f32.mrf.mxu1 }
 0x38b   :  { %8173 = vst [vmem:[#allocation2 + $0xd08] sm:$0xff] %v3901_v0  ;;  %11364 = vmatmul.msk.f32.gmra.mxu0 %vm1067_vm0, %v412_v50  ;;  %v8894_v29 = vadd.f32 %v8893_v55, %v3901_v0  ;;  %v415_v50 = vld [vmem:[%s19765_s0 + $0xca0] sm:$0xff] }
 0x38c   :  { %11428 = vmatmul.msk.f32.gmra.mxu2 %vm1067_vm0, %v476_v53  ;;  %v479_v53 = vld [vmem:[%s19765_s0 + $0xea0] sm:$0xff] }
 0x38d   :  { %11396 = vmatmul.msk.f32.gmra.mxu1 %vm1067_vm0, %v444_v3 }
 0x38e   :  { %11460 = vmatmul.msk.f32.gmra.mxu3 %vm1067_vm0, %v508_v52  ;;  %v447_v52 = vld [vmem:[%s19765_s0 + $0xda0] sm:$0xff] }
 0x38f   :  { %v4110_v9 = vpop.f32.mrf.mxu2 }
 0x390   :  { %8205 = vst [vmem:[#allocation2 + $0xe08] sm:$0xff] %v4110_v9  ;;  %v8895_v24 = vadd.f32 %v8894_v29, %v4110_v9  ;;  %v3695_v39 = vpop.f32.mrf.mxu0  ;;  %v511_v29 = vld [vmem:[%s19765_s0 + $0xfa0] sm:$0xff] }
 0x391   :  { %8142 = vst [vmem:[#allocation2 + $0xc10] sm:$0xff] %v3695_v39  ;;  %v8924_v11 = vadd.f32 %v14652_v25, %v3695_v39  ;;  %v4319_v13 = vpop.f32.mrf.mxu3 }
 0x392   :  { %8237 = vst [vmem:[#allocation2 + $0xf08] sm:$0xff] %v4319_v13  ;;  %v15253_v19 = vadd.f32 %v8895_v24, %v4319_v13  ;;  %v3904_v22 = vpop.f32.mrf.mxu1 }
 0x393   :  { %8174 = vst [vmem:[#allocation2 + $0xd10] sm:$0xff] %v3904_v22  ;;  %11365 = vmatmul.msk.f32.gmra.mxu0 %vm1067_vm0, %v413_v6  ;;  %v8925_v44 = vadd.f32 %v8924_v11, %v3904_v22  ;;  %v416_v6 = vld [vmem:[%s19765_s0 + $0xca8] sm:$0xff] }
 0x394   :  { %11429 = vmatmul.msk.f32.gmra.mxu2 %vm1067_vm0, %v477_v10  ;;  %v480_v10 = vld [vmem:[%s19765_s0 + $0xea8] sm:$0xff] }
 0x395   :  { %11397 = vmatmul.msk.f32.gmra.mxu1 %vm1067_vm0, %v445_v23 }
 0x396   :  { %11461 = vmatmul.msk.f32.gmra.mxu3 %vm1067_vm0, %v509_v2  ;;  %v448_v2 = vld [vmem:[%s19765_s0 + $0xda8] sm:$0xff] }
 0x397   :  { %v4113_v25 = vpop.f32.mrf.mxu2 }
 0x398   :  { %8206 = vst [vmem:[#allocation2 + $0xe10] sm:$0xff] %v4113_v25  ;;  %v8926_v1 = vadd.f32 %v8925_v44, %v4113_v25  ;;  %v3698_v36 = vpop.f32.mrf.mxu0  ;;  %v512_v44 = vld [vmem:[%s19765_s0 + $0xfa8] sm:$0xff] }
 0x399   :  { %8143 = vst [vmem:[#allocation2 + $0xc18] sm:$0xff] %v3698_v36  ;;  %v8955_v34 = vadd.f32 %v14671_v40, %v3698_v36  ;;  %v4322_v35 = vpop.f32.mrf.mxu3 }
 0x39a   :  { %8238 = vst [vmem:[#allocation2 + $0xf10] sm:$0xff] %v4322_v35  ;;  %v15272_v41 = vadd.f32 %v8926_v1, %v4322_v35  ;;  %v3907_v45 = vpop.f32.mrf.mxu1 }
 0x39b   :  { %8175 = vst [vmem:[#allocation2 + $0xd18] sm:$0xff] %v3907_v45  ;;  %11366 = vmatmul.msk.f32.gmra.mxu0 %vm1067_vm0, %v414_v30  ;;  %v8956_v58 = vadd.f32 %v8955_v34, %v3907_v45  ;;  %v417_v30 = vld [vmem:[%s19765_s0 + $0xcb0] sm:$0xff] }
 0x39c   :  { %11430 = vmatmul.msk.f32.gmra.mxu2 %vm1067_vm0, %v478_v31  ;;  %v481_v31 = vld [vmem:[%s19765_s0 + $0xeb0] sm:$0xff] }
 0x39d   :  { %11398 = vmatmul.msk.f32.gmra.mxu1 %vm1067_vm0, %v446_v46 }
 0x39e   :  { %11462 = vmatmul.msk.f32.gmra.mxu3 %vm1067_vm0, %v510_v15  ;;  %v449_v15 = vld [vmem:[%s19765_s0 + $0xdb0] sm:$0xff] }
 0x39f   :  { %v4116_v40 = vpop.f32.mrf.mxu2 }
 0x3a0   :  { %8207 = vst [vmem:[#allocation2 + $0xe18] sm:$0xff] %v4116_v40  ;;  %v8957_v12 = vadd.f32 %v8956_v58, %v4116_v40  ;;  %v3701_v48 = vpop.f32.mrf.mxu0  ;;  %v513_v58 = vld [vmem:[%s19765_s0 + $0xfb0] sm:$0xff] }
 0x3a1   :  { %8144 = vst [vmem:[#allocation2 + $0xc20] sm:$0xff] %v3701_v48  ;;  %v8986_v55 = vadd.f32 %v14690_v56, %v3701_v48  ;;  %v4325_v8 = vpop.f32.mrf.mxu3 }
 0x3a2   :  { %8239 = vst [vmem:[#allocation2 + $0xf18] sm:$0xff] %v4325_v8  ;;  %v15291_v0 = vadd.f32 %v8957_v12, %v4325_v8  ;;  %v3910_v3 = vpop.f32.mrf.mxu1 }
 0x3a3   :  { %8176 = vst [vmem:[#allocation2 + $0xd20] sm:$0xff] %v3910_v3  ;;  %11367 = vmatmul.msk.f32.gmra.mxu0 %vm1067_vm0, %v415_v50  ;;  %v8987_v9 = vadd.f32 %v8986_v55, %v3910_v3  ;;  %v418_v50 = vld [vmem:[%s19765_s0 + $0xcb8] sm:$0xff] }
 0x3a4   :  { %11431 = vmatmul.msk.f32.gmra.mxu2 %vm1067_vm0, %v479_v53  ;;  %v482_v53 = vld [vmem:[%s19765_s0 + $0xeb8] sm:$0xff] }
 0x3a5   :  { %11399 = vmatmul.msk.f32.gmra.mxu1 %vm1067_vm0, %v447_v52 }
 0x3a6   :  { %11463 = vmatmul.msk.f32.gmra.mxu3 %vm1067_vm0, %v511_v29  ;;  %v450_v29 = vld [vmem:[%s19765_s0 + $0xdb8] sm:$0xff] }
 0x3a7   :  { %v4119_v56 = vpop.f32.mrf.mxu2 }
 0x3a8   :  { %8208 = vst [vmem:[#allocation2 + $0xe20] sm:$0xff] %v4119_v56  ;;  %v8988_v24 = vadd.f32 %v8987_v9, %v4119_v56  ;;  %v3704_v39 = vpop.f32.mrf.mxu0  ;;  %v514_v9 = vld [vmem:[%s19765_s0 + $0xfb8] sm:$0xff] }
 0x3a9   :  { %8145 = vst [vmem:[#allocation2 + $0xc28] sm:$0xff] %v3704_v39  ;;  %v9017_v11 = vadd.f32 %v14709_v7, %v3704_v39  ;;  %v4328_v13 = vpop.f32.mrf.mxu3 }
 0x3aa   :  { %8240 = vst [vmem:[#allocation2 + $0xf20] sm:$0xff] %v4328_v13  ;;  %v15310_v22 = vadd.f32 %v8988_v24, %v4328_v13  ;;  %v3913_v23 = vpop.f32.mrf.mxu1 }
 0x3ab   :  { %8177 = vst [vmem:[#allocation2 + $0xd28] sm:$0xff] %v3913_v23  ;;  %11368 = vmatmul.msk.f32.gmra.mxu0 %vm1067_vm0, %v416_v6  ;;  %v9018_v25 = vadd.f32 %v9017_v11, %v3913_v23  ;;  %v419_v6 = vld [vmem:[%s19765_s0 + $0xcc0] sm:$0xff] }
 0x3ac   :  { %11432 = vmatmul.msk.f32.gmra.mxu2 %vm1067_vm0, %v480_v10  ;;  %v483_v10 = vld [vmem:[%s19765_s0 + $0xec0] sm:$0xff] }
 0x3ad   :  { %11400 = vmatmul.msk.f32.gmra.mxu1 %vm1067_vm0, %v448_v2 }
 0x3ae   :  { %11464 = vmatmul.msk.f32.gmra.mxu3 %vm1067_vm0, %v512_v44  ;;  %v451_v44 = vld [vmem:[%s19765_s0 + $0xdc0] sm:$0xff] }
 0x3af   :  { %v4122_v7 = vpop.f32.mrf.mxu2 }
 0x3b0   :  { %8209 = vst [vmem:[#allocation2 + $0xe28] sm:$0xff] %v4122_v7  ;;  %v9019_v1 = vadd.f32 %v9018_v25, %v4122_v7  ;;  %v3707_v36 = vpop.f32.mrf.mxu0  ;;  %v515_v25 = vld [vmem:[%s19765_s0 + $0xfc0] sm:$0xff] }
 0x3b1   :  { %8146 = vst [vmem:[#allocation2 + $0xc30] sm:$0xff] %v3707_v36  ;;  %v9048_v34 = vadd.f32 %v14728_v26, %v3707_v36  ;;  %v4331_v35 = vpop.f32.mrf.mxu3 }
 0x3b2   :  { %8241 = vst [vmem:[#allocation2 + $0xf28] sm:$0xff] %v4331_v35  ;;  %v15329_v45 = vadd.f32 %v9019_v1, %v4331_v35  ;;  %v3916_v46 = vpop.f32.mrf.mxu1 }
 0x3b3   :  { %8178 = vst [vmem:[#allocation2 + $0xd30] sm:$0xff] %v3916_v46  ;;  %11369 = vmatmul.msk.f32.gmra.mxu0 %vm1067_vm0, %v417_v30  ;;  %v9049_v40 = vadd.f32 %v9048_v34, %v3916_v46  ;;  %v420_v30 = vld [vmem:[%s19765_s0 + $0xcc8] sm:$0xff] }
 0x3b4   :  { %11433 = vmatmul.msk.f32.gmra.mxu2 %vm1067_vm0, %v481_v31  ;;  %v484_v31 = vld [vmem:[%s19765_s0 + $0xec8] sm:$0xff] }
 0x3b5   :  { %11401 = vmatmul.msk.f32.gmra.mxu1 %vm1067_vm0, %v449_v15 }
 0x3b6   :  { %11465 = vmatmul.msk.f32.gmra.mxu3 %vm1067_vm0, %v513_v58  ;;  %v452_v58 = vld [vmem:[%s19765_s0 + $0xdc8] sm:$0xff] }
 0x3b7   :  { %v4125_v26 = vpop.f32.mrf.mxu2 }
 0x3b8   :  { %8210 = vst [vmem:[#allocation2 + $0xe30] sm:$0xff] %v4125_v26  ;;  %v9050_v12 = vadd.f32 %v9049_v40, %v4125_v26  ;;  %v3710_v48 = vpop.f32.mrf.mxu0  ;;  %v516_v40 = vld [vmem:[%s19765_s0 + $0xfc8] sm:$0xff] }
 0x3b9   :  { %8147 = vst [vmem:[#allocation2 + $0xc38] sm:$0xff] %v3710_v48  ;;  %v9079_v55 = vadd.f32 %v14747_v42, %v3710_v48  ;;  %v4334_v8 = vpop.f32.mrf.mxu3 }
 0x3ba   :  { %8242 = vst [vmem:[#allocation2 + $0xf30] sm:$0xff] %v4334_v8  ;;  %v15348_v3 = vadd.f32 %v9050_v12, %v4334_v8  ;;  %v3919_v52 = vpop.f32.mrf.mxu1 }
 0x3bb   :  { %8179 = vst [vmem:[#allocation2 + $0xd38] sm:$0xff] %v3919_v52  ;;  %11370 = vmatmul.msk.f32.gmra.mxu0 %vm1067_vm0, %v418_v50  ;;  %v9080_v56 = vadd.f32 %v9079_v55, %v3919_v52  ;;  %v421_v50 = vld [vmem:[%s19765_s0 + $0xcd0] sm:$0xff] }
 0x3bc   :  { %11434 = vmatmul.msk.f32.gmra.mxu2 %vm1067_vm0, %v482_v53  ;;  %v485_v53 = vld [vmem:[%s19765_s0 + $0xed0] sm:$0xff] }
 0x3bd   :  { %11402 = vmatmul.msk.f32.gmra.mxu1 %vm1067_vm0, %v450_v29 }
 0x3be   :  { %11466 = vmatmul.msk.f32.gmra.mxu3 %vm1067_vm0, %v514_v9  ;;  %v453_v9 = vld [vmem:[%s19765_s0 + $0xdd0] sm:$0xff] }
 0x3bf   :  { %v4128_v42 = vpop.f32.mrf.mxu2 }
 0x3c0   :  { %8211 = vst [vmem:[#allocation2 + $0xe38] sm:$0xff] %v4128_v42  ;;  %v9081_v24 = vadd.f32 %v9080_v56, %v4128_v42  ;;  %v3713_v39 = vpop.f32.mrf.mxu0  ;;  %v517_v56 = vld [vmem:[%s19765_s0 + $0xfd0] sm:$0xff] }
 0x3c1   :  { %8148 = vst [vmem:[#allocation2 + $0xc40] sm:$0xff] %v3713_v39  ;;  %v9110_v11 = vadd.f32 %v14766_v61, %v3713_v39  ;;  %v4337_v13 = vpop.f32.mrf.mxu3 }
 0x3c2   :  { %8243 = vst [vmem:[#allocation2 + $0xf38] sm:$0xff] %v4337_v13  ;;  %v15367_v23 = vadd.f32 %v9081_v24, %v4337_v13  ;;  %v3922_v2 = vpop.f32.mrf.mxu1 }
 0x3c3   :  { %8180 = vst [vmem:[#allocation2 + $0xd40] sm:$0xff] %v3922_v2  ;;  %11371 = vmatmul.msk.f32.gmra.mxu0 %vm1067_vm0, %v419_v6  ;;  %v9111_v7 = vadd.f32 %v9110_v11, %v3922_v2  ;;  %v422_v6 = vld [vmem:[%s19765_s0 + $0xcd8] sm:$0xff] }
 0x3c4   :  { %11435 = vmatmul.msk.f32.gmra.mxu2 %vm1067_vm0, %v483_v10  ;;  %v486_v10 = vld [vmem:[%s19765_s0 + $0xed8] sm:$0xff] }
 0x3c5   :  { %11403 = vmatmul.msk.f32.gmra.mxu1 %vm1067_vm0, %v451_v44 }
 0x3c6   :  { %11467 = vmatmul.msk.f32.gmra.mxu3 %vm1067_vm0, %v515_v25  ;;  %v454_v25 = vld [vmem:[%s19765_s0 + $0xdd8] sm:$0xff] }
 0x3c7   :  { %v4131_v61 = vpop.f32.mrf.mxu2 }
 0x3c8   :  { %8212 = vst [vmem:[#allocation2 + $0xe40] sm:$0xff] %v4131_v61  ;;  %v9112_v1 = vadd.f32 %v9111_v7, %v4131_v61  ;;  %v3716_v36 = vpop.f32.mrf.mxu0  ;;  %v518_v7 = vld [vmem:[%s19765_s0 + $0xfd8] sm:$0xff] }
 0x3c9   :  { %8149 = vst [vmem:[#allocation2 + $0xc48] sm:$0xff] %v3716_v36  ;;  %v9141_v34 = vadd.f32 %v14785_v14, %v3716_v36  ;;  %v4340_v35 = vpop.f32.mrf.mxu3 }
 0x3ca   :  { %8244 = vst [vmem:[#allocation2 + $0xf40] sm:$0xff] %v4340_v35  ;;  %v15386_v46 = vadd.f32 %v9112_v1, %v4340_v35  ;;  %v3925_v15 = vpop.f32.mrf.mxu1 }
 0x3cb   :  { %8181 = vst [vmem:[#allocation2 + $0xd48] sm:$0xff] %v3925_v15  ;;  %11372 = vmatmul.msk.f32.gmra.mxu0 %vm1067_vm0, %v420_v30  ;;  %v9142_v26 = vadd.f32 %v9141_v34, %v3925_v15  ;;  %v423_v30 = vld [vmem:[%s19765_s0 + $0xce0] sm:$0xff] }
 0x3cc   :  { %11436 = vmatmul.msk.f32.gmra.mxu2 %vm1067_vm0, %v484_v31  ;;  %v487_v31 = vld [vmem:[%s19765_s0 + $0xee0] sm:$0xff] }
 0x3cd   :  { %11404 = vmatmul.msk.f32.gmra.mxu1 %vm1067_vm0, %v452_v58 }
 0x3ce   :  { %11468 = vmatmul.msk.f32.gmra.mxu3 %vm1067_vm0, %v516_v40  ;;  %v455_v40 = vld [vmem:[%s19765_s0 + $0xde0] sm:$0xff] }
 0x3cf   :  { %v4134_v14 = vpop.f32.mrf.mxu2 }
 0x3d0   :  { %8213 = vst [vmem:[#allocation2 + $0xe48] sm:$0xff] %v4134_v14  ;;  %v9143_v12 = vadd.f32 %v9142_v26, %v4134_v14  ;;  %v3719_v48 = vpop.f32.mrf.mxu0  ;;  %v519_v26 = vld [vmem:[%s19765_s0 + $0xfe0] sm:$0xff] }
 0x3d1   :  { %8150 = vst [vmem:[#allocation2 + $0xc50] sm:$0xff] %v3719_v48  ;;  %v9172_v55 = vadd.f32 %v14804_v33, %v3719_v48  ;;  %v4343_v8 = vpop.f32.mrf.mxu3  ;;  %v1055_v48 = vld [vmem:[%s19763_s1 + $0xa0] sm:$0xff] }
 0x3d2   :  { %8245 = vst [vmem:[#allocation2 + $0xf48] sm:$0xff] %v4343_v8  ;;  %v15405_v52 = vadd.f32 %v9143_v12, %v4343_v8  ;;  %v3928_v29 = vpop.f32.mrf.mxu1  ;;  %5359 = vmatpush.msrb.mxu0 %v1055_v48  ;;  %v458_v48 = vld [vmem:[%s19765_s0 + $0xdf8] sm:$0xff] }
 0x3d3   :  { %8182 = vst [vmem:[#allocation2 + $0xd50] sm:$0xff] %v3928_v29  ;;  %11373 = vmatmul.msk.f32.gmra.mxu0 %vm1067_vm0, %v421_v50  ;;  %v9173_v42 = vadd.f32 %v9172_v55, %v3928_v29  ;;  %v1058_v50 = vld [vmem:[%s19763_s1 + $0xb8] sm:$0xff]  ;;  %v1056_v55 = vld [vmem:[%s19763_s1 + $0xa8] sm:$0xff] }
 0x3d4   :  { %11437 = vmatmul.msk.f32.gmra.mxu2 %vm1067_vm0, %v485_v53  ;;  %5986 = vmatpush.msrb.mxu3 %v1058_v50  ;;  %v424_v29 = vld [vmem:[%s19765_s0 + $0xce8] sm:$0xff]  ;;  %v522_v50 = vld [vmem:[%s19765_s0 + $0xff8] sm:$0xff] }
 0x3d5   :  { %11405 = vmatmul.msk.f32.gmra.mxu1 %vm1067_vm0, %v453_v9  ;;  %v488_v9 = vld [vmem:[%s19765_s0 + $0xee8] sm:$0xff] }
 0x3d6   :  { %11469 = vmatmul.msk.f32.gmra.mxu3 %vm1067_vm0, %v517_v56  ;;  %5568 = vmatpush.msrb.mxu1 %v1056_v55 }
 0x3d7   :  { %v4137_v33 = vpop.f32.mrf.mxu2 }
 0x3d8   :  { %8214 = vst [vmem:[#allocation2 + $0xe50] sm:$0xff] %v4137_v33  ;;  %v9174_v24 = vadd.f32 %v9173_v42, %v4137_v33  ;;  %v3722_v39 = vpop.f32.mrf.mxu0 }
 0x3d9   :  { %8151 = vst [vmem:[#allocation2 + $0xc58] sm:$0xff] %v3722_v39  ;;  %v9203_v11 = vadd.f32 %v14823_v51, %v3722_v39  ;;  %v4346_v13 = vpop.f32.mrf.mxu3  ;;  %v456_v39 = vld [vmem:[%s19765_s0 + $0xde8] sm:$0xff] }
 0x3da   :  { %8246 = vst [vmem:[#allocation2 + $0xf50] sm:$0xff] %v4346_v13  ;;  %v15424_v2 = vadd.f32 %v9174_v24, %v4346_v13  ;;  %v3931_v44 = vpop.f32.mrf.mxu1 }
 0x3db   :  { %8183 = vst [vmem:[#allocation2 + $0xd58] sm:$0xff] %v3931_v44  ;;  %11374 = vmatmul.msk.f32.gmra.mxu0 %vm1067_vm0, %v422_v6  ;;  %v9204_v61 = vadd.f32 %v9203_v11, %v3931_v44  ;;  %v520_v6 = vld [vmem:[%s19765_s0 + $0xfe8] sm:$0xff]  ;;  %v425_v44 = vld [vmem:[%s19765_s0 + $0xcf0] sm:$0xff] }
 0x3dc   :  { %11438 = vmatmul.msk.f32.gmra.mxu2 %vm1067_vm0, %v486_v10 }
 0x3dd   :  { %11406 = vmatmul.msk.f32.gmra.mxu1 %vm1067_vm0, %v454_v25  ;;  %v489_v25 = vld [vmem:[%s19765_s0 + $0xef0] sm:$0xff] }
 0x3de   :  { %11470 = vmatmul.msk.f32.gmra.mxu3 %vm1067_vm0, %v518_v7 }
 0x3df   :  { %v4140_v51 = vpop.f32.mrf.mxu2 }
 0x3e0   :  { %8215 = vst [vmem:[#allocation2 + $0xe58] sm:$0xff] %v4140_v51  ;;  %v9205_v1 = vadd.f32 %v9204_v61, %v4140_v51  ;;  %v3725_v36 = vpop.f32.mrf.mxu0 }
 0x3e1   :  { %8152 = vst [vmem:[#allocation2 + $0xc60] sm:$0xff] %v3725_v36  ;;  %v9234_v34 = vadd.f32 %v14854_v16, %v3725_v36  ;;  %v4349_v35 = vpop.f32.mrf.mxu3  ;;  %v1057_v16 = vld [vmem:[%s19763_s1 + $0xb0] sm:$0xff] }
 0x3e2   :  { %8247 = vst [vmem:[#allocation2 + $0xf58] sm:$0xff] %v4349_v35  ;;  %v15443_v15 = vadd.f32 %v9205_v1, %v4349_v35  ;;  %v3934_v58 = vpop.f32.mrf.mxu1  ;;  %5777 = vmatpush.msrb.mxu2 %v1057_v16  ;;  %v457_v36 = vld [vmem:[%s19765_s0 + $0xdf0] sm:$0xff] }
 0x3e3   :  { %8184 = vst [vmem:[#allocation2 + $0xd60] sm:$0xff] %v3934_v58  ;;  %11375 = vmatmul.msk.f32.gmra.mxu0 %vm1067_vm0, %v423_v30  ;;  %v9235_v14 = vadd.f32 %v9234_v34, %v3934_v58  ;;  %v521_v30 = vld [vmem:[%s19765_s0 + $0xff0] sm:$0xff]  ;;  %v426_v58 = vld [vmem:[%s19765_s0 + $0xcf8] sm:$0xff] }
 0x3e4   :  { %11439 = vmatmul.msk.f32.gmra.mxu2 %vm1067_vm0, %v487_v31 }
 0x3e5   :  { %11407 = vmatmul.msk.f32.gmra.mxu1 %vm1067_vm0, %v455_v40  ;;  %v490_v40 = vld [vmem:[%s19765_s0 + $0xef8] sm:$0xff] }
 0x3e6   :  { %11471 = vmatmul.msk.f32.gmra.mxu3 %vm1067_vm0, %v519_v26 }
 0x3e7   :  { %v4143_v12 = vpop.f32.mrf.mxu2 }
 0x3e8   :  { %8216 = vst [vmem:[#allocation2 + $0xe60] sm:$0xff] %v4143_v12  ;;  %v9236_v53 = vadd.f32 %v9235_v14, %v4143_v12  ;;  %v3728_v8 = vpop.f32.mrf.mxu0 }
 0x3e9   :  { %8153 = vst [vmem:[#allocation2 + $0xc68] sm:$0xff] %v3728_v8  ;;  %v9265_v56 = vadd.f32 %v14873_v37, %v3728_v8  ;;  %v4352_v42 = vpop.f32.mrf.mxu3 }
 0x3ea   :  { %8248 = vst [vmem:[#allocation2 + $0xf60] sm:$0xff] %v4352_v42  ;;  %v15474_v33 = vadd.f32 %v9236_v53, %v4352_v42  ;;  %v3937_v24 = vpop.f32.mrf.mxu1 }
 0x3eb   :  { %8185 = vst [vmem:[#allocation2 + $0xd68] sm:$0xff] %v3937_v24  ;;  %11376 = vmatmul.msk.f32.gmra.mxu0 %vm1067_vm0, %v424_v29  ;;  %v9266_v10 = vadd.f32 %v9265_v56, %v3937_v24  ;;  %v523_v29 = vld [vmem:[%s19765_s0 + $0x1000] sm:$0xff] }
 0x3ec   :  { %11440 = vmatmul.msk.f32.gmra.mxu2 %vm1067_vm0, %v488_v9  ;;  %v587_v9 = vld [vmem:[%s19765_s0 + $0x1200] sm:$0xff] }
 0x3ed   :  { %11408 = vmatmul.msk.f32.gmra.mxu1 %vm1067_vm0, %v456_v39 }
 0x3ee   :  { %11472 = vmatmul.msk.f32.gmra.mxu3 %vm1067_vm0, %v520_v6  ;;  %v555_v6 = vld [vmem:[%s19765_s0 + $0x1100] sm:$0xff] }
 0x3ef   :  { %v4146_v37 = vpop.f32.mrf.mxu2 }
 0x3f0   :  { %8217 = vst [vmem:[#allocation2 + $0xe68] sm:$0xff] %v4146_v37  ;;  %v9267_v11 = vadd.f32 %v9266_v10, %v4146_v37  ;;  %v3731_v13 = vpop.f32.mrf.mxu0  ;;  %v619_v10 = vld [vmem:[%s19765_s0 + $0x1300] sm:$0xff] }
 0x3f1   :  { %8154 = vst [vmem:[#allocation2 + $0xc70] sm:$0xff] %v3731_v13  ;;  %v9296_v7 = vadd.f32 %v14892_v57, %v3731_v13  ;;  %v4355_v61 = vpop.f32.mrf.mxu3 }
 0x3f2   :  { %8249 = vst [vmem:[#allocation2 + $0xf68] sm:$0xff] %v4355_v61  ;;  %v15493_v51 = vadd.f32 %v9267_v11, %v4355_v61  ;;  %v3940_v1 = vpop.f32.mrf.mxu1 }
 0x3f3   :  { %8186 = vst [vmem:[#allocation2 + $0xd70] sm:$0xff] %v3940_v1  ;;  %11377 = vmatmul.msk.f32.gmra.mxu0 %vm1067_vm0, %v425_v44  ;;  %v9297_v31 = vadd.f32 %v9296_v7, %v3940_v1  ;;  %v524_v44 = vld [vmem:[%s19765_s0 + $0x1008] sm:$0xff] }
 0x3f4   :  { %11441 = vmatmul.msk.f32.gmra.mxu2 %vm1067_vm0, %v489_v25  ;;  %v588_v25 = vld [vmem:[%s19765_s0 + $0x1208] sm:$0xff] }
 0x3f5   :  { %11409 = vmatmul.msk.f32.gmra.mxu1 %vm1067_vm0, %v457_v36 }
 0x3f6   :  { %11473 = vmatmul.msk.f32.gmra.mxu3 %vm1067_vm0, %v521_v30  ;;  %v556_v30 = vld [vmem:[%s19765_s0 + $0x1108] sm:$0xff] }
 0x3f7   :  { %v4149_v57 = vpop.f32.mrf.mxu2 }
 0x3f8   :  { %8218 = vst [vmem:[#allocation2 + $0xe70] sm:$0xff] %v4149_v57  ;;  %v9298_v34 = vadd.f32 %v9297_v31, %v4149_v57  ;;  %v3734_v35 = vpop.f32.mrf.mxu0  ;;  %v620_v31 = vld [vmem:[%s19765_s0 + $0x1308] sm:$0xff] }
 0x3f9   :  { %8155 = vst [vmem:[#allocation2 + $0xc78] sm:$0xff] %v3734_v35  ;;  %v9327_v26 = vadd.f32 %v14911_v47, %v3734_v35  ;;  %v4358_v16 = vpop.f32.mrf.mxu3 }
 0x3fa   :  { %8250 = vst [vmem:[#allocation2 + $0xf70] sm:$0xff] %v4358_v16  ;;  %v15512_v14 = vadd.f32 %v9298_v34, %v4358_v16  ;;  %v3943_v12 = vpop.f32.mrf.mxu1 }
 0x3fb   :  { %8187 = vst [vmem:[#allocation2 + $0xd78] sm:$0xff] %v3943_v12  ;;  %11378 = vmatmul.msk.f32.gmra.mxu0 %vm1067_vm0, %v426_v58  ;;  %v9328_v53 = vadd.f32 %v9327_v26, %v3943_v12  ;;  %v525_v58 = vld [vmem:[%s19765_s0 + $0x1010] sm:$0xff] }
 0x3fc   :  { %11442 = vmatmul.msk.f32.gmra.mxu2 %vm1067_vm0, %v490_v40  ;;  %v589_v40 = vld [vmem:[%s19765_s0 + $0x1210] sm:$0xff] }
 0x3fd   :  { %11410 = vmatmul.msk.f32.gmra.mxu1 %vm1067_vm0, %v458_v48 }
 0x3fe   :  { %11474 = vmatmul.msk.f32.gmra.mxu3 %vm1067_vm0, %v522_v50  ;;  %v557_v50 = vld [vmem:[%s19765_s0 + $0x1110] sm:$0xff] }
 0x3ff   :  { %v4152_v47 = vpop.f32.mrf.mxu2 }
 0x400   :  { %8219 = vst [vmem:[#allocation2 + $0xe78] sm:$0xff] %v4152_v47  ;;  %v9329_v55 = vadd.f32 %v9328_v53, %v4152_v47  ;;  %v3737_v8 = vpop.f32.mrf.mxu0  ;;  %v621_v53 = vld [vmem:[%s19765_s0 + $0x1310] sm:$0xff] }
 0x401   :  { %8156 = vst [vmem:[#allocation2 + $0xc80] sm:$0xff] %v3737_v8  ;;  %v9358_v56 = vadd.f32 %v14930_v4, %v3737_v8  ;;  %v4361_v42 = vpop.f32.mrf.mxu3 }
 0x402   :  { %8251 = vst [vmem:[#allocation2 + $0xf78] sm:$0xff] %v4361_v42  ;;  %v15531_v24 = vadd.f32 %v9329_v55, %v4361_v42  ;;  %v3946_v39 = vpop.f32.mrf.mxu1 }
 0x403   :  { %8188 = vst [vmem:[#allocation2 + $0xd80] sm:$0xff] %v3946_v39  ;;  %11475 = vmatmul.msk.f32.vlgmr.msra.gmra.mxu0 %vm1067_vm0, %v523_v29  ;;  %v9359_v37 = vadd.f32 %v9358_v56, %v3946_v39  ;;  %v526_v29 = vld [vmem:[%s19765_s0 + $0x1018] sm:$0xff] }
 0x404   :  { %11539 = vmatmul.msk.f32.vlgmr.msra.gmra.mxu2 %vm1067_vm0, %v587_v9  ;;  %v590_v9 = vld [vmem:[%s19765_s0 + $0x1218] sm:$0xff] }
 0x405   :  { %11507 = vmatmul.msk.f32.vlgmr.msra.gmra.mxu1 %vm1067_vm0, %v555_v6 }
 0x406   :  { %11571 = vmatmul.msk.f32.vlgmr.msra.gmra.mxu3 %vm1067_vm0, %v619_v10  ;;  %v558_v10 = vld [vmem:[%s19765_s0 + $0x1118] sm:$0xff] }
 0x407   :  { %v4155_v4 = vpop.f32.mrf.mxu2 }
 0x408   :  { %8220 = vst [vmem:[#allocation2 + $0xe80] sm:$0xff] %v4155_v4  ;;  %v9360_v11 = vadd.f32 %v9359_v37, %v4155_v4  ;;  %v3740_v13 = vpop.f32.mrf.mxu0  ;;  %v622_v37 = vld [vmem:[%s19765_s0 + $0x1318] sm:$0xff] }
 0x409   :  { %8157 = vst [vmem:[#allocation2 + $0xc88] sm:$0xff] %v3740_v13  ;;  %v9389_v7 = vadd.f32 %v14949_v27, %v3740_v13  ;;  %v4364_v61 = vpop.f32.mrf.mxu3 }
 0x40a   :  { %8252 = vst [vmem:[#allocation2 + $0xf80] sm:$0xff] %v4364_v61  ;;  %v15550_v1 = vadd.f32 %v9360_v11, %v4364_v61  ;;  %v3949_v36 = vpop.f32.mrf.mxu1 }
 0x40b   :  { %8189 = vst [vmem:[#allocation2 + $0xd88] sm:$0xff] %v3949_v36  ;;  %11476 = vmatmul.msk.f32.gmra.mxu0 %vm1067_vm0, %v524_v44  ;;  %v9390_v57 = vadd.f32 %v9389_v7, %v3949_v36  ;;  %v527_v44 = vld [vmem:[%s19765_s0 + $0x1020] sm:$0xff] }
 0x40c   :  { %11540 = vmatmul.msk.f32.gmra.mxu2 %vm1067_vm0, %v588_v25  ;;  %v591_v25 = vld [vmem:[%s19765_s0 + $0x1220] sm:$0xff] }
 0x40d   :  { %11508 = vmatmul.msk.f32.gmra.mxu1 %vm1067_vm0, %v556_v30 }
 0x40e   :  { %11572 = vmatmul.msk.f32.gmra.mxu3 %vm1067_vm0, %v620_v31  ;;  %v559_v31 = vld [vmem:[%s19765_s0 + $0x1120] sm:$0xff] }
 0x40f   :  { %v4158_v27 = vpop.f32.mrf.mxu2 }
 0x410   :  { %8221 = vst [vmem:[#allocation2 + $0xe88] sm:$0xff] %v4158_v27  ;;  %v9391_v34 = vadd.f32 %v9390_v57, %v4158_v27  ;;  %v3743_v35 = vpop.f32.mrf.mxu0  ;;  %v623_v57 = vld [vmem:[%s19765_s0 + $0x1320] sm:$0xff] }
 0x411   :  { %8158 = vst [vmem:[#allocation2 + $0xc90] sm:$0xff] %v3743_v35  ;;  %v9420_v26 = vadd.f32 %v14968_v49, %v3743_v35  ;;  %v4367_v16 = vpop.f32.mrf.mxu3 }
 0x412   :  { %8253 = vst [vmem:[#allocation2 + $0xf88] sm:$0xff] %v4367_v16  ;;  %v15569_v12 = vadd.f32 %v9391_v34, %v4367_v16  ;;  %v3952_v48 = vpop.f32.mrf.mxu1 }
 0x413   :  { %8190 = vst [vmem:[#allocation2 + $0xd90] sm:$0xff] %v3952_v48  ;;  %11477 = vmatmul.msk.f32.gmra.mxu0 %vm1067_vm0, %v525_v58  ;;  %v9421_v47 = vadd.f32 %v9420_v26, %v3952_v48  ;;  %v528_v58 = vld [vmem:[%s19765_s0 + $0x1028] sm:$0xff] }
 0x414   :  { %11541 = vmatmul.msk.f32.gmra.mxu2 %vm1067_vm0, %v589_v40  ;;  %v592_v40 = vld [vmem:[%s19765_s0 + $0x1228] sm:$0xff] }
 0x415   :  { %11509 = vmatmul.msk.f32.gmra.mxu1 %vm1067_vm0, %v557_v50 }
 0x416   :  { %11573 = vmatmul.msk.f32.gmra.mxu3 %vm1067_vm0, %v621_v53  ;;  %v560_v53 = vld [vmem:[%s19765_s0 + $0x1128] sm:$0xff] }
 0x417   :  { %v4161_v49 = vpop.f32.mrf.mxu2 }
 0x418   :  { %8222 = vst [vmem:[#allocation2 + $0xe90] sm:$0xff] %v4161_v49  ;;  %v9422_v55 = vadd.f32 %v9421_v47, %v4161_v49  ;;  %v3746_v8 = vpop.f32.mrf.mxu0  ;;  %v624_v47 = vld [vmem:[%s19765_s0 + $0x1328] sm:$0xff] }
 0x419   :  { %8159 = vst [vmem:[#allocation2 + $0xc98] sm:$0xff] %v3746_v8  ;;  %v9451_v56 = vadd.f32 %v14987_v5, %v3746_v8  ;;  %v4370_v42 = vpop.f32.mrf.mxu3 }
 0x41a   :  { %8254 = vst [vmem:[#allocation2 + $0xf90] sm:$0xff] %v4370_v42  ;;  %v15588_v39 = vadd.f32 %v9422_v55, %v4370_v42  ;;  %v3955_v6 = vpop.f32.mrf.mxu1 }
 0x41b   :  { %8191 = vst [vmem:[#allocation2 + $0xd98] sm:$0xff] %v3955_v6  ;;  %11478 = vmatmul.msk.f32.gmra.mxu0 %vm1067_vm0, %v526_v29  ;;  %v9452_v4 = vadd.f32 %v9451_v56, %v3955_v6  ;;  %v529_v29 = vld [vmem:[%s19765_s0 + $0x1030] sm:$0xff] }
 0x41c   :  { %11542 = vmatmul.msk.f32.gmra.mxu2 %vm1067_vm0, %v590_v9  ;;  %v593_v9 = vld [vmem:[%s19765_s0 + $0x1230] sm:$0xff] }
 0x41d   :  { %11510 = vmatmul.msk.f32.gmra.mxu1 %vm1067_vm0, %v558_v10 }
 0x41e   :  { %11574 = vmatmul.msk.f32.gmra.mxu3 %vm1067_vm0, %v622_v37  ;;  %v561_v37 = vld [vmem:[%s19765_s0 + $0x1130] sm:$0xff] }
 0x41f   :  { %v4164_v5 = vpop.f32.mrf.mxu2 }
 0x420   :  { %8223 = vst [vmem:[#allocation2 + $0xe98] sm:$0xff] %v4164_v5  ;;  %v9453_v11 = vadd.f32 %v9452_v4, %v4164_v5  ;;  %v3749_v13 = vpop.f32.mrf.mxu0  ;;  %v625_v4 = vld [vmem:[%s19765_s0 + $0x1330] sm:$0xff] }
 0x421   :  { %8160 = vst [vmem:[#allocation2 + $0xca0] sm:$0xff] %v3749_v13  ;;  %v9482_v7 = vadd.f32 %v15006_v28, %v3749_v13  ;;  %v4373_v61 = vpop.f32.mrf.mxu3 }
 0x422   :  { %8255 = vst [vmem:[#allocation2 + $0xf98] sm:$0xff] %v4373_v61  ;;  %v15607_v36 = vadd.f32 %v9453_v11, %v4373_v61  ;;  %v3958_v30 = vpop.f32.mrf.mxu1 }
 0x423   :  { %8192 = vst [vmem:[#allocation2 + $0xda0] sm:$0xff] %v3958_v30  ;;  %11479 = vmatmul.msk.f32.gmra.mxu0 %vm1067_vm0, %v527_v44  ;;  %v9483_v27 = vadd.f32 %v9482_v7, %v3958_v30  ;;  %v530_v44 = vld [vmem:[%s19765_s0 + $0x1038] sm:$0xff] }
 0x424   :  { %11543 = vmatmul.msk.f32.gmra.mxu2 %vm1067_vm0, %v591_v25  ;;  %v594_v25 = vld [vmem:[%s19765_s0 + $0x1238] sm:$0xff] }
 0x425   :  { %11511 = vmatmul.msk.f32.gmra.mxu1 %vm1067_vm0, %v559_v31 }
 0x426   :  { %11575 = vmatmul.msk.f32.gmra.mxu3 %vm1067_vm0, %v623_v57  ;;  %v562_v57 = vld [vmem:[%s19765_s0 + $0x1138] sm:$0xff] }
 0x427   :  { %v4167_v28 = vpop.f32.mrf.mxu2 }
 0x428   :  { %8224 = vst [vmem:[#allocation2 + $0xea0] sm:$0xff] %v4167_v28  ;;  %v9484_v34 = vadd.f32 %v9483_v27, %v4167_v28  ;;  %v3752_v35 = vpop.f32.mrf.mxu0  ;;  %v626_v27 = vld [vmem:[%s19765_s0 + $0x1338] sm:$0xff] }
 0x429   :  { %8161 = vst [vmem:[#allocation2 + $0xca8] sm:$0xff] %v3752_v35  ;;  %v9513_v26 = vadd.f32 %v15025_v59, %v3752_v35  ;;  %v4376_v16 = vpop.f32.mrf.mxu3 }
 0x42a   :  { %8256 = vst [vmem:[#allocation2 + $0xfa0] sm:$0xff] %v4376_v16  ;;  %v15626_v48 = vadd.f32 %v9484_v34, %v4376_v16  ;;  %v3961_v50 = vpop.f32.mrf.mxu1 }
 0x42b   :  { %8193 = vst [vmem:[#allocation2 + $0xda8] sm:$0xff] %v3961_v50  ;;  %11480 = vmatmul.msk.f32.gmra.mxu0 %vm1067_vm0, %v528_v58  ;;  %v9514_v49 = vadd.f32 %v9513_v26, %v3961_v50  ;;  %v531_v58 = vld [vmem:[%s19765_s0 + $0x1040] sm:$0xff] }
 0x42c   :  { %11544 = vmatmul.msk.f32.gmra.mxu2 %vm1067_vm0, %v592_v40  ;;  %v595_v40 = vld [vmem:[%s19765_s0 + $0x1240] sm:$0xff] }
 0x42d   :  { %11512 = vmatmul.msk.f32.gmra.mxu1 %vm1067_vm0, %v560_v53 }
 0x42e   :  { %11576 = vmatmul.msk.f32.gmra.mxu3 %vm1067_vm0, %v624_v47  ;;  %v563_v47 = vld [vmem:[%s19765_s0 + $0x1140] sm:$0xff] }
 0x42f   :  { %v4170_v59 = vpop.f32.mrf.mxu2 }
 0x430   :  { %8225 = vst [vmem:[#allocation2 + $0xea8] sm:$0xff] %v4170_v59  ;;  %v9515_v55 = vadd.f32 %v9514_v49, %v4170_v59  ;;  %v3755_v8 = vpop.f32.mrf.mxu0  ;;  %v627_v49 = vld [vmem:[%s19765_s0 + $0x1340] sm:$0xff] }
 0x431   :  { %8162 = vst [vmem:[#allocation2 + $0xcb0] sm:$0xff] %v3755_v8  ;;  %v9544_v56 = vadd.f32 %v15044_v17, %v3755_v8  ;;  %v4379_v42 = vpop.f32.mrf.mxu3 }
 0x432   :  { %8257 = vst [vmem:[#allocation2 + $0xfa8] sm:$0xff] %v4379_v42  ;;  %v15645_v6 = vadd.f32 %v9515_v55, %v4379_v42  ;;  %v3964_v10 = vpop.f32.mrf.mxu1 }
 0x433   :  { %8194 = vst [vmem:[#allocation2 + $0xdb0] sm:$0xff] %v3964_v10  ;;  %11481 = vmatmul.msk.f32.gmra.mxu0 %vm1067_vm0, %v529_v29  ;;  %v9545_v5 = vadd.f32 %v9544_v56, %v3964_v10  ;;  %v532_v29 = vld [vmem:[%s19765_s0 + $0x1048] sm:$0xff] }
 0x434   :  { %11545 = vmatmul.msk.f32.gmra.mxu2 %vm1067_vm0, %v593_v9  ;;  %v596_v9 = vld [vmem:[%s19765_s0 + $0x1248] sm:$0xff] }
 0x435   :  { %11513 = vmatmul.msk.f32.gmra.mxu1 %vm1067_vm0, %v561_v37 }
 0x436   :  { %11577 = vmatmul.msk.f32.gmra.mxu3 %vm1067_vm0, %v625_v4  ;;  %v564_v4 = vld [vmem:[%s19765_s0 + $0x1148] sm:$0xff] }
 0x437   :  { %v4173_v17 = vpop.f32.mrf.mxu2 }
 0x438   :  { %8226 = vst [vmem:[#allocation2 + $0xeb0] sm:$0xff] %v4173_v17  ;;  %v9546_v11 = vadd.f32 %v9545_v5, %v4173_v17  ;;  %v3758_v13 = vpop.f32.mrf.mxu0  ;;  %v628_v5 = vld [vmem:[%s19765_s0 + $0x1348] sm:$0xff] }
 0x439   :  { %8163 = vst [vmem:[#allocation2 + $0xcb8] sm:$0xff] %v3758_v13  ;;  %v9575_v7 = vadd.f32 %v15063_v21, %v3758_v13  ;;  %v4382_v61 = vpop.f32.mrf.mxu3 }
 0x43a   :  { %8258 = vst [vmem:[#allocation2 + $0xfb0] sm:$0xff] %v4382_v61  ;;  %v15664_v30 = vadd.f32 %v9546_v11, %v4382_v61  ;;  %v3967_v31 = vpop.f32.mrf.mxu1 }
 0x43b   :  { %8195 = vst [vmem:[#allocation2 + $0xdb8] sm:$0xff] %v3967_v31  ;;  %11482 = vmatmul.msk.f32.gmra.mxu0 %vm1067_vm0, %v530_v44  ;;  %v9576_v28 = vadd.f32 %v9575_v7, %v3967_v31  ;;  %v533_v44 = vld [vmem:[%s19765_s0 + $0x1050] sm:$0xff] }
 0x43c   :  { %11546 = vmatmul.msk.f32.gmra.mxu2 %vm1067_vm0, %v594_v25  ;;  %v597_v25 = vld [vmem:[%s19765_s0 + $0x1250] sm:$0xff] }
 0x43d   :  { %11514 = vmatmul.msk.f32.gmra.mxu1 %vm1067_vm0, %v562_v57 }
 0x43e   :  { %11578 = vmatmul.msk.f32.gmra.mxu3 %vm1067_vm0, %v626_v27  ;;  %v565_v27 = vld [vmem:[%s19765_s0 + $0x1150] sm:$0xff] }
 0x43f   :  { %v4176_v21 = vpop.f32.mrf.mxu2 }
 0x440   :  { %8227 = vst [vmem:[#allocation2 + $0xeb8] sm:$0xff] %v4176_v21  ;;  %v9577_v34 = vadd.f32 %v9576_v28, %v4176_v21  ;;  %v3761_v35 = vpop.f32.mrf.mxu0  ;;  %v629_v28 = vld [vmem:[%s19765_s0 + $0x1350] sm:$0xff] }
 0x441   :  { %8164 = vst [vmem:[#allocation2 + $0xcc0] sm:$0xff] %v3761_v35  ;;  %v9606_v26 = vadd.f32 %v15082_v32, %v3761_v35  ;;  %v4385_v16 = vpop.f32.mrf.mxu3 }
 0x442   :  { %8259 = vst [vmem:[#allocation2 + $0xfb8] sm:$0xff] %v4385_v16  ;;  %v15683_v50 = vadd.f32 %v9577_v34, %v4385_v16  ;;  %v3970_v53 = vpop.f32.mrf.mxu1 }
 0x443   :  { %8196 = vst [vmem:[#allocation2 + $0xdc0] sm:$0xff] %v3970_v53  ;;  %11483 = vmatmul.msk.f32.gmra.mxu0 %vm1067_vm0, %v531_v58  ;;  %v9607_v59 = vadd.f32 %v9606_v26, %v3970_v53  ;;  %v534_v58 = vld [vmem:[%s19765_s0 + $0x1058] sm:$0xff] }
 0x444   :  { %11547 = vmatmul.msk.f32.gmra.mxu2 %vm1067_vm0, %v595_v40  ;;  %v598_v40 = vld [vmem:[%s19765_s0 + $0x1258] sm:$0xff] }
 0x445   :  { %11515 = vmatmul.msk.f32.gmra.mxu1 %vm1067_vm0, %v563_v47 }
 0x446   :  { %11579 = vmatmul.msk.f32.gmra.mxu3 %vm1067_vm0, %v627_v49  ;;  %v566_v49 = vld [vmem:[%s19765_s0 + $0x1158] sm:$0xff] }
 0x447   :  { %v4179_v32 = vpop.f32.mrf.mxu2 }
 0x448   :  { %8228 = vst [vmem:[#allocation2 + $0xec0] sm:$0xff] %v4179_v32  ;;  %v9608_v55 = vadd.f32 %v9607_v59, %v4179_v32  ;;  %v3764_v8 = vpop.f32.mrf.mxu0  ;;  %v630_v59 = vld [vmem:[%s19765_s0 + $0x1358] sm:$0xff] }
 0x449   :  { %8165 = vst [vmem:[#allocation2 + $0xcc8] sm:$0xff] %v3764_v8  ;;  %v9637_v56 = vadd.f32 %v15101_v43, %v3764_v8  ;;  %v4388_v42 = vpop.f32.mrf.mxu3 }
 0x44a   :  { %8260 = vst [vmem:[#allocation2 + $0xfc0] sm:$0xff] %v4388_v42  ;;  %v15702_v10 = vadd.f32 %v9608_v55, %v4388_v42  ;;  %v3973_v37 = vpop.f32.mrf.mxu1 }
 0x44b   :  { %8197 = vst [vmem:[#allocation2 + $0xdc8] sm:$0xff] %v3973_v37  ;;  %11484 = vmatmul.msk.f32.gmra.mxu0 %vm1067_vm0, %v532_v29  ;;  %v9638_v17 = vadd.f32 %v9637_v56, %v3973_v37  ;;  %v535_v29 = vld [vmem:[%s19765_s0 + $0x1060] sm:$0xff] }
 0x44c   :  { %11548 = vmatmul.msk.f32.gmra.mxu2 %vm1067_vm0, %v596_v9  ;;  %v599_v9 = vld [vmem:[%s19765_s0 + $0x1260] sm:$0xff] }
 0x44d   :  { %11516 = vmatmul.msk.f32.gmra.mxu1 %vm1067_vm0, %v564_v4 }
 0x44e   :  { %11580 = vmatmul.msk.f32.gmra.mxu3 %vm1067_vm0, %v628_v5  ;;  %v567_v5 = vld [vmem:[%s19765_s0 + $0x1160] sm:$0xff] }
 0x44f   :  { %v4182_v43 = vpop.f32.mrf.mxu2 }
 0x450   :  { %8229 = vst [vmem:[#allocation2 + $0xec8] sm:$0xff] %v4182_v43  ;;  %v9639_v11 = vadd.f32 %v9638_v17, %v4182_v43  ;;  %v3767_v13 = vpop.f32.mrf.mxu0  ;;  %v631_v17 = vld [vmem:[%s19765_s0 + $0x1360] sm:$0xff] }
 0x451   :  { %8166 = vst [vmem:[#allocation2 + $0xcd0] sm:$0xff] %v3767_v13  ;;  %v9668_v7 = vadd.f32 %v15120_v54, %v3767_v13  ;;  %v4391_v61 = vpop.f32.mrf.mxu3 }
 0x452   :  { %8261 = vst [vmem:[#allocation2 + $0xfc8] sm:$0xff] %v4391_v61  ;;  %v15721_v31 = vadd.f32 %v9639_v11, %v4391_v61  ;;  %v3976_v57 = vpop.f32.mrf.mxu1 }
 0x453   :  { %8198 = vst [vmem:[#allocation2 + $0xdd0] sm:$0xff] %v3976_v57  ;;  %11485 = vmatmul.msk.f32.gmra.mxu0 %vm1067_vm0, %v533_v44  ;;  %v9669_v21 = vadd.f32 %v9668_v7, %v3976_v57  ;;  %v536_v44 = vld [vmem:[%s19765_s0 + $0x1068] sm:$0xff] }
 0x454   :  { %11549 = vmatmul.msk.f32.gmra.mxu2 %vm1067_vm0, %v597_v25  ;;  %v600_v25 = vld [vmem:[%s19765_s0 + $0x1268] sm:$0xff] }
 0x455   :  { %11517 = vmatmul.msk.f32.gmra.mxu1 %vm1067_vm0, %v565_v27 }
 0x456   :  { %11581 = vmatmul.msk.f32.gmra.mxu3 %vm1067_vm0, %v629_v28  ;;  %v568_v28 = vld [vmem:[%s19765_s0 + $0x1168] sm:$0xff] }
 0x457   :  { %v4185_v54 = vpop.f32.mrf.mxu2 }
 0x458   :  { %8230 = vst [vmem:[#allocation2 + $0xed0] sm:$0xff] %v4185_v54  ;;  %v9670_v34 = vadd.f32 %v9669_v21, %v4185_v54  ;;  %v3770_v35 = vpop.f32.mrf.mxu0  ;;  %v632_v21 = vld [vmem:[%s19765_s0 + $0x1368] sm:$0xff] }
 0x459   :  { %8167 = vst [vmem:[#allocation2 + $0xcd8] sm:$0xff] %v3770_v35  ;;  %v9699_v26 = vadd.f32 %v15139_v20, %v3770_v35  ;;  %v4394_v16 = vpop.f32.mrf.mxu3 }
 0x45a   :  { %8262 = vst [vmem:[#allocation2 + $0xfd0] sm:$0xff] %v4394_v16  ;;  %v15740_v53 = vadd.f32 %v9670_v34, %v4394_v16  ;;  %v3979_v47 = vpop.f32.mrf.mxu1 }
 0x45b   :  { %8199 = vst [vmem:[#allocation2 + $0xdd8] sm:$0xff] %v3979_v47  ;;  %11486 = vmatmul.msk.f32.gmra.mxu0 %vm1067_vm0, %v534_v58  ;;  %v9700_v32 = vadd.f32 %v9699_v26, %v3979_v47  ;;  %v537_v58 = vld [vmem:[%s19765_s0 + $0x1070] sm:$0xff] }
 0x45c   :  { %11550 = vmatmul.msk.f32.gmra.mxu2 %vm1067_vm0, %v598_v40  ;;  %v601_v40 = vld [vmem:[%s19765_s0 + $0x1270] sm:$0xff] }
 0x45d   :  { %11518 = vmatmul.msk.f32.gmra.mxu1 %vm1067_vm0, %v566_v49 }
 0x45e   :  { %11582 = vmatmul.msk.f32.gmra.mxu3 %vm1067_vm0, %v630_v59  ;;  %v569_v59 = vld [vmem:[%s19765_s0 + $0x1170] sm:$0xff] }
 0x45f   :  { %v4188_v20 = vpop.f32.mrf.mxu2 }
 0x460   :  { %8231 = vst [vmem:[#allocation2 + $0xed8] sm:$0xff] %v4188_v20  ;;  %v9701_v55 = vadd.f32 %v9700_v32, %v4188_v20  ;;  %v3773_v8 = vpop.f32.mrf.mxu0  ;;  %v633_v32 = vld [vmem:[%s19765_s0 + $0x1370] sm:$0xff] }
 0x461   :  { %8168 = vst [vmem:[#allocation2 + $0xce0] sm:$0xff] %v3773_v8  ;;  %v9730_v56 = vadd.f32 %v15158_v60, %v3773_v8  ;;  %v4397_v42 = vpop.f32.mrf.mxu3 }
 0x462   :  { %8263 = vst [vmem:[#allocation2 + $0xfd8] sm:$0xff] %v4397_v42  ;;  %v15759_v37 = vadd.f32 %v9701_v55, %v4397_v42  ;;  %v3982_v4 = vpop.f32.mrf.mxu1 }
 0x463   :  { %8200 = vst [vmem:[#allocation2 + $0xde0] sm:$0xff] %v3982_v4  ;;  %11487 = vmatmul.msk.f32.gmra.mxu0 %vm1067_vm0, %v535_v29  ;;  %v9731_v43 = vadd.f32 %v9730_v56, %v3982_v4  ;;  %v538_v29 = vld [vmem:[%s19765_s0 + $0x1078] sm:$0xff] }
 0x464   :  { %11551 = vmatmul.msk.f32.gmra.mxu2 %vm1067_vm0, %v599_v9  ;;  %v602_v9 = vld [vmem:[%s19765_s0 + $0x1278] sm:$0xff] }
 0x465   :  { %11519 = vmatmul.msk.f32.gmra.mxu1 %vm1067_vm0, %v567_v5 }
 0x466   :  { %11583 = vmatmul.msk.f32.gmra.mxu3 %vm1067_vm0, %v631_v17  ;;  %v570_v17 = vld [vmem:[%s19765_s0 + $0x1178] sm:$0xff] }
 0x467   :  { %v4191_v60 = vpop.f32.mrf.mxu2 }
 0x468   :  { %8232 = vst [vmem:[#allocation2 + $0xee0] sm:$0xff] %v4191_v60  ;;  %v9732_v11 = vadd.f32 %v9731_v43, %v4191_v60  ;;  %v3776_v13 = vpop.f32.mrf.mxu0  ;;  %v634_v43 = vld [vmem:[%s19765_s0 + $0x1378] sm:$0xff] }
 0x469   :  { %8169 = vst [vmem:[#allocation2 + $0xce8] sm:$0xff] %v3776_v13  ;;  %v9761_v7 = vadd.f32 %v15177_v62, %v3776_v13  ;;  %v4400_v61 = vpop.f32.mrf.mxu3 }
 0x46a   :  { %8264 = vst [vmem:[#allocation2 + $0xfe0] sm:$0xff] %v4400_v61  ;;  %v15778_v57 = vadd.f32 %v9732_v11, %v4400_v61  ;;  %v3985_v27 = vpop.f32.mrf.mxu1 }
 0x46b   :  { %8201 = vst [vmem:[#allocation2 + $0xde8] sm:$0xff] %v3985_v27  ;;  %11488 = vmatmul.msk.f32.gmra.mxu0 %vm1067_vm0, %v536_v44  ;;  %v9762_v54 = vadd.f32 %v9761_v7, %v3985_v27  ;;  %v539_v44 = vld [vmem:[%s19765_s0 + $0x1080] sm:$0xff] }
 0x46c   :  { %11552 = vmatmul.msk.f32.gmra.mxu2 %vm1067_vm0, %v600_v25  ;;  %v603_v25 = vld [vmem:[%s19765_s0 + $0x1280] sm:$0xff] }
 0x46d   :  { %11520 = vmatmul.msk.f32.gmra.mxu1 %vm1067_vm0, %v568_v28 }
 0x46e   :  { %11584 = vmatmul.msk.f32.gmra.mxu3 %vm1067_vm0, %v632_v21  ;;  %v571_v21 = vld [vmem:[%s19765_s0 + $0x1180] sm:$0xff] }
 0x46f   :  { %v4194_v62 = vpop.f32.mrf.mxu2 }
 0x470   :  { %8233 = vst [vmem:[#allocation2 + $0xee8] sm:$0xff] %v4194_v62  ;;  %v9763_v34 = vadd.f32 %v9762_v54, %v4194_v62  ;;  %v3779_v35 = vpop.f32.mrf.mxu0  ;;  %v635_v54 = vld [vmem:[%s19765_s0 + $0x1380] sm:$0xff] }
 0x471   :  { %8170 = vst [vmem:[#allocation2 + $0xcf0] sm:$0xff] %v3779_v35  ;;  %v9792_v26 = vadd.f32 %v15196_v18, %v3779_v35  ;;  %v4403_v16 = vpop.f32.mrf.mxu3 }
 0x472   :  { %8265 = vst [vmem:[#allocation2 + $0xfe8] sm:$0xff] %v4403_v16  ;;  %v15797_v47 = vadd.f32 %v9763_v34, %v4403_v16  ;;  %v3988_v49 = vpop.f32.mrf.mxu1 }
 0x473   :  { %8202 = vst [vmem:[#allocation2 + $0xdf0] sm:$0xff] %v3988_v49  ;;  %11489 = vmatmul.msk.f32.gmra.mxu0 %vm1067_vm0, %v537_v58  ;;  %v9793_v20 = vadd.f32 %v9792_v26, %v3988_v49  ;;  %v540_v58 = vld [vmem:[%s19765_s0 + $0x1088] sm:$0xff] }
 0x474   :  { %11553 = vmatmul.msk.f32.gmra.mxu2 %vm1067_vm0, %v601_v40  ;;  %v604_v40 = vld [vmem:[%s19765_s0 + $0x1288] sm:$0xff] }
 0x475   :  { %11521 = vmatmul.msk.f32.gmra.mxu1 %vm1067_vm0, %v569_v59 }
 0x476   :  { %11585 = vmatmul.msk.f32.gmra.mxu3 %vm1067_vm0, %v633_v32  ;;  %v572_v32 = vld [vmem:[%s19765_s0 + $0x1188] sm:$0xff] }
 0x477   :  { %v4197_v18 = vpop.f32.mrf.mxu2 }
 0x478   :  { %8234 = vst [vmem:[#allocation2 + $0xef0] sm:$0xff] %v4197_v18  ;;  %v9794_v55 = vadd.f32 %v9793_v20, %v4197_v18  ;;  %v3782_v8 = vpop.f32.mrf.mxu0  ;;  %v636_v20 = vld [vmem:[%s19765_s0 + $0x1388] sm:$0xff] }
 0x479   :  { %8171 = vst [vmem:[#allocation2 + $0xcf8] sm:$0xff] %v3782_v8  ;;  %v9823_v56 = vadd.f32 %v15215_v38, %v3782_v8  ;;  %v4406_v42 = vpop.f32.mrf.mxu3 }
 0x47a   :  { %8266 = vst [vmem:[#allocation2 + $0xff0] sm:$0xff] %v4406_v42  ;;  %v15816_v4 = vadd.f32 %v9794_v55, %v4406_v42  ;;  %v3991_v5 = vpop.f32.mrf.mxu1 }
 0x47b   :  { %8203 = vst [vmem:[#allocation2 + $0xdf8] sm:$0xff] %v3991_v5  ;;  %11490 = vmatmul.msk.f32.gmra.mxu0 %vm1067_vm0, %v538_v29  ;;  %v9824_v60 = vadd.f32 %v9823_v56, %v3991_v5  ;;  %v541_v29 = vld [vmem:[%s19765_s0 + $0x1090] sm:$0xff] }
 0x47c   :  { %11554 = vmatmul.msk.f32.gmra.mxu2 %vm1067_vm0, %v602_v9  ;;  %v605_v9 = vld [vmem:[%s19765_s0 + $0x1290] sm:$0xff] }
 0x47d   :  { %11522 = vmatmul.msk.f32.gmra.mxu1 %vm1067_vm0, %v570_v17 }
 0x47e   :  { %11586 = vmatmul.msk.f32.gmra.mxu3 %vm1067_vm0, %v634_v43  ;;  %v573_v43 = vld [vmem:[%s19765_s0 + $0x1190] sm:$0xff] }
 0x47f   :  { %v4200_v38 = vpop.f32.mrf.mxu2 }
 0x480   :  { %8235 = vst [vmem:[#allocation2 + $0xef8] sm:$0xff] %v4200_v38  ;;  %v9825_v11 = vadd.f32 %v9824_v60, %v4200_v38  ;;  %v4525_v13 = vpop.f32.mrf.mxu0  ;;  %v637_v60 = vld [vmem:[%s19765_s0 + $0x1390] sm:$0xff] }
 0x481   :  { %v4409_v7 = vpop.f32.mrf.mxu3  ;;  %8268 = vst [vmem:[#allocation2 + $0x1000] sm:$0xff] %v4525_v13  ;;  %v8866_v61 = vadd.f32 %v15234_v63, %v4525_v13 }
 0x482   :  { %8267 = vst [vmem:[#allocation2 + $0xff8] sm:$0xff] %v4409_v7  ;;  %v15835_v27 = vadd.f32 %v9825_v11, %v4409_v7  ;;  %v4734_v28 = vpop.f32.mrf.mxu1 }
 0x483   :  { %8300 = vst [vmem:[#allocation2 + $0x1100] sm:$0xff] %v4734_v28  ;;  %11491 = vmatmul.msk.f32.gmra.mxu0 %vm1067_vm0, %v539_v44  ;;  %v8867_v62 = vadd.f32 %v8866_v61, %v4734_v28  ;;  %v542_v44 = vld [vmem:[%s19765_s0 + $0x1098] sm:$0xff] }
 0x484   :  { %11555 = vmatmul.msk.f32.gmra.mxu2 %vm1067_vm0, %v603_v25  ;;  %v606_v25 = vld [vmem:[%s19765_s0 + $0x1298] sm:$0xff] }
 0x485   :  { %11523 = vmatmul.msk.f32.gmra.mxu1 %vm1067_vm0, %v571_v21 }
 0x486   :  { %11587 = vmatmul.msk.f32.gmra.mxu3 %vm1067_vm0, %v635_v54  ;;  %v574_v54 = vld [vmem:[%s19765_s0 + $0x1198] sm:$0xff] }
 0x487   :  { %v4943_v63 = vpop.f32.mrf.mxu2 }
 0x488   :  { %8332 = vst [vmem:[#allocation2 + $0x1200] sm:$0xff] %v4943_v63  ;;  %v8868_v34 = vadd.f32 %v8867_v62, %v4943_v63  ;;  %v4528_v35 = vpop.f32.mrf.mxu0  ;;  %v638_v62 = vld [vmem:[%s19765_s0 + $0x1398] sm:$0xff] }
 0x489   :  { %8269 = vst [vmem:[#allocation2 + $0x1008] sm:$0xff] %v4528_v35  ;;  %v8897_v26 = vadd.f32 %v15253_v19, %v4528_v35  ;;  %v5152_v16 = vpop.f32.mrf.mxu3 }
 0x48a   :  { %8364 = vst [vmem:[#allocation2 + $0x1300] sm:$0xff] %v5152_v16  ;;  %v15854_v49 = vadd.f32 %v8868_v34, %v5152_v16  ;;  %v4737_v59 = vpop.f32.mrf.mxu1 }
 0x48b   :  { %8301 = vst [vmem:[#allocation2 + $0x1108] sm:$0xff] %v4737_v59  ;;  %11492 = vmatmul.msk.f32.gmra.mxu0 %vm1067_vm0, %v540_v58  ;;  %v8898_v18 = vadd.f32 %v8897_v26, %v4737_v59  ;;  %v543_v58 = vld [vmem:[%s19765_s0 + $0x10a0] sm:$0xff] }
 0x48c   :  { %11556 = vmatmul.msk.f32.gmra.mxu2 %vm1067_vm0, %v604_v40  ;;  %v607_v40 = vld [vmem:[%s19765_s0 + $0x12a0] sm:$0xff] }
 0x48d   :  { %11524 = vmatmul.msk.f32.gmra.mxu1 %vm1067_vm0, %v572_v32 }
 0x48e   :  { %11588 = vmatmul.msk.f32.gmra.mxu3 %vm1067_vm0, %v636_v20  ;;  %v575_v20 = vld [vmem:[%s19765_s0 + $0x11a0] sm:$0xff] }
 0x48f   :  { %v4946_v19 = vpop.f32.mrf.mxu2 }
 0x490   :  { %8333 = vst [vmem:[#allocation2 + $0x1208] sm:$0xff] %v4946_v19  ;;  %v8899_v55 = vadd.f32 %v8898_v18, %v4946_v19  ;;  %v4531_v8 = vpop.f32.mrf.mxu0  ;;  %v639_v18 = vld [vmem:[%s19765_s0 + $0x13a0] sm:$0xff] }
 0x491   :  { %8270 = vst [vmem:[#allocation2 + $0x1010] sm:$0xff] %v4531_v8  ;;  %v8928_v56 = vadd.f32 %v15272_v41, %v4531_v8  ;;  %v5155_v42 = vpop.f32.mrf.mxu3 }
 0x492   :  { %8365 = vst [vmem:[#allocation2 + $0x1308] sm:$0xff] %v5155_v42  ;;  %v15873_v5 = vadd.f32 %v8899_v55, %v5155_v42  ;;  %v4740_v17 = vpop.f32.mrf.mxu1 }
 0x493   :  { %8302 = vst [vmem:[#allocation2 + $0x1110] sm:$0xff] %v4740_v17  ;;  %11493 = vmatmul.msk.f32.gmra.mxu0 %vm1067_vm0, %v541_v29  ;;  %v8929_v38 = vadd.f32 %v8928_v56, %v4740_v17  ;;  %v544_v29 = vld [vmem:[%s19765_s0 + $0x10a8] sm:$0xff] }
 0x494   :  { %11557 = vmatmul.msk.f32.gmra.mxu2 %vm1067_vm0, %v605_v9  ;;  %v608_v9 = vld [vmem:[%s19765_s0 + $0x12a8] sm:$0xff] }
 0x495   :  { %11525 = vmatmul.msk.f32.gmra.mxu1 %vm1067_vm0, %v573_v43 }
 0x496   :  { %11589 = vmatmul.msk.f32.gmra.mxu3 %vm1067_vm0, %v637_v60  ;;  %v576_v60 = vld [vmem:[%s19765_s0 + $0x11a8] sm:$0xff] }
 0x497   :  { %v4949_v41 = vpop.f32.mrf.mxu2 }
 0x498   :  { %8334 = vst [vmem:[#allocation2 + $0x1210] sm:$0xff] %v4949_v41  ;;  %v8930_v11 = vadd.f32 %v8929_v38, %v4949_v41  ;;  %v4534_v13 = vpop.f32.mrf.mxu0  ;;  %v640_v38 = vld [vmem:[%s19765_s0 + $0x13a8] sm:$0xff] }
 0x499   :  { %8271 = vst [vmem:[#allocation2 + $0x1018] sm:$0xff] %v4534_v13  ;;  %v8959_v7 = vadd.f32 %v15291_v0, %v4534_v13  ;;  %v5158_v61 = vpop.f32.mrf.mxu3 }
 0x49a   :  { %8366 = vst [vmem:[#allocation2 + $0x1310] sm:$0xff] %v5158_v61  ;;  %v15892_v28 = vadd.f32 %v8930_v11, %v5158_v61  ;;  %v4743_v21 = vpop.f32.mrf.mxu1 }
 0x49b   :  { %8303 = vst [vmem:[#allocation2 + $0x1118] sm:$0xff] %v4743_v21  ;;  %11494 = vmatmul.msk.f32.gmra.mxu0 %vm1067_vm0, %v542_v44  ;;  %v8960_v63 = vadd.f32 %v8959_v7, %v4743_v21  ;;  %v545_v44 = vld [vmem:[%s19765_s0 + $0x10b0] sm:$0xff] }
 0x49c   :  { %11558 = vmatmul.msk.f32.gmra.mxu2 %vm1067_vm0, %v606_v25  ;;  %v609_v25 = vld [vmem:[%s19765_s0 + $0x12b0] sm:$0xff] }
 0x49d   :  { %11526 = vmatmul.msk.f32.gmra.mxu1 %vm1067_vm0, %v574_v54 }
 0x49e   :  { %11590 = vmatmul.msk.f32.gmra.mxu3 %vm1067_vm0, %v638_v62  ;;  %v577_v62 = vld [vmem:[%s19765_s0 + $0x11b0] sm:$0xff] }
 0x49f   :  { %v4952_v0 = vpop.f32.mrf.mxu2 }
 0x4a0   :  { %8335 = vst [vmem:[#allocation2 + $0x1218] sm:$0xff] %v4952_v0  ;;  %v8961_v34 = vadd.f32 %v8960_v63, %v4952_v0  ;;  %v4537_v35 = vpop.f32.mrf.mxu0  ;;  %v641_v63 = vld [vmem:[%s19765_s0 + $0x13b0] sm:$0xff] }
 0x4a1   :  { %8272 = vst [vmem:[#allocation2 + $0x1020] sm:$0xff] %v4537_v35  ;;  %v8990_v26 = vadd.f32 %v15310_v22, %v4537_v35  ;;  %v5161_v16 = vpop.f32.mrf.mxu3 }
 0x4a2   :  { %8367 = vst [vmem:[#allocation2 + $0x1318] sm:$0xff] %v5161_v16  ;;  %v15911_v59 = vadd.f32 %v8961_v34, %v5161_v16  ;;  %v4746_v32 = vpop.f32.mrf.mxu1 }
 0x4a3   :  { %8304 = vst [vmem:[#allocation2 + $0x1120] sm:$0xff] %v4746_v32  ;;  %11495 = vmatmul.msk.f32.gmra.mxu0 %vm1067_vm0, %v543_v58  ;;  %v8991_v19 = vadd.f32 %v8990_v26, %v4746_v32  ;;  %v546_v58 = vld [vmem:[%s19765_s0 + $0x10b8] sm:$0xff] }
 0x4a4   :  { %11559 = vmatmul.msk.f32.gmra.mxu2 %vm1067_vm0, %v607_v40  ;;  %v610_v40 = vld [vmem:[%s19765_s0 + $0x12b8] sm:$0xff] }
 0x4a5   :  { %11527 = vmatmul.msk.f32.gmra.mxu1 %vm1067_vm0, %v575_v20 }
 0x4a6   :  { %11591 = vmatmul.msk.f32.gmra.mxu3 %vm1067_vm0, %v639_v18  ;;  %v578_v18 = vld [vmem:[%s19765_s0 + $0x11b8] sm:$0xff] }
 0x4a7   :  { %v4955_v22 = vpop.f32.mrf.mxu2 }
 0x4a8   :  { %8336 = vst [vmem:[#allocation2 + $0x1220] sm:$0xff] %v4955_v22  ;;  %v8992_v55 = vadd.f32 %v8991_v19, %v4955_v22  ;;  %v4540_v8 = vpop.f32.mrf.mxu0  ;;  %v642_v19 = vld [vmem:[%s19765_s0 + $0x13b8] sm:$0xff] }
 0x4a9   :  { %8273 = vst [vmem:[#allocation2 + $0x1028] sm:$0xff] %v4540_v8  ;;  %v9021_v56 = vadd.f32 %v15329_v45, %v4540_v8  ;;  %v5164_v42 = vpop.f32.mrf.mxu3 }
 0x4aa   :  { %8368 = vst [vmem:[#allocation2 + $0x1320] sm:$0xff] %v5164_v42  ;;  %v15930_v17 = vadd.f32 %v8992_v55, %v5164_v42  ;;  %v4749_v43 = vpop.f32.mrf.mxu1 }
 0x4ab   :  { %8305 = vst [vmem:[#allocation2 + $0x1128] sm:$0xff] %v4749_v43  ;;  %11496 = vmatmul.msk.f32.gmra.mxu0 %vm1067_vm0, %v544_v29  ;;  %v9022_v41 = vadd.f32 %v9021_v56, %v4749_v43  ;;  %v547_v29 = vld [vmem:[%s19765_s0 + $0x10c0] sm:$0xff] }
 0x4ac   :  { %11560 = vmatmul.msk.f32.gmra.mxu2 %vm1067_vm0, %v608_v9  ;;  %v611_v9 = vld [vmem:[%s19765_s0 + $0x12c0] sm:$0xff] }
 0x4ad   :  { %11528 = vmatmul.msk.f32.gmra.mxu1 %vm1067_vm0, %v576_v60 }
 0x4ae   :  { %11592 = vmatmul.msk.f32.gmra.mxu3 %vm1067_vm0, %v640_v38  ;;  %v579_v38 = vld [vmem:[%s19765_s0 + $0x11c0] sm:$0xff] }
 0x4af   :  { %v4958_v45 = vpop.f32.mrf.mxu2 }
 0x4b0   :  { %8337 = vst [vmem:[#allocation2 + $0x1228] sm:$0xff] %v4958_v45  ;;  %v9023_v11 = vadd.f32 %v9022_v41, %v4958_v45  ;;  %v4543_v13 = vpop.f32.mrf.mxu0  ;;  %v643_v41 = vld [vmem:[%s19765_s0 + $0x13c0] sm:$0xff] }
 0x4b1   :  { %8274 = vst [vmem:[#allocation2 + $0x1030] sm:$0xff] %v4543_v13  ;;  %v9052_v7 = vadd.f32 %v15348_v3, %v4543_v13  ;;  %v5167_v61 = vpop.f32.mrf.mxu3 }
 0x4b2   :  { %8369 = vst [vmem:[#allocation2 + $0x1328] sm:$0xff] %v5167_v61  ;;  %v15949_v21 = vadd.f32 %v9023_v11, %v5167_v61  ;;  %v4752_v54 = vpop.f32.mrf.mxu1 }
 0x4b3   :  { %8306 = vst [vmem:[#allocation2 + $0x1130] sm:$0xff] %v4752_v54  ;;  %11497 = vmatmul.msk.f32.gmra.mxu0 %vm1067_vm0, %v545_v44  ;;  %v9053_v0 = vadd.f32 %v9052_v7, %v4752_v54  ;;  %v548_v44 = vld [vmem:[%s19765_s0 + $0x10c8] sm:$0xff] }
 0x4b4   :  { %11561 = vmatmul.msk.f32.gmra.mxu2 %vm1067_vm0, %v609_v25  ;;  %v612_v25 = vld [vmem:[%s19765_s0 + $0x12c8] sm:$0xff] }
 0x4b5   :  { %11529 = vmatmul.msk.f32.gmra.mxu1 %vm1067_vm0, %v577_v62 }
 0x4b6   :  { %11593 = vmatmul.msk.f32.gmra.mxu3 %vm1067_vm0, %v641_v63  ;;  %v580_v63 = vld [vmem:[%s19765_s0 + $0x11c8] sm:$0xff] }
 0x4b7   :  { %v4961_v3 = vpop.f32.mrf.mxu2 }
 0x4b8   :  { %8338 = vst [vmem:[#allocation2 + $0x1230] sm:$0xff] %v4961_v3  ;;  %v9054_v34 = vadd.f32 %v9053_v0, %v4961_v3  ;;  %v4546_v35 = vpop.f32.mrf.mxu0  ;;  %v644_v0 = vld [vmem:[%s19765_s0 + $0x13c8] sm:$0xff] }
 0x4b9   :  { %8275 = vst [vmem:[#allocation2 + $0x1038] sm:$0xff] %v4546_v35  ;;  %v9083_v26 = vadd.f32 %v15367_v23, %v4546_v35  ;;  %v5170_v16 = vpop.f32.mrf.mxu3 }
 0x4ba   :  { %8370 = vst [vmem:[#allocation2 + $0x1330] sm:$0xff] %v5170_v16  ;;  %v15968_v32 = vadd.f32 %v9054_v34, %v5170_v16  ;;  %v4755_v20 = vpop.f32.mrf.mxu1 }
 0x4bb   :  { %8307 = vst [vmem:[#allocation2 + $0x1138] sm:$0xff] %v4755_v20  ;;  %11498 = vmatmul.msk.f32.gmra.mxu0 %vm1067_vm0, %v546_v58  ;;  %v9084_v22 = vadd.f32 %v9083_v26, %v4755_v20  ;;  %v549_v58 = vld [vmem:[%s19765_s0 + $0x10d0] sm:$0xff] }
 0x4bc   :  { %11562 = vmatmul.msk.f32.gmra.mxu2 %vm1067_vm0, %v610_v40  ;;  %v613_v40 = vld [vmem:[%s19765_s0 + $0x12d0] sm:$0xff] }
 0x4bd   :  { %11530 = vmatmul.msk.f32.gmra.mxu1 %vm1067_vm0, %v578_v18 }
 0x4be   :  { %11594 = vmatmul.msk.f32.gmra.mxu3 %vm1067_vm0, %v642_v19  ;;  %v581_v19 = vld [vmem:[%s19765_s0 + $0x11d0] sm:$0xff] }
 0x4bf   :  { %v4964_v23 = vpop.f32.mrf.mxu2 }
 0x4c0   :  { %8339 = vst [vmem:[#allocation2 + $0x1238] sm:$0xff] %v4964_v23  ;;  %v9085_v55 = vadd.f32 %v9084_v22, %v4964_v23  ;;  %v4549_v8 = vpop.f32.mrf.mxu0  ;;  %v645_v22 = vld [vmem:[%s19765_s0 + $0x13d0] sm:$0xff] }
 0x4c1   :  { %8276 = vst [vmem:[#allocation2 + $0x1040] sm:$0xff] %v4549_v8  ;;  %v9114_v56 = vadd.f32 %v15386_v46, %v4549_v8  ;;  %v5173_v42 = vpop.f32.mrf.mxu3 }
 0x4c2   :  { %8371 = vst [vmem:[#allocation2 + $0x1338] sm:$0xff] %v5173_v42  ;;  %v15987_v43 = vadd.f32 %v9085_v55, %v5173_v42  ;;  %v4758_v60 = vpop.f32.mrf.mxu1 }
 0x4c3   :  { %8308 = vst [vmem:[#allocation2 + $0x1140] sm:$0xff] %v4758_v60  ;;  %11499 = vmatmul.msk.f32.gmra.mxu0 %vm1067_vm0, %v547_v29  ;;  %v9115_v45 = vadd.f32 %v9114_v56, %v4758_v60  ;;  %v550_v29 = vld [vmem:[%s19765_s0 + $0x10d8] sm:$0xff] }
 0x4c4   :  { %11563 = vmatmul.msk.f32.gmra.mxu2 %vm1067_vm0, %v611_v9  ;;  %v614_v9 = vld [vmem:[%s19765_s0 + $0x12d8] sm:$0xff] }
 0x4c5   :  { %11531 = vmatmul.msk.f32.gmra.mxu1 %vm1067_vm0, %v579_v38 }
 0x4c6   :  { %11595 = vmatmul.msk.f32.gmra.mxu3 %vm1067_vm0, %v643_v41  ;;  %v582_v41 = vld [vmem:[%s19765_s0 + $0x11d8] sm:$0xff] }
 0x4c7   :  { %v4967_v46 = vpop.f32.mrf.mxu2 }
 0x4c8   :  { %8340 = vst [vmem:[#allocation2 + $0x1240] sm:$0xff] %v4967_v46  ;;  %v9116_v11 = vadd.f32 %v9115_v45, %v4967_v46  ;;  %v4552_v13 = vpop.f32.mrf.mxu0  ;;  %v646_v45 = vld [vmem:[%s19765_s0 + $0x13d8] sm:$0xff] }
 0x4c9   :  { %8277 = vst [vmem:[#allocation2 + $0x1048] sm:$0xff] %v4552_v13  ;;  %v9145_v7 = vadd.f32 %v15405_v52, %v4552_v13  ;;  %v5176_v61 = vpop.f32.mrf.mxu3 }
 0x4ca   :  { %8372 = vst [vmem:[#allocation2 + $0x1340] sm:$0xff] %v5176_v61  ;;  %v16006_v54 = vadd.f32 %v9116_v11, %v5176_v61  ;;  %v4761_v62 = vpop.f32.mrf.mxu1 }
 0x4cb   :  { %8309 = vst [vmem:[#allocation2 + $0x1148] sm:$0xff] %v4761_v62  ;;  %11500 = vmatmul.msk.f32.gmra.mxu0 %vm1067_vm0, %v548_v44  ;;  %v9146_v3 = vadd.f32 %v9145_v7, %v4761_v62  ;;  %v551_v44 = vld [vmem:[%s19765_s0 + $0x10e0] sm:$0xff] }
 0x4cc   :  { %11564 = vmatmul.msk.f32.gmra.mxu2 %vm1067_vm0, %v612_v25  ;;  %v615_v25 = vld [vmem:[%s19765_s0 + $0x12e0] sm:$0xff] }
 0x4cd   :  { %11532 = vmatmul.msk.f32.gmra.mxu1 %vm1067_vm0, %v580_v63 }
 0x4ce   :  { %11596 = vmatmul.msk.f32.gmra.mxu3 %vm1067_vm0, %v644_v0  ;;  %v583_v0 = vld [vmem:[%s19765_s0 + $0x11e0] sm:$0xff] }
 0x4cf   :  { %v4970_v52 = vpop.f32.mrf.mxu2 }
 0x4d0   :  { %8341 = vst [vmem:[#allocation2 + $0x1248] sm:$0xff] %v4970_v52  ;;  %v9147_v34 = vadd.f32 %v9146_v3, %v4970_v52  ;;  %v4555_v35 = vpop.f32.mrf.mxu0  ;;  %v647_v3 = vld [vmem:[%s19765_s0 + $0x13e0] sm:$0xff] }
 0x4d1   :  { %8278 = vst [vmem:[#allocation2 + $0x1050] sm:$0xff] %v4555_v35  ;;  %v9176_v26 = vadd.f32 %v15424_v2, %v4555_v35  ;;  %v5179_v16 = vpop.f32.mrf.mxu3  ;;  %v1059_v35 = vld [vmem:[%s19763_s1 + $0xc0] sm:$0xff] }
 0x4d2   :  { %8373 = vst [vmem:[#allocation2 + $0x1348] sm:$0xff] %v5179_v16  ;;  %v16025_v20 = vadd.f32 %v9147_v34, %v5179_v16  ;;  %v4764_v18 = vpop.f32.mrf.mxu1  ;;  %6195 = vmatpush.msra.mxu0 %v1059_v35  ;;  %v586_v35 = vld [vmem:[%s19765_s0 + $0x11f8] sm:$0xff] }
 0x4d3   :  { %8310 = vst [vmem:[#allocation2 + $0x1150] sm:$0xff] %v4764_v18  ;;  %11501 = vmatmul.msk.f32.gmra.mxu0 %vm1067_vm0, %v549_v58  ;;  %v9177_v23 = vadd.f32 %v9176_v26, %v4764_v18  ;;  %v1062_v58 = vld [vmem:[%s19763_s1 + $0xd8] sm:$0xff]  ;;  %v1060_v26 = vld [vmem:[%s19763_s1 + $0xc8] sm:$0xff] }
 0x4d4   :  { %11565 = vmatmul.msk.f32.gmra.mxu2 %vm1067_vm0, %v613_v40  ;;  %6822 = vmatpush.msra.mxu3 %v1062_v58  ;;  %v552_v18 = vld [vmem:[%s19765_s0 + $0x10e8] sm:$0xff]  ;;  %v650_v58 = vld [vmem:[%s19765_s0 + $0x13f8] sm:$0xff] }
 0x4d5   :  { %11533 = vmatmul.msk.f32.gmra.mxu1 %vm1067_vm0, %v581_v19  ;;  %v616_v19 = vld [vmem:[%s19765_s0 + $0x12e8] sm:$0xff] }
 0x4d6   :  { %11597 = vmatmul.msk.f32.gmra.mxu3 %vm1067_vm0, %v645_v22  ;;  %6404 = vmatpush.msra.mxu1 %v1060_v26 }
 0x4d7   :  { %v4973_v2 = vpop.f32.mrf.mxu2 }
 0x4d8   :  { %8342 = vst [vmem:[#allocation2 + $0x1250] sm:$0xff] %v4973_v2  ;;  %v9178_v55 = vadd.f32 %v9177_v23, %v4973_v2  ;;  %v4558_v8 = vpop.f32.mrf.mxu0 }
 0x4d9   :  { %8279 = vst [vmem:[#allocation2 + $0x1058] sm:$0xff] %v4558_v8  ;;  %v9207_v56 = vadd.f32 %v15443_v15, %v4558_v8  ;;  %v5182_v42 = vpop.f32.mrf.mxu3  ;;  %v584_v8 = vld [vmem:[%s19765_s0 + $0x11e8] sm:$0xff] }
 0x4da   :  { %8374 = vst [vmem:[#allocation2 + $0x1350] sm:$0xff] %v5182_v42  ;;  %v16044_v60 = vadd.f32 %v9178_v55, %v5182_v42  ;;  %v4767_v38 = vpop.f32.mrf.mxu1 }
 0x4db   :  { %8311 = vst [vmem:[#allocation2 + $0x1158] sm:$0xff] %v4767_v38  ;;  %11502 = vmatmul.msk.f32.gmra.mxu0 %vm1067_vm0, %v550_v29  ;;  %v9208_v46 = vadd.f32 %v9207_v56, %v4767_v38  ;;  %v648_v29 = vld [vmem:[%s19765_s0 + $0x13e8] sm:$0xff]  ;;  %v553_v38 = vld [vmem:[%s19765_s0 + $0x10f0] sm:$0xff] }
 0x4dc   :  { %11566 = vmatmul.msk.f32.gmra.mxu2 %vm1067_vm0, %v614_v9 }
 0x4dd   :  { %11534 = vmatmul.msk.f32.gmra.mxu1 %vm1067_vm0, %v582_v41  ;;  %v617_v41 = vld [vmem:[%s19765_s0 + $0x12f0] sm:$0xff] }
 0x4de   :  { %11598 = vmatmul.msk.f32.gmra.mxu3 %vm1067_vm0, %v646_v45 }
 0x4df   :  { %v4976_v15 = vpop.f32.mrf.mxu2 }
 0x4e0   :  { %8343 = vst [vmem:[#allocation2 + $0x1258] sm:$0xff] %v4976_v15  ;;  %v9209_v11 = vadd.f32 %v9208_v46, %v4976_v15  ;;  %v4561_v13 = vpop.f32.mrf.mxu0 }
 0x4e1   :  { %8280 = vst [vmem:[#allocation2 + $0x1060] sm:$0xff] %v4561_v13  ;;  %v9238_v7 = vadd.f32 %v15474_v33, %v4561_v13  ;;  %v5185_v61 = vpop.f32.mrf.mxu3  ;;  %v1061_v33 = vld [vmem:[%s19763_s1 + $0xd0] sm:$0xff] }
 0x4e2   :  { %8375 = vst [vmem:[#allocation2 + $0x1358] sm:$0xff] %v5185_v61  ;;  %v16063_v62 = vadd.f32 %v9209_v11, %v5185_v61  ;;  %v4770_v63 = vpop.f32.mrf.mxu1  ;;  %6613 = vmatpush.msra.mxu2 %v1061_v33  ;;  %v585_v13 = vld [vmem:[%s19765_s0 + $0x11f0] sm:$0xff] }
 0x4e3   :  { %8312 = vst [vmem:[#allocation2 + $0x1160] sm:$0xff] %v4770_v63  ;;  %11503 = vmatmul.msk.f32.gmra.mxu0 %vm1067_vm0, %v551_v44  ;;  %v9239_v52 = vadd.f32 %v9238_v7, %v4770_v63  ;;  %v649_v44 = vld [vmem:[%s19765_s0 + $0x13f0] sm:$0xff]  ;;  %v554_v63 = vld [vmem:[%s19765_s0 + $0x10f8] sm:$0xff] }
 0x4e4   :  { %11567 = vmatmul.msk.f32.gmra.mxu2 %vm1067_vm0, %v615_v25 }
 0x4e5   :  { %11535 = vmatmul.msk.f32.gmra.mxu1 %vm1067_vm0, %v583_v0  ;;  %v618_v0 = vld [vmem:[%s19765_s0 + $0x12f8] sm:$0xff] }
 0x4e6   :  { %11599 = vmatmul.msk.f32.gmra.mxu3 %vm1067_vm0, %v647_v3 }
 0x4e7   :  { %v4979_v34 = vpop.f32.mrf.mxu2 }
 0x4e8   :  { %8344 = vst [vmem:[#allocation2 + $0x1260] sm:$0xff] %v4979_v34  ;;  %v9240_v40 = vadd.f32 %v9239_v52, %v4979_v34  ;;  %v4564_v16 = vpop.f32.mrf.mxu0 }
 0x4e9   :  { %8281 = vst [vmem:[#allocation2 + $0x1068] sm:$0xff] %v4564_v16  ;;  %v9269_v22 = vadd.f32 %v15493_v51, %v4564_v16  ;;  %v5188_v23 = vpop.f32.mrf.mxu3 }
 0x4ea   :  { %8376 = vst [vmem:[#allocation2 + $0x1360] sm:$0xff] %v5188_v23  ;;  %v16094_v2 = vadd.f32 %v9240_v40, %v5188_v23  ;;  %v4773_v55 = vpop.f32.mrf.mxu1 }
 0x4eb   :  { %8313 = vst [vmem:[#allocation2 + $0x1168] sm:$0xff] %v4773_v55  ;;  %11504 = vmatmul.msk.f32.gmra.mxu0 %vm1067_vm0, %v552_v18  ;;  %v9270_v9 = vadd.f32 %v9269_v22, %v4773_v55  ;;  %v651_v18 = vld [vmem:[%s19765_s0 + $0x1400] sm:$0xff] }
 0x4ec   :  { %11568 = vmatmul.msk.f32.gmra.mxu2 %vm1067_vm0, %v616_v19  ;;  %v715_v19 = vld [vmem:[%s19765_s0 + $0x1600] sm:$0xff] }
 0x4ed   :  { %11536 = vmatmul.msk.f32.gmra.mxu1 %vm1067_vm0, %v584_v8 }
 0x4ee   :  { %11600 = vmatmul.msk.f32.gmra.mxu3 %vm1067_vm0, %v648_v29  ;;  %v683_v29 = vld [vmem:[%s19765_s0 + $0x1500] sm:$0xff] }
 0x4ef   :  { %v4982_v51 = vpop.f32.mrf.mxu2 }
 0x4f0   :  { %8345 = vst [vmem:[#allocation2 + $0x1268] sm:$0xff] %v4982_v51  ;;  %v9271_v56 = vadd.f32 %v9270_v9, %v4982_v51  ;;  %v4567_v42 = vpop.f32.mrf.mxu0  ;;  %v747_v9 = vld [vmem:[%s19765_s0 + $0x1700] sm:$0xff] }
 0x4f1   :  { %8282 = vst [vmem:[#allocation2 + $0x1070] sm:$0xff] %v4567_v42  ;;  %v9300_v45 = vadd.f32 %v15512_v14, %v4567_v42  ;;  %v5191_v46 = vpop.f32.mrf.mxu3 }
 0x4f2   :  { %8377 = vst [vmem:[#allocation2 + $0x1368] sm:$0xff] %v5191_v46  ;;  %v16113_v15 = vadd.f32 %v9271_v56, %v5191_v46  ;;  %v4776_v11 = vpop.f32.mrf.mxu1 }
 0x4f3   :  { %8314 = vst [vmem:[#allocation2 + $0x1170] sm:$0xff] %v4776_v11  ;;  %11505 = vmatmul.msk.f32.gmra.mxu0 %vm1067_vm0, %v553_v38  ;;  %v9301_v25 = vadd.f32 %v9300_v45, %v4776_v11  ;;  %v652_v38 = vld [vmem:[%s19765_s0 + $0x1408] sm:$0xff] }
 0x4f4   :  { %11569 = vmatmul.msk.f32.gmra.mxu2 %vm1067_vm0, %v617_v41  ;;  %v716_v41 = vld [vmem:[%s19765_s0 + $0x1608] sm:$0xff] }
 0x4f5   :  { %11537 = vmatmul.msk.f32.gmra.mxu1 %vm1067_vm0, %v585_v13 }
 0x4f6   :  { %11601 = vmatmul.msk.f32.gmra.mxu3 %vm1067_vm0, %v649_v44  ;;  %v684_v44 = vld [vmem:[%s19765_s0 + $0x1508] sm:$0xff] }
 0x4f7   :  { %v4985_v14 = vpop.f32.mrf.mxu2 }
 0x4f8   :  { %8346 = vst [vmem:[#allocation2 + $0x1270] sm:$0xff] %v4985_v14  ;;  %v9302_v7 = vadd.f32 %v9301_v25, %v4985_v14  ;;  %v4570_v61 = vpop.f32.mrf.mxu0  ;;  %v748_v25 = vld [vmem:[%s19765_s0 + $0x1708] sm:$0xff] }
 0x4f9   :  { %8283 = vst [vmem:[#allocation2 + $0x1078] sm:$0xff] %v4570_v61  ;;  %v9331_v3 = vadd.f32 %v15531_v24, %v4570_v61  ;;  %v5194_v33 = vpop.f32.mrf.mxu3 }
 0x4fa   :  { %8378 = vst [vmem:[#allocation2 + $0x1370] sm:$0xff] %v5194_v33  ;;  %v16132_v52 = vadd.f32 %v9302_v7, %v5194_v33  ;;  %v4779_v34 = vpop.f32.mrf.mxu1 }
 0x4fb   :  { %8315 = vst [vmem:[#allocation2 + $0x1178] sm:$0xff] %v4779_v34  ;;  %11506 = vmatmul.msk.f32.gmra.mxu0 %vm1067_vm0, %v554_v63  ;;  %v9332_v40 = vadd.f32 %v9331_v3, %v4779_v34  ;;  %v653_v63 = vld [vmem:[%s19765_s0 + $0x1410] sm:$0xff] }
 0x4fc   :  { %11570 = vmatmul.msk.f32.gmra.mxu2 %vm1067_vm0, %v618_v0  ;;  %v717_v0 = vld [vmem:[%s19765_s0 + $0x1610] sm:$0xff] }
 0x4fd   :  { %11538 = vmatmul.msk.f32.gmra.mxu1 %vm1067_vm0, %v586_v35 }
 0x4fe   :  { %11602 = vmatmul.msk.f32.gmra.mxu3 %vm1067_vm0, %v650_v58  ;;  %v685_v58 = vld [vmem:[%s19765_s0 + $0x1510] sm:$0xff] }
 0x4ff   :  { %v4988_v24 = vpop.f32.mrf.mxu2 }
 0x500   :  { %8347 = vst [vmem:[#allocation2 + $0x1278] sm:$0xff] %v4988_v24  ;;  %v9333_v26 = vadd.f32 %v9332_v40, %v4988_v24  ;;  %v4573_v16 = vpop.f32.mrf.mxu0  ;;  %v749_v40 = vld [vmem:[%s19765_s0 + $0x1710] sm:$0xff] }
 0x501   :  { %8284 = vst [vmem:[#allocation2 + $0x1080] sm:$0xff] %v4573_v16  ;;  %v9362_v22 = vadd.f32 %v15550_v1, %v4573_v16  ;;  %v5197_v23 = vpop.f32.mrf.mxu3 }
 0x502   :  { %8379 = vst [vmem:[#allocation2 + $0x1378] sm:$0xff] %v5197_v23  ;;  %v16151_v55 = vadd.f32 %v9333_v26, %v5197_v23  ;;  %v4782_v8 = vpop.f32.mrf.mxu1 }
 0x503   :  { %8316 = vst [vmem:[#allocation2 + $0x1180] sm:$0xff] %v4782_v8  ;;  %11603 = vmatmul.msk.f32.vlgmr.msrb.gmra.mxu0 %vm1067_vm0, %v651_v18  ;;  %v9363_v51 = vadd.f32 %v9362_v22, %v4782_v8  ;;  %v654_v18 = vld [vmem:[%s19765_s0 + $0x1418] sm:$0xff] }
 0x504   :  { %11667 = vmatmul.msk.f32.vlgmr.msrb.gmra.mxu2 %vm1067_vm0, %v715_v19  ;;  %v718_v19 = vld [vmem:[%s19765_s0 + $0x1618] sm:$0xff] }
 0x505   :  { %11635 = vmatmul.msk.f32.vlgmr.msrb.gmra.mxu1 %vm1067_vm0, %v683_v29 }
 0x506   :  { %11699 = vmatmul.msk.f32.vlgmr.msrb.gmra.mxu3 %vm1067_vm0, %v747_v9  ;;  %v686_v9 = vld [vmem:[%s19765_s0 + $0x1518] sm:$0xff] }
 0x507   :  { %v4991_v1 = vpop.f32.mrf.mxu2 }
 0x508   :  { %8348 = vst [vmem:[#allocation2 + $0x1280] sm:$0xff] %v4991_v1  ;;  %v9364_v56 = vadd.f32 %v9363_v51, %v4991_v1  ;;  %v4576_v42 = vpop.f32.mrf.mxu0  ;;  %v750_v51 = vld [vmem:[%s19765_s0 + $0x1718] sm:$0xff] }
 0x509   :  { %8285 = vst [vmem:[#allocation2 + $0x1088] sm:$0xff] %v4576_v42  ;;  %v9393_v45 = vadd.f32 %v15569_v12, %v4576_v42  ;;  %v5200_v46 = vpop.f32.mrf.mxu3 }
 0x50a   :  { %8380 = vst [vmem:[#allocation2 + $0x1380] sm:$0xff] %v5200_v46  ;;  %v16170_v11 = vadd.f32 %v9364_v56, %v5200_v46  ;;  %v4785_v13 = vpop.f32.mrf.mxu1 }
 0x50b   :  { %8317 = vst [vmem:[#allocation2 + $0x1188] sm:$0xff] %v4785_v13  ;;  %11604 = vmatmul.msk.f32.gmra.mxu0 %vm1067_vm0, %v652_v38  ;;  %v9394_v14 = vadd.f32 %v9393_v45, %v4785_v13  ;;  %v655_v38 = vld [vmem:[%s19765_s0 + $0x1420] sm:$0xff] }
 0x50c   :  { %11668 = vmatmul.msk.f32.gmra.mxu2 %vm1067_vm0, %v716_v41  ;;  %v719_v41 = vld [vmem:[%s19765_s0 + $0x1620] sm:$0xff] }
 0x50d   :  { %11636 = vmatmul.msk.f32.gmra.mxu1 %vm1067_vm0, %v684_v44 }
 0x50e   :  { %11700 = vmatmul.msk.f32.gmra.mxu3 %vm1067_vm0, %v748_v25  ;;  %v687_v25 = vld [vmem:[%s19765_s0 + $0x1520] sm:$0xff] }
 0x50f   :  { %v4994_v12 = vpop.f32.mrf.mxu2 }
 0x510   :  { %8349 = vst [vmem:[#allocation2 + $0x1288] sm:$0xff] %v4994_v12  ;;  %v9395_v7 = vadd.f32 %v9394_v14, %v4994_v12  ;;  %v4579_v61 = vpop.f32.mrf.mxu0  ;;  %v751_v14 = vld [vmem:[%s19765_s0 + $0x1720] sm:$0xff] }
 0x511   :  { %8286 = vst [vmem:[#allocation2 + $0x1090] sm:$0xff] %v4579_v61  ;;  %v9424_v3 = vadd.f32 %v15588_v39, %v4579_v61  ;;  %v5203_v33 = vpop.f32.mrf.mxu3 }
 0x512   :  { %8381 = vst [vmem:[#allocation2 + $0x1388] sm:$0xff] %v5203_v33  ;;  %v16189_v34 = vadd.f32 %v9395_v7, %v5203_v33  ;;  %v4788_v35 = vpop.f32.mrf.mxu1 }
 0x513   :  { %8318 = vst [vmem:[#allocation2 + $0x1190] sm:$0xff] %v4788_v35  ;;  %11605 = vmatmul.msk.f32.gmra.mxu0 %vm1067_vm0, %v653_v63  ;;  %v9425_v24 = vadd.f32 %v9424_v3, %v4788_v35  ;;  %v656_v63 = vld [vmem:[%s19765_s0 + $0x1428] sm:$0xff] }
 0x514   :  { %11669 = vmatmul.msk.f32.gmra.mxu2 %vm1067_vm0, %v717_v0  ;;  %v720_v0 = vld [vmem:[%s19765_s0 + $0x1628] sm:$0xff] }
 0x515   :  { %11637 = vmatmul.msk.f32.gmra.mxu1 %vm1067_vm0, %v685_v58 }
 0x516   :  { %11701 = vmatmul.msk.f32.gmra.mxu3 %vm1067_vm0, %v749_v40  ;;  %v688_v40 = vld [vmem:[%s19765_s0 + $0x1528] sm:$0xff] }
 0x517   :  { %v4997_v39 = vpop.f32.mrf.mxu2 }
 0x518   :  { %8350 = vst [vmem:[#allocation2 + $0x1290] sm:$0xff] %v4997_v39  ;;  %v9426_v26 = vadd.f32 %v9425_v24, %v4997_v39  ;;  %v4582_v16 = vpop.f32.mrf.mxu0  ;;  %v752_v24 = vld [vmem:[%s19765_s0 + $0x1728] sm:$0xff] }
 0x519   :  { %8287 = vst [vmem:[#allocation2 + $0x1098] sm:$0xff] %v4582_v16  ;;  %v9455_v22 = vadd.f32 %v15607_v36, %v4582_v16  ;;  %v5206_v23 = vpop.f32.mrf.mxu3 }
 0x51a   :  { %8382 = vst [vmem:[#allocation2 + $0x1390] sm:$0xff] %v5206_v23  ;;  %v16208_v8 = vadd.f32 %v9426_v26, %v5206_v23  ;;  %v4791_v29 = vpop.f32.mrf.mxu1 }
 0x51b   :  { %8319 = vst [vmem:[#allocation2 + $0x1198] sm:$0xff] %v4791_v29  ;;  %11606 = vmatmul.msk.f32.gmra.mxu0 %vm1067_vm0, %v654_v18  ;;  %v9456_v1 = vadd.f32 %v9455_v22, %v4791_v29  ;;  %v657_v18 = vld [vmem:[%s19765_s0 + $0x1430] sm:$0xff] }
 0x51c   :  { %11670 = vmatmul.msk.f32.gmra.mxu2 %vm1067_vm0, %v718_v19  ;;  %v721_v19 = vld [vmem:[%s19765_s0 + $0x1630] sm:$0xff] }
 0x51d   :  { %11638 = vmatmul.msk.f32.gmra.mxu1 %vm1067_vm0, %v686_v9 }
 0x51e   :  { %11702 = vmatmul.msk.f32.gmra.mxu3 %vm1067_vm0, %v750_v51  ;;  %v689_v51 = vld [vmem:[%s19765_s0 + $0x1530] sm:$0xff] }
 0x51f   :  { %v5000_v36 = vpop.f32.mrf.mxu2 }
 0x520   :  { %8351 = vst [vmem:[#allocation2 + $0x1298] sm:$0xff] %v5000_v36  ;;  %v9457_v56 = vadd.f32 %v9456_v1, %v5000_v36  ;;  %v4585_v42 = vpop.f32.mrf.mxu0  ;;  %v753_v1 = vld [vmem:[%s19765_s0 + $0x1730] sm:$0xff] }
 0x521   :  { %8288 = vst [vmem:[#allocation2 + $0x10a0] sm:$0xff] %v4585_v42  ;;  %v9486_v45 = vadd.f32 %v15626_v48, %v4585_v42  ;;  %v5209_v46 = vpop.f32.mrf.mxu3 }
 0x522   :  { %8383 = vst [vmem:[#allocation2 + $0x1398] sm:$0xff] %v5209_v46  ;;  %v16227_v13 = vadd.f32 %v9457_v56, %v5209_v46  ;;  %v4794_v44 = vpop.f32.mrf.mxu1 }
 0x523   :  { %8320 = vst [vmem:[#allocation2 + $0x11a0] sm:$0xff] %v4794_v44  ;;  %11607 = vmatmul.msk.f32.gmra.mxu0 %vm1067_vm0, %v655_v38  ;;  %v9487_v12 = vadd.f32 %v9486_v45, %v4794_v44  ;;  %v658_v38 = vld [vmem:[%s19765_s0 + $0x1438] sm:$0xff] }
 0x524   :  { %11671 = vmatmul.msk.f32.gmra.mxu2 %vm1067_vm0, %v719_v41  ;;  %v722_v41 = vld [vmem:[%s19765_s0 + $0x1638] sm:$0xff] }
 0x525   :  { %11639 = vmatmul.msk.f32.gmra.mxu1 %vm1067_vm0, %v687_v25 }
 0x526   :  { %11703 = vmatmul.msk.f32.gmra.mxu3 %vm1067_vm0, %v751_v14  ;;  %v690_v14 = vld [vmem:[%s19765_s0 + $0x1538] sm:$0xff] }
 0x527   :  { %v5003_v48 = vpop.f32.mrf.mxu2 }
 0x528   :  { %8352 = vst [vmem:[#allocation2 + $0x12a0] sm:$0xff] %v5003_v48  ;;  %v9488_v7 = vadd.f32 %v9487_v12, %v5003_v48  ;;  %v4588_v61 = vpop.f32.mrf.mxu0  ;;  %v754_v12 = vld [vmem:[%s19765_s0 + $0x1738] sm:$0xff] }
 0x529   :  { %8289 = vst [vmem:[#allocation2 + $0x10a8] sm:$0xff] %v4588_v61  ;;  %v9517_v3 = vadd.f32 %v15645_v6, %v4588_v61  ;;  %v5212_v33 = vpop.f32.mrf.mxu3 }
 0x52a   :  { %8384 = vst [vmem:[#allocation2 + $0x13a0] sm:$0xff] %v5212_v33  ;;  %v16246_v35 = vadd.f32 %v9488_v7, %v5212_v33  ;;  %v4797_v58 = vpop.f32.mrf.mxu1 }
 0x52b   :  { %8321 = vst [vmem:[#allocation2 + $0x11a8] sm:$0xff] %v4797_v58  ;;  %11608 = vmatmul.msk.f32.gmra.mxu0 %vm1067_vm0, %v656_v63  ;;  %v9518_v39 = vadd.f32 %v9517_v3, %v4797_v58  ;;  %v659_v63 = vld [vmem:[%s19765_s0 + $0x1440] sm:$0xff] }
 0x52c   :  { %11672 = vmatmul.msk.f32.gmra.mxu2 %vm1067_vm0, %v720_v0  ;;  %v723_v0 = vld [vmem:[%s19765_s0 + $0x1640] sm:$0xff] }
 0x52d   :  { %11640 = vmatmul.msk.f32.gmra.mxu1 %vm1067_vm0, %v688_v40 }
 0x52e   :  { %11704 = vmatmul.msk.f32.gmra.mxu3 %vm1067_vm0, %v752_v24  ;;  %v691_v24 = vld [vmem:[%s19765_s0 + $0x1540] sm:$0xff] }
 0x52f   :  { %v5006_v6 = vpop.f32.mrf.mxu2 }
 0x530   :  { %8353 = vst [vmem:[#allocation2 + $0x12a8] sm:$0xff] %v5006_v6  ;;  %v9519_v26 = vadd.f32 %v9518_v39, %v5006_v6  ;;  %v4591_v16 = vpop.f32.mrf.mxu0  ;;  %v755_v39 = vld [vmem:[%s19765_s0 + $0x1740] sm:$0xff] }
 0x531   :  { %8290 = vst [vmem:[#allocation2 + $0x10b0] sm:$0xff] %v4591_v16  ;;  %v9548_v22 = vadd.f32 %v15664_v30, %v4591_v16  ;;  %v5215_v23 = vpop.f32.mrf.mxu3 }
 0x532   :  { %8385 = vst [vmem:[#allocation2 + $0x13a8] sm:$0xff] %v5215_v23  ;;  %v16265_v29 = vadd.f32 %v9519_v26, %v5215_v23  ;;  %v4800_v9 = vpop.f32.mrf.mxu1 }
 0x533   :  { %8322 = vst [vmem:[#allocation2 + $0x11b0] sm:$0xff] %v4800_v9  ;;  %11609 = vmatmul.msk.f32.gmra.mxu0 %vm1067_vm0, %v657_v18  ;;  %v9549_v36 = vadd.f32 %v9548_v22, %v4800_v9  ;;  %v660_v18 = vld [vmem:[%s19765_s0 + $0x1448] sm:$0xff] }
 0x534   :  { %11673 = vmatmul.msk.f32.gmra.mxu2 %vm1067_vm0, %v721_v19  ;;  %v724_v19 = vld [vmem:[%s19765_s0 + $0x1648] sm:$0xff] }
 0x535   :  { %11641 = vmatmul.msk.f32.gmra.mxu1 %vm1067_vm0, %v689_v51 }
 0x536   :  { %11705 = vmatmul.msk.f32.gmra.mxu3 %vm1067_vm0, %v753_v1  ;;  %v692_v1 = vld [vmem:[%s19765_s0 + $0x1548] sm:$0xff] }
 0x537   :  { %v5009_v30 = vpop.f32.mrf.mxu2 }
 0x538   :  { %8354 = vst [vmem:[#allocation2 + $0x12b0] sm:$0xff] %v5009_v30  ;;  %v9550_v56 = vadd.f32 %v9549_v36, %v5009_v30  ;;  %v4594_v42 = vpop.f32.mrf.mxu0  ;;  %v756_v36 = vld [vmem:[%s19765_s0 + $0x1748] sm:$0xff] }
 0x539   :  { %8291 = vst [vmem:[#allocation2 + $0x10b8] sm:$0xff] %v4594_v42  ;;  %v9579_v45 = vadd.f32 %v15683_v50, %v4594_v42  ;;  %v5218_v46 = vpop.f32.mrf.mxu3 }
 0x53a   :  { %8386 = vst [vmem:[#allocation2 + $0x13b0] sm:$0xff] %v5218_v46  ;;  %v16284_v44 = vadd.f32 %v9550_v56, %v5218_v46  ;;  %v4803_v25 = vpop.f32.mrf.mxu1 }
 0x53b   :  { %8323 = vst [vmem:[#allocation2 + $0x11b8] sm:$0xff] %v4803_v25  ;;  %11610 = vmatmul.msk.f32.gmra.mxu0 %vm1067_vm0, %v658_v38  ;;  %v9580_v48 = vadd.f32 %v9579_v45, %v4803_v25  ;;  %v661_v38 = vld [vmem:[%s19765_s0 + $0x1450] sm:$0xff] }
 0x53c   :  { %11674 = vmatmul.msk.f32.gmra.mxu2 %vm1067_vm0, %v722_v41  ;;  %v725_v41 = vld [vmem:[%s19765_s0 + $0x1650] sm:$0xff] }
 0x53d   :  { %11642 = vmatmul.msk.f32.gmra.mxu1 %vm1067_vm0, %v690_v14 }
 0x53e   :  { %11706 = vmatmul.msk.f32.gmra.mxu3 %vm1067_vm0, %v754_v12  ;;  %v693_v12 = vld [vmem:[%s19765_s0 + $0x1550] sm:$0xff] }
 0x53f   :  { %v5012_v50 = vpop.f32.mrf.mxu2 }
 0x540   :  { %8355 = vst [vmem:[#allocation2 + $0x12b8] sm:$0xff] %v5012_v50  ;;  %v9581_v7 = vadd.f32 %v9580_v48, %v5012_v50  ;;  %v4597_v61 = vpop.f32.mrf.mxu0  ;;  %v757_v48 = vld [vmem:[%s19765_s0 + $0x1750] sm:$0xff] }
 0x541   :  { %8292 = vst [vmem:[#allocation2 + $0x10c0] sm:$0xff] %v4597_v61  ;;  %v9610_v3 = vadd.f32 %v15702_v10, %v4597_v61  ;;  %v5221_v33 = vpop.f32.mrf.mxu3 }
 0x542   :  { %8387 = vst [vmem:[#allocation2 + $0x13b8] sm:$0xff] %v5221_v33  ;;  %v16303_v58 = vadd.f32 %v9581_v7, %v5221_v33  ;;  %v4806_v40 = vpop.f32.mrf.mxu1 }
 0x543   :  { %8324 = vst [vmem:[#allocation2 + $0x11c0] sm:$0xff] %v4806_v40  ;;  %11611 = vmatmul.msk.f32.gmra.mxu0 %vm1067_vm0, %v659_v63  ;;  %v9611_v6 = vadd.f32 %v9610_v3, %v4806_v40  ;;  %v662_v63 = vld [vmem:[%s19765_s0 + $0x1458] sm:$0xff] }
 0x544   :  { %11675 = vmatmul.msk.f32.gmra.mxu2 %vm1067_vm0, %v723_v0  ;;  %v726_v0 = vld [vmem:[%s19765_s0 + $0x1658] sm:$0xff] }
 0x545   :  { %11643 = vmatmul.msk.f32.gmra.mxu1 %vm1067_vm0, %v691_v24 }
 0x546   :  { %11707 = vmatmul.msk.f32.gmra.mxu3 %vm1067_vm0, %v755_v39  ;;  %v694_v39 = vld [vmem:[%s19765_s0 + $0x1558] sm:$0xff] }
 0x547   :  { %v5015_v10 = vpop.f32.mrf.mxu2 }
 0x548   :  { %8356 = vst [vmem:[#allocation2 + $0x12c0] sm:$0xff] %v5015_v10  ;;  %v9612_v26 = vadd.f32 %v9611_v6, %v5015_v10  ;;  %v4600_v16 = vpop.f32.mrf.mxu0  ;;  %v758_v6 = vld [vmem:[%s19765_s0 + $0x1758] sm:$0xff] }
 0x549   :  { %8293 = vst [vmem:[#allocation2 + $0x10c8] sm:$0xff] %v4600_v16  ;;  %v9641_v22 = vadd.f32 %v15721_v31, %v4600_v16  ;;  %v5224_v23 = vpop.f32.mrf.mxu3 }
 0x54a   :  { %8388 = vst [vmem:[#allocation2 + $0x13c0] sm:$0xff] %v5224_v23  ;;  %v16322_v9 = vadd.f32 %v9612_v26, %v5224_v23  ;;  %v4809_v51 = vpop.f32.mrf.mxu1 }
 0x54b   :  { %8325 = vst [vmem:[#allocation2 + $0x11c8] sm:$0xff] %v4809_v51  ;;  %11612 = vmatmul.msk.f32.gmra.mxu0 %vm1067_vm0, %v660_v18  ;;  %v9642_v30 = vadd.f32 %v9641_v22, %v4809_v51  ;;  %v663_v18 = vld [vmem:[%s19765_s0 + $0x1460] sm:$0xff] }
 0x54c   :  { %11676 = vmatmul.msk.f32.gmra.mxu2 %vm1067_vm0, %v724_v19  ;;  %v727_v19 = vld [vmem:[%s19765_s0 + $0x1660] sm:$0xff] }
 0x54d   :  { %11644 = vmatmul.msk.f32.gmra.mxu1 %vm1067_vm0, %v692_v1 }
 0x54e   :  { %11708 = vmatmul.msk.f32.gmra.mxu3 %vm1067_vm0, %v756_v36  ;;  %v695_v36 = vld [vmem:[%s19765_s0 + $0x1560] sm:$0xff] }
 0x54f   :  { %v5018_v31 = vpop.f32.mrf.mxu2 }
 0x550   :  { %8357 = vst [vmem:[#allocation2 + $0x12c8] sm:$0xff] %v5018_v31  ;;  %v9643_v56 = vadd.f32 %v9642_v30, %v5018_v31  ;;  %v4603_v42 = vpop.f32.mrf.mxu0  ;;  %v759_v30 = vld [vmem:[%s19765_s0 + $0x1760] sm:$0xff] }
 0x551   :  { %8294 = vst [vmem:[#allocation2 + $0x10d0] sm:$0xff] %v4603_v42  ;;  %v9672_v45 = vadd.f32 %v15740_v53, %v4603_v42  ;;  %v5227_v46 = vpop.f32.mrf.mxu3 }
 0x552   :  { %8389 = vst [vmem:[#allocation2 + $0x13c8] sm:$0xff] %v5227_v46  ;;  %v16341_v25 = vadd.f32 %v9643_v56, %v5227_v46  ;;  %v4812_v14 = vpop.f32.mrf.mxu1 }
 0x553   :  { %8326 = vst [vmem:[#allocation2 + $0x11d0] sm:$0xff] %v4812_v14  ;;  %11613 = vmatmul.msk.f32.gmra.mxu0 %vm1067_vm0, %v661_v38  ;;  %v9673_v50 = vadd.f32 %v9672_v45, %v4812_v14  ;;  %v664_v38 = vld [vmem:[%s19765_s0 + $0x1468] sm:$0xff] }
 0x554   :  { %11677 = vmatmul.msk.f32.gmra.mxu2 %vm1067_vm0, %v725_v41  ;;  %v728_v41 = vld [vmem:[%s19765_s0 + $0x1668] sm:$0xff] }
 0x555   :  { %11645 = vmatmul.msk.f32.gmra.mxu1 %vm1067_vm0, %v693_v12 }
 0x556   :  { %11709 = vmatmul.msk.f32.gmra.mxu3 %vm1067_vm0, %v757_v48  ;;  %v696_v48 = vld [vmem:[%s19765_s0 + $0x1568] sm:$0xff] }
 0x557   :  { %v5021_v53 = vpop.f32.mrf.mxu2 }
 0x558   :  { %8358 = vst [vmem:[#allocation2 + $0x12d0] sm:$0xff] %v5021_v53  ;;  %v9674_v7 = vadd.f32 %v9673_v50, %v5021_v53  ;;  %v4606_v61 = vpop.f32.mrf.mxu0  ;;  %v760_v50 = vld [vmem:[%s19765_s0 + $0x1768] sm:$0xff] }
 0x559   :  { %8295 = vst [vmem:[#allocation2 + $0x10d8] sm:$0xff] %v4606_v61  ;;  %v9703_v3 = vadd.f32 %v15759_v37, %v4606_v61  ;;  %v5230_v33 = vpop.f32.mrf.mxu3 }
 0x55a   :  { %8390 = vst [vmem:[#allocation2 + $0x13d0] sm:$0xff] %v5230_v33  ;;  %v16360_v40 = vadd.f32 %v9674_v7, %v5230_v33  ;;  %v4815_v24 = vpop.f32.mrf.mxu1 }
 0x55b   :  { %8327 = vst [vmem:[#allocation2 + $0x11d8] sm:$0xff] %v4815_v24  ;;  %11614 = vmatmul.msk.f32.gmra.mxu0 %vm1067_vm0, %v662_v63  ;;  %v9704_v10 = vadd.f32 %v9703_v3, %v4815_v24  ;;  %v665_v63 = vld [vmem:[%s19765_s0 + $0x1470] sm:$0xff] }
 0x55c   :  { %11678 = vmatmul.msk.f32.gmra.mxu2 %vm1067_vm0, %v726_v0  ;;  %v729_v0 = vld [vmem:[%s19765_s0 + $0x1670] sm:$0xff] }
 0x55d   :  { %11646 = vmatmul.msk.f32.gmra.mxu1 %vm1067_vm0, %v694_v39 }
 0x55e   :  { %11710 = vmatmul.msk.f32.gmra.mxu3 %vm1067_vm0, %v758_v6  ;;  %v697_v6 = vld [vmem:[%s19765_s0 + $0x1570] sm:$0xff] }
 0x55f   :  { %v5024_v37 = vpop.f32.mrf.mxu2 }
 0x560   :  { %8359 = vst [vmem:[#allocation2 + $0x12d8] sm:$0xff] %v5024_v37  ;;  %v9705_v26 = vadd.f32 %v9704_v10, %v5024_v37  ;;  %v4609_v16 = vpop.f32.mrf.mxu0  ;;  %v761_v10 = vld [vmem:[%s19765_s0 + $0x1770] sm:$0xff] }
 0x561   :  { %8296 = vst [vmem:[#allocation2 + $0x10e0] sm:$0xff] %v4609_v16  ;;  %v9734_v22 = vadd.f32 %v15778_v57, %v4609_v16  ;;  %v5233_v23 = vpop.f32.mrf.mxu3 }
 0x562   :  { %8391 = vst [vmem:[#allocation2 + $0x13d8] sm:$0xff] %v5233_v23  ;;  %v16379_v51 = vadd.f32 %v9705_v26, %v5233_v23  ;;  %v4818_v1 = vpop.f32.mrf.mxu1 }
 0x563   :  { %8328 = vst [vmem:[#allocation2 + $0x11e0] sm:$0xff] %v4818_v1  ;;  %11615 = vmatmul.msk.f32.gmra.mxu0 %vm1067_vm0, %v663_v18  ;;  %v9735_v31 = vadd.f32 %v9734_v22, %v4818_v1  ;;  %v666_v18 = vld [vmem:[%s19765_s0 + $0x1478] sm:$0xff] }
 0x564   :  { %11679 = vmatmul.msk.f32.gmra.mxu2 %vm1067_vm0, %v727_v19  ;;  %v730_v19 = vld [vmem:[%s19765_s0 + $0x1678] sm:$0xff] }
 0x565   :  { %11647 = vmatmul.msk.f32.gmra.mxu1 %vm1067_vm0, %v695_v36 }
 0x566   :  { %11711 = vmatmul.msk.f32.gmra.mxu3 %vm1067_vm0, %v759_v30  ;;  %v698_v30 = vld [vmem:[%s19765_s0 + $0x1578] sm:$0xff] }
 0x567   :  { %v5027_v57 = vpop.f32.mrf.mxu2 }
 0x568   :  { %8360 = vst [vmem:[#allocation2 + $0x12e0] sm:$0xff] %v5027_v57  ;;  %v9736_v56 = vadd.f32 %v9735_v31, %v5027_v57  ;;  %v4612_v42 = vpop.f32.mrf.mxu0  ;;  %v762_v31 = vld [vmem:[%s19765_s0 + $0x1778] sm:$0xff] }
 0x569   :  { %8297 = vst [vmem:[#allocation2 + $0x10e8] sm:$0xff] %v4612_v42  ;;  %v9765_v45 = vadd.f32 %v15797_v47, %v4612_v42  ;;  %v5236_v46 = vpop.f32.mrf.mxu3 }
 0x56a   :  { %8392 = vst [vmem:[#allocation2 + $0x13e0] sm:$0xff] %v5236_v46  ;;  %v16398_v14 = vadd.f32 %v9736_v56, %v5236_v46  ;;  %v4821_v12 = vpop.f32.mrf.mxu1 }
 0x56b   :  { %8329 = vst [vmem:[#allocation2 + $0x11e8] sm:$0xff] %v4821_v12  ;;  %11616 = vmatmul.msk.f32.gmra.mxu0 %vm1067_vm0, %v664_v38  ;;  %v9766_v53 = vadd.f32 %v9765_v45, %v4821_v12  ;;  %v667_v38 = vld [vmem:[%s19765_s0 + $0x1480] sm:$0xff] }
 0x56c   :  { %11680 = vmatmul.msk.f32.gmra.mxu2 %vm1067_vm0, %v728_v41  ;;  %v731_v41 = vld [vmem:[%s19765_s0 + $0x1680] sm:$0xff] }
 0x56d   :  { %11648 = vmatmul.msk.f32.gmra.mxu1 %vm1067_vm0, %v696_v48 }
 0x56e   :  { %11712 = vmatmul.msk.f32.gmra.mxu3 %vm1067_vm0, %v760_v50  ;;  %v699_v50 = vld [vmem:[%s19765_s0 + $0x1580] sm:$0xff] }
 0x56f   :  { %v5030_v47 = vpop.f32.mrf.mxu2 }
 0x570   :  { %8361 = vst [vmem:[#allocation2 + $0x12e8] sm:$0xff] %v5030_v47  ;;  %v9767_v7 = vadd.f32 %v9766_v53, %v5030_v47  ;;  %v4615_v61 = vpop.f32.mrf.mxu0  ;;  %v763_v53 = vld [vmem:[%s19765_s0 + $0x1780] sm:$0xff] }
 0x571   :  { %8298 = vst [vmem:[#allocation2 + $0x10f0] sm:$0xff] %v4615_v61  ;;  %v9796_v3 = vadd.f32 %v15816_v4, %v4615_v61  ;;  %v5239_v33 = vpop.f32.mrf.mxu3 }
 0x572   :  { %8393 = vst [vmem:[#allocation2 + $0x13e8] sm:$0xff] %v5239_v33  ;;  %v16417_v24 = vadd.f32 %v9767_v7, %v5239_v33  ;;  %v4824_v39 = vpop.f32.mrf.mxu1 }
 0x573   :  { %8330 = vst [vmem:[#allocation2 + $0x11f0] sm:$0xff] %v4824_v39  ;;  %11617 = vmatmul.msk.f32.gmra.mxu0 %vm1067_vm0, %v665_v63  ;;  %v9797_v37 = vadd.f32 %v9796_v3, %v4824_v39  ;;  %v668_v63 = vld [vmem:[%s19765_s0 + $0x1488] sm:$0xff] }
 0x574   :  { %11681 = vmatmul.msk.f32.gmra.mxu2 %vm1067_vm0, %v729_v0  ;;  %v732_v0 = vld [vmem:[%s19765_s0 + $0x1688] sm:$0xff] }
 0x575   :  { %11649 = vmatmul.msk.f32.gmra.mxu1 %vm1067_vm0, %v697_v6 }
 0x576   :  { %11713 = vmatmul.msk.f32.gmra.mxu3 %vm1067_vm0, %v761_v10  ;;  %v700_v10 = vld [vmem:[%s19765_s0 + $0x1588] sm:$0xff] }
 0x577   :  { %v5033_v4 = vpop.f32.mrf.mxu2 }
 0x578   :  { %8362 = vst [vmem:[#allocation2 + $0x12f0] sm:$0xff] %v5033_v4  ;;  %v9798_v26 = vadd.f32 %v9797_v37, %v5033_v4  ;;  %v4618_v16 = vpop.f32.mrf.mxu0  ;;  %v764_v37 = vld [vmem:[%s19765_s0 + $0x1788] sm:$0xff] }
 0x579   :  { %8299 = vst [vmem:[#allocation2 + $0x10f8] sm:$0xff] %v4618_v16  ;;  %v9827_v22 = vadd.f32 %v15835_v27, %v4618_v16  ;;  %v5242_v23 = vpop.f32.mrf.mxu3 }
 0x57a   :  { %8394 = vst [vmem:[#allocation2 + $0x13f0] sm:$0xff] %v5242_v23  ;;  %v16436_v1 = vadd.f32 %v9798_v26, %v5242_v23  ;;  %v4827_v36 = vpop.f32.mrf.mxu1 }
 0x57b   :  { %8331 = vst [vmem:[#allocation2 + $0x11f8] sm:$0xff] %v4827_v36  ;;  %11618 = vmatmul.msk.f32.gmra.mxu0 %vm1067_vm0, %v666_v18  ;;  %v9828_v57 = vadd.f32 %v9827_v22, %v4827_v36  ;;  %v669_v18 = vld [vmem:[%s19765_s0 + $0x1490] sm:$0xff] }
 0x57c   :  { %11682 = vmatmul.msk.f32.gmra.mxu2 %vm1067_vm0, %v730_v19  ;;  %v733_v19 = vld [vmem:[%s19765_s0 + $0x1690] sm:$0xff] }
 0x57d   :  { %11650 = vmatmul.msk.f32.gmra.mxu1 %vm1067_vm0, %v698_v30 }
 0x57e   :  { %11714 = vmatmul.msk.f32.gmra.mxu3 %vm1067_vm0, %v762_v31  ;;  %v701_v31 = vld [vmem:[%s19765_s0 + $0x1590] sm:$0xff] }
 0x57f   :  { %v5036_v27 = vpop.f32.mrf.mxu2 }
 0x580   :  { %8363 = vst [vmem:[#allocation2 + $0x12f8] sm:$0xff] %v5036_v27  ;;  %v9829_v56 = vadd.f32 %v9828_v57, %v5036_v27  ;;  %v5361_v42 = vpop.f32.mrf.mxu0  ;;  %v765_v57 = vld [vmem:[%s19765_s0 + $0x1790] sm:$0xff] }
 0x581   :  { %v5245_v45 = vpop.f32.mrf.mxu3  ;;  %8396 = vst [vmem:[#allocation2 + $0x1400] sm:$0xff] %v5361_v42  ;;  %v8870_v46 = vadd.f32 %v15854_v49, %v5361_v42 }
 0x582   :  { %8395 = vst [vmem:[#allocation2 + $0x13f8] sm:$0xff] %v5245_v45  ;;  %v16455_v12 = vadd.f32 %v9829_v56, %v5245_v45  ;;  %v5570_v48 = vpop.f32.mrf.mxu1 }
 0x583   :  { %8428 = vst [vmem:[#allocation2 + $0x1500] sm:$0xff] %v5570_v48  ;;  %11619 = vmatmul.msk.f32.gmra.mxu0 %vm1067_vm0, %v667_v38  ;;  %v8871_v47 = vadd.f32 %v8870_v46, %v5570_v48  ;;  %v670_v38 = vld [vmem:[%s19765_s0 + $0x1498] sm:$0xff] }
 0x584   :  { %11683 = vmatmul.msk.f32.gmra.mxu2 %vm1067_vm0, %v731_v41  ;;  %v734_v41 = vld [vmem:[%s19765_s0 + $0x1698] sm:$0xff] }
 0x585   :  { %11651 = vmatmul.msk.f32.gmra.mxu1 %vm1067_vm0, %v699_v50 }
 0x586   :  { %11715 = vmatmul.msk.f32.gmra.mxu3 %vm1067_vm0, %v763_v53  ;;  %v702_v53 = vld [vmem:[%s19765_s0 + $0x1598] sm:$0xff] }
 0x587   :  { %v5779_v49 = vpop.f32.mrf.mxu2 }
 0x588   :  { %8460 = vst [vmem:[#allocation2 + $0x1600] sm:$0xff] %v5779_v49  ;;  %v8872_v7 = vadd.f32 %v8871_v47, %v5779_v49  ;;  %v5364_v61 = vpop.f32.mrf.mxu0  ;;  %v766_v47 = vld [vmem:[%s19765_s0 + $0x1798] sm:$0xff] }
 0x589   :  { %8397 = vst [vmem:[#allocation2 + $0x1408] sm:$0xff] %v5364_v61  ;;  %v8901_v3 = vadd.f32 %v15873_v5, %v5364_v61  ;;  %v5988_v33 = vpop.f32.mrf.mxu3 }
 0x58a   :  { %8492 = vst [vmem:[#allocation2 + $0x1700] sm:$0xff] %v5988_v33  ;;  %v16474_v39 = vadd.f32 %v8872_v7, %v5988_v33  ;;  %v5573_v6 = vpop.f32.mrf.mxu1 }
 0x58b   :  { %8429 = vst [vmem:[#allocation2 + $0x1508] sm:$0xff] %v5573_v6  ;;  %11620 = vmatmul.msk.f32.gmra.mxu0 %vm1067_vm0, %v668_v63  ;;  %v8902_v4 = vadd.f32 %v8901_v3, %v5573_v6  ;;  %v671_v63 = vld [vmem:[%s19765_s0 + $0x14a0] sm:$0xff] }
 0x58c   :  { %11684 = vmatmul.msk.f32.gmra.mxu2 %vm1067_vm0, %v732_v0  ;;  %v735_v0 = vld [vmem:[%s19765_s0 + $0x16a0] sm:$0xff] }
 0x58d   :  { %11652 = vmatmul.msk.f32.gmra.mxu1 %vm1067_vm0, %v700_v10 }
 0x58e   :  { %11716 = vmatmul.msk.f32.gmra.mxu3 %vm1067_vm0, %v764_v37  ;;  %v703_v37 = vld [vmem:[%s19765_s0 + $0x15a0] sm:$0xff] }
 0x58f   :  { %v5782_v5 = vpop.f32.mrf.mxu2 }
 0x590   :  { %8461 = vst [vmem:[#allocation2 + $0x1608] sm:$0xff] %v5782_v5  ;;  %v8903_v26 = vadd.f32 %v8902_v4, %v5782_v5  ;;  %v5367_v16 = vpop.f32.mrf.mxu0  ;;  %v767_v4 = vld [vmem:[%s19765_s0 + $0x17a0] sm:$0xff] }
 0x591   :  { %8398 = vst [vmem:[#allocation2 + $0x1410] sm:$0xff] %v5367_v16  ;;  %v8932_v22 = vadd.f32 %v15892_v28, %v5367_v16  ;;  %v5991_v23 = vpop.f32.mrf.mxu3 }
 0x592   :  { %8493 = vst [vmem:[#allocation2 + $0x1708] sm:$0xff] %v5991_v23  ;;  %v16493_v36 = vadd.f32 %v8903_v26, %v5991_v23  ;;  %v5576_v30 = vpop.f32.mrf.mxu1 }
 0x593   :  { %8430 = vst [vmem:[#allocation2 + $0x1510] sm:$0xff] %v5576_v30  ;;  %11621 = vmatmul.msk.f32.gmra.mxu0 %vm1067_vm0, %v669_v18  ;;  %v8933_v27 = vadd.f32 %v8932_v22, %v5576_v30  ;;  %v672_v18 = vld [vmem:[%s19765_s0 + $0x14a8] sm:$0xff] }
 0x594   :  { %11685 = vmatmul.msk.f32.gmra.mxu2 %vm1067_vm0, %v733_v19  ;;  %v736_v19 = vld [vmem:[%s19765_s0 + $0x16a8] sm:$0xff] }
 0x595   :  { %11653 = vmatmul.msk.f32.gmra.mxu1 %vm1067_vm0, %v701_v31 }
 0x596   :  { %11717 = vmatmul.msk.f32.gmra.mxu3 %vm1067_vm0, %v765_v57  ;;  %v704_v57 = vld [vmem:[%s19765_s0 + $0x15a8] sm:$0xff] }
 0x597   :  { %v5785_v28 = vpop.f32.mrf.mxu2 }
 0x598   :  { %8462 = vst [vmem:[#allocation2 + $0x1610] sm:$0xff] %v5785_v28  ;;  %v8934_v56 = vadd.f32 %v8933_v27, %v5785_v28  ;;  %v5370_v42 = vpop.f32.mrf.mxu0  ;;  %v768_v27 = vld [vmem:[%s19765_s0 + $0x17a8] sm:$0xff] }
 0x599   :  { %8399 = vst [vmem:[#allocation2 + $0x1418] sm:$0xff] %v5370_v42  ;;  %v8963_v45 = vadd.f32 %v15911_v59, %v5370_v42  ;;  %v5994_v46 = vpop.f32.mrf.mxu3 }
 0x59a   :  { %8494 = vst [vmem:[#allocation2 + $0x1710] sm:$0xff] %v5994_v46  ;;  %v16512_v48 = vadd.f32 %v8934_v56, %v5994_v46  ;;  %v5579_v50 = vpop.f32.mrf.mxu1 }
 0x59b   :  { %8431 = vst [vmem:[#allocation2 + $0x1518] sm:$0xff] %v5579_v50  ;;  %11622 = vmatmul.msk.f32.gmra.mxu0 %vm1067_vm0, %v670_v38  ;;  %v8964_v49 = vadd.f32 %v8963_v45, %v5579_v50  ;;  %v673_v38 = vld [vmem:[%s19765_s0 + $0x14b0] sm:$0xff] }
 0x59c   :  { %11686 = vmatmul.msk.f32.gmra.mxu2 %vm1067_vm0, %v734_v41  ;;  %v737_v41 = vld [vmem:[%s19765_s0 + $0x16b0] sm:$0xff] }
 0x59d   :  { %11654 = vmatmul.msk.f32.gmra.mxu1 %vm1067_vm0, %v702_v53 }
 0x59e   :  { %11718 = vmatmul.msk.f32.gmra.mxu3 %vm1067_vm0, %v766_v47  ;;  %v705_v47 = vld [vmem:[%s19765_s0 + $0x15b0] sm:$0xff] }
 0x59f   :  { %v5788_v59 = vpop.f32.mrf.mxu2 }
 0x5a0   :  { %8463 = vst [vmem:[#allocation2 + $0x1618] sm:$0xff] %v5788_v59  ;;  %v8965_v7 = vadd.f32 %v8964_v49, %v5788_v59  ;;  %v5373_v61 = vpop.f32.mrf.mxu0  ;;  %v769_v49 = vld [vmem:[%s19765_s0 + $0x17b0] sm:$0xff] }
 0x5a1   :  { %8400 = vst [vmem:[#allocation2 + $0x1420] sm:$0xff] %v5373_v61  ;;  %v8994_v3 = vadd.f32 %v15930_v17, %v5373_v61  ;;  %v5997_v33 = vpop.f32.mrf.mxu3 }
 0x5a2   :  { %8495 = vst [vmem:[#allocation2 + $0x1718] sm:$0xff] %v5997_v33  ;;  %v16531_v6 = vadd.f32 %v8965_v7, %v5997_v33  ;;  %v5582_v10 = vpop.f32.mrf.mxu1 }
 0x5a3   :  { %8432 = vst [vmem:[#allocation2 + $0x1520] sm:$0xff] %v5582_v10  ;;  %11623 = vmatmul.msk.f32.gmra.mxu0 %vm1067_vm0, %v671_v63  ;;  %v8995_v5 = vadd.f32 %v8994_v3, %v5582_v10  ;;  %v674_v63 = vld [vmem:[%s19765_s0 + $0x14b8] sm:$0xff] }
 0x5a4   :  { %11687 = vmatmul.msk.f32.gmra.mxu2 %vm1067_vm0, %v735_v0  ;;  %v738_v0 = vld [vmem:[%s19765_s0 + $0x16b8] sm:$0xff] }
 0x5a5   :  { %11655 = vmatmul.msk.f32.gmra.mxu1 %vm1067_vm0, %v703_v37 }
 0x5a6   :  { %11719 = vmatmul.msk.f32.gmra.mxu3 %vm1067_vm0, %v767_v4  ;;  %v706_v4 = vld [vmem:[%s19765_s0 + $0x15b8] sm:$0xff] }
 0x5a7   :  { %v5791_v17 = vpop.f32.mrf.mxu2 }
 0x5a8   :  { %8464 = vst [vmem:[#allocation2 + $0x1620] sm:$0xff] %v5791_v17  ;;  %v8996_v26 = vadd.f32 %v8995_v5, %v5791_v17  ;;  %v5376_v16 = vpop.f32.mrf.mxu0  ;;  %v770_v5 = vld [vmem:[%s19765_s0 + $0x17b8] sm:$0xff] }
 0x5a9   :  { %8401 = vst [vmem:[#allocation2 + $0x1428] sm:$0xff] %v5376_v16  ;;  %v9025_v22 = vadd.f32 %v15949_v21, %v5376_v16  ;;  %v6000_v23 = vpop.f32.mrf.mxu3 }
 0x5aa   :  { %8496 = vst [vmem:[#allocation2 + $0x1720] sm:$0xff] %v6000_v23  ;;  %v16550_v30 = vadd.f32 %v8996_v26, %v6000_v23  ;;  %v5585_v31 = vpop.f32.mrf.mxu1 }
 0x5ab   :  { %8433 = vst [vmem:[#allocation2 + $0x1528] sm:$0xff] %v5585_v31  ;;  %11624 = vmatmul.msk.f32.gmra.mxu0 %vm1067_vm0, %v672_v18  ;;  %v9026_v28 = vadd.f32 %v9025_v22, %v5585_v31  ;;  %v675_v18 = vld [vmem:[%s19765_s0 + $0x14c0] sm:$0xff] }
 0x5ac   :  { %11688 = vmatmul.msk.f32.gmra.mxu2 %vm1067_vm0, %v736_v19  ;;  %v739_v19 = vld [vmem:[%s19765_s0 + $0x16c0] sm:$0xff] }
 0x5ad   :  { %11656 = vmatmul.msk.f32.gmra.mxu1 %vm1067_vm0, %v704_v57 }
 0x5ae   :  { %11720 = vmatmul.msk.f32.gmra.mxu3 %vm1067_vm0, %v768_v27  ;;  %v707_v27 = vld [vmem:[%s19765_s0 + $0x15c0] sm:$0xff] }
 0x5af   :  { %v5794_v21 = vpop.f32.mrf.mxu2 }
 0x5b0   :  { %8465 = vst [vmem:[#allocation2 + $0x1628] sm:$0xff] %v5794_v21  ;;  %v9027_v56 = vadd.f32 %v9026_v28, %v5794_v21  ;;  %v5379_v42 = vpop.f32.mrf.mxu0  ;;  %v771_v28 = vld [vmem:[%s19765_s0 + $0x17c0] sm:$0xff] }
 0x5b1   :  { %8402 = vst [vmem:[#allocation2 + $0x1430] sm:$0xff] %v5379_v42  ;;  %v9056_v45 = vadd.f32 %v15968_v32, %v5379_v42  ;;  %v6003_v46 = vpop.f32.mrf.mxu3 }
 0x5b2   :  { %8497 = vst [vmem:[#allocation2 + $0x1728] sm:$0xff] %v6003_v46  ;;  %v16569_v50 = vadd.f32 %v9027_v56, %v6003_v46  ;;  %v5588_v53 = vpop.f32.mrf.mxu1 }
 0x5b3   :  { %8434 = vst [vmem:[#allocation2 + $0x1530] sm:$0xff] %v5588_v53  ;;  %11625 = vmatmul.msk.f32.gmra.mxu0 %vm1067_vm0, %v673_v38  ;;  %v9057_v59 = vadd.f32 %v9056_v45, %v5588_v53  ;;  %v676_v38 = vld [vmem:[%s19765_s0 + $0x14c8] sm:$0xff] }
 0x5b4   :  { %11689 = vmatmul.msk.f32.gmra.mxu2 %vm1067_vm0, %v737_v41  ;;  %v740_v41 = vld [vmem:[%s19765_s0 + $0x16c8] sm:$0xff] }
 0x5b5   :  { %11657 = vmatmul.msk.f32.gmra.mxu1 %vm1067_vm0, %v705_v47 }
 0x5b6   :  { %11721 = vmatmul.msk.f32.gmra.mxu3 %vm1067_vm0, %v769_v49  ;;  %v708_v49 = vld [vmem:[%s19765_s0 + $0x15c8] sm:$0xff] }
 0x5b7   :  { %v5797_v32 = vpop.f32.mrf.mxu2 }
 0x5b8   :  { %8466 = vst [vmem:[#allocation2 + $0x1630] sm:$0xff] %v5797_v32  ;;  %v9058_v7 = vadd.f32 %v9057_v59, %v5797_v32  ;;  %v5382_v61 = vpop.f32.mrf.mxu0  ;;  %v772_v59 = vld [vmem:[%s19765_s0 + $0x17c8] sm:$0xff] }
 0x5b9   :  { %8403 = vst [vmem:[#allocation2 + $0x1438] sm:$0xff] %v5382_v61  ;;  %v9087_v3 = vadd.f32 %v15987_v43, %v5382_v61  ;;  %v6006_v33 = vpop.f32.mrf.mxu3 }
 0x5ba   :  { %8498 = vst [vmem:[#allocation2 + $0x1730] sm:$0xff] %v6006_v33  ;;  %v16588_v10 = vadd.f32 %v9058_v7, %v6006_v33  ;;  %v5591_v37 = vpop.f32.mrf.mxu1 }
 0x5bb   :  { %8435 = vst [vmem:[#allocation2 + $0x1538] sm:$0xff] %v5591_v37  ;;  %11626 = vmatmul.msk.f32.gmra.mxu0 %vm1067_vm0, %v674_v63  ;;  %v9088_v17 = vadd.f32 %v9087_v3, %v5591_v37  ;;  %v677_v63 = vld [vmem:[%s19765_s0 + $0x14d0] sm:$0xff] }
 0x5bc   :  { %11690 = vmatmul.msk.f32.gmra.mxu2 %vm1067_vm0, %v738_v0  ;;  %v741_v0 = vld [vmem:[%s19765_s0 + $0x16d0] sm:$0xff] }
 0x5bd   :  { %11658 = vmatmul.msk.f32.gmra.mxu1 %vm1067_vm0, %v706_v4 }
 0x5be   :  { %11722 = vmatmul.msk.f32.gmra.mxu3 %vm1067_vm0, %v770_v5  ;;  %v709_v5 = vld [vmem:[%s19765_s0 + $0x15d0] sm:$0xff] }
 0x5bf   :  { %v5800_v43 = vpop.f32.mrf.mxu2 }
 0x5c0   :  { %8467 = vst [vmem:[#allocation2 + $0x1638] sm:$0xff] %v5800_v43  ;;  %v9089_v26 = vadd.f32 %v9088_v17, %v5800_v43  ;;  %v5385_v16 = vpop.f32.mrf.mxu0  ;;  %v773_v17 = vld [vmem:[%s19765_s0 + $0x17d0] sm:$0xff] }
 0x5c1   :  { %8404 = vst [vmem:[#allocation2 + $0x1440] sm:$0xff] %v5385_v16  ;;  %v9118_v22 = vadd.f32 %v16006_v54, %v5385_v16  ;;  %v6009_v23 = vpop.f32.mrf.mxu3 }
 0x5c2   :  { %8499 = vst [vmem:[#allocation2 + $0x1738] sm:$0xff] %v6009_v23  ;;  %v16607_v31 = vadd.f32 %v9089_v26, %v6009_v23  ;;  %v5594_v57 = vpop.f32.mrf.mxu1 }
 0x5c3   :  { %8436 = vst [vmem:[#allocation2 + $0x1540] sm:$0xff] %v5594_v57  ;;  %11627 = vmatmul.msk.f32.gmra.mxu0 %vm1067_vm0, %v675_v18  ;;  %v9119_v21 = vadd.f32 %v9118_v22, %v5594_v57  ;;  %v678_v18 = vld [vmem:[%s19765_s0 + $0x14d8] sm:$0xff] }
 0x5c4   :  { %11691 = vmatmul.msk.f32.gmra.mxu2 %vm1067_vm0, %v739_v19  ;;  %v742_v19 = vld [vmem:[%s19765_s0 + $0x16d8] sm:$0xff] }
 0x5c5   :  { %11659 = vmatmul.msk.f32.gmra.mxu1 %vm1067_vm0, %v707_v27 }
 0x5c6   :  { %11723 = vmatmul.msk.f32.gmra.mxu3 %vm1067_vm0, %v771_v28  ;;  %v710_v28 = vld [vmem:[%s19765_s0 + $0x15d8] sm:$0xff] }
 0x5c7   :  { %v5803_v54 = vpop.f32.mrf.mxu2 }
 0x5c8   :  { %8468 = vst [vmem:[#allocation2 + $0x1640] sm:$0xff] %v5803_v54  ;;  %v9120_v56 = vadd.f32 %v9119_v21, %v5803_v54  ;;  %v5388_v42 = vpop.f32.mrf.mxu0  ;;  %v774_v21 = vld [vmem:[%s19765_s0 + $0x17d8] sm:$0xff] }
 0x5c9   :  { %8405 = vst [vmem:[#allocation2 + $0x1448] sm:$0xff] %v5388_v42  ;;  %v9149_v45 = vadd.f32 %v16025_v20, %v5388_v42  ;;  %v6012_v46 = vpop.f32.mrf.mxu3 }
 0x5ca   :  { %8500 = vst [vmem:[#allocation2 + $0x1740] sm:$0xff] %v6012_v46  ;;  %v16626_v53 = vadd.f32 %v9120_v56, %v6012_v46  ;;  %v5597_v47 = vpop.f32.mrf.mxu1 }
 0x5cb   :  { %8437 = vst [vmem:[#allocation2 + $0x1548] sm:$0xff] %v5597_v47  ;;  %11628 = vmatmul.msk.f32.gmra.mxu0 %vm1067_vm0, %v676_v38  ;;  %v9150_v32 = vadd.f32 %v9149_v45, %v5597_v47  ;;  %v679_v38 = vld [vmem:[%s19765_s0 + $0x14e0] sm:$0xff] }
 0x5cc   :  { %11692 = vmatmul.msk.f32.gmra.mxu2 %vm1067_vm0, %v740_v41  ;;  %v743_v41 = vld [vmem:[%s19765_s0 + $0x16e0] sm:$0xff] }
 0x5cd   :  { %11660 = vmatmul.msk.f32.gmra.mxu1 %vm1067_vm0, %v708_v49 }
 0x5ce   :  { %11724 = vmatmul.msk.f32.gmra.mxu3 %vm1067_vm0, %v772_v59  ;;  %v711_v59 = vld [vmem:[%s19765_s0 + $0x15e0] sm:$0xff] }
 0x5cf   :  { %v5806_v20 = vpop.f32.mrf.mxu2 }
 0x5d0   :  { %8469 = vst [vmem:[#allocation2 + $0x1648] sm:$0xff] %v5806_v20  ;;  %v9151_v7 = vadd.f32 %v9150_v32, %v5806_v20  ;;  %v5391_v61 = vpop.f32.mrf.mxu0  ;;  %v775_v32 = vld [vmem:[%s19765_s0 + $0x17e0] sm:$0xff] }
 0x5d1   :  { %8406 = vst [vmem:[#allocation2 + $0x1450] sm:$0xff] %v5391_v61  ;;  %v9180_v3 = vadd.f32 %v16044_v60, %v5391_v61  ;;  %v6015_v33 = vpop.f32.mrf.mxu3  ;;  %v1063_v61 = vld [vmem:[%s19763_s1 + $0xe0] sm:$0xff] }
 0x5d2   :  { %8501 = vst [vmem:[#allocation2 + $0x1748] sm:$0xff] %v6015_v33  ;;  %v16645_v37 = vadd.f32 %v9151_v7, %v6015_v33  ;;  %v5600_v4 = vpop.f32.mrf.mxu1  ;;  %7031 = vmatpush.msrb.mxu0 %v1063_v61  ;;  %v714_v61 = vld [vmem:[%s19765_s0 + $0x15f8] sm:$0xff] }
 0x5d3   :  { %8438 = vst [vmem:[#allocation2 + $0x1550] sm:$0xff] %v5600_v4  ;;  %11629 = vmatmul.msk.f32.gmra.mxu0 %vm1067_vm0, %v677_v63  ;;  %v9181_v43 = vadd.f32 %v9180_v3, %v5600_v4  ;;  %v1066_v63 = vld [vmem:[%s19763_s1 + $0xf8] sm:$0xff]  ;;  %v1064_v3 = vld [vmem:[%s19763_s1 + $0xe8] sm:$0xff] }
 0x5d4   :  { %11693 = vmatmul.msk.f32.gmra.mxu2 %vm1067_vm0, %v741_v0  ;;  %7658 = vmatpush.msrb.mxu3 %v1066_v63  ;;  %v680_v4 = vld [vmem:[%s19765_s0 + $0x14e8] sm:$0xff]  ;;  %v778_v63 = vld [vmem:[%s19765_s0 + $0x17f8] sm:$0xff] }
 0x5d5   :  { %11661 = vmatmul.msk.f32.gmra.mxu1 %vm1067_vm0, %v709_v5  ;;  %v744_v5 = vld [vmem:[%s19765_s0 + $0x16e8] sm:$0xff] }
 0x5d6   :  { %11725 = vmatmul.msk.f32.gmra.mxu3 %vm1067_vm0, %v773_v17  ;;  %7240 = vmatpush.msrb.mxu1 %v1064_v3 }
 0x5d7   :  { %v5809_v60 = vpop.f32.mrf.mxu2 }
 0x5d8   :  { %8470 = vst [vmem:[#allocation2 + $0x1650] sm:$0xff] %v5809_v60  ;;  %v9182_v26 = vadd.f32 %v9181_v43, %v5809_v60  ;;  %v5394_v16 = vpop.f32.mrf.mxu0 }
 0x5d9   :  { %8407 = vst [vmem:[#allocation2 + $0x1458] sm:$0xff] %v5394_v16  ;;  %v9211_v22 = vadd.f32 %v16063_v62, %v5394_v16  ;;  %v6018_v23 = vpop.f32.mrf.mxu3  ;;  %v712_v16 = vld [vmem:[%s19765_s0 + $0x15e8] sm:$0xff] }
 0x5da   :  { %8502 = vst [vmem:[#allocation2 + $0x1750] sm:$0xff] %v6018_v23  ;;  %v16664_v57 = vadd.f32 %v9182_v26, %v6018_v23  ;;  %v5603_v27 = vpop.f32.mrf.mxu1 }
 0x5db   :  { %8439 = vst [vmem:[#allocation2 + $0x1558] sm:$0xff] %v5603_v27  ;;  %11630 = vmatmul.msk.f32.gmra.mxu0 %vm1067_vm0, %v678_v18  ;;  %v9212_v54 = vadd.f32 %v9211_v22, %v5603_v27  ;;  %v776_v18 = vld [vmem:[%s19765_s0 + $0x17e8] sm:$0xff]  ;;  %v681_v27 = vld [vmem:[%s19765_s0 + $0x14f0] sm:$0xff] }
 0x5dc   :  { %11694 = vmatmul.msk.f32.gmra.mxu2 %vm1067_vm0, %v742_v19 }
 0x5dd   :  { %11662 = vmatmul.msk.f32.gmra.mxu1 %vm1067_vm0, %v710_v28  ;;  %v745_v28 = vld [vmem:[%s19765_s0 + $0x16f0] sm:$0xff] }
 0x5de   :  { %11726 = vmatmul.msk.f32.gmra.mxu3 %vm1067_vm0, %v774_v21 }
 0x5df   :  { %v5812_v62 = vpop.f32.mrf.mxu2 }
 0x5e0   :  { %8471 = vst [vmem:[#allocation2 + $0x1658] sm:$0xff] %v5812_v62  ;;  %v9213_v56 = vadd.f32 %v9212_v54, %v5812_v62  ;;  %v5397_v42 = vpop.f32.mrf.mxu0 }
 0x5e1   :  { %8408 = vst [vmem:[#allocation2 + $0x1460] sm:$0xff] %v5397_v42  ;;  %v9242_v45 = vadd.f32 %v16094_v2, %v5397_v42  ;;  %v6021_v46 = vpop.f32.mrf.mxu3  ;;  %v1065_v2 = vld [vmem:[%s19763_s1 + $0xf0] sm:$0xff] }
 0x5e2   :  { %8503 = vst [vmem:[#allocation2 + $0x1758] sm:$0xff] %v6021_v46  ;;  %v16683_v47 = vadd.f32 %v9213_v56, %v6021_v46  ;;  %v5606_v49 = vpop.f32.mrf.mxu1  ;;  %7449 = vmatpush.msrb.mxu2 %v1065_v2  ;;  %v713_v42 = vld [vmem:[%s19765_s0 + $0x15f0] sm:$0xff] }
 0x5e3   :  { %8440 = vst [vmem:[#allocation2 + $0x1560] sm:$0xff] %v5606_v49  ;;  %11631 = vmatmul.msk.f32.gmra.mxu0 %vm1067_vm0, %v679_v38  ;;  %v9243_v20 = vadd.f32 %v9242_v45, %v5606_v49  ;;  %v777_v38 = vld [vmem:[%s19765_s0 + $0x17f0] sm:$0xff]  ;;  %v682_v49 = vld [vmem:[%s19765_s0 + $0x14f8] sm:$0xff] }
 0x5e4   :  { %11695 = vmatmul.msk.f32.gmra.mxu2 %vm1067_vm0, %v743_v41 }
 0x5e5   :  { %11663 = vmatmul.msk.f32.gmra.mxu1 %vm1067_vm0, %v711_v59  ;;  %v746_v59 = vld [vmem:[%s19765_s0 + $0x16f8] sm:$0xff] }
 0x5e6   :  { %11727 = vmatmul.msk.f32.gmra.mxu3 %vm1067_vm0, %v775_v32 }
 0x5e7   :  { %v5815_v7 = vpop.f32.mrf.mxu2 }
 0x5e8   :  { %8472 = vst [vmem:[#allocation2 + $0x1660] sm:$0xff] %v5815_v7  ;;  %v9244_v0 = vadd.f32 %v9243_v20, %v5815_v7  ;;  %v5400_v33 = vpop.f32.mrf.mxu0 }
 0x5e9   :  { %8409 = vst [vmem:[#allocation2 + $0x1468] sm:$0xff] %v5400_v33  ;;  %v9273_v17 = vadd.f32 %v16113_v15, %v5400_v33  ;;  %v6024_v43 = vpop.f32.mrf.mxu3 }
 0x5ea   :  { %8504 = vst [vmem:[#allocation2 + $0x1760] sm:$0xff] %v6024_v43  ;;  %v16714_v60 = vadd.f32 %v9244_v0, %v6024_v43  ;;  %v5609_v26 = vpop.f32.mrf.mxu1 }
 0x5eb   :  { %8441 = vst [vmem:[#allocation2 + $0x1568] sm:$0xff] %v5609_v26  ;;  %11632 = vmatmul.msk.f32.gmra.mxu0 %vm1067_vm0, %v680_v4  ;;  %v9274_v19 = vadd.f32 %v9273_v17, %v5609_v26  ;;  %v779_v4 = vld [vmem:[%s19765_s0 + $0x1800] sm:$0xff] }
 0x5ec   :  { %11696 = vmatmul.msk.f32.gmra.mxu2 %vm1067_vm0, %v744_v5  ;;  %v843_v5 = vld [vmem:[%s19765_s0 + $0x1a00] sm:$0xff] }
 0x5ed   :  { %11664 = vmatmul.msk.f32.gmra.mxu1 %vm1067_vm0, %v712_v16 }
 0x5ee   :  { %11728 = vmatmul.msk.f32.gmra.mxu3 %vm1067_vm0, %v776_v18  ;;  %v811_v18 = vld [vmem:[%s19765_s0 + $0x1900] sm:$0xff] }
 0x5ef   :  { %v5818_v15 = vpop.f32.mrf.mxu2 }
 0x5f0   :  { %8473 = vst [vmem:[#allocation2 + $0x1668] sm:$0xff] %v5818_v15  ;;  %v9275_v22 = vadd.f32 %v9274_v19, %v5818_v15  ;;  %v5403_v23 = vpop.f32.mrf.mxu0  ;;  %v875_v19 = vld [vmem:[%s19765_s0 + $0x1b00] sm:$0xff] }
 0x5f1   :  { %8410 = vst [vmem:[#allocation2 + $0x1470] sm:$0xff] %v5403_v23  ;;  %v9304_v21 = vadd.f32 %v16132_v52, %v5403_v23  ;;  %v6027_v54 = vpop.f32.mrf.mxu3 }
 0x5f2   :  { %8505 = vst [vmem:[#allocation2 + $0x1768] sm:$0xff] %v6027_v54  ;;  %v16733_v62 = vadd.f32 %v9275_v22, %v6027_v54  ;;  %v5612_v56 = vpop.f32.mrf.mxu1 }
 0x5f3   :  { %8442 = vst [vmem:[#allocation2 + $0x1570] sm:$0xff] %v5612_v56  ;;  %11633 = vmatmul.msk.f32.gmra.mxu0 %vm1067_vm0, %v681_v27  ;;  %v9305_v41 = vadd.f32 %v9304_v21, %v5612_v56  ;;  %v780_v27 = vld [vmem:[%s19765_s0 + $0x1808] sm:$0xff] }
 0x5f4   :  { %11697 = vmatmul.msk.f32.gmra.mxu2 %vm1067_vm0, %v745_v28  ;;  %v844_v28 = vld [vmem:[%s19765_s0 + $0x1a08] sm:$0xff] }
 0x5f5   :  { %11665 = vmatmul.msk.f32.gmra.mxu1 %vm1067_vm0, %v713_v42 }
 0x5f6   :  { %11729 = vmatmul.msk.f32.gmra.mxu3 %vm1067_vm0, %v777_v38  ;;  %v812_v38 = vld [vmem:[%s19765_s0 + $0x1908] sm:$0xff] }
 0x5f7   :  { %v5821_v52 = vpop.f32.mrf.mxu2 }
 0x5f8   :  { %8474 = vst [vmem:[#allocation2 + $0x1670] sm:$0xff] %v5821_v52  ;;  %v9306_v45 = vadd.f32 %v9305_v41, %v5821_v52  ;;  %v5406_v46 = vpop.f32.mrf.mxu0  ;;  %v876_v41 = vld [vmem:[%s19765_s0 + $0x1b08] sm:$0xff] }
 0x5f9   :  { %8411 = vst [vmem:[#allocation2 + $0x1478] sm:$0xff] %v5406_v46  ;;  %v9335_v32 = vadd.f32 %v16151_v55, %v5406_v46  ;;  %v6030_v2 = vpop.f32.mrf.mxu3 }
 0x5fa   :  { %8506 = vst [vmem:[#allocation2 + $0x1770] sm:$0xff] %v6030_v2  ;;  %v16752_v20 = vadd.f32 %v9306_v45, %v6030_v2  ;;  %v5615_v7 = vpop.f32.mrf.mxu1 }
 0x5fb   :  { %8443 = vst [vmem:[#allocation2 + $0x1578] sm:$0xff] %v5615_v7  ;;  %11634 = vmatmul.msk.f32.gmra.mxu0 %vm1067_vm0, %v682_v49  ;;  %v9336_v0 = vadd.f32 %v9335_v32, %v5615_v7  ;;  %v781_v49 = vld [vmem:[%s19765_s0 + $0x1810] sm:$0xff] }
 0x5fc   :  { %11698 = vmatmul.msk.f32.gmra.mxu2 %vm1067_vm0, %v746_v59  ;;  %v845_v59 = vld [vmem:[%s19765_s0 + $0x1a10] sm:$0xff] }
 0x5fd   :  { %11666 = vmatmul.msk.f32.gmra.mxu1 %vm1067_vm0, %v714_v61 }
 0x5fe   :  { %11730 = vmatmul.msk.f32.gmra.mxu3 %vm1067_vm0, %v778_v63  ;;  %v813_v63 = vld [vmem:[%s19765_s0 + $0x1910] sm:$0xff] }
 0x5ff   :  { %v5824_v55 = vpop.f32.mrf.mxu2 }
 0x600   :  { %8475 = vst [vmem:[#allocation2 + $0x1678] sm:$0xff] %v5824_v55  ;;  %v9337_v3 = vadd.f32 %v9336_v0, %v5824_v55  ;;  %v5409_v33 = vpop.f32.mrf.mxu0  ;;  %v877_v0 = vld [vmem:[%s19765_s0 + $0x1b10] sm:$0xff] }
 0x601   :  { %8412 = vst [vmem:[#allocation2 + $0x1480] sm:$0xff] %v5409_v33  ;;  %v9366_v17 = vadd.f32 %v16170_v11, %v5409_v33  ;;  %v6033_v43 = vpop.f32.mrf.mxu3 }
 0x602   :  { %8507 = vst [vmem:[#allocation2 + $0x1778] sm:$0xff] %v6033_v43  ;;  %v16771_v26 = vadd.f32 %v9337_v3, %v6033_v43  ;;  %v5618_v16 = vpop.f32.mrf.mxu1 }
 0x603   :  { %8444 = vst [vmem:[#allocation2 + $0x1580] sm:$0xff] %v5618_v16  ;;  %11731 = vmatmul.msk.f32.vlgmr.msra.gmra.mxu0 %vm1067_vm0, %v779_v4  ;;  %v9367_v15 = vadd.f32 %v9366_v17, %v5618_v16  ;;  %v782_v4 = vld [vmem:[%s19765_s0 + $0x1818] sm:$0xff] }
 0x604   :  { %11795 = vmatmul.msk.f32.vlgmr.msra.gmra.mxu2 %vm1067_vm0, %v843_v5  ;;  %v846_v5 = vld [vmem:[%s19765_s0 + $0x1a18] sm:$0xff] }
 0x605   :  { %11763 = vmatmul.msk.f32.vlgmr.msra.gmra.mxu1 %vm1067_vm0, %v811_v18 }
 0x606   :  { %11827 = vmatmul.msk.f32.vlgmr.msra.gmra.mxu3 %vm1067_vm0, %v875_v19  ;;  %v814_v19 = vld [vmem:[%s19765_s0 + $0x1918] sm:$0xff] }
 0x607   :  { %v5827_v11 = vpop.f32.mrf.mxu2 }
 0x608   :  { %8476 = vst [vmem:[#allocation2 + $0x1680] sm:$0xff] %v5827_v11  ;;  %v9368_v22 = vadd.f32 %v9367_v15, %v5827_v11  ;;  %v5412_v23 = vpop.f32.mrf.mxu0  ;;  %v878_v15 = vld [vmem:[%s19765_s0 + $0x1b18] sm:$0xff] }
 0x609   :  { %8413 = vst [vmem:[#allocation2 + $0x1488] sm:$0xff] %v5412_v23  ;;  %v9397_v21 = vadd.f32 %v16189_v34, %v5412_v23  ;;  %v6036_v54 = vpop.f32.mrf.mxu3 }
 0x60a   :  { %8508 = vst [vmem:[#allocation2 + $0x1780] sm:$0xff] %v6036_v54  ;;  %v16790_v56 = vadd.f32 %v9368_v22, %v6036_v54  ;;  %v5621_v42 = vpop.f32.mrf.mxu1 }
 0x60b   :  { %8445 = vst [vmem:[#allocation2 + $0x1588] sm:$0xff] %v5621_v42  ;;  %11732 = vmatmul.msk.f32.gmra.mxu0 %vm1067_vm0, %v780_v27  ;;  %v9398_v52 = vadd.f32 %v9397_v21, %v5621_v42  ;;  %v783_v27 = vld [vmem:[%s19765_s0 + $0x1820] sm:$0xff] }
 0x60c   :  { %11796 = vmatmul.msk.f32.gmra.mxu2 %vm1067_vm0, %v844_v28  ;;  %v847_v28 = vld [vmem:[%s19765_s0 + $0x1a20] sm:$0xff] }
 0x60d   :  { %11764 = vmatmul.msk.f32.gmra.mxu1 %vm1067_vm0, %v812_v38 }
 0x60e   :  { %11828 = vmatmul.msk.f32.gmra.mxu3 %vm1067_vm0, %v876_v41  ;;  %v815_v41 = vld [vmem:[%s19765_s0 + $0x1920] sm:$0xff] }
 0x60f   :  { %v5830_v34 = vpop.f32.mrf.mxu2 }
 0x610   :  { %8477 = vst [vmem:[#allocation2 + $0x1688] sm:$0xff] %v5830_v34  ;;  %v9399_v45 = vadd.f32 %v9398_v52, %v5830_v34  ;;  %v5415_v46 = vpop.f32.mrf.mxu0  ;;  %v879_v52 = vld [vmem:[%s19765_s0 + $0x1b20] sm:$0xff] }
 0x611   :  { %8414 = vst [vmem:[#allocation2 + $0x1490] sm:$0xff] %v5415_v46  ;;  %v9428_v32 = vadd.f32 %v16208_v8, %v5415_v46  ;;  %v6039_v2 = vpop.f32.mrf.mxu3 }
 0x612   :  { %8509 = vst [vmem:[#allocation2 + $0x1788] sm:$0xff] %v6039_v2  ;;  %v16809_v7 = vadd.f32 %v9399_v45, %v6039_v2  ;;  %v5624_v61 = vpop.f32.mrf.mxu1 }
 0x613   :  { %8446 = vst [vmem:[#allocation2 + $0x1590] sm:$0xff] %v5624_v61  ;;  %11733 = vmatmul.msk.f32.gmra.mxu0 %vm1067_vm0, %v781_v49  ;;  %v9429_v55 = vadd.f32 %v9428_v32, %v5624_v61  ;;  %v784_v49 = vld [vmem:[%s19765_s0 + $0x1828] sm:$0xff] }
 0x614   :  { %11797 = vmatmul.msk.f32.gmra.mxu2 %vm1067_vm0, %v845_v59  ;;  %v848_v59 = vld [vmem:[%s19765_s0 + $0x1a28] sm:$0xff] }
 0x615   :  { %11765 = vmatmul.msk.f32.gmra.mxu1 %vm1067_vm0, %v813_v63 }
 0x616   :  { %11829 = vmatmul.msk.f32.gmra.mxu3 %vm1067_vm0, %v877_v0  ;;  %v816_v0 = vld [vmem:[%s19765_s0 + $0x1928] sm:$0xff] }
 0x617   :  { %v5833_v8 = vpop.f32.mrf.mxu2 }
 0x618   :  { %8478 = vst [vmem:[#allocation2 + $0x1690] sm:$0xff] %v5833_v8  ;;  %v9430_v3 = vadd.f32 %v9429_v55, %v5833_v8  ;;  %v5418_v33 = vpop.f32.mrf.mxu0  ;;  %v880_v55 = vld [vmem:[%s19765_s0 + $0x1b28] sm:$0xff] }
 0x619   :  { %8415 = vst [vmem:[#allocation2 + $0x1498] sm:$0xff] %v5418_v33  ;;  %v9459_v17 = vadd.f32 %v16227_v13, %v5418_v33  ;;  %v6042_v43 = vpop.f32.mrf.mxu3 }
 0x61a   :  { %8510 = vst [vmem:[#allocation2 + $0x1790] sm:$0xff] %v6042_v43  ;;  %v16828_v16 = vadd.f32 %v9430_v3, %v6042_v43  ;;  %v5627_v18 = vpop.f32.mrf.mxu1 }
 0x61b   :  { %8447 = vst [vmem:[#allocation2 + $0x1598] sm:$0xff] %v5627_v18  ;;  %11734 = vmatmul.msk.f32.gmra.mxu0 %vm1067_vm0, %v782_v4  ;;  %v9460_v11 = vadd.f32 %v9459_v17, %v5627_v18  ;;  %v785_v4 = vld [vmem:[%s19765_s0 + $0x1830] sm:$0xff] }
 0x61c   :  { %11798 = vmatmul.msk.f32.gmra.mxu2 %vm1067_vm0, %v846_v5  ;;  %v849_v5 = vld [vmem:[%s19765_s0 + $0x1a30] sm:$0xff] }
 0x61d   :  { %11766 = vmatmul.msk.f32.gmra.mxu1 %vm1067_vm0, %v814_v19 }
 0x61e   :  { %11830 = vmatmul.msk.f32.gmra.mxu3 %vm1067_vm0, %v878_v15  ;;  %v817_v15 = vld [vmem:[%s19765_s0 + $0x1930] sm:$0xff] }
 0x61f   :  { %v5836_v13 = vpop.f32.mrf.mxu2 }
 0x620   :  { %8479 = vst [vmem:[#allocation2 + $0x1698] sm:$0xff] %v5836_v13  ;;  %v9461_v22 = vadd.f32 %v9460_v11, %v5836_v13  ;;  %v5421_v23 = vpop.f32.mrf.mxu0  ;;  %v881_v11 = vld [vmem:[%s19765_s0 + $0x1b30] sm:$0xff] }
 0x621   :  { %8416 = vst [vmem:[#allocation2 + $0x14a0] sm:$0xff] %v5421_v23  ;;  %v9490_v21 = vadd.f32 %v16246_v35, %v5421_v23  ;;  %v6045_v54 = vpop.f32.mrf.mxu3 }
 0x622   :  { %8511 = vst [vmem:[#allocation2 + $0x1798] sm:$0xff] %v6045_v54  ;;  %v16847_v42 = vadd.f32 %v9461_v22, %v6045_v54  ;;  %v5630_v38 = vpop.f32.mrf.mxu1 }
 0x623   :  { %8448 = vst [vmem:[#allocation2 + $0x15a0] sm:$0xff] %v5630_v38  ;;  %11735 = vmatmul.msk.f32.gmra.mxu0 %vm1067_vm0, %v783_v27  ;;  %v9491_v34 = vadd.f32 %v9490_v21, %v5630_v38  ;;  %v786_v27 = vld [vmem:[%s19765_s0 + $0x1838] sm:$0xff] }
 0x624   :  { %11799 = vmatmul.msk.f32.gmra.mxu2 %vm1067_vm0, %v847_v28  ;;  %v850_v28 = vld [vmem:[%s19765_s0 + $0x1a38] sm:$0xff] }
 0x625   :  { %11767 = vmatmul.msk.f32.gmra.mxu1 %vm1067_vm0, %v815_v41 }
 0x626   :  { %11831 = vmatmul.msk.f32.gmra.mxu3 %vm1067_vm0, %v879_v52  ;;  %v818_v52 = vld [vmem:[%s19765_s0 + $0x1938] sm:$0xff] }
 0x627   :  { %v5839_v35 = vpop.f32.mrf.mxu2 }
 0x628   :  { %8480 = vst [vmem:[#allocation2 + $0x16a0] sm:$0xff] %v5839_v35  ;;  %v9492_v45 = vadd.f32 %v9491_v34, %v5839_v35  ;;  %v5424_v46 = vpop.f32.mrf.mxu0  ;;  %v882_v34 = vld [vmem:[%s19765_s0 + $0x1b38] sm:$0xff] }
 0x629   :  { %8417 = vst [vmem:[#allocation2 + $0x14a8] sm:$0xff] %v5424_v46  ;;  %v9521_v32 = vadd.f32 %v16265_v29, %v5424_v46  ;;  %v6048_v2 = vpop.f32.mrf.mxu3 }
 0x62a   :  { %8512 = vst [vmem:[#allocation2 + $0x17a0] sm:$0xff] %v6048_v2  ;;  %v16866_v61 = vadd.f32 %v9492_v45, %v6048_v2  ;;  %v5633_v63 = vpop.f32.mrf.mxu1 }
 0x62b   :  { %8449 = vst [vmem:[#allocation2 + $0x15a8] sm:$0xff] %v5633_v63  ;;  %11736 = vmatmul.msk.f32.gmra.mxu0 %vm1067_vm0, %v784_v49  ;;  %v9522_v8 = vadd.f32 %v9521_v32, %v5633_v63  ;;  %v787_v49 = vld [vmem:[%s19765_s0 + $0x1840] sm:$0xff] }
 0x62c   :  { %11800 = vmatmul.msk.f32.gmra.mxu2 %vm1067_vm0, %v848_v59  ;;  %v851_v59 = vld [vmem:[%s19765_s0 + $0x1a40] sm:$0xff] }
 0x62d   :  { %11768 = vmatmul.msk.f32.gmra.mxu1 %vm1067_vm0, %v816_v0 }
 0x62e   :  { %11832 = vmatmul.msk.f32.gmra.mxu3 %vm1067_vm0, %v880_v55  ;;  %v819_v55 = vld [vmem:[%s19765_s0 + $0x1940] sm:$0xff] }
 0x62f   :  { %v5842_v29 = vpop.f32.mrf.mxu2 }
 0x630   :  { %8481 = vst [vmem:[#allocation2 + $0x16a8] sm:$0xff] %v5842_v29  ;;  %v9523_v3 = vadd.f32 %v9522_v8, %v5842_v29  ;;  %v5427_v33 = vpop.f32.mrf.mxu0  ;;  %v883_v8 = vld [vmem:[%s19765_s0 + $0x1b40] sm:$0xff] }
 0x631   :  { %8418 = vst [vmem:[#allocation2 + $0x14b0] sm:$0xff] %v5427_v33  ;;  %v9552_v17 = vadd.f32 %v16284_v44, %v5427_v33  ;;  %v6051_v43 = vpop.f32.mrf.mxu3 }
 0x632   :  { %8513 = vst [vmem:[#allocation2 + $0x17a8] sm:$0xff] %v6051_v43  ;;  %v16885_v18 = vadd.f32 %v9523_v3, %v6051_v43  ;;  %v5636_v19 = vpop.f32.mrf.mxu1 }
 0x633   :  { %8450 = vst [vmem:[#allocation2 + $0x15b0] sm:$0xff] %v5636_v19  ;;  %11737 = vmatmul.msk.f32.gmra.mxu0 %vm1067_vm0, %v785_v4  ;;  %v9553_v13 = vadd.f32 %v9552_v17, %v5636_v19  ;;  %v788_v4 = vld [vmem:[%s19765_s0 + $0x1848] sm:$0xff] }
 0x634   :  { %11801 = vmatmul.msk.f32.gmra.mxu2 %vm1067_vm0, %v849_v5  ;;  %v852_v5 = vld [vmem:[%s19765_s0 + $0x1a48] sm:$0xff] }
 0x635   :  { %11769 = vmatmul.msk.f32.gmra.mxu1 %vm1067_vm0, %v817_v15 }
 0x636   :  { %11833 = vmatmul.msk.f32.gmra.mxu3 %vm1067_vm0, %v881_v11  ;;  %v820_v11 = vld [vmem:[%s19765_s0 + $0x1948] sm:$0xff] }
 0x637   :  { %v5845_v44 = vpop.f32.mrf.mxu2 }
 0x638   :  { %8482 = vst [vmem:[#allocation2 + $0x16b0] sm:$0xff] %v5845_v44  ;;  %v9554_v22 = vadd.f32 %v9553_v13, %v5845_v44  ;;  %v5430_v23 = vpop.f32.mrf.mxu0  ;;  %v884_v13 = vld [vmem:[%s19765_s0 + $0x1b48] sm:$0xff] }
 0x639   :  { %8419 = vst [vmem:[#allocation2 + $0x14b8] sm:$0xff] %v5430_v23  ;;  %v9583_v21 = vadd.f32 %v16303_v58, %v5430_v23  ;;  %v6054_v54 = vpop.f32.mrf.mxu3 }
 0x63a   :  { %8514 = vst [vmem:[#allocation2 + $0x17b0] sm:$0xff] %v6054_v54  ;;  %v16904_v38 = vadd.f32 %v9554_v22, %v6054_v54  ;;  %v5639_v41 = vpop.f32.mrf.mxu1 }
 0x63b   :  { %8451 = vst [vmem:[#allocation2 + $0x15b8] sm:$0xff] %v5639_v41  ;;  %11738 = vmatmul.msk.f32.gmra.mxu0 %vm1067_vm0, %v786_v27  ;;  %v9584_v35 = vadd.f32 %v9583_v21, %v5639_v41  ;;  %v789_v27 = vld [vmem:[%s19765_s0 + $0x1850] sm:$0xff] }
 0x63c   :  { %11802 = vmatmul.msk.f32.gmra.mxu2 %vm1067_vm0, %v850_v28  ;;  %v853_v28 = vld [vmem:[%s19765_s0 + $0x1a50] sm:$0xff] }
 0x63d   :  { %11770 = vmatmul.msk.f32.gmra.mxu1 %vm1067_vm0, %v818_v52 }
 0x63e   :  { %11834 = vmatmul.msk.f32.gmra.mxu3 %vm1067_vm0, %v882_v34  ;;  %v821_v34 = vld [vmem:[%s19765_s0 + $0x1950] sm:$0xff] }
 0x63f   :  { %v5848_v58 = vpop.f32.mrf.mxu2 }
 0x640   :  { %8483 = vst [vmem:[#allocation2 + $0x16b8] sm:$0xff] %v5848_v58  ;;  %v9585_v45 = vadd.f32 %v9584_v35, %v5848_v58  ;;  %v5433_v46 = vpop.f32.mrf.mxu0  ;;  %v885_v35 = vld [vmem:[%s19765_s0 + $0x1b50] sm:$0xff] }
 0x641   :  { %8420 = vst [vmem:[#allocation2 + $0x14c0] sm:$0xff] %v5433_v46  ;;  %v9614_v32 = vadd.f32 %v16322_v9, %v5433_v46  ;;  %v6057_v2 = vpop.f32.mrf.mxu3 }
 0x642   :  { %8515 = vst [vmem:[#allocation2 + $0x17b8] sm:$0xff] %v6057_v2  ;;  %v16923_v63 = vadd.f32 %v9585_v45, %v6057_v2  ;;  %v5642_v0 = vpop.f32.mrf.mxu1 }
 0x643   :  { %8452 = vst [vmem:[#allocation2 + $0x15c0] sm:$0xff] %v5642_v0  ;;  %11739 = vmatmul.msk.f32.gmra.mxu0 %vm1067_vm0, %v787_v49  ;;  %v9615_v29 = vadd.f32 %v9614_v32, %v5642_v0  ;;  %v790_v49 = vld [vmem:[%s19765_s0 + $0x1858] sm:$0xff] }
 0x644   :  { %11803 = vmatmul.msk.f32.gmra.mxu2 %vm1067_vm0, %v851_v59  ;;  %v854_v59 = vld [vmem:[%s19765_s0 + $0x1a58] sm:$0xff] }
 0x645   :  { %11771 = vmatmul.msk.f32.gmra.mxu1 %vm1067_vm0, %v819_v55 }
 0x646   :  { %11835 = vmatmul.msk.f32.gmra.mxu3 %vm1067_vm0, %v883_v8  ;;  %v822_v8 = vld [vmem:[%s19765_s0 + $0x1958] sm:$0xff] }
 0x647   :  { %v5851_v9 = vpop.f32.mrf.mxu2 }
 0x648   :  { %8484 = vst [vmem:[#allocation2 + $0x16c0] sm:$0xff] %v5851_v9  ;;  %v9616_v3 = vadd.f32 %v9615_v29, %v5851_v9  ;;  %v5436_v33 = vpop.f32.mrf.mxu0  ;;  %v886_v29 = vld [vmem:[%s19765_s0 + $0x1b58] sm:$0xff] }
 0x649   :  { %8421 = vst [vmem:[#allocation2 + $0x14c8] sm:$0xff] %v5436_v33  ;;  %v9645_v17 = vadd.f32 %v16341_v25, %v5436_v33  ;;  %v6060_v43 = vpop.f32.mrf.mxu3 }
 0x64a   :  { %8516 = vst [vmem:[#allocation2 + $0x17c0] sm:$0xff] %v6060_v43  ;;  %v16942_v19 = vadd.f32 %v9616_v3, %v6060_v43  ;;  %v5645_v15 = vpop.f32.mrf.mxu1 }
 0x64b   :  { %8453 = vst [vmem:[#allocation2 + $0x15c8] sm:$0xff] %v5645_v15  ;;  %11740 = vmatmul.msk.f32.gmra.mxu0 %vm1067_vm0, %v788_v4  ;;  %v9646_v44 = vadd.f32 %v9645_v17, %v5645_v15  ;;  %v791_v4 = vld [vmem:[%s19765_s0 + $0x1860] sm:$0xff] }
 0x64c   :  { %11804 = vmatmul.msk.f32.gmra.mxu2 %vm1067_vm0, %v852_v5  ;;  %v855_v5 = vld [vmem:[%s19765_s0 + $0x1a60] sm:$0xff] }
 0x64d   :  { %11772 = vmatmul.msk.f32.gmra.mxu1 %vm1067_vm0, %v820_v11 }
 0x64e   :  { %11836 = vmatmul.msk.f32.gmra.mxu3 %vm1067_vm0, %v884_v13  ;;  %v823_v13 = vld [vmem:[%s19765_s0 + $0x1960] sm:$0xff] }
 0x64f   :  { %v5854_v25 = vpop.f32.mrf.mxu2 }
 0x650   :  { %8485 = vst [vmem:[#allocation2 + $0x16c8] sm:$0xff] %v5854_v25  ;;  %v9647_v22 = vadd.f32 %v9646_v44, %v5854_v25  ;;  %v5439_v23 = vpop.f32.mrf.mxu0  ;;  %v887_v44 = vld [vmem:[%s19765_s0 + $0x1b60] sm:$0xff] }
 0x651   :  { %8422 = vst [vmem:[#allocation2 + $0x14d0] sm:$0xff] %v5439_v23  ;;  %v9676_v21 = vadd.f32 %v16360_v40, %v5439_v23  ;;  %v6063_v54 = vpop.f32.mrf.mxu3 }
 0x652   :  { %8517 = vst [vmem:[#allocation2 + $0x17c8] sm:$0xff] %v6063_v54  ;;  %v16961_v41 = vadd.f32 %v9647_v22, %v6063_v54  ;;  %v5648_v52 = vpop.f32.mrf.mxu1 }
 0x653   :  { %8454 = vst [vmem:[#allocation2 + $0x15d0] sm:$0xff] %v5648_v52  ;;  %11741 = vmatmul.msk.f32.gmra.mxu0 %vm1067_vm0, %v789_v27  ;;  %v9677_v58 = vadd.f32 %v9676_v21, %v5648_v52  ;;  %v792_v27 = vld [vmem:[%s19765_s0 + $0x1868] sm:$0xff] }
 0x654   :  { %11805 = vmatmul.msk.f32.gmra.mxu2 %vm1067_vm0, %v853_v28  ;;  %v856_v28 = vld [vmem:[%s19765_s0 + $0x1a68] sm:$0xff] }
 0x655   :  { %11773 = vmatmul.msk.f32.gmra.mxu1 %vm1067_vm0, %v821_v34 }
 0x656   :  { %11837 = vmatmul.msk.f32.gmra.mxu3 %vm1067_vm0, %v885_v35  ;;  %v824_v35 = vld [vmem:[%s19765_s0 + $0x1968] sm:$0xff] }
 0x657   :  { %v5857_v40 = vpop.f32.mrf.mxu2 }
 0x658   :  { %8486 = vst [vmem:[#allocation2 + $0x16d0] sm:$0xff] %v5857_v40  ;;  %v9678_v45 = vadd.f32 %v9677_v58, %v5857_v40  ;;  %v5442_v46 = vpop.f32.mrf.mxu0  ;;  %v888_v58 = vld [vmem:[%s19765_s0 + $0x1b68] sm:$0xff] }
 0x659   :  { %8423 = vst [vmem:[#allocation2 + $0x14d8] sm:$0xff] %v5442_v46  ;;  %v9707_v32 = vadd.f32 %v16379_v51, %v5442_v46  ;;  %v6066_v2 = vpop.f32.mrf.mxu3 }
 0x65a   :  { %8518 = vst [vmem:[#allocation2 + $0x17d0] sm:$0xff] %v6066_v2  ;;  %v16980_v0 = vadd.f32 %v9678_v45, %v6066_v2  ;;  %v5651_v55 = vpop.f32.mrf.mxu1 }
 0x65b   :  { %8455 = vst [vmem:[#allocation2 + $0x15d8] sm:$0xff] %v5651_v55  ;;  %11742 = vmatmul.msk.f32.gmra.mxu0 %vm1067_vm0, %v790_v49  ;;  %v9708_v9 = vadd.f32 %v9707_v32, %v5651_v55  ;;  %v793_v49 = vld [vmem:[%s19765_s0 + $0x1870] sm:$0xff] }
 0x65c   :  { %11806 = vmatmul.msk.f32.gmra.mxu2 %vm1067_vm0, %v854_v59  ;;  %v857_v59 = vld [vmem:[%s19765_s0 + $0x1a70] sm:$0xff] }
 0x65d   :  { %11774 = vmatmul.msk.f32.gmra.mxu1 %vm1067_vm0, %v822_v8 }
 0x65e   :  { %11838 = vmatmul.msk.f32.gmra.mxu3 %vm1067_vm0, %v886_v29  ;;  %v825_v29 = vld [vmem:[%s19765_s0 + $0x1970] sm:$0xff] }
 0x65f   :  { %v5860_v51 = vpop.f32.mrf.mxu2 }
 0x660   :  { %8487 = vst [vmem:[#allocation2 + $0x16d8] sm:$0xff] %v5860_v51  ;;  %v9709_v3 = vadd.f32 %v9708_v9, %v5860_v51  ;;  %v5445_v33 = vpop.f32.mrf.mxu0  ;;  %v889_v9 = vld [vmem:[%s19765_s0 + $0x1b70] sm:$0xff] }
 0x661   :  { %8424 = vst [vmem:[#allocation2 + $0x14e0] sm:$0xff] %v5445_v33  ;;  %v9738_v17 = vadd.f32 %v16398_v14, %v5445_v33  ;;  %v6069_v43 = vpop.f32.mrf.mxu3 }
 0x662   :  { %8519 = vst [vmem:[#allocation2 + $0x17d8] sm:$0xff] %v6069_v43  ;;  %v16999_v15 = vadd.f32 %v9709_v3, %v6069_v43  ;;  %v5654_v11 = vpop.f32.mrf.mxu1 }
 0x663   :  { %8456 = vst [vmem:[#allocation2 + $0x15e0] sm:$0xff] %v5654_v11  ;;  %11743 = vmatmul.msk.f32.gmra.mxu0 %vm1067_vm0, %v791_v4  ;;  %v9739_v25 = vadd.f32 %v9738_v17, %v5654_v11  ;;  %v794_v4 = vld [vmem:[%s19765_s0 + $0x1878] sm:$0xff] }
 0x664   :  { %11807 = vmatmul.msk.f32.gmra.mxu2 %vm1067_vm0, %v855_v5  ;;  %v858_v5 = vld [vmem:[%s19765_s0 + $0x1a78] sm:$0xff] }
 0x665   :  { %11775 = vmatmul.msk.f32.gmra.mxu1 %vm1067_vm0, %v823_v13 }
 0x666   :  { %11839 = vmatmul.msk.f32.gmra.mxu3 %vm1067_vm0, %v887_v44  ;;  %v826_v44 = vld [vmem:[%s19765_s0 + $0x1978] sm:$0xff] }
 0x667   :  { %v5863_v14 = vpop.f32.mrf.mxu2 }
 0x668   :  { %8488 = vst [vmem:[#allocation2 + $0x16e0] sm:$0xff] %v5863_v14  ;;  %v9740_v22 = vadd.f32 %v9739_v25, %v5863_v14  ;;  %v5448_v23 = vpop.f32.mrf.mxu0  ;;  %v890_v25 = vld [vmem:[%s19765_s0 + $0x1b78] sm:$0xff] }
 0x669   :  { %8425 = vst [vmem:[#allocation2 + $0x14e8] sm:$0xff] %v5448_v23  ;;  %v9769_v21 = vadd.f32 %v16417_v24, %v5448_v23  ;;  %v6072_v54 = vpop.f32.mrf.mxu3 }
 0x66a   :  { %8520 = vst [vmem:[#allocation2 + $0x17e0] sm:$0xff] %v6072_v54  ;;  %v17018_v52 = vadd.f32 %v9740_v22, %v6072_v54  ;;  %v5657_v34 = vpop.f32.mrf.mxu1 }
 0x66b   :  { %8457 = vst [vmem:[#allocation2 + $0x15e8] sm:$0xff] %v5657_v34  ;;  %11744 = vmatmul.msk.f32.gmra.mxu0 %vm1067_vm0, %v792_v27  ;;  %v9770_v40 = vadd.f32 %v9769_v21, %v5657_v34  ;;  %v795_v27 = vld [vmem:[%s19765_s0 + $0x1880] sm:$0xff] }
 0x66c   :  { %11808 = vmatmul.msk.f32.gmra.mxu2 %vm1067_vm0, %v856_v28  ;;  %v859_v28 = vld [vmem:[%s19765_s0 + $0x1a80] sm:$0xff] }
 0x66d   :  { %11776 = vmatmul.msk.f32.gmra.mxu1 %vm1067_vm0, %v824_v35 }
 0x66e   :  { %11840 = vmatmul.msk.f32.gmra.mxu3 %vm1067_vm0, %v888_v58  ;;  %v827_v58 = vld [vmem:[%s19765_s0 + $0x1980] sm:$0xff] }
 0x66f   :  { %v5866_v24 = vpop.f32.mrf.mxu2 }
 0x670   :  { %8489 = vst [vmem:[#allocation2 + $0x16e8] sm:$0xff] %v5866_v24  ;;  %v9771_v45 = vadd.f32 %v9770_v40, %v5866_v24  ;;  %v5451_v46 = vpop.f32.mrf.mxu0  ;;  %v891_v40 = vld [vmem:[%s19765_s0 + $0x1b80] sm:$0xff] }
 0x671   :  { %8426 = vst [vmem:[#allocation2 + $0x14f0] sm:$0xff] %v5451_v46  ;;  %v9800_v32 = vadd.f32 %v16436_v1, %v5451_v46  ;;  %v6075_v2 = vpop.f32.mrf.mxu3 }
 0x672   :  { %8521 = vst [vmem:[#allocation2 + $0x17e8] sm:$0xff] %v6075_v2  ;;  %v17037_v55 = vadd.f32 %v9771_v45, %v6075_v2  ;;  %v5660_v8 = vpop.f32.mrf.mxu1 }
 0x673   :  { %8458 = vst [vmem:[#allocation2 + $0x15f0] sm:$0xff] %v5660_v8  ;;  %11745 = vmatmul.msk.f32.gmra.mxu0 %vm1067_vm0, %v793_v49  ;;  %v9801_v51 = vadd.f32 %v9800_v32, %v5660_v8  ;;  %v796_v49 = vld [vmem:[%s19765_s0 + $0x1888] sm:$0xff] }
 0x674   :  { %11809 = vmatmul.msk.f32.gmra.mxu2 %vm1067_vm0, %v857_v59  ;;  %v860_v59 = vld [vmem:[%s19765_s0 + $0x1a88] sm:$0xff] }
 0x675   :  { %11777 = vmatmul.msk.f32.gmra.mxu1 %vm1067_vm0, %v825_v29 }
 0x676   :  { %11841 = vmatmul.msk.f32.gmra.mxu3 %vm1067_vm0, %v889_v9  ;;  %v828_v9 = vld [vmem:[%s19765_s0 + $0x1988] sm:$0xff] }
 0x677   :  { %v5869_v1 = vpop.f32.mrf.mxu2 }
 0x678   :  { %8490 = vst [vmem:[#allocation2 + $0x16f0] sm:$0xff] %v5869_v1  ;;  %v9802_v3 = vadd.f32 %v9801_v51, %v5869_v1  ;;  %v5454_v33 = vpop.f32.mrf.mxu0  ;;  %v892_v51 = vld [vmem:[%s19765_s0 + $0x1b88] sm:$0xff] }
 0x679   :  { %8427 = vst [vmem:[#allocation2 + $0x14f8] sm:$0xff] %v5454_v33  ;;  %v9831_v17 = vadd.f32 %v16455_v12, %v5454_v33  ;;  %v6078_v43 = vpop.f32.mrf.mxu3 }
 0x67a   :  { %8522 = vst [vmem:[#allocation2 + $0x17f0] sm:$0xff] %v6078_v43  ;;  %v17056_v11 = vadd.f32 %v9802_v3, %v6078_v43  ;;  %v5663_v13 = vpop.f32.mrf.mxu1 }
 0x67b   :  { %8459 = vst [vmem:[#allocation2 + $0x15f8] sm:$0xff] %v5663_v13  ;;  %11746 = vmatmul.msk.f32.gmra.mxu0 %vm1067_vm0, %v794_v4  ;;  %v9832_v14 = vadd.f32 %v9831_v17, %v5663_v13  ;;  %v797_v4 = vld [vmem:[%s19765_s0 + $0x1890] sm:$0xff] }
 0x67c   :  { %11810 = vmatmul.msk.f32.gmra.mxu2 %vm1067_vm0, %v858_v5  ;;  %v861_v5 = vld [vmem:[%s19765_s0 + $0x1a90] sm:$0xff] }
 0x67d   :  { %11778 = vmatmul.msk.f32.gmra.mxu1 %vm1067_vm0, %v826_v44 }
 0x67e   :  { %11842 = vmatmul.msk.f32.gmra.mxu3 %vm1067_vm0, %v890_v25  ;;  %v829_v25 = vld [vmem:[%s19765_s0 + $0x1990] sm:$0xff] }
 0x67f   :  { %v5872_v12 = vpop.f32.mrf.mxu2 }
 0x680   :  { %8491 = vst [vmem:[#allocation2 + $0x16f8] sm:$0xff] %v5872_v12  ;;  %v9833_v22 = vadd.f32 %v9832_v14, %v5872_v12  ;;  %v6197_v23 = vpop.f32.mrf.mxu0  ;;  %v893_v14 = vld [vmem:[%s19765_s0 + $0x1b90] sm:$0xff] }
 0x681   :  { %v6081_v21 = vpop.f32.mrf.mxu3  ;;  %8524 = vst [vmem:[#allocation2 + $0x1800] sm:$0xff] %v6197_v23  ;;  %v8874_v54 = vadd.f32 %v16474_v39, %v6197_v23 }
 0x682   :  { %8523 = vst [vmem:[#allocation2 + $0x17f8] sm:$0xff] %v6081_v21  ;;  %v17075_v34 = vadd.f32 %v9833_v22, %v6081_v21  ;;  %v6406_v35 = vpop.f32.mrf.mxu1 }
 0x683   :  { %8556 = vst [vmem:[#allocation2 + $0x1900] sm:$0xff] %v6406_v35  ;;  %11747 = vmatmul.msk.f32.gmra.mxu0 %vm1067_vm0, %v795_v27  ;;  %v8875_v24 = vadd.f32 %v8874_v54, %v6406_v35  ;;  %v798_v27 = vld [vmem:[%s19765_s0 + $0x1898] sm:$0xff] }
 0x684   :  { %11811 = vmatmul.msk.f32.gmra.mxu2 %vm1067_vm0, %v859_v28  ;;  %v862_v28 = vld [vmem:[%s19765_s0 + $0x1a98] sm:$0xff] }
 0x685   :  { %11779 = vmatmul.msk.f32.gmra.mxu1 %vm1067_vm0, %v827_v58 }
 0x686   :  { %11843 = vmatmul.msk.f32.gmra.mxu3 %vm1067_vm0, %v891_v40  ;;  %v830_v40 = vld [vmem:[%s19765_s0 + $0x1998] sm:$0xff] }
 0x687   :  { %v6615_v39 = vpop.f32.mrf.mxu2 }
 0x688   :  { %8588 = vst [vmem:[#allocation2 + $0x1a00] sm:$0xff] %v6615_v39  ;;  %v8876_v45 = vadd.f32 %v8875_v24, %v6615_v39  ;;  %v6200_v46 = vpop.f32.mrf.mxu0  ;;  %v894_v24 = vld [vmem:[%s19765_s0 + $0x1b98] sm:$0xff] }
 0x689   :  { %8525 = vst [vmem:[#allocation2 + $0x1808] sm:$0xff] %v6200_v46  ;;  %v8905_v32 = vadd.f32 %v16493_v36, %v6200_v46  ;;  %v6824_v2 = vpop.f32.mrf.mxu3 }
 0x68a   :  { %8620 = vst [vmem:[#allocation2 + $0x1b00] sm:$0xff] %v6824_v2  ;;  %v17094_v8 = vadd.f32 %v8876_v45, %v6824_v2  ;;  %v6409_v29 = vpop.f32.mrf.mxu1 }
 0x68b   :  { %8557 = vst [vmem:[#allocation2 + $0x1908] sm:$0xff] %v6409_v29  ;;  %11748 = vmatmul.msk.f32.gmra.mxu0 %vm1067_vm0, %v796_v49  ;;  %v8906_v1 = vadd.f32 %v8905_v32, %v6409_v29  ;;  %v799_v49 = vld [vmem:[%s19765_s0 + $0x18a0] sm:$0xff] }
 0x68c   :  { %11812 = vmatmul.msk.f32.gmra.mxu2 %vm1067_vm0, %v860_v59  ;;  %v863_v59 = vld [vmem:[%s19765_s0 + $0x1aa0] sm:$0xff] }
 0x68d   :  { %11780 = vmatmul.msk.f32.gmra.mxu1 %vm1067_vm0, %v828_v9 }
 0x68e   :  { %11844 = vmatmul.msk.f32.gmra.mxu3 %vm1067_vm0, %v892_v51  ;;  %v831_v51 = vld [vmem:[%s19765_s0 + $0x19a0] sm:$0xff] }
 0x68f   :  { %v6618_v36 = vpop.f32.mrf.mxu2 }
 0x690   :  { %8589 = vst [vmem:[#allocation2 + $0x1a08] sm:$0xff] %v6618_v36  ;;  %v8907_v3 = vadd.f32 %v8906_v1, %v6618_v36  ;;  %v6203_v33 = vpop.f32.mrf.mxu0  ;;  %v895_v1 = vld [vmem:[%s19765_s0 + $0x1ba0] sm:$0xff] }
 0x691   :  { %8526 = vst [vmem:[#allocation2 + $0x1810] sm:$0xff] %v6203_v33  ;;  %v8936_v17 = vadd.f32 %v16512_v48, %v6203_v33  ;;  %v6827_v43 = vpop.f32.mrf.mxu3 }
 0x692   :  { %8621 = vst [vmem:[#allocation2 + $0x1b08] sm:$0xff] %v6827_v43  ;;  %v17113_v13 = vadd.f32 %v8907_v3, %v6827_v43  ;;  %v6412_v44 = vpop.f32.mrf.mxu1 }
 0x693   :  { %8558 = vst [vmem:[#allocation2 + $0x1910] sm:$0xff] %v6412_v44  ;;  %11749 = vmatmul.msk.f32.gmra.mxu0 %vm1067_vm0, %v797_v4  ;;  %v8937_v12 = vadd.f32 %v8936_v17, %v6412_v44  ;;  %v800_v4 = vld [vmem:[%s19765_s0 + $0x18a8] sm:$0xff] }
 0x694   :  { %11813 = vmatmul.msk.f32.gmra.mxu2 %vm1067_vm0, %v861_v5  ;;  %v864_v5 = vld [vmem:[%s19765_s0 + $0x1aa8] sm:$0xff] }
 0x695   :  { %11781 = vmatmul.msk.f32.gmra.mxu1 %vm1067_vm0, %v829_v25 }
 0x696   :  { %11845 = vmatmul.msk.f32.gmra.mxu3 %vm1067_vm0, %v893_v14  ;;  %v832_v14 = vld [vmem:[%s19765_s0 + $0x19a8] sm:$0xff] }
 0x697   :  { %v6621_v48 = vpop.f32.mrf.mxu2 }
 0x698   :  { %8590 = vst [vmem:[#allocation2 + $0x1a10] sm:$0xff] %v6621_v48  ;;  %v8938_v22 = vadd.f32 %v8937_v12, %v6621_v48  ;;  %v6206_v23 = vpop.f32.mrf.mxu0  ;;  %v896_v12 = vld [vmem:[%s19765_s0 + $0x1ba8] sm:$0xff] }
 0x699   :  { %8527 = vst [vmem:[#allocation2 + $0x1818] sm:$0xff] %v6206_v23  ;;  %v8967_v21 = vadd.f32 %v16531_v6, %v6206_v23  ;;  %v6830_v54 = vpop.f32.mrf.mxu3 }
 0x69a   :  { %8622 = vst [vmem:[#allocation2 + $0x1b10] sm:$0xff] %v6830_v54  ;;  %v17132_v35 = vadd.f32 %v8938_v22, %v6830_v54  ;;  %v6415_v58 = vpop.f32.mrf.mxu1 }
 0x69b   :  { %8559 = vst [vmem:[#allocation2 + $0x1918] sm:$0xff] %v6415_v58  ;;  %11750 = vmatmul.msk.f32.gmra.mxu0 %vm1067_vm0, %v798_v27  ;;  %v8968_v39 = vadd.f32 %v8967_v21, %v6415_v58  ;;  %v801_v27 = vld [vmem:[%s19765_s0 + $0x18b0] sm:$0xff] }
 0x69c   :  { %11814 = vmatmul.msk.f32.gmra.mxu2 %vm1067_vm0, %v862_v28  ;;  %v865_v28 = vld [vmem:[%s19765_s0 + $0x1ab0] sm:$0xff] }
 0x69d   :  { %11782 = vmatmul.msk.f32.gmra.mxu1 %vm1067_vm0, %v830_v40 }
 0x69e   :  { %11846 = vmatmul.msk.f32.gmra.mxu3 %vm1067_vm0, %v894_v24  ;;  %v833_v24 = vld [vmem:[%s19765_s0 + $0x19b0] sm:$0xff] }
 0x69f   :  { %v6624_v6 = vpop.f32.mrf.mxu2 }
 0x6a0   :  { %8591 = vst [vmem:[#allocation2 + $0x1a18] sm:$0xff] %v6624_v6  ;;  %v8969_v45 = vadd.f32 %v8968_v39, %v6624_v6  ;;  %v6209_v46 = vpop.f32.mrf.mxu0  ;;  %v897_v39 = vld [vmem:[%s19765_s0 + $0x1bb0] sm:$0xff] }
 0x6a1   :  { %8528 = vst [vmem:[#allocation2 + $0x1820] sm:$0xff] %v6209_v46  ;;  %v8998_v32 = vadd.f32 %v16550_v30, %v6209_v46  ;;  %v6833_v2 = vpop.f32.mrf.mxu3 }
 0x6a2   :  { %8623 = vst [vmem:[#allocation2 + $0x1b18] sm:$0xff] %v6833_v2  ;;  %v17151_v29 = vadd.f32 %v8969_v45, %v6833_v2  ;;  %v6418_v9 = vpop.f32.mrf.mxu1 }
 0x6a3   :  { %8560 = vst [vmem:[#allocation2 + $0x1920] sm:$0xff] %v6418_v9  ;;  %11751 = vmatmul.msk.f32.gmra.mxu0 %vm1067_vm0, %v799_v49  ;;  %v8999_v36 = vadd.f32 %v8998_v32, %v6418_v9  ;;  %v802_v49 = vld [vmem:[%s19765_s0 + $0x18b8] sm:$0xff] }
 0x6a4   :  { %11815 = vmatmul.msk.f32.gmra.mxu2 %vm1067_vm0, %v863_v59  ;;  %v866_v59 = vld [vmem:[%s19765_s0 + $0x1ab8] sm:$0xff] }
 0x6a5   :  { %11783 = vmatmul.msk.f32.gmra.mxu1 %vm1067_vm0, %v831_v51 }
 0x6a6   :  { %11847 = vmatmul.msk.f32.gmra.mxu3 %vm1067_vm0, %v895_v1  ;;  %v834_v1 = vld [vmem:[%s19765_s0 + $0x19b8] sm:$0xff] }
 0x6a7   :  { %v6627_v30 = vpop.f32.mrf.mxu2 }
 0x6a8   :  { %8592 = vst [vmem:[#allocation2 + $0x1a20] sm:$0xff] %v6627_v30  ;;  %v9000_v3 = vadd.f32 %v8999_v36, %v6627_v30  ;;  %v6212_v33 = vpop.f32.mrf.mxu0  ;;  %v898_v36 = vld [vmem:[%s19765_s0 + $0x1bb8] sm:$0xff] }
 0x6a9   :  { %8529 = vst [vmem:[#allocation2 + $0x1828] sm:$0xff] %v6212_v33  ;;  %v9029_v17 = vadd.f32 %v16569_v50, %v6212_v33  ;;  %v6836_v43 = vpop.f32.mrf.mxu3 }
 0x6aa   :  { %8624 = vst [vmem:[#allocation2 + $0x1b20] sm:$0xff] %v6836_v43  ;;  %v17170_v44 = vadd.f32 %v9000_v3, %v6836_v43  ;;  %v6421_v25 = vpop.f32.mrf.mxu1 }
 0x6ab   :  { %8561 = vst [vmem:[#allocation2 + $0x1928] sm:$0xff] %v6421_v25  ;;  %11752 = vmatmul.msk.f32.gmra.mxu0 %vm1067_vm0, %v800_v4  ;;  %v9030_v48 = vadd.f32 %v9029_v17, %v6421_v25  ;;  %v803_v4 = vld [vmem:[%s19765_s0 + $0x18c0] sm:$0xff] }
 0x6ac   :  { %11816 = vmatmul.msk.f32.gmra.mxu2 %vm1067_vm0, %v864_v5  ;;  %v867_v5 = vld [vmem:[%s19765_s0 + $0x1ac0] sm:$0xff] }
 0x6ad   :  { %11784 = vmatmul.msk.f32.gmra.mxu1 %vm1067_vm0, %v832_v14 }
 0x6ae   :  { %11848 = vmatmul.msk.f32.gmra.mxu3 %vm1067_vm0, %v896_v12  ;;  %v835_v12 = vld [vmem:[%s19765_s0 + $0x19c0] sm:$0xff] }
 0x6af   :  { %v6630_v50 = vpop.f32.mrf.mxu2 }
 0x6b0   :  { %8593 = vst [vmem:[#allocation2 + $0x1a28] sm:$0xff] %v6630_v50  ;;  %v9031_v22 = vadd.f32 %v9030_v48, %v6630_v50  ;;  %v6215_v23 = vpop.f32.mrf.mxu0  ;;  %v899_v48 = vld [vmem:[%s19765_s0 + $0x1bc0] sm:$0xff] }
 0x6b1   :  { %8530 = vst [vmem:[#allocation2 + $0x1830] sm:$0xff] %v6215_v23  ;;  %v9060_v21 = vadd.f32 %v16588_v10, %v6215_v23  ;;  %v6839_v54 = vpop.f32.mrf.mxu3 }
 0x6b2   :  { %8625 = vst [vmem:[#allocation2 + $0x1b28] sm:$0xff] %v6839_v54  ;;  %v17189_v58 = vadd.f32 %v9031_v22, %v6839_v54  ;;  %v6424_v40 = vpop.f32.mrf.mxu1 }
 0x6b3   :  { %8562 = vst [vmem:[#allocation2 + $0x1930] sm:$0xff] %v6424_v40  ;;  %11753 = vmatmul.msk.f32.gmra.mxu0 %vm1067_vm0, %v801_v27  ;;  %v9061_v6 = vadd.f32 %v9060_v21, %v6424_v40  ;;  %v804_v27 = vld [vmem:[%s19765_s0 + $0x18c8] sm:$0xff] }
 0x6b4   :  { %11817 = vmatmul.msk.f32.gmra.mxu2 %vm1067_vm0, %v865_v28  ;;  %v868_v28 = vld [vmem:[%s19765_s0 + $0x1ac8] sm:$0xff] }
 0x6b5   :  { %11785 = vmatmul.msk.f32.gmra.mxu1 %vm1067_vm0, %v833_v24 }
 0x6b6   :  { %11849 = vmatmul.msk.f32.gmra.mxu3 %vm1067_vm0, %v897_v39  ;;  %v836_v39 = vld [vmem:[%s19765_s0 + $0x19c8] sm:$0xff] }
 0x6b7   :  { %v6633_v10 = vpop.f32.mrf.mxu2 }
 0x6b8   :  { %8594 = vst [vmem:[#allocation2 + $0x1a30] sm:$0xff] %v6633_v10  ;;  %v9062_v45 = vadd.f32 %v9061_v6, %v6633_v10  ;;  %v6218_v46 = vpop.f32.mrf.mxu0  ;;  %v900_v6 = vld [vmem:[%s19765_s0 + $0x1bc8] sm:$0xff] }
 0x6b9   :  { %8531 = vst [vmem:[#allocation2 + $0x1838] sm:$0xff] %v6218_v46  ;;  %v9091_v32 = vadd.f32 %v16607_v31, %v6218_v46  ;;  %v6842_v2 = vpop.f32.mrf.mxu3 }
 0x6ba   :  { %8626 = vst [vmem:[#allocation2 + $0x1b30] sm:$0xff] %v6842_v2  ;;  %v17208_v9 = vadd.f32 %v9062_v45, %v6842_v2  ;;  %v6427_v51 = vpop.f32.mrf.mxu1 }
 0x6bb   :  { %8563 = vst [vmem:[#allocation2 + $0x1938] sm:$0xff] %v6427_v51  ;;  %11754 = vmatmul.msk.f32.gmra.mxu0 %vm1067_vm0, %v802_v49  ;;  %v9092_v30 = vadd.f32 %v9091_v32, %v6427_v51  ;;  %v805_v49 = vld [vmem:[%s19765_s0 + $0x18d0] sm:$0xff] }
 0x6bc   :  { %11818 = vmatmul.msk.f32.gmra.mxu2 %vm1067_vm0, %v866_v59  ;;  %v869_v59 = vld [vmem:[%s19765_s0 + $0x1ad0] sm:$0xff] }
 0x6bd   :  { %11786 = vmatmul.msk.f32.gmra.mxu1 %vm1067_vm0, %v834_v1 }
 0x6be   :  { %11850 = vmatmul.msk.f32.gmra.mxu3 %vm1067_vm0, %v898_v36  ;;  %v837_v36 = vld [vmem:[%s19765_s0 + $0x19d0] sm:$0xff] }
 0x6bf   :  { %v6636_v31 = vpop.f32.mrf.mxu2 }
 0x6c0   :  { %8595 = vst [vmem:[#allocation2 + $0x1a38] sm:$0xff] %v6636_v31  ;;  %v9093_v3 = vadd.f32 %v9092_v30, %v6636_v31  ;;  %v6221_v33 = vpop.f32.mrf.mxu0  ;;  %v901_v30 = vld [vmem:[%s19765_s0 + $0x1bd0] sm:$0xff] }
 0x6c1   :  { %8532 = vst [vmem:[#allocation2 + $0x1840] sm:$0xff] %v6221_v33  ;;  %v9122_v17 = vadd.f32 %v16626_v53, %v6221_v33  ;;  %v6845_v43 = vpop.f32.mrf.mxu3 }
 0x6c2   :  { %8627 = vst [vmem:[#allocation2 + $0x1b38] sm:$0xff] %v6845_v43  ;;  %v17227_v25 = vadd.f32 %v9093_v3, %v6845_v43  ;;  %v6430_v14 = vpop.f32.mrf.mxu1 }
 0x6c3   :  { %8564 = vst [vmem:[#allocation2 + $0x1940] sm:$0xff] %v6430_v14  ;;  %11755 = vmatmul.msk.f32.gmra.mxu0 %vm1067_vm0, %v803_v4  ;;  %v9123_v50 = vadd.f32 %v9122_v17, %v6430_v14  ;;  %v806_v4 = vld [vmem:[%s19765_s0 + $0x18d8] sm:$0xff] }
 0x6c4   :  { %11819 = vmatmul.msk.f32.gmra.mxu2 %vm1067_vm0, %v867_v5  ;;  %v870_v5 = vld [vmem:[%s19765_s0 + $0x1ad8] sm:$0xff] }
 0x6c5   :  { %11787 = vmatmul.msk.f32.gmra.mxu1 %vm1067_vm0, %v835_v12 }
 0x6c6   :  { %11851 = vmatmul.msk.f32.gmra.mxu3 %vm1067_vm0, %v899_v48  ;;  %v838_v48 = vld [vmem:[%s19765_s0 + $0x19d8] sm:$0xff] }
 0x6c7   :  { %v6639_v53 = vpop.f32.mrf.mxu2 }
 0x6c8   :  { %8596 = vst [vmem:[#allocation2 + $0x1a40] sm:$0xff] %v6639_v53  ;;  %v9124_v22 = vadd.f32 %v9123_v50, %v6639_v53  ;;  %v6224_v23 = vpop.f32.mrf.mxu0  ;;  %v902_v50 = vld [vmem:[%s19765_s0 + $0x1bd8] sm:$0xff] }
 0x6c9   :  { %8533 = vst [vmem:[#allocation2 + $0x1848] sm:$0xff] %v6224_v23  ;;  %v9153_v21 = vadd.f32 %v16645_v37, %v6224_v23  ;;  %v6848_v54 = vpop.f32.mrf.mxu3 }
 0x6ca   :  { %8628 = vst [vmem:[#allocation2 + $0x1b40] sm:$0xff] %v6848_v54  ;;  %v17246_v40 = vadd.f32 %v9124_v22, %v6848_v54  ;;  %v6433_v24 = vpop.f32.mrf.mxu1 }
 0x6cb   :  { %8565 = vst [vmem:[#allocation2 + $0x1948] sm:$0xff] %v6433_v24  ;;  %11756 = vmatmul.msk.f32.gmra.mxu0 %vm1067_vm0, %v804_v27  ;;  %v9154_v10 = vadd.f32 %v9153_v21, %v6433_v24  ;;  %v807_v27 = vld [vmem:[%s19765_s0 + $0x18e0] sm:$0xff] }
 0x6cc   :  { %11820 = vmatmul.msk.f32.gmra.mxu2 %vm1067_vm0, %v868_v28  ;;  %v871_v28 = vld [vmem:[%s19765_s0 + $0x1ae0] sm:$0xff] }
 0x6cd   :  { %11788 = vmatmul.msk.f32.gmra.mxu1 %vm1067_vm0, %v836_v39 }
 0x6ce   :  { %11852 = vmatmul.msk.f32.gmra.mxu3 %vm1067_vm0, %v900_v6  ;;  %v839_v6 = vld [vmem:[%s19765_s0 + $0x19e0] sm:$0xff] }
 0x6cf   :  { %v6642_v37 = vpop.f32.mrf.mxu2 }
 0x6d0   :  { %8597 = vst [vmem:[#allocation2 + $0x1a48] sm:$0xff] %v6642_v37  ;;  %v9155_v45 = vadd.f32 %v9154_v10, %v6642_v37  ;;  %v6227_v46 = vpop.f32.mrf.mxu0  ;;  %v903_v10 = vld [vmem:[%s19765_s0 + $0x1be0] sm:$0xff] }
 0x6d1   :  { %8534 = vst [vmem:[#allocation2 + $0x1850] sm:$0xff] %v6227_v46  ;;  %v9184_v32 = vadd.f32 %v16664_v57, %v6227_v46  ;;  %v6851_v2 = vpop.f32.mrf.mxu3 }
 0x6d2   :  { %8629 = vst [vmem:[#allocation2 + $0x1b48] sm:$0xff] %v6851_v2  ;;  %v17265_v51 = vadd.f32 %v9155_v45, %v6851_v2  ;;  %v6436_v1 = vpop.f32.mrf.mxu1 }
 0x6d3   :  { %8566 = vst [vmem:[#allocation2 + $0x1950] sm:$0xff] %v6436_v1  ;;  %11757 = vmatmul.msk.f32.gmra.mxu0 %vm1067_vm0, %v805_v49  ;;  %v9185_v31 = vadd.f32 %v9184_v32, %v6436_v1  ;;  %v808_v49 = vld [vmem:[%s19765_s0 + $0x18e8] sm:$0xff] }
 0x6d4   :  { %11821 = vmatmul.msk.f32.gmra.mxu2 %vm1067_vm0, %v869_v59  ;;  %v872_v59 = vld [vmem:[%s19765_s0 + $0x1ae8] sm:$0xff] }
 0x6d5   :  { %11789 = vmatmul.msk.f32.gmra.mxu1 %vm1067_vm0, %v837_v36 }
 0x6d6   :  { %11853 = vmatmul.msk.f32.gmra.mxu3 %vm1067_vm0, %v901_v30  ;;  %v840_v30 = vld [vmem:[%s19765_s0 + $0x19e8] sm:$0xff] }
 0x6d7   :  { %v6645_v57 = vpop.f32.mrf.mxu2 }
 0x6d8   :  { %8598 = vst [vmem:[#allocation2 + $0x1a50] sm:$0xff] %v6645_v57  ;;  %v9186_v3 = vadd.f32 %v9185_v31, %v6645_v57  ;;  %v6230_v33 = vpop.f32.mrf.mxu0  ;;  %v904_v31 = vld [vmem:[%s19765_s0 + $0x1be8] sm:$0xff] }
 0x6d9   :  { %8535 = vst [vmem:[#allocation2 + $0x1858] sm:$0xff] %v6230_v33  ;;  %v9215_v17 = vadd.f32 %v16683_v47, %v6230_v33  ;;  %v6854_v43 = vpop.f32.mrf.mxu3 }
 0x6da   :  { %8630 = vst [vmem:[#allocation2 + $0x1b50] sm:$0xff] %v6854_v43  ;;  %v17284_v14 = vadd.f32 %v9186_v3, %v6854_v43  ;;  %v6439_v12 = vpop.f32.mrf.mxu1 }
 0x6db   :  { %8567 = vst [vmem:[#allocation2 + $0x1958] sm:$0xff] %v6439_v12  ;;  %11758 = vmatmul.msk.f32.gmra.mxu0 %vm1067_vm0, %v806_v4  ;;  %v9216_v53 = vadd.f32 %v9215_v17, %v6439_v12  ;;  %v809_v4 = vld [vmem:[%s19765_s0 + $0x18f0] sm:$0xff] }
 0x6dc   :  { %11822 = vmatmul.msk.f32.gmra.mxu2 %vm1067_vm0, %v870_v5  ;;  %v873_v5 = vld [vmem:[%s19765_s0 + $0x1af0] sm:$0xff] }
 0x6dd   :  { %11790 = vmatmul.msk.f32.gmra.mxu1 %vm1067_vm0, %v838_v48 }
 0x6de   :  { %11854 = vmatmul.msk.f32.gmra.mxu3 %vm1067_vm0, %v902_v50  ;;  %v841_v50 = vld [vmem:[%s19765_s0 + $0x19f0] sm:$0xff] }
 0x6df   :  { %v6648_v47 = vpop.f32.mrf.mxu2 }
 0x6e0   :  { %8599 = vst [vmem:[#allocation2 + $0x1a58] sm:$0xff] %v6648_v47  ;;  %v9217_v22 = vadd.f32 %v9216_v53, %v6648_v47  ;;  %v6233_v23 = vpop.f32.mrf.mxu0  ;;  %v905_v53 = vld [vmem:[%s19765_s0 + $0x1bf0] sm:$0xff] }
 0x6e1   :  { %8536 = vst [vmem:[#allocation2 + $0x1860] sm:$0xff] %v6233_v23  ;;  %v9246_v21 = vadd.f32 %v16714_v60, %v6233_v23  ;;  %v6857_v54 = vpop.f32.mrf.mxu3 }
 0x6e2   :  { %8631 = vst [vmem:[#allocation2 + $0x1b58] sm:$0xff] %v6857_v54  ;;  %v17303_v24 = vadd.f32 %v9217_v22, %v6857_v54  ;;  %v6442_v39 = vpop.f32.mrf.mxu1 }
 0x6e3   :  { %8568 = vst [vmem:[#allocation2 + $0x1960] sm:$0xff] %v6442_v39  ;;  %11759 = vmatmul.msk.f32.gmra.mxu0 %vm1067_vm0, %v807_v27  ;;  %v9247_v37 = vadd.f32 %v9246_v21, %v6442_v39  ;;  %v810_v27 = vld [vmem:[%s19765_s0 + $0x18f8] sm:$0xff] }
 0x6e4   :  { %11823 = vmatmul.msk.f32.gmra.mxu2 %vm1067_vm0, %v871_v28  ;;  %v874_v28 = vld [vmem:[%s19765_s0 + $0x1af8] sm:$0xff] }
 0x6e5   :  { %11791 = vmatmul.msk.f32.gmra.mxu1 %vm1067_vm0, %v839_v6 }
 0x6e6   :  { %11855 = vmatmul.msk.f32.gmra.mxu3 %vm1067_vm0, %v903_v10  ;;  %v842_v10 = vld [vmem:[%s19765_s0 + $0x19f8] sm:$0xff] }
 0x6e7   :  { %v6651_v60 = vpop.f32.mrf.mxu2 }
 0x6e8   :  { %8600 = vst [vmem:[#allocation2 + $0x1a60] sm:$0xff] %v6651_v60  ;;  %v9248_v45 = vadd.f32 %v9247_v37, %v6651_v60  ;;  %v6236_v46 = vpop.f32.mrf.mxu0  ;;  %v906_v37 = vld [vmem:[%s19765_s0 + $0x1bf8] sm:$0xff] }
 0x6e9   :  { %8537 = vst [vmem:[#allocation2 + $0x1868] sm:$0xff] %v6236_v46  ;;  %v9277_v32 = vadd.f32 %v16733_v62, %v6236_v46  ;;  %v6860_v2 = vpop.f32.mrf.mxu3 }
 0x6ea   :  { %8632 = vst [vmem:[#allocation2 + $0x1b60] sm:$0xff] %v6860_v2  ;;  %v17322_v1 = vadd.f32 %v9248_v45, %v6860_v2  ;;  %v6445_v36 = vpop.f32.mrf.mxu1 }
 0x6eb   :  { %8569 = vst [vmem:[#allocation2 + $0x1968] sm:$0xff] %v6445_v36  ;;  %11760 = vmatmul.msk.f32.gmra.mxu0 %vm1067_vm0, %v808_v49  ;;  %v9278_v57 = vadd.f32 %v9277_v32, %v6445_v36  ;;  %v907_v49 = vld [vmem:[%s19765_s0 + $0x1c00] sm:$0xff] }
 0x6ec   :  { %11824 = vmatmul.msk.f32.gmra.mxu2 %vm1067_vm0, %v872_v59  ;;  %v971_v59 = vld [vmem:[%s19765_s0 + $0x1e00] sm:$0xff] }
 0x6ed   :  { %11792 = vmatmul.msk.f32.gmra.mxu1 %vm1067_vm0, %v840_v30 }
 0x6ee   :  { %11856 = vmatmul.msk.f32.gmra.mxu3 %vm1067_vm0, %v904_v31  ;;  %v939_v31 = vld [vmem:[%s19765_s0 + $0x1d00] sm:$0xff] }
 0x6ef   :  { %v6654_v62 = vpop.f32.mrf.mxu2 }
 0x6f0   :  { %8601 = vst [vmem:[#allocation2 + $0x1a68] sm:$0xff] %v6654_v62  ;;  %v9279_v3 = vadd.f32 %v9278_v57, %v6654_v62  ;;  %v6239_v33 = vpop.f32.mrf.mxu0  ;;  %v1003_v57 = vld [vmem:[%s19765_s0 + $0x1f00] sm:$0xff] }
 0x6f1   :  { %8538 = vst [vmem:[#allocation2 + $0x1870] sm:$0xff] %v6239_v33  ;;  %v9308_v17 = vadd.f32 %v16752_v20, %v6239_v33  ;;  %v6863_v43 = vpop.f32.mrf.mxu3 }
 0x6f2   :  { %8633 = vst [vmem:[#allocation2 + $0x1b68] sm:$0xff] %v6863_v43  ;;  %v17341_v12 = vadd.f32 %v9279_v3, %v6863_v43  ;;  %v6448_v48 = vpop.f32.mrf.mxu1 }
 0x6f3   :  { %8570 = vst [vmem:[#allocation2 + $0x1970] sm:$0xff] %v6448_v48  ;;  %11761 = vmatmul.msk.f32.gmra.mxu0 %vm1067_vm0, %v809_v4  ;;  %v9309_v47 = vadd.f32 %v9308_v17, %v6448_v48  ;;  %v908_v4 = vld [vmem:[%s19765_s0 + $0x1c08] sm:$0xff] }
 0x6f4   :  { %11825 = vmatmul.msk.f32.gmra.mxu2 %vm1067_vm0, %v873_v5  ;;  %v972_v5 = vld [vmem:[%s19765_s0 + $0x1e08] sm:$0xff] }
 0x6f5   :  { %11793 = vmatmul.msk.f32.gmra.mxu1 %vm1067_vm0, %v841_v50 }
 0x6f6   :  { %11857 = vmatmul.msk.f32.gmra.mxu3 %vm1067_vm0, %v905_v53  ;;  %v940_v53 = vld [vmem:[%s19765_s0 + $0x1d08] sm:$0xff] }
 0x6f7   :  { %v6657_v20 = vpop.f32.mrf.mxu2 }
 0x6f8   :  { %8602 = vst [vmem:[#allocation2 + $0x1a70] sm:$0xff] %v6657_v20  ;;  %v9310_v22 = vadd.f32 %v9309_v47, %v6657_v20  ;;  %v6242_v23 = vpop.f32.mrf.mxu0  ;;  %v1004_v47 = vld [vmem:[%s19765_s0 + $0x1f08] sm:$0xff] }
 0x6f9   :  { %8539 = vst [vmem:[#allocation2 + $0x1878] sm:$0xff] %v6242_v23  ;;  %v9339_v21 = vadd.f32 %v16771_v26, %v6242_v23  ;;  %v6866_v54 = vpop.f32.mrf.mxu3 }
 0x6fa   :  { %8634 = vst [vmem:[#allocation2 + $0x1b70] sm:$0xff] %v6866_v54  ;;  %v17360_v39 = vadd.f32 %v9310_v22, %v6866_v54  ;;  %v6451_v6 = vpop.f32.mrf.mxu1 }
 0x6fb   :  { %8571 = vst [vmem:[#allocation2 + $0x1978] sm:$0xff] %v6451_v6  ;;  %11762 = vmatmul.msk.f32.gmra.mxu0 %vm1067_vm0, %v810_v27  ;;  %v9340_v60 = vadd.f32 %v9339_v21, %v6451_v6  ;;  %v909_v27 = vld [vmem:[%s19765_s0 + $0x1c10] sm:$0xff] }
 0x6fc   :  { %11826 = vmatmul.msk.f32.gmra.mxu2 %vm1067_vm0, %v874_v28  ;;  %v973_v28 = vld [vmem:[%s19765_s0 + $0x1e10] sm:$0xff] }
 0x6fd   :  { %11794 = vmatmul.msk.f32.gmra.mxu1 %vm1067_vm0, %v842_v10 }
 0x6fe   :  { %11858 = vmatmul.msk.f32.gmra.mxu3 %vm1067_vm0, %v906_v37  ;;  %v941_v37 = vld [vmem:[%s19765_s0 + $0x1d10] sm:$0xff] }
 0x6ff   :  { %v6660_v26 = vpop.f32.mrf.mxu2 }
 0x700   :  { %8603 = vst [vmem:[#allocation2 + $0x1a78] sm:$0xff] %v6660_v26  ;;  %v9341_v45 = vadd.f32 %v9340_v60, %v6660_v26  ;;  %v6245_v46 = vpop.f32.mrf.mxu0  ;;  %v1005_v60 = vld [vmem:[%s19765_s0 + $0x1f10] sm:$0xff] }
 0x701   :  { %8540 = vst [vmem:[#allocation2 + $0x1880] sm:$0xff] %v6245_v46  ;;  %v9370_v32 = vadd.f32 %v16790_v56, %v6245_v46  ;;  %v6869_v2 = vpop.f32.mrf.mxu3 }
 0x702   :  { %8635 = vst [vmem:[#allocation2 + $0x1b78] sm:$0xff] %v6869_v2  ;;  %v17379_v36 = vadd.f32 %v9341_v45, %v6869_v2  ;;  %v6454_v30 = vpop.f32.mrf.mxu1 }
 0x703   :  { %8572 = vst [vmem:[#allocation2 + $0x1980] sm:$0xff] %v6454_v30  ;;  %11859 = vmatmul.msk.f32.vlgmr.msrb.gmra.mxu0 %vm1067_vm0, %v907_v49  ;;  %v9371_v62 = vadd.f32 %v9370_v32, %v6454_v30  ;;  %v910_v49 = vld [vmem:[%s19765_s0 + $0x1c18] sm:$0xff] }
 0x704   :  { %11923 = vmatmul.msk.f32.vlgmr.msrb.gmra.mxu2 %vm1067_vm0, %v971_v59  ;;  %v974_v59 = vld [vmem:[%s19765_s0 + $0x1e18] sm:$0xff] }
 0x705   :  { %11891 = vmatmul.msk.f32.vlgmr.msrb.gmra.mxu1 %vm1067_vm0, %v939_v31 }
 0x706   :  { %11955 = vmatmul.msk.f32.vlgmr.msrb.gmra.mxu3 %vm1067_vm0, %v1003_v57  ;;  %v942_v57 = vld [vmem:[%s19765_s0 + $0x1d18] sm:$0xff] }
 0x707   :  { %v6663_v56 = vpop.f32.mrf.mxu2 }
 0x708   :  { %8604 = vst [vmem:[#allocation2 + $0x1a80] sm:$0xff] %v6663_v56  ;;  %v9372_v3 = vadd.f32 %v9371_v62, %v6663_v56  ;;  %v6248_v33 = vpop.f32.mrf.mxu0  ;;  %v1006_v62 = vld [vmem:[%s19765_s0 + $0x1f18] sm:$0xff] }
 0x709   :  { %8541 = vst [vmem:[#allocation2 + $0x1888] sm:$0xff] %v6248_v33  ;;  %v9401_v17 = vadd.f32 %v16809_v7, %v6248_v33  ;;  %v6872_v43 = vpop.f32.mrf.mxu3 }
 0x70a   :  { %8636 = vst [vmem:[#allocation2 + $0x1b80] sm:$0xff] %v6872_v43  ;;  %v17398_v48 = vadd.f32 %v9372_v3, %v6872_v43  ;;  %v6457_v50 = vpop.f32.mrf.mxu1 }
 0x70b   :  { %8573 = vst [vmem:[#allocation2 + $0x1988] sm:$0xff] %v6457_v50  ;;  %11860 = vmatmul.msk.f32.gmra.mxu0 %vm1067_vm0, %v908_v4  ;;  %v9402_v20 = vadd.f32 %v9401_v17, %v6457_v50  ;;  %v911_v4 = vld [vmem:[%s19765_s0 + $0x1c20] sm:$0xff] }
 0x70c   :  { %11924 = vmatmul.msk.f32.gmra.mxu2 %vm1067_vm0, %v972_v5  ;;  %v975_v5 = vld [vmem:[%s19765_s0 + $0x1e20] sm:$0xff] }
 0x70d   :  { %11892 = vmatmul.msk.f32.gmra.mxu1 %vm1067_vm0, %v940_v53 }
 0x70e   :  { %11956 = vmatmul.msk.f32.gmra.mxu3 %vm1067_vm0, %v1004_v47  ;;  %v943_v47 = vld [vmem:[%s19765_s0 + $0x1d20] sm:$0xff] }
 0x70f   :  { %v6666_v7 = vpop.f32.mrf.mxu2 }
 0x710   :  { %8605 = vst [vmem:[#allocation2 + $0x1a88] sm:$0xff] %v6666_v7  ;;  %v9403_v22 = vadd.f32 %v9402_v20, %v6666_v7  ;;  %v6251_v23 = vpop.f32.mrf.mxu0  ;;  %v1007_v20 = vld [vmem:[%s19765_s0 + $0x1f20] sm:$0xff] }
 0x711   :  { %8542 = vst [vmem:[#allocation2 + $0x1890] sm:$0xff] %v6251_v23  ;;  %v9432_v21 = vadd.f32 %v16828_v16, %v6251_v23  ;;  %v6875_v54 = vpop.f32.mrf.mxu3 }
 0x712   :  { %8637 = vst [vmem:[#allocation2 + $0x1b88] sm:$0xff] %v6875_v54  ;;  %v17417_v6 = vadd.f32 %v9403_v22, %v6875_v54  ;;  %v6460_v10 = vpop.f32.mrf.mxu1 }
 0x713   :  { %8574 = vst [vmem:[#allocation2 + $0x1990] sm:$0xff] %v6460_v10  ;;  %11861 = vmatmul.msk.f32.gmra.mxu0 %vm1067_vm0, %v909_v27  ;;  %v9433_v26 = vadd.f32 %v9432_v21, %v6460_v10  ;;  %v912_v27 = vld [vmem:[%s19765_s0 + $0x1c28] sm:$0xff] }
 0x714   :  { %11925 = vmatmul.msk.f32.gmra.mxu2 %vm1067_vm0, %v973_v28  ;;  %v976_v28 = vld [vmem:[%s19765_s0 + $0x1e28] sm:$0xff] }
 0x715   :  { %11893 = vmatmul.msk.f32.gmra.mxu1 %vm1067_vm0, %v941_v37 }
 0x716   :  { %11957 = vmatmul.msk.f32.gmra.mxu3 %vm1067_vm0, %v1005_v60  ;;  %v944_v60 = vld [vmem:[%s19765_s0 + $0x1d28] sm:$0xff] }
 0x717   :  { %v6669_v16 = vpop.f32.mrf.mxu2 }
 0x718   :  { %8606 = vst [vmem:[#allocation2 + $0x1a90] sm:$0xff] %v6669_v16  ;;  %v9434_v45 = vadd.f32 %v9433_v26, %v6669_v16  ;;  %v6254_v46 = vpop.f32.mrf.mxu0  ;;  %v1008_v26 = vld [vmem:[%s19765_s0 + $0x1f28] sm:$0xff] }
 0x719   :  { %8543 = vst [vmem:[#allocation2 + $0x1898] sm:$0xff] %v6254_v46  ;;  %v9463_v32 = vadd.f32 %v16847_v42, %v6254_v46  ;;  %v6878_v2 = vpop.f32.mrf.mxu3 }
 0x71a   :  { %8638 = vst [vmem:[#allocation2 + $0x1b90] sm:$0xff] %v6878_v2  ;;  %v17436_v30 = vadd.f32 %v9434_v45, %v6878_v2  ;;  %v6463_v31 = vpop.f32.mrf.mxu1 }
 0x71b   :  { %8575 = vst [vmem:[#allocation2 + $0x1998] sm:$0xff] %v6463_v31  ;;  %11862 = vmatmul.msk.f32.gmra.mxu0 %vm1067_vm0, %v910_v49  ;;  %v9464_v56 = vadd.f32 %v9463_v32, %v6463_v31  ;;  %v913_v49 = vld [vmem:[%s19765_s0 + $0x1c30] sm:$0xff] }
 0x71c   :  { %11926 = vmatmul.msk.f32.gmra.mxu2 %vm1067_vm0, %v974_v59  ;;  %v977_v59 = vld [vmem:[%s19765_s0 + $0x1e30] sm:$0xff] }
 0x71d   :  { %11894 = vmatmul.msk.f32.gmra.mxu1 %vm1067_vm0, %v942_v57 }
 0x71e   :  { %11958 = vmatmul.msk.f32.gmra.mxu3 %vm1067_vm0, %v1006_v62  ;;  %v945_v62 = vld [vmem:[%s19765_s0 + $0x1d30] sm:$0xff] }
 0x71f   :  { %v6672_v42 = vpop.f32.mrf.mxu2 }
 0x720   :  { %8607 = vst [vmem:[#allocation2 + $0x1a98] sm:$0xff] %v6672_v42  ;;  %v9465_v3 = vadd.f32 %v9464_v56, %v6672_v42  ;;  %v6257_v33 = vpop.f32.mrf.mxu0  ;;  %v1009_v56 = vld [vmem:[%s19765_s0 + $0x1f30] sm:$0xff] }
 0x721   :  { %8544 = vst [vmem:[#allocation2 + $0x18a0] sm:$0xff] %v6257_v33  ;;  %v9494_v17 = vadd.f32 %v16866_v61, %v6257_v33  ;;  %v6881_v43 = vpop.f32.mrf.mxu3 }
 0x722   :  { %8639 = vst [vmem:[#allocation2 + $0x1b98] sm:$0xff] %v6881_v43  ;;  %v17455_v50 = vadd.f32 %v9465_v3, %v6881_v43  ;;  %v6466_v53 = vpop.f32.mrf.mxu1 }
 0x723   :  { %8576 = vst [vmem:[#allocation2 + $0x19a0] sm:$0xff] %v6466_v53  ;;  %11863 = vmatmul.msk.f32.gmra.mxu0 %vm1067_vm0, %v911_v4  ;;  %v9495_v7 = vadd.f32 %v9494_v17, %v6466_v53  ;;  %v914_v4 = vld [vmem:[%s19765_s0 + $0x1c38] sm:$0xff] }
 0x724   :  { %11927 = vmatmul.msk.f32.gmra.mxu2 %vm1067_vm0, %v975_v5  ;;  %v978_v5 = vld [vmem:[%s19765_s0 + $0x1e38] sm:$0xff] }
 0x725   :  { %11895 = vmatmul.msk.f32.gmra.mxu1 %vm1067_vm0, %v943_v47 }
 0x726   :  { %11959 = vmatmul.msk.f32.gmra.mxu3 %vm1067_vm0, %v1007_v20  ;;  %v946_v20 = vld [vmem:[%s19765_s0 + $0x1d38] sm:$0xff] }
 0x727   :  { %v6675_v61 = vpop.f32.mrf.mxu2 }
 0x728   :  { %8608 = vst [vmem:[#allocation2 + $0x1aa0] sm:$0xff] %v6675_v61  ;;  %v9496_v22 = vadd.f32 %v9495_v7, %v6675_v61  ;;  %v6260_v23 = vpop.f32.mrf.mxu0  ;;  %v1010_v7 = vld [vmem:[%s19765_s0 + $0x1f38] sm:$0xff] }
 0x729   :  { %8545 = vst [vmem:[#allocation2 + $0x18a8] sm:$0xff] %v6260_v23  ;;  %v9525_v21 = vadd.f32 %v16885_v18, %v6260_v23  ;;  %v6884_v54 = vpop.f32.mrf.mxu3 }
 0x72a   :  { %8640 = vst [vmem:[#allocation2 + $0x1ba0] sm:$0xff] %v6884_v54  ;;  %v17474_v10 = vadd.f32 %v9496_v22, %v6884_v54  ;;  %v6469_v37 = vpop.f32.mrf.mxu1 }
 0x72b   :  { %8577 = vst [vmem:[#allocation2 + $0x19a8] sm:$0xff] %v6469_v37  ;;  %11864 = vmatmul.msk.f32.gmra.mxu0 %vm1067_vm0, %v912_v27  ;;  %v9526_v16 = vadd.f32 %v9525_v21, %v6469_v37  ;;  %v915_v27 = vld [vmem:[%s19765_s0 + $0x1c40] sm:$0xff] }
 0x72c   :  { %11928 = vmatmul.msk.f32.gmra.mxu2 %vm1067_vm0, %v976_v28  ;;  %v979_v28 = vld [vmem:[%s19765_s0 + $0x1e40] sm:$0xff] }
 0x72d   :  { %11896 = vmatmul.msk.f32.gmra.mxu1 %vm1067_vm0, %v944_v60 }
 0x72e   :  { %11960 = vmatmul.msk.f32.gmra.mxu3 %vm1067_vm0, %v1008_v26  ;;  %v947_v26 = vld [vmem:[%s19765_s0 + $0x1d40] sm:$0xff] }
 0x72f   :  { %v6678_v18 = vpop.f32.mrf.mxu2 }
 0x730   :  { %8609 = vst [vmem:[#allocation2 + $0x1aa8] sm:$0xff] %v6678_v18  ;;  %v9527_v45 = vadd.f32 %v9526_v16, %v6678_v18  ;;  %v6263_v46 = vpop.f32.mrf.mxu0  ;;  %v1011_v16 = vld [vmem:[%s19765_s0 + $0x1f40] sm:$0xff] }
 0x731   :  { %8546 = vst [vmem:[#allocation2 + $0x18b0] sm:$0xff] %v6263_v46  ;;  %v9556_v32 = vadd.f32 %v16904_v38, %v6263_v46  ;;  %v6887_v2 = vpop.f32.mrf.mxu3 }
 0x732   :  { %8641 = vst [vmem:[#allocation2 + $0x1ba8] sm:$0xff] %v6887_v2  ;;  %v17493_v31 = vadd.f32 %v9527_v45, %v6887_v2  ;;  %v6472_v57 = vpop.f32.mrf.mxu1 }
 0x733   :  { %8578 = vst [vmem:[#allocation2 + $0x19b0] sm:$0xff] %v6472_v57  ;;  %11865 = vmatmul.msk.f32.gmra.mxu0 %vm1067_vm0, %v913_v49  ;;  %v9557_v42 = vadd.f32 %v9556_v32, %v6472_v57  ;;  %v916_v49 = vld [vmem:[%s19765_s0 + $0x1c48] sm:$0xff] }
 0x734   :  { %11929 = vmatmul.msk.f32.gmra.mxu2 %vm1067_vm0, %v977_v59  ;;  %v980_v59 = vld [vmem:[%s19765_s0 + $0x1e48] sm:$0xff] }
 0x735   :  { %11897 = vmatmul.msk.f32.gmra.mxu1 %vm1067_vm0, %v945_v62 }
 0x736   :  { %11961 = vmatmul.msk.f32.gmra.mxu3 %vm1067_vm0, %v1009_v56  ;;  %v948_v56 = vld [vmem:[%s19765_s0 + $0x1d48] sm:$0xff] }
 0x737   :  { %v6681_v38 = vpop.f32.mrf.mxu2 }
 0x738   :  { %8610 = vst [vmem:[#allocation2 + $0x1ab0] sm:$0xff] %v6681_v38  ;;  %v9558_v3 = vadd.f32 %v9557_v42, %v6681_v38  ;;  %v6266_v33 = vpop.f32.mrf.mxu0  ;;  %v1012_v42 = vld [vmem:[%s19765_s0 + $0x1f48] sm:$0xff] }
 0x739   :  { %8547 = vst [vmem:[#allocation2 + $0x18b8] sm:$0xff] %v6266_v33  ;;  %v9587_v17 = vadd.f32 %v16923_v63, %v6266_v33  ;;  %v6890_v43 = vpop.f32.mrf.mxu3 }
 0x73a   :  { %8642 = vst [vmem:[#allocation2 + $0x1bb0] sm:$0xff] %v6890_v43  ;;  %v17512_v53 = vadd.f32 %v9558_v3, %v6890_v43  ;;  %v6475_v47 = vpop.f32.mrf.mxu1 }
 0x73b   :  { %8579 = vst [vmem:[#allocation2 + $0x19b8] sm:$0xff] %v6475_v47  ;;  %11866 = vmatmul.msk.f32.gmra.mxu0 %vm1067_vm0, %v914_v4  ;;  %v9588_v61 = vadd.f32 %v9587_v17, %v6475_v47  ;;  %v917_v4 = vld [vmem:[%s19765_s0 + $0x1c50] sm:$0xff] }
 0x73c   :  { %11930 = vmatmul.msk.f32.gmra.mxu2 %vm1067_vm0, %v978_v5  ;;  %v981_v5 = vld [vmem:[%s19765_s0 + $0x1e50] sm:$0xff] }
 0x73d   :  { %11898 = vmatmul.msk.f32.gmra.mxu1 %vm1067_vm0, %v946_v20 }
 0x73e   :  { %11962 = vmatmul.msk.f32.gmra.mxu3 %vm1067_vm0, %v1010_v7  ;;  %v949_v7 = vld [vmem:[%s19765_s0 + $0x1d50] sm:$0xff] }
 0x73f   :  { %v6684_v63 = vpop.f32.mrf.mxu2 }
 0x740   :  { %8611 = vst [vmem:[#allocation2 + $0x1ab8] sm:$0xff] %v6684_v63  ;;  %v9589_v22 = vadd.f32 %v9588_v61, %v6684_v63  ;;  %v6269_v23 = vpop.f32.mrf.mxu0  ;;  %v1013_v61 = vld [vmem:[%s19765_s0 + $0x1f50] sm:$0xff] }
 0x741   :  { %8548 = vst [vmem:[#allocation2 + $0x18c0] sm:$0xff] %v6269_v23  ;;  %v9618_v21 = vadd.f32 %v16942_v19, %v6269_v23  ;;  %v6893_v54 = vpop.f32.mrf.mxu3 }
 0x742   :  { %8643 = vst [vmem:[#allocation2 + $0x1bb8] sm:$0xff] %v6893_v54  ;;  %v17531_v37 = vadd.f32 %v9589_v22, %v6893_v54  ;;  %v6478_v60 = vpop.f32.mrf.mxu1 }
 0x743   :  { %8580 = vst [vmem:[#allocation2 + $0x19c0] sm:$0xff] %v6478_v60  ;;  %11867 = vmatmul.msk.f32.gmra.mxu0 %vm1067_vm0, %v915_v27  ;;  %v9619_v18 = vadd.f32 %v9618_v21, %v6478_v60  ;;  %v918_v27 = vld [vmem:[%s19765_s0 + $0x1c58] sm:$0xff] }
 0x744   :  { %11931 = vmatmul.msk.f32.gmra.mxu2 %vm1067_vm0, %v979_v28  ;;  %v982_v28 = vld [vmem:[%s19765_s0 + $0x1e58] sm:$0xff] }
 0x745   :  { %11899 = vmatmul.msk.f32.gmra.mxu1 %vm1067_vm0, %v947_v26 }
 0x746   :  { %11963 = vmatmul.msk.f32.gmra.mxu3 %vm1067_vm0, %v1011_v16  ;;  %v950_v16 = vld [vmem:[%s19765_s0 + $0x1d58] sm:$0xff] }
 0x747   :  { %v6687_v19 = vpop.f32.mrf.mxu2 }
 0x748   :  { %8612 = vst [vmem:[#allocation2 + $0x1ac0] sm:$0xff] %v6687_v19  ;;  %v9620_v45 = vadd.f32 %v9619_v18, %v6687_v19  ;;  %v6272_v46 = vpop.f32.mrf.mxu0  ;;  %v1014_v18 = vld [vmem:[%s19765_s0 + $0x1f58] sm:$0xff] }
 0x749   :  { %8549 = vst [vmem:[#allocation2 + $0x18c8] sm:$0xff] %v6272_v46  ;;  %v9649_v32 = vadd.f32 %v16961_v41, %v6272_v46  ;;  %v6896_v2 = vpop.f32.mrf.mxu3 }
 0x74a   :  { %8644 = vst [vmem:[#allocation2 + $0x1bc0] sm:$0xff] %v6896_v2  ;;  %v17550_v57 = vadd.f32 %v9620_v45, %v6896_v2  ;;  %v6481_v62 = vpop.f32.mrf.mxu1 }
 0x74b   :  { %8581 = vst [vmem:[#allocation2 + $0x19c8] sm:$0xff] %v6481_v62  ;;  %11868 = vmatmul.msk.f32.gmra.mxu0 %vm1067_vm0, %v916_v49  ;;  %v9650_v38 = vadd.f32 %v9649_v32, %v6481_v62  ;;  %v919_v49 = vld [vmem:[%s19765_s0 + $0x1c60] sm:$0xff] }
 0x74c   :  { %11932 = vmatmul.msk.f32.gmra.mxu2 %vm1067_vm0, %v980_v59  ;;  %v983_v59 = vld [vmem:[%s19765_s0 + $0x1e60] sm:$0xff] }
 0x74d   :  { %11900 = vmatmul.msk.f32.gmra.mxu1 %vm1067_vm0, %v948_v56 }
 0x74e   :  { %11964 = vmatmul.msk.f32.gmra.mxu3 %vm1067_vm0, %v1012_v42  ;;  %v951_v42 = vld [vmem:[%s19765_s0 + $0x1d60] sm:$0xff] }
 0x74f   :  { %v6690_v41 = vpop.f32.mrf.mxu2 }
 0x750   :  { %8613 = vst [vmem:[#allocation2 + $0x1ac8] sm:$0xff] %v6690_v41  ;;  %v9651_v3 = vadd.f32 %v9650_v38, %v6690_v41  ;;  %v6275_v33 = vpop.f32.mrf.mxu0  ;;  %v1015_v38 = vld [vmem:[%s19765_s0 + $0x1f60] sm:$0xff] }
 0x751   :  { %8550 = vst [vmem:[#allocation2 + $0x18d0] sm:$0xff] %v6275_v33  ;;  %v9680_v17 = vadd.f32 %v16980_v0, %v6275_v33  ;;  %v6899_v43 = vpop.f32.mrf.mxu3 }
 0x752   :  { %8645 = vst [vmem:[#allocation2 + $0x1bc8] sm:$0xff] %v6899_v43  ;;  %v17569_v47 = vadd.f32 %v9651_v3, %v6899_v43  ;;  %v6484_v20 = vpop.f32.mrf.mxu1 }
 0x753   :  { %8582 = vst [vmem:[#allocation2 + $0x19d0] sm:$0xff] %v6484_v20  ;;  %11869 = vmatmul.msk.f32.gmra.mxu0 %vm1067_vm0, %v917_v4  ;;  %v9681_v63 = vadd.f32 %v9680_v17, %v6484_v20  ;;  %v920_v4 = vld [vmem:[%s19765_s0 + $0x1c68] sm:$0xff] }
 0x754   :  { %11933 = vmatmul.msk.f32.gmra.mxu2 %vm1067_vm0, %v981_v5  ;;  %v984_v5 = vld [vmem:[%s19765_s0 + $0x1e68] sm:$0xff] }
 0x755   :  { %11901 = vmatmul.msk.f32.gmra.mxu1 %vm1067_vm0, %v949_v7 }
 0x756   :  { %11965 = vmatmul.msk.f32.gmra.mxu3 %vm1067_vm0, %v1013_v61  ;;  %v952_v61 = vld [vmem:[%s19765_s0 + $0x1d68] sm:$0xff] }
 0x757   :  { %v6693_v0 = vpop.f32.mrf.mxu2 }
 0x758   :  { %8614 = vst [vmem:[#allocation2 + $0x1ad0] sm:$0xff] %v6693_v0  ;;  %v9682_v22 = vadd.f32 %v9681_v63, %v6693_v0  ;;  %v6278_v23 = vpop.f32.mrf.mxu0  ;;  %v1016_v63 = vld [vmem:[%s19765_s0 + $0x1f68] sm:$0xff] }
 0x759   :  { %8551 = vst [vmem:[#allocation2 + $0x18d8] sm:$0xff] %v6278_v23  ;;  %v9711_v21 = vadd.f32 %v16999_v15, %v6278_v23  ;;  %v6902_v54 = vpop.f32.mrf.mxu3 }
 0x75a   :  { %8646 = vst [vmem:[#allocation2 + $0x1bd0] sm:$0xff] %v6902_v54  ;;  %v17588_v60 = vadd.f32 %v9682_v22, %v6902_v54  ;;  %v6487_v26 = vpop.f32.mrf.mxu1 }
 0x75b   :  { %8583 = vst [vmem:[#allocation2 + $0x19d8] sm:$0xff] %v6487_v26  ;;  %11870 = vmatmul.msk.f32.gmra.mxu0 %vm1067_vm0, %v918_v27  ;;  %v9712_v19 = vadd.f32 %v9711_v21, %v6487_v26  ;;  %v921_v27 = vld [vmem:[%s19765_s0 + $0x1c70] sm:$0xff] }
 0x75c   :  { %11934 = vmatmul.msk.f32.gmra.mxu2 %vm1067_vm0, %v982_v28  ;;  %v985_v28 = vld [vmem:[%s19765_s0 + $0x1e70] sm:$0xff] }
 0x75d   :  { %11902 = vmatmul.msk.f32.gmra.mxu1 %vm1067_vm0, %v950_v16 }
 0x75e   :  { %11966 = vmatmul.msk.f32.gmra.mxu3 %vm1067_vm0, %v1014_v18  ;;  %v953_v18 = vld [vmem:[%s19765_s0 + $0x1d70] sm:$0xff] }
 0x75f   :  { %v6696_v15 = vpop.f32.mrf.mxu2 }
 0x760   :  { %8615 = vst [vmem:[#allocation2 + $0x1ad8] sm:$0xff] %v6696_v15  ;;  %v9713_v45 = vadd.f32 %v9712_v19, %v6696_v15  ;;  %v6281_v46 = vpop.f32.mrf.mxu0  ;;  %v1017_v19 = vld [vmem:[%s19765_s0 + $0x1f70] sm:$0xff] }
 0x761   :  { %8552 = vst [vmem:[#allocation2 + $0x18e0] sm:$0xff] %v6281_v46  ;;  %v9742_v32 = vadd.f32 %v17018_v52, %v6281_v46  ;;  %v6905_v2 = vpop.f32.mrf.mxu3 }
 0x762   :  { %8647 = vst [vmem:[#allocation2 + $0x1bd8] sm:$0xff] %v6905_v2  ;;  %v17607_v62 = vadd.f32 %v9713_v45, %v6905_v2  ;;  %v6490_v56 = vpop.f32.mrf.mxu1 }
 0x763   :  { %8584 = vst [vmem:[#allocation2 + $0x19e0] sm:$0xff] %v6490_v56  ;;  %11871 = vmatmul.msk.f32.gmra.mxu0 %vm1067_vm0, %v919_v49  ;;  %v9743_v41 = vadd.f32 %v9742_v32, %v6490_v56  ;;  %v922_v49 = vld [vmem:[%s19765_s0 + $0x1c78] sm:$0xff] }
 0x764   :  { %11935 = vmatmul.msk.f32.gmra.mxu2 %vm1067_vm0, %v983_v59  ;;  %v986_v59 = vld [vmem:[%s19765_s0 + $0x1e78] sm:$0xff] }
 0x765   :  { %11903 = vmatmul.msk.f32.gmra.mxu1 %vm1067_vm0, %v951_v42 }
 0x766   :  { %11967 = vmatmul.msk.f32.gmra.mxu3 %vm1067_vm0, %v1015_v38  ;;  %v954_v38 = vld [vmem:[%s19765_s0 + $0x1d78] sm:$0xff] }
 0x767   :  { %v6699_v52 = vpop.f32.mrf.mxu2 }
 0x768   :  { %8616 = vst [vmem:[#allocation2 + $0x1ae0] sm:$0xff] %v6699_v52  ;;  %v9744_v3 = vadd.f32 %v9743_v41, %v6699_v52  ;;  %v6284_v33 = vpop.f32.mrf.mxu0  ;;  %v1018_v41 = vld [vmem:[%s19765_s0 + $0x1f78] sm:$0xff] }
 0x769   :  { %8553 = vst [vmem:[#allocation2 + $0x18e8] sm:$0xff] %v6284_v33  ;;  %v9773_v17 = vadd.f32 %v17037_v55, %v6284_v33  ;;  %v6908_v43 = vpop.f32.mrf.mxu3 }
 0x76a   :  { %8648 = vst [vmem:[#allocation2 + $0x1be0] sm:$0xff] %v6908_v43  ;;  %v17626_v20 = vadd.f32 %v9744_v3, %v6908_v43  ;;  %v6493_v7 = vpop.f32.mrf.mxu1 }
 0x76b   :  { %8585 = vst [vmem:[#allocation2 + $0x19e8] sm:$0xff] %v6493_v7  ;;  %11872 = vmatmul.msk.f32.gmra.mxu0 %vm1067_vm0, %v920_v4  ;;  %v9774_v0 = vadd.f32 %v9773_v17, %v6493_v7  ;;  %v923_v4 = vld [vmem:[%s19765_s0 + $0x1c80] sm:$0xff] }
 0x76c   :  { %11936 = vmatmul.msk.f32.gmra.mxu2 %vm1067_vm0, %v984_v5  ;;  %v987_v5 = vld [vmem:[%s19765_s0 + $0x1e80] sm:$0xff] }
 0x76d   :  { %11904 = vmatmul.msk.f32.gmra.mxu1 %vm1067_vm0, %v952_v61  ;;  %v955_v61 = vld [vmem:[%s19765_s0 + $0x1d80] sm:$0xff] }
 0x76e   :  { %11968 = vmatmul.msk.f32.gmra.mxu3 %vm1067_vm0, %v1016_v63 }
 0x76f   :  { %v6702_v55 = vpop.f32.mrf.mxu2 }
 0x770   :  { %8617 = vst [vmem:[#allocation2 + $0x1ae8] sm:$0xff] %v6702_v55  ;;  %v9775_v22 = vadd.f32 %v9774_v0, %v6702_v55  ;;  %v6287_v23 = vpop.f32.mrf.mxu0  ;;  %v1019_v0 = vld [vmem:[%s19765_s0 + $0x1f80] sm:$0xff] }
 0x771   :  { %8554 = vst [vmem:[#allocation2 + $0x18f0] sm:$0xff] %v6287_v23  ;;  %v9804_v21 = vadd.f32 %v17056_v11, %v6287_v23  ;;  %v6911_v54 = vpop.f32.mrf.mxu3 }
 0x772   :  { %8649 = vst [vmem:[#allocation2 + $0x1be8] sm:$0xff] %v6911_v54  ;;  %v17645_v26 = vadd.f32 %v9775_v22, %v6911_v54  ;;  %v6496_v16 = vpop.f32.mrf.mxu1 }
 0x773   :  { %8586 = vst [vmem:[#allocation2 + $0x19f0] sm:$0xff] %v6496_v16  ;;  %11873 = vmatmul.msk.f32.gmra.mxu0 %vm1067_vm0, %v921_v27  ;;  %v9805_v15 = vadd.f32 %v9804_v21, %v6496_v16  ;;  %v924_v27 = vld [vmem:[%s19765_s0 + $0x1c88] sm:$0xff] }
 0x774   :  { %11937 = vmatmul.msk.f32.gmra.mxu2 %vm1067_vm0, %v985_v28  ;;  %v988_v28 = vld [vmem:[%s19765_s0 + $0x1e88] sm:$0xff] }
 0x775   :  { %11905 = vmatmul.msk.f32.gmra.mxu1 %vm1067_vm0, %v953_v18 }
 0x776   :  { %11969 = vmatmul.msk.f32.gmra.mxu3 %vm1067_vm0, %v1017_v19  ;;  %v956_v19 = vld [vmem:[%s19765_s0 + $0x1d88] sm:$0xff] }
 0x777   :  { %v6705_v11 = vpop.f32.mrf.mxu2 }
 0x778   :  { %8618 = vst [vmem:[#allocation2 + $0x1af0] sm:$0xff] %v6705_v11  ;;  %v9806_v45 = vadd.f32 %v9805_v15, %v6705_v11  ;;  %v6290_v46 = vpop.f32.mrf.mxu0  ;;  %v1020_v15 = vld [vmem:[%s19765_s0 + $0x1f88] sm:$0xff] }
 0x779   :  { %8555 = vst [vmem:[#allocation2 + $0x18f8] sm:$0xff] %v6290_v46  ;;  %v9835_v32 = vadd.f32 %v17075_v34, %v6290_v46  ;;  %v6914_v2 = vpop.f32.mrf.mxu3 }
 0x77a   :  { %8650 = vst [vmem:[#allocation2 + $0x1bf0] sm:$0xff] %v6914_v2  ;;  %v17664_v56 = vadd.f32 %v9806_v45, %v6914_v2  ;;  %v6499_v42 = vpop.f32.mrf.mxu1 }
 0x77b   :  { %8587 = vst [vmem:[#allocation2 + $0x19f8] sm:$0xff] %v6499_v42  ;;  %11874 = vmatmul.msk.f32.gmra.mxu0 %vm1067_vm0, %v922_v49  ;;  %v9836_v52 = vadd.f32 %v9835_v32, %v6499_v42  ;;  %v925_v49 = vld [vmem:[%s19765_s0 + $0x1c90] sm:$0xff] }
 0x77c   :  { %11938 = vmatmul.msk.f32.gmra.mxu2 %vm1067_vm0, %v986_v59  ;;  %v989_v59 = vld [vmem:[%s19765_s0 + $0x1e90] sm:$0xff] }
 0x77d   :  { %11906 = vmatmul.msk.f32.gmra.mxu1 %vm1067_vm0, %v954_v38 }
 0x77e   :  { %11970 = vmatmul.msk.f32.gmra.mxu3 %vm1067_vm0, %v1018_v41  ;;  %v957_v41 = vld [vmem:[%s19765_s0 + $0x1d90] sm:$0xff] }
 0x77f   :  { %v6708_v34 = vpop.f32.mrf.mxu2 }
 0x780   :  { %8619 = vst [vmem:[#allocation2 + $0x1af8] sm:$0xff] %v6708_v34  ;;  %v9837_v3 = vadd.f32 %v9836_v52, %v6708_v34  ;;  %v7033_v33 = vpop.f32.mrf.mxu0  ;;  %v1021_v52 = vld [vmem:[%s19765_s0 + $0x1f90] sm:$0xff] }
 0x781   :  { %v6917_v17 = vpop.f32.mrf.mxu3  ;;  %8652 = vst [vmem:[#allocation2 + $0x1c00] sm:$0xff] %v7033_v33  ;;  %v8878_v43 = vadd.f32 %v17094_v8, %v7033_v33 }
 0x782   :  { %8651 = vst [vmem:[#allocation2 + $0x1bf8] sm:$0xff] %v6917_v17  ;;  %v7242_v7 = vpop.f32.mrf.mxu1  ;;  %v17686_v63 = vadd.f32 %v9837_v3, %v6917_v17 }
 0x783   :  { %8684 = vst [vmem:[#allocation2 + $0x1d00] sm:$0xff] %v7242_v7  ;;  %11875 = vmatmul.msk.f32.gmra.mxu0 %vm1067_vm0, %v923_v4  ;;  %v8879_v55 = vadd.f32 %v8878_v43, %v7242_v7  ;;  %v926_v4 = vld [vmem:[%s19765_s0 + $0x1c98] sm:$0xff] }
 0x784   :  { %11939 = vmatmul.msk.f32.gmra.mxu2 %vm1067_vm0, %v987_v5  ;;  %v990_v5 = vld [vmem:[%s19765_s0 + $0x1e98] sm:$0xff] }
 0x785   :  { %11907 = vmatmul.msk.f32.gmra.mxu1 %vm1067_vm0, %v955_v61 }
 0x786   :  { %11971 = vmatmul.msk.f32.gmra.mxu3 %vm1067_vm0, %v1019_v0  ;;  %v958_v0 = vld [vmem:[%s19765_s0 + $0x1d98] sm:$0xff] }
 0x787   :  { %v7451_v8 = vpop.f32.mrf.mxu2 }
 0x788   :  { %8716 = vst [vmem:[#allocation2 + $0x1e00] sm:$0xff] %v7451_v8  ;;  %v8880_v22 = vadd.f32 %v8879_v55, %v7451_v8  ;;  %v7036_v23 = vpop.f32.mrf.mxu0  ;;  %v1022_v55 = vld [vmem:[%s19765_s0 + $0x1f98] sm:$0xff] }
 0x789   :  { %8653 = vst [vmem:[#allocation2 + $0x1c08] sm:$0xff] %v7036_v23  ;;  %v8909_v21 = vadd.f32 %v17113_v13, %v7036_v23  ;;  %v7660_v54 = vpop.f32.mrf.mxu3 }
 0x78a   :  { %8748 = vst [vmem:[#allocation2 + $0x1f00] sm:$0xff] %v7660_v54  ;;  %v17702_v16 = vadd.f32 %v8880_v22, %v7660_v54  ;;  %v7245_v18 = vpop.f32.mrf.mxu1 }
 0x78b   :  { %8685 = vst [vmem:[#allocation2 + $0x1d08] sm:$0xff] %v7245_v18  ;;  %11876 = vmatmul.msk.f32.gmra.mxu0 %vm1067_vm0, %v924_v27  ;;  %v8910_v11 = vadd.f32 %v8909_v21, %v7245_v18  ;;  %v927_v27 = vld [vmem:[%s19765_s0 + $0x1ca0] sm:$0xff] }
 0x78c   :  { %11940 = vmatmul.msk.f32.gmra.mxu2 %vm1067_vm0, %v988_v28  ;;  %v991_v28 = vld [vmem:[%s19765_s0 + $0x1ea0] sm:$0xff] }
 0x78d   :  { %11908 = vmatmul.msk.f32.gmra.mxu1 %vm1067_vm0, %v956_v19 }
 0x78e   :  { %11972 = vmatmul.msk.f32.gmra.mxu3 %vm1067_vm0, %v1020_v15  ;;  %v959_v15 = vld [vmem:[%s19765_s0 + $0x1da0] sm:$0xff] }
 0x78f   :  { %v7454_v13 = vpop.f32.mrf.mxu2 }
 0x790   :  { %8717 = vst [vmem:[#allocation2 + $0x1e08] sm:$0xff] %v7454_v13  ;;  %v8911_v45 = vadd.f32 %v8910_v11, %v7454_v13  ;;  %v7039_v46 = vpop.f32.mrf.mxu0  ;;  %v1023_v11 = vld [vmem:[%s19765_s0 + $0x1fa0] sm:$0xff] }
 0x791   :  { %8654 = vst [vmem:[#allocation2 + $0x1c10] sm:$0xff] %v7039_v46  ;;  %v8940_v32 = vadd.f32 %v17132_v35, %v7039_v46  ;;  %v7663_v2 = vpop.f32.mrf.mxu3 }
 0x792   :  { %8749 = vst [vmem:[#allocation2 + $0x1f08] sm:$0xff] %v7663_v2  ;;  %v17721_v42 = vadd.f32 %v8911_v45, %v7663_v2  ;;  %v7248_v38 = vpop.f32.mrf.mxu1 }
 0x793   :  { %8686 = vst [vmem:[#allocation2 + $0x1d10] sm:$0xff] %v7248_v38  ;;  %11877 = vmatmul.msk.f32.gmra.mxu0 %vm1067_vm0, %v925_v49  ;;  %v8941_v34 = vadd.f32 %v8940_v32, %v7248_v38  ;;  %v928_v49 = vld [vmem:[%s19765_s0 + $0x1ca8] sm:$0xff] }
 0x794   :  { %11941 = vmatmul.msk.f32.gmra.mxu2 %vm1067_vm0, %v989_v59  ;;  %v992_v59 = vld [vmem:[%s19765_s0 + $0x1ea8] sm:$0xff] }
 0x795   :  { %11909 = vmatmul.msk.f32.gmra.mxu1 %vm1067_vm0, %v957_v41 }
 0x796   :  { %11973 = vmatmul.msk.f32.gmra.mxu3 %vm1067_vm0, %v1021_v52  ;;  %v960_v52 = vld [vmem:[%s19765_s0 + $0x1da8] sm:$0xff] }
 0x797   :  { %v7457_v35 = vpop.f32.mrf.mxu2 }
 0x798   :  { %8718 = vst [vmem:[#allocation2 + $0x1e10] sm:$0xff] %v7457_v35  ;;  %v8942_v3 = vadd.f32 %v8941_v34, %v7457_v35  ;;  %v7042_v33 = vpop.f32.mrf.mxu0  ;;  %v1024_v34 = vld [vmem:[%s19765_s0 + $0x1fa8] sm:$0xff] }
 0x799   :  { %8655 = vst [vmem:[#allocation2 + $0x1c18] sm:$0xff] %v7042_v33  ;;  %v8971_v17 = vadd.f32 %v17151_v29, %v7042_v33  ;;  %v7666_v43 = vpop.f32.mrf.mxu3 }
 0x79a   :  { %8750 = vst [vmem:[#allocation2 + $0x1f10] sm:$0xff] %v7666_v43  ;;  %v17740_v7 = vadd.f32 %v8942_v3, %v7666_v43  ;;  %v7251_v61 = vpop.f32.mrf.mxu1 }
 0x79b   :  { %8687 = vst [vmem:[#allocation2 + $0x1d18] sm:$0xff] %v7251_v61  ;;  %11878 = vmatmul.msk.f32.gmra.mxu0 %vm1067_vm0, %v926_v4  ;;  %v8972_v8 = vadd.f32 %v8971_v17, %v7251_v61  ;;  %v929_v4 = vld [vmem:[%s19765_s0 + $0x1cb0] sm:$0xff] }
 0x79c   :  { %11942 = vmatmul.msk.f32.gmra.mxu2 %vm1067_vm0, %v990_v5  ;;  %v993_v5 = vld [vmem:[%s19765_s0 + $0x1eb0] sm:$0xff] }
 0x79d   :  { %11910 = vmatmul.msk.f32.gmra.mxu1 %vm1067_vm0, %v958_v0 }
 0x79e   :  { %11974 = vmatmul.msk.f32.gmra.mxu3 %vm1067_vm0, %v1022_v55  ;;  %v961_v55 = vld [vmem:[%s19765_s0 + $0x1db0] sm:$0xff] }
 0x79f   :  { %v7460_v29 = vpop.f32.mrf.mxu2 }
 0x7a0   :  { %8719 = vst [vmem:[#allocation2 + $0x1e18] sm:$0xff] %v7460_v29  ;;  %v8973_v22 = vadd.f32 %v8972_v8, %v7460_v29  ;;  %v7045_v23 = vpop.f32.mrf.mxu0  ;;  %v1025_v8 = vld [vmem:[%s19765_s0 + $0x1fb0] sm:$0xff]  ;;  %v17804_v29 = vmul.f32 0.1, %v17740_v7  ;;  %v930_v7 = vld [vmem:[%s19765_s0 + $0x1cb8] sm:$0xff] }
 0x7a1   :  { %8656 = vst [vmem:[#allocation2 + $0x1c20] sm:$0xff] %v7045_v23  ;;  %v9002_v21 = vadd.f32 %v17170_v44, %v7045_v23  ;;  %v7669_v54 = vpop.f32.mrf.mxu3 }
 0x7a2   :  { %8751 = vst [vmem:[#allocation2 + $0x1f18] sm:$0xff] %v7669_v54  ;;  %v17759_v18 = vadd.f32 %v8973_v22, %v7669_v54  ;;  %v7254_v19 = vpop.f32.mrf.mxu1  ;;  %v17808_v22 = vmul.f32 0.1, %v17702_v16  ;;  %v994_v16 = vld [vmem:[%s19765_s0 + $0x1eb8] sm:$0xff] }
 0x7a3   :  { %8688 = vst [vmem:[#allocation2 + $0x1d20] sm:$0xff] %v7254_v19  ;;  %11879 = vmatmul.msk.f32.gmra.mxu0 %vm1067_vm0, %v927_v27  ;;  %v9003_v13 = vadd.f32 %v9002_v21, %v7254_v19  ;;  %v9877_v21 = vmul.f32 %v17804_v29, %v17804_v29 }
 0x7a4   :  { %11943 = vmatmul.msk.f32.gmra.mxu2 %vm1067_vm0, %v991_v28 }
 0x7a5   :  { %11911 = vmatmul.msk.f32.gmra.mxu1 %vm1067_vm0, %v959_v15 }
 0x7a6   :  { %11975 = vmatmul.msk.f32.gmra.mxu3 %vm1067_vm0, %v1023_v11  ;;  %v9875_v11 = vmul.f32 %v17808_v22, %v17808_v22 }
 0x7a7   :  { %v7463_v44 = vpop.f32.mrf.mxu2 }
 0x7a8   :  { %8720 = vst [vmem:[#allocation2 + $0x1e20] sm:$0xff] %v7463_v44  ;;  %v9004_v45 = vadd.f32 %v9003_v13, %v7463_v44  ;;  %v7048_v46 = vpop.f32.mrf.mxu0 }
 0x7a9   :  { %8657 = vst [vmem:[#allocation2 + $0x1c28] sm:$0xff] %v7048_v46  ;;  %v9033_v32 = vadd.f32 %v17189_v58, %v7048_v46  ;;  %v7672_v2 = vpop.f32.mrf.mxu3  ;;  %v962_v46 = vld [vmem:[%s19765_s0 + $0x1db8] sm:$0xff] }
 0x7aa   :  { %8752 = vst [vmem:[#allocation2 + $0x1f20] sm:$0xff] %v7672_v2  ;;  %v9005_v38 = vadd.f32 %v9004_v45, %v7672_v2  ;;  %v7257_v41 = vpop.f32.mrf.mxu1 }
 0x7ab   :  { %8689 = vst [vmem:[#allocation2 + $0x1d28] sm:$0xff] %v7257_v41  ;;  %11880 = vmatmul.msk.f32.gmra.mxu0 %vm1067_vm0, %v928_v49  ;;  %v9034_v35 = vadd.f32 %v9033_v32, %v7257_v41  ;;  %v9907_v49 = vadd.f32 %v9877_v21, %v9875_v11  ;;  %v932_v11 = vld [vmem:[%s19765_s0 + $0x1cc8] sm:$0xff] }
 0x7ac   :  { %11944 = vmatmul.msk.f32.gmra.mxu2 %vm1067_vm0, %v992_v59  ;;  %v17810_v23 = vmul.f32 0.1, %v9005_v38  ;;  %v17835_v59 = vmul.f32 0.1, %v17759_v18  ;;  %v17841_v38 = vmul.f32 0.1, %v17721_v42 }
 0x7ad   :  { %11912 = vmatmul.msk.f32.gmra.mxu1 %vm1067_vm0, %v960_v52  ;;  %v931_v42 = vld [vmem:[%s19765_s0 + $0x1cc0] sm:$0xff] }
 0x7ae   :  { %11976 = vmatmul.msk.f32.gmra.mxu3 %vm1067_vm0, %v1024_v34  ;;  %v9879_v13 = vmul.f32 %v17810_v23, %v17810_v23 }
 0x7af   :  { %v7466_v58 = vpop.f32.mrf.mxu2 }
 0x7b0   :  { %8721 = vst [vmem:[#allocation2 + $0x1e28] sm:$0xff] %v7466_v58  ;;  %v9035_v3 = vadd.f32 %v9034_v35, %v7466_v58  ;;  %v7051_v33 = vpop.f32.mrf.mxu0  ;;  %v9908_v41 = vadd.f32 %v9907_v49, %v9879_v13  ;;  %v9878_v58 = vmul.f32 %v17835_v59, %v17835_v59  ;;  %v996_v13 = vld [vmem:[%s19765_s0 + $0x1ec8] sm:$0xff] }
 0x7b1   :  { %8658 = vst [vmem:[#allocation2 + $0x1c30] sm:$0xff] %v7051_v33  ;;  %v9064_v17 = vadd.f32 %v17208_v9, %v7051_v33  ;;  %v7675_v43 = vpop.f32.mrf.mxu3  ;;  %v964_v49 = vld [vmem:[%s19765_s0 + $0x1dc8] sm:$0xff] }
 0x7b2   :  { %8753 = vst [vmem:[#allocation2 + $0x1f28] sm:$0xff] %v7675_v43  ;;  %v9036_v61 = vadd.f32 %v9035_v3, %v7675_v43  ;;  %v7260_v0 = vpop.f32.mrf.mxu1  ;;  %v9876_v43 = vmul.f32 %v17841_v38, %v17841_v38 }
 0x7b3   :  { %8690 = vst [vmem:[#allocation2 + $0x1d30] sm:$0xff] %v7260_v0  ;;  %11881 = vmatmul.msk.f32.gmra.mxu0 %vm1067_vm0, %v929_v4  ;;  %v9065_v9 = vadd.f32 %v9064_v17, %v7260_v0  ;;  %v995_v4 = vld [vmem:[%s19765_s0 + $0x1ec0] sm:$0xff] }
 0x7b4   :  { %11945 = vmatmul.msk.f32.gmra.mxu2 %vm1067_vm0, %v993_v5  ;;  %v17843_v52 = vmul.f32 0.1, %v9036_v61 }
 0x7b5   :  { %11913 = vmatmul.msk.f32.gmra.mxu1 %vm1067_vm0, %v961_v55 }
 0x7b6   :  { %11977 = vmatmul.msk.f32.gmra.mxu3 %vm1067_vm0, %v1025_v8  ;;  %v9880_v61 = vmul.f32 %v17843_v52, %v17843_v52  ;;  %v963_v8 = vld [vmem:[%s19765_s0 + $0x1dc0] sm:$0xff] }
 0x7b7   :  { %v7469_v27 = vpop.f32.mrf.mxu2 }
 0x7b8   :  { %8722 = vst [vmem:[#allocation2 + $0x1e30] sm:$0xff] %v7469_v27  ;;  %v9066_v28 = vadd.f32 %v9065_v9, %v7469_v27  ;;  %v7054_v54 = vpop.f32.mrf.mxu0  ;;  %v9922_v27 = vadd.f32 %v9878_v58, %v9876_v43 }
 0x7b9   :  { %8659 = vst [vmem:[#allocation2 + $0x1c38] sm:$0xff] %v7054_v54  ;;  %v9095_v19 = vadd.f32 %v17227_v25, %v7054_v54  ;;  %v7678_v15 = vpop.f32.mrf.mxu3  ;;  %v1026_v25 = vld [vmem:[%s19765_s0 + $0x1fb8] sm:$0xff] }
 0x7ba   :  { %8754 = vst [vmem:[#allocation2 + $0x1f30] sm:$0xff] %v7678_v15  ;;  %v9067_v44 = vadd.f32 %v9066_v28, %v7678_v15  ;;  %v7263_v45 = vpop.f32.mrf.mxu1  ;;  %v9923_v21 = vadd.f32 %v9922_v27, %v9880_v61 }
 0x7bb   :  { %8691 = vst [vmem:[#allocation2 + $0x1d38] sm:$0xff] %v7263_v45  ;;  %11882 = vmatmul.msk.f32.gmra.mxu0 %vm1067_vm0, %v930_v7  ;;  %v9096_v2 = vadd.f32 %v9095_v19, %v7263_v45 }
 0x7bc   :  { %11946 = vmatmul.msk.f32.gmra.mxu2 %vm1067_vm0, %v994_v16  ;;  %v17837_v32 = vmul.f32 0.1, %v9067_v44 }
 0x7bd   :  { %11914 = vmatmul.msk.f32.gmra.mxu1 %vm1067_vm0, %v962_v46 }
 0x7be   :  { %v9881_v34 = vmul.f32 %v17837_v32, %v17837_v32  ;;  %11978 = vmatmul.msk.f32.gmra.mxu3 %vm1067_vm0, %v1026_v25 }
 0x7bf   :  { %v7472_v35 = vpop.f32.mrf.mxu2 }
 0x7c0   :  { %8723 = vst [vmem:[#allocation2 + $0x1e38] sm:$0xff] %v7472_v35  ;;  %v9097_v18 = vadd.f32 %v9096_v2, %v7472_v35  ;;  %v9909_v3 = vadd.f32 %v9908_v41, %v9881_v34  ;;  %v7057_v33 = vpop.f32.mrf.mxu0  ;;  %v1028_v41 = vld [vmem:[%s19765_s0 + $0x1fc8] sm:$0xff] }
 0x7c1   :  { %8660 = vst [vmem:[#allocation2 + $0x1c40] sm:$0xff] %v7057_v33  ;;  %v9126_v5 = vadd.f32 %v17246_v40, %v7057_v33  ;;  %v7681_v17 = vpop.f32.mrf.mxu3  ;;  %v1027_v40 = vld [vmem:[%s19765_s0 + $0x1fc0] sm:$0xff] }
 0x7c2   :  { %8755 = vst [vmem:[#allocation2 + $0x1f38] sm:$0xff] %v7681_v17  ;;  %v9098_v0 = vadd.f32 %v9097_v18, %v7681_v17  ;;  %v7266_v55 = vpop.f32.mrf.mxu1 }
 0x7c3   :  { %8692 = vst [vmem:[#allocation2 + $0x1d40] sm:$0xff] %v7266_v55  ;;  %v9127_v9 = vadd.f32 %v9126_v5, %v7266_v55  ;;  %11883 = vmatmul.msk.f32.gmra.mxu0 %vm1067_vm0, %v931_v42  ;;  %v933_v42 = vld [vmem:[%s19765_s0 + $0x1cd0] sm:$0xff] }
 0x7c4   :  { %11947 = vmatmul.msk.f32.gmra.mxu2 %vm1067_vm0, %v995_v4  ;;  %v17869_v28 = vmul.f32 0.1, %v9098_v0  ;;  %v997_v4 = vld [vmem:[%s19765_s0 + $0x1ed0] sm:$0xff] }
 0x7c5   :  { %11915 = vmatmul.msk.f32.gmra.mxu1 %vm1067_vm0, %v963_v8  ;;  %v1029_v55 = vld [vmem:[%s19765_s0 + $0x1fd0] sm:$0xff] }
 0x7c6   :  { %v9882_v54 = vmul.f32 %v17869_v28, %v17869_v28  ;;  %11979 = vmatmul.msk.f32.gmra.mxu3 %vm1067_vm0, %v1027_v40 }
 0x7c7   :  { %v7475_v7 = vpop.f32.mrf.mxu2 }
 0x7c8   :  { %8724 = vst [vmem:[#allocation2 + $0x1e40] sm:$0xff] %v7475_v7  ;;  %v9128_v16 = vadd.f32 %v9127_v9, %v7475_v7  ;;  %v9924_v19 = vadd.f32 %v9923_v21, %v9882_v54  ;;  %v7060_v15 = vpop.f32.mrf.mxu0  ;;  %v934_v54 = vld [vmem:[%s19765_s0 + $0x1cd8] sm:$0xff] }
 0x7c9   :  { %8661 = vst [vmem:[#allocation2 + $0x1c48] sm:$0xff] %v7060_v15  ;;  %v9157_v44 = vadd.f32 %v17265_v51, %v7060_v15  ;;  %v7684_v45 = vpop.f32.mrf.mxu3  ;;  %v998_v7 = vld [vmem:[%s19765_s0 + $0x1ed8] sm:$0xff] }
 0x7ca   :  { %8756 = vst [vmem:[#allocation2 + $0x1f40] sm:$0xff] %v7684_v45  ;;  %v9129_v46 = vadd.f32 %v9128_v16, %v7684_v45  ;;  %v7269_v25 = vpop.f32.mrf.mxu1  ;;  %v1030_v45 = vld [vmem:[%s19765_s0 + $0x1fd8] sm:$0xff] }
 0x7cb   :  { %8693 = vst [vmem:[#allocation2 + $0x1d48] sm:$0xff] %v7269_v25  ;;  %v9158_v2 = vadd.f32 %v9157_v44, %v7269_v25  ;;  %11884 = vmatmul.msk.f32.gmra.mxu0 %vm1067_vm0, %v932_v11 }
 0x7cc   :  { %11948 = vmatmul.msk.f32.gmra.mxu2 %vm1067_vm0, %v996_v13  ;;  %v17890_v34 = vmul.f32 0.1, %v9129_v46 }
 0x7cd   :  { %11916 = vmatmul.msk.f32.gmra.mxu1 %vm1067_vm0, %v964_v49 }
 0x7ce   :  { %v9883_v51 = vmul.f32 %v17890_v34, %v17890_v34  ;;  %11980 = vmatmul.msk.f32.gmra.mxu3 %vm1067_vm0, %v1028_v41 }
 0x7cf   :  { %v7478_v35 = vpop.f32.mrf.mxu2 }
 0x7d0   :  { %8725 = vst [vmem:[#allocation2 + $0x1e48] sm:$0xff] %v7478_v35  ;;  %v9159_v18 = vadd.f32 %v9158_v2, %v7478_v35  ;;  %v9910_v58 = vadd.f32 %v9909_v3, %v9883_v51  ;;  %v7063_v33 = vpop.f32.mrf.mxu0  ;;  %v965_v3 = vld [vmem:[%s19765_s0 + $0x1dd0] sm:$0xff]  ;;  %v935_v51 = vld [vmem:[%s19765_s0 + $0x1ce0] sm:$0xff] }
 0x7d1   :  { %8662 = vst [vmem:[#allocation2 + $0x1c50] sm:$0xff] %v7063_v33  ;;  %v9188_v5 = vadd.f32 %v17284_v14, %v7063_v33  ;;  %v7687_v17 = vpop.f32.mrf.mxu3  ;;  %v999_v35 = vld [vmem:[%s19765_s0 + $0x1ee0] sm:$0xff] }
 0x7d2   :  { %8757 = vst [vmem:[#allocation2 + $0x1f48] sm:$0xff] %v7687_v17  ;;  %v9160_v43 = vadd.f32 %v9159_v18, %v7687_v17  ;;  %v7272_v61 = vpop.f32.mrf.mxu1  ;;  %v1031_v17 = vld [vmem:[%s19765_s0 + $0x1fe0] sm:$0xff] }
 0x7d3   :  { %8694 = vst [vmem:[#allocation2 + $0x1d50] sm:$0xff] %v7272_v61  ;;  %v9189_v0 = vadd.f32 %v9188_v5, %v7272_v61  ;;  %11885 = vmatmul.msk.f32.gmra.mxu0 %vm1067_vm0, %v933_v42 }
 0x7d4   :  { %11949 = vmatmul.msk.f32.gmra.mxu2 %vm1067_vm0, %v997_v4  ;;  %v17911_v8 = vmul.f32 0.1, %v9160_v43 }
 0x7d5   :  { %11917 = vmatmul.msk.f32.gmra.mxu1 %vm1067_vm0, %v965_v3 }
 0x7d6   :  { %v9884_v14 = vmul.f32 %v17911_v8, %v17911_v8  ;;  %11981 = vmatmul.msk.f32.gmra.mxu3 %vm1067_vm0, %v1029_v55 }
 0x7d7   :  { %v7481_v9 = vpop.f32.mrf.mxu2 }
 0x7d8   :  { %8726 = vst [vmem:[#allocation2 + $0x1e50] sm:$0xff] %v7481_v9  ;;  %v9190_v40 = vadd.f32 %v9189_v0, %v7481_v9  ;;  %v9925_v27 = vadd.f32 %v9924_v19, %v9884_v14  ;;  %v7066_v21 = vpop.f32.mrf.mxu0  ;;  %v966_v19 = vld [vmem:[%s19765_s0 + $0x1dd8] sm:$0xff]  ;;  %v936_v14 = vld [vmem:[%s19765_s0 + $0x1ce8] sm:$0xff] }
 0x7d9   :  { %8663 = vst [vmem:[#allocation2 + $0x1c58] sm:$0xff] %v7066_v21  ;;  %v9219_v16 = vadd.f32 %v17303_v24, %v7066_v21  ;;  %v7690_v15 = vpop.f32.mrf.mxu3  ;;  %v1000_v9 = vld [vmem:[%s19765_s0 + $0x1ee8] sm:$0xff] }
 0x7da   :  { %8758 = vst [vmem:[#allocation2 + $0x1f50] sm:$0xff] %v7690_v15  ;;  %v9191_v11 = vadd.f32 %v9190_v40, %v7690_v15  ;;  %v7275_v13 = vpop.f32.mrf.mxu1  ;;  %v1032_v15 = vld [vmem:[%s19765_s0 + $0x1fe8] sm:$0xff] }
 0x7db   :  { %8695 = vst [vmem:[#allocation2 + $0x1d58] sm:$0xff] %v7275_v13  ;;  %v9220_v44 = vadd.f32 %v9219_v16, %v7275_v13  ;;  %11886 = vmatmul.msk.f32.gmra.mxu0 %vm1067_vm0, %v934_v54 }
 0x7dc   :  { %11950 = vmatmul.msk.f32.gmra.mxu2 %vm1067_vm0, %v998_v7  ;;  %v17932_v46 = vmul.f32 0.1, %v9191_v11 }
 0x7dd   :  { %11918 = vmatmul.msk.f32.gmra.mxu1 %vm1067_vm0, %v966_v19 }
 0x7de   :  { %v9885_v24 = vmul.f32 %v17932_v46, %v17932_v46  ;;  %11982 = vmatmul.msk.f32.gmra.mxu3 %vm1067_vm0, %v1030_v45 }
 0x7df   :  { %v7484_v25 = vpop.f32.mrf.mxu2 }
 0x7e0   :  { %8727 = vst [vmem:[#allocation2 + $0x1e58] sm:$0xff] %v7484_v25  ;;  %v9221_v49 = vadd.f32 %v9220_v44, %v7484_v25  ;;  %v9911_v2 = vadd.f32 %v9910_v58, %v9885_v24  ;;  %v7069_v41 = vpop.f32.mrf.mxu0  ;;  %v967_v58 = vld [vmem:[%s19765_s0 + $0x1de0] sm:$0xff]  ;;  %v937_v24 = vld [vmem:[%s19765_s0 + $0x1cf0] sm:$0xff] }
 0x7e1   :  { %8664 = vst [vmem:[#allocation2 + $0x1c60] sm:$0xff] %v7069_v41  ;;  %v9250_v18 = vadd.f32 %v17322_v1, %v7069_v41  ;;  %v7693_v33 = vpop.f32.mrf.mxu3  ;;  %v1001_v25 = vld [vmem:[%s19765_s0 + $0x1ef0] sm:$0xff] }
 0x7e2   :  { %8759 = vst [vmem:[#allocation2 + $0x1f58] sm:$0xff] %v7693_v33  ;;  %v9222_v42 = vadd.f32 %v9221_v49, %v7693_v33  ;;  %v7278_v4 = vpop.f32.mrf.mxu1  ;;  %v1033_v33 = vld [vmem:[%s19765_s0 + $0x1ff0] sm:$0xff] }
 0x7e3   :  { %8696 = vst [vmem:[#allocation2 + $0x1d60] sm:$0xff] %v7278_v4  ;;  %v9251_v5 = vadd.f32 %v9250_v18, %v7278_v4  ;;  %11887 = vmatmul.msk.f32.gmra.mxu0 %vm1067_vm0, %v935_v51 }
 0x7e4   :  { %11951 = vmatmul.msk.f32.gmra.mxu2 %vm1067_vm0, %v999_v35  ;;  %v17953_v43 = vmul.f32 0.1, %v9222_v42 }
 0x7e5   :  { %11919 = vmatmul.msk.f32.gmra.mxu1 %vm1067_vm0, %v967_v58 }
 0x7e6   :  { %v9886_v1 = vmul.f32 %v17953_v43, %v17953_v43  ;;  %11983 = vmatmul.msk.f32.gmra.mxu3 %vm1067_vm0, %v1031_v17 }
 0x7e7   :  { %v7487_v61 = vpop.f32.mrf.mxu2 }
 0x7e8   :  { %8728 = vst [vmem:[#allocation2 + $0x1e60] sm:$0xff] %v7487_v61  ;;  %v9252_v3 = vadd.f32 %v9251_v5, %v7487_v61  ;;  %v9926_v0 = vadd.f32 %v9925_v27, %v9886_v1  ;;  %v7072_v55 = vpop.f32.mrf.mxu0  ;;  %v968_v27 = vld [vmem:[%s19765_s0 + $0x1de8] sm:$0xff]  ;;  %v938_v1 = vld [vmem:[%s19765_s0 + $0x1cf8] sm:$0xff] }
 0x7e9   :  { %8665 = vst [vmem:[#allocation2 + $0x1c68] sm:$0xff] %v7072_v55  ;;  %v9281_v40 = vadd.f32 %v17341_v12, %v7072_v55  ;;  %v7696_v21 = vpop.f32.mrf.mxu3  ;;  %v1002_v61 = vld [vmem:[%s19765_s0 + $0x1ef8] sm:$0xff] }
 0x7ea   :  { %8760 = vst [vmem:[#allocation2 + $0x1f60] sm:$0xff] %v7696_v21  ;;  %v9253_v54 = vadd.f32 %v9252_v3, %v7696_v21  ;;  %v7281_v7 = vpop.f32.mrf.mxu1  ;;  %v1034_v21 = vld [vmem:[%s19765_s0 + $0x1ff8] sm:$0xff] }
 0x7eb   :  { %8697 = vst [vmem:[#allocation2 + $0x1d68] sm:$0xff] %v7281_v7  ;;  %v9282_v16 = vadd.f32 %v9281_v40, %v7281_v7  ;;  %11888 = vmatmul.msk.f32.gmra.mxu0 %vm1067_vm0, %v936_v14 }
 0x7ec   :  { %11952 = vmatmul.msk.f32.gmra.mxu2 %vm1067_vm0, %v1000_v9  ;;  %v17974_v11 = vmul.f32 0.1, %v9253_v54 }
 0x7ed   :  { %11920 = vmatmul.msk.f32.gmra.mxu1 %vm1067_vm0, %v968_v27 }
 0x7ee   :  { %v9887_v12 = vmul.f32 %v17974_v11, %v17974_v11  ;;  %11984 = vmatmul.msk.f32.gmra.mxu3 %vm1067_vm0, %v1032_v15 }
 0x7ef   :  { %v7490_v13 = vpop.f32.mrf.mxu2 }
 0x7f0   :  { %8729 = vst [vmem:[#allocation2 + $0x1e68] sm:$0xff] %v7490_v13  ;;  %v9283_v19 = vadd.f32 %v9282_v16, %v7490_v13  ;;  %v9912_v44 = vadd.f32 %v9911_v2, %v9887_v12  ;;  %v7075_v45 = vpop.f32.mrf.mxu0  ;;  %v969_v2 = vld [vmem:[%s19765_s0 + $0x1df0] sm:$0xff] }
 0x7f1   :  { %8666 = vst [vmem:[#allocation2 + $0x1c70] sm:$0xff] %v7075_v45  ;;  %v9312_v49 = vadd.f32 %v17360_v39, %v7075_v45  ;;  %v7699_v41 = vpop.f32.mrf.mxu3 }
 0x7f2   :  { %8761 = vst [vmem:[#allocation2 + $0x1f68] sm:$0xff] %v7699_v41  ;;  %v9284_v51 = vadd.f32 %v9283_v19, %v7699_v41  ;;  %v7284_v35 = vpop.f32.mrf.mxu1 }
 0x7f3   :  { %8698 = vst [vmem:[#allocation2 + $0x1d70] sm:$0xff] %v7284_v35  ;;  %v9313_v18 = vadd.f32 %v9312_v49, %v7284_v35  ;;  %11889 = vmatmul.msk.f32.gmra.mxu0 %vm1067_vm0, %v937_v24 }
 0x7f4   :  { %11953 = vmatmul.msk.f32.gmra.mxu2 %vm1067_vm0, %v1001_v25  ;;  %v17995_v42 = vmul.f32 0.1, %v9284_v51 }
 0x7f5   :  { %11921 = vmatmul.msk.f32.gmra.mxu1 %vm1067_vm0, %v969_v2 }
 0x7f6   :  { %v9888_v39 = vmul.f32 %v17995_v42, %v17995_v42  ;;  %11985 = vmatmul.msk.f32.gmra.mxu3 %vm1067_vm0, %v1033_v33 }
 0x7f7   :  { %v7493_v4 = vpop.f32.mrf.mxu2 }
 0x7f8   :  { %8730 = vst [vmem:[#allocation2 + $0x1e70] sm:$0xff] %v7493_v4  ;;  %v9314_v58 = vadd.f32 %v9313_v18, %v7493_v4  ;;  %v9927_v5 = vadd.f32 %v9926_v0, %v9888_v39  ;;  %v7078_v17 = vpop.f32.mrf.mxu0  ;;  %v970_v0 = vld [vmem:[%s19765_s0 + $0x1df8] sm:$0xff]  ;;  %s18343_s0 = smov 0  }
 0x7f9   :  { %8667 = vst [vmem:[#allocation2 + $0x1c78] sm:$0xff] %v7078_v17  ;;  %v9343_v3 = vadd.f32 %v17379_v36, %v7078_v17  ;;  %v7702_v55 = vpop.f32.mrf.mxu3 }
 0x7fa   :  { %8762 = vst [vmem:[#allocation2 + $0x1f70] sm:$0xff] %v7702_v55  ;;  %v9315_v14 = vadd.f32 %v9314_v58, %v7702_v55  ;;  %v7287_v9 = vpop.f32.mrf.mxu1 }
 0x7fb   :  { %8699 = vst [vmem:[#allocation2 + $0x1d78] sm:$0xff] %v7287_v9  ;;  %v9344_v40 = vadd.f32 %v9343_v3, %v7287_v9  ;;  %11890 = vmatmul.msk.f32.gmra.mxu0 %vm1067_vm0, %v938_v1 }
 0x7fc   :  { %11954 = vmatmul.msk.f32.gmra.mxu2 %vm1067_vm0, %v1002_v61  ;;  %v18016_v54 = vmul.f32 0.1, %v9315_v14 }
 0x7fd   :  { %11922 = vmatmul.msk.f32.gmra.mxu1 %vm1067_vm0, %v970_v0 }
 0x7fe   :  { %v9889_v36 = vmul.f32 %v18016_v54, %v18016_v54  ;;  %11986 = vmatmul.msk.f32.gmra.mxu3 %vm1067_vm0, %v1034_v21 }
 0x7ff   :  { %v7496_v7 = vpop.f32.mrf.mxu2 }
 0x800   :  { %8731 = vst [vmem:[#allocation2 + $0x1e78] sm:$0xff] %v7496_v7  ;;  %v9345_v27 = vadd.f32 %v9344_v40, %v7496_v7  ;;  %v9913_v16 = vadd.f32 %v9912_v44, %v9889_v36  ;;  %v7081_v15 = vpop.f32.mrf.mxu0 }
 0x801   :  { %8668 = vst [vmem:[#allocation2 + $0x1c80] sm:$0xff] %v7081_v15  ;;  %v9374_v12 = vadd.f32 %v17398_v48, %v7081_v15  ;;  %v7705_v13 = vpop.f32.mrf.mxu3 }
 0x802   :  { %8763 = vst [vmem:[#allocation2 + $0x1f78] sm:$0xff] %v7705_v13  ;;  %v9346_v19 = vadd.f32 %v9345_v27, %v7705_v13  ;;  %v7290_v45 = vpop.f32.mrf.mxu1 }
 0x803   :  { %8700 = vst [vmem:[#allocation2 + $0x1d80] sm:$0xff] %v7290_v45  ;;  %v9375_v24 = vadd.f32 %v9374_v12, %v7290_v45 }
 0x804   :  { %v18023_v25 = vmul.f32 0.1, %v9346_v19 }
 0x806   :  { %v9890_v49 = vmul.f32 %v18023_v25, %v18023_v25 }
 0x807   :  { %v7499_v41 = vpop.f32.mrf.mxu2 }
 0x808   :  { %8732 = vst [vmem:[#allocation2 + $0x1e80] sm:$0xff] %v7499_v41  ;;  %v9376_v51 = vadd.f32 %v9375_v24, %v7499_v41  ;;  %v9928_v35 = vadd.f32 %v9927_v5, %v9890_v49  ;;  %v7084_v44 = vpop.f32.mrf.mxu0 }
 0x809   :  { %8669 = vst [vmem:[#allocation2 + $0x1c88] sm:$0xff] %v7084_v44  ;;  %v9405_v2 = vadd.f32 %v17417_v6, %v7084_v44  ;;  %v7708_v48 = vpop.f32.mrf.mxu3 }
 0x80a   :  { %8764 = vst [vmem:[#allocation2 + $0x1f80] sm:$0xff] %v7708_v48  ;;  %v9377_v18 = vadd.f32 %v9376_v51, %v7708_v48  ;;  %v7293_v33 = vpop.f32.mrf.mxu1 }
 0x80b   :  { %8701 = vst [vmem:[#allocation2 + $0x1d88] sm:$0xff] %v7293_v33  ;;  %v9406_v39 = vadd.f32 %v9405_v2, %v7293_v33 }
 0x80c   :  { %v18028_v4 = vmul.f32 0.1, %v9377_v18 }
 0x80e   :  { %v9891_v58 = vmul.f32 %v18028_v4, %v18028_v4 }
 0x80f   :  { %v7502_v17 = vpop.f32.mrf.mxu2 }
 0x810   :  { %8733 = vst [vmem:[#allocation2 + $0x1e88] sm:$0xff] %v7502_v17  ;;  %v9407_v1 = vadd.f32 %v9406_v39, %v7502_v17  ;;  %v9914_v61 = vadd.f32 %v9913_v16, %v9891_v58  ;;  %v7087_v5 = vpop.f32.mrf.mxu0 }
 0x811   :  { %8670 = vst [vmem:[#allocation2 + $0x1c90] sm:$0xff] %v7087_v5  ;;  %v9436_v3 = vadd.f32 %v17436_v30, %v7087_v5  ;;  %v7711_v6 = vpop.f32.mrf.mxu3 }
 0x812   :  { %8765 = vst [vmem:[#allocation2 + $0x1f88] sm:$0xff] %v7711_v6  ;;  %v9408_v55 = vadd.f32 %v9407_v1, %v7711_v6  ;;  %v7296_v14 = vpop.f32.mrf.mxu1 }
 0x813   :  { %8702 = vst [vmem:[#allocation2 + $0x1d90] sm:$0xff] %v7296_v14  ;;  %v9437_v9 = vadd.f32 %v9436_v3, %v7296_v14 }
 0x814   :  { %v18033_v0 = vmul.f32 0.1, %v9408_v55 }
 0x816   :  { %v9892_v40 = vmul.f32 %v18033_v0, %v18033_v0 }
 0x817   :  { %v7505_v21 = vpop.f32.mrf.mxu2 }
 0x818   :  { %8734 = vst [vmem:[#allocation2 + $0x1e90] sm:$0xff] %v7505_v21  ;;  %v9438_v36 = vadd.f32 %v9437_v9, %v7505_v21  ;;  %v9929_v7 = vadd.f32 %v9928_v35, %v9892_v40  ;;  %v7090_v27 = vpop.f32.mrf.mxu0 }
 0x819   :  { %8671 = vst [vmem:[#allocation2 + $0x1c98] sm:$0xff] %v7090_v27  ;;  %v9467_v16 = vadd.f32 %v17455_v50, %v7090_v27  ;;  %v7714_v30 = vpop.f32.mrf.mxu3 }
 0x81a   :  { %8766 = vst [vmem:[#allocation2 + $0x1f90] sm:$0xff] %v7714_v30  ;;  %v9439_v15 = vadd.f32 %v9438_v36, %v7714_v30  ;;  %v7299_v12 = vpop.f32.mrf.mxu1 }
 0x81b   :  { %8703 = vst [vmem:[#allocation2 + $0x1d98] sm:$0xff] %v7299_v12  ;;  %v9468_v13 = vadd.f32 %v9467_v16, %v7299_v12 }
 0x81c   :  { %v18038_v19 = vmul.f32 0.1, %v9439_v15 }
 0x81e   :  { %v9893_v45 = vmul.f32 %v18038_v19, %v18038_v19 }
 0x81f   :  { %v7508_v24 = vpop.f32.mrf.mxu2 }
 0x820   :  { %8735 = vst [vmem:[#allocation2 + $0x1e98] sm:$0xff] %v7508_v24  ;;  %v9469_v49 = vadd.f32 %v9468_v13, %v7508_v24  ;;  %v9915_v41 = vadd.f32 %v9914_v61, %v9893_v45  ;;  %v7093_v51 = vpop.f32.mrf.mxu0 }
 0x821   :  { %8672 = vst [vmem:[#allocation2 + $0x1ca0] sm:$0xff] %v7093_v51  ;;  %v9498_v35 = vadd.f32 %v17474_v10, %v7093_v51  ;;  %v7717_v50 = vpop.f32.mrf.mxu3 }
 0x822   :  { %8767 = vst [vmem:[#allocation2 + $0x1f98] sm:$0xff] %v7717_v50  ;;  %v9470_v44 = vadd.f32 %v9469_v49, %v7717_v50  ;;  %v7302_v2 = vpop.f32.mrf.mxu1 }
 0x823   :  { %8704 = vst [vmem:[#allocation2 + $0x1da0] sm:$0xff] %v7302_v2  ;;  %v9499_v48 = vadd.f32 %v9498_v35, %v7302_v2 }
 0x824   :  { %v18043_v18 = vmul.f32 0.1, %v9470_v44 }
 0x826   :  { %v9894_v33 = vmul.f32 %v18043_v18, %v18043_v18 }
 0x827   :  { %v7511_v39 = vpop.f32.mrf.mxu2 }
 0x828   :  { %8736 = vst [vmem:[#allocation2 + $0x1ea0] sm:$0xff] %v7511_v39  ;;  %v9500_v58 = vadd.f32 %v9499_v48, %v7511_v39  ;;  %v9930_v17 = vadd.f32 %v9929_v7, %v9894_v33  ;;  %v7096_v1 = vpop.f32.mrf.mxu0 }
 0x829   :  { %8673 = vst [vmem:[#allocation2 + $0x1ca8] sm:$0xff] %v7096_v1  ;;  %v9529_v61 = vadd.f32 %v17493_v31, %v7096_v1  ;;  %v7720_v10 = vpop.f32.mrf.mxu3 }
 0x82a   :  { %8768 = vst [vmem:[#allocation2 + $0x1fa0] sm:$0xff] %v7720_v10  ;;  %v9501_v5 = vadd.f32 %v9500_v58, %v7720_v10  ;;  %v7305_v3 = vpop.f32.mrf.mxu1 }
 0x82b   :  { %8705 = vst [vmem:[#allocation2 + $0x1da8] sm:$0xff] %v7305_v3  ;;  %v9530_v6 = vadd.f32 %v9529_v61, %v7305_v3 }
 0x82c   :  { %v18048_v55 = vmul.f32 0.1, %v9501_v5 }
 0x82e   :  { %v9895_v14 = vmul.f32 %v18048_v55, %v18048_v55 }
 0x82f   :  { %v7514_v9 = vpop.f32.mrf.mxu2 }
 0x830   :  { %8737 = vst [vmem:[#allocation2 + $0x1ea8] sm:$0xff] %v7514_v9  ;;  %v9531_v40 = vadd.f32 %v9530_v6, %v7514_v9  ;;  %v9916_v21 = vadd.f32 %v9915_v41, %v9895_v14  ;;  %v7099_v36 = vpop.f32.mrf.mxu0 }
 0x831   :  { %8674 = vst [vmem:[#allocation2 + $0x1cb0] sm:$0xff] %v7099_v36  ;;  %v9560_v7 = vadd.f32 %v17512_v53, %v7099_v36  ;;  %v7723_v31 = vpop.f32.mrf.mxu3 }
 0x832   :  { %8769 = vst [vmem:[#allocation2 + $0x1fa8] sm:$0xff] %v7723_v31  ;;  %v9532_v27 = vadd.f32 %v9531_v40, %v7723_v31  ;;  %v7308_v16 = vpop.f32.mrf.mxu1 }
 0x833   :  { %8706 = vst [vmem:[#allocation2 + $0x1db0] sm:$0xff] %v7308_v16  ;;  %v9561_v30 = vadd.f32 %v9560_v7, %v7308_v16 }
 0x834   :  { %v18053_v15 = vmul.f32 0.1, %v9532_v27 }
 0x836   :  { %v9896_v12 = vmul.f32 %v18053_v15, %v18053_v15 }
 0x837   :  { %v7517_v13 = vpop.f32.mrf.mxu2 }
 0x838   :  { %8738 = vst [vmem:[#allocation2 + $0x1eb0] sm:$0xff] %v7517_v13  ;;  %v9562_v45 = vadd.f32 %v9561_v30, %v7517_v13  ;;  %v9931_v24 = vadd.f32 %v9930_v17, %v9896_v12  ;;  %v7102_v49 = vpop.f32.mrf.mxu0 }
 0x839   :  { %8675 = vst [vmem:[#allocation2 + $0x1cb8] sm:$0xff] %v7102_v49  ;;  %v9591_v41 = vadd.f32 %v17531_v37, %v7102_v49  ;;  %v7726_v53 = vpop.f32.mrf.mxu3 }
 0x83a   :  { %8770 = vst [vmem:[#allocation2 + $0x1fb0] sm:$0xff] %v7726_v53  ;;  %v9563_v51 = vadd.f32 %v9562_v45, %v7726_v53  ;;  %v7311_v35 = vpop.f32.mrf.mxu1 }
 0x83b   :  { %8707 = vst [vmem:[#allocation2 + $0x1db8] sm:$0xff] %v7311_v35  ;;  %v9592_v50 = vadd.f32 %v9591_v41, %v7311_v35 }
 0x83c   :  { %v18058_v44 = vmul.f32 0.1, %v9563_v51 }
 0x83e   :  { %v9897_v2 = vmul.f32 %v18058_v44, %v18058_v44 }
 0x83f   :  { %v7520_v48 = vpop.f32.mrf.mxu2 }
 0x840   :  { %8739 = vst [vmem:[#allocation2 + $0x1eb8] sm:$0xff] %v7520_v48  ;;  %v9593_v33 = vadd.f32 %v9592_v50, %v7520_v48  ;;  %v9917_v39 = vadd.f32 %v9916_v21, %v9897_v2  ;;  %v7105_v58 = vpop.f32.mrf.mxu0 }
 0x841   :  { %8676 = vst [vmem:[#allocation2 + $0x1cc0] sm:$0xff] %v7105_v58  ;;  %v9622_v17 = vadd.f32 %v17550_v57, %v7105_v58  ;;  %v7729_v37 = vpop.f32.mrf.mxu3 }
 0x842   :  { %8771 = vst [vmem:[#allocation2 + $0x1fb8] sm:$0xff] %v7729_v37  ;;  %v9594_v1 = vadd.f32 %v9593_v33, %v7729_v37  ;;  %v7314_v61 = vpop.f32.mrf.mxu1 }
 0x843   :  { %8708 = vst [vmem:[#allocation2 + $0x1dc0] sm:$0xff] %v7314_v61  ;;  %v9623_v10 = vadd.f32 %v9622_v17, %v7314_v61 }
 0x844   :  { %v18063_v5 = vmul.f32 0.1, %v9594_v1 }
 0x846   :  { %v9898_v3 = vmul.f32 %v18063_v5, %v18063_v5 }
 0x847   :  { %v7523_v6 = vpop.f32.mrf.mxu2 }
 0x848   :  { %8740 = vst [vmem:[#allocation2 + $0x1ec0] sm:$0xff] %v7523_v6  ;;  %v9624_v14 = vadd.f32 %v9623_v10, %v7523_v6  ;;  %v9932_v9 = vadd.f32 %v9931_v24, %v9898_v3  ;;  %v7108_v40 = vpop.f32.mrf.mxu0 }
 0x849   :  { %8677 = vst [vmem:[#allocation2 + $0x1cc8] sm:$0xff] %v7108_v40  ;;  %v9653_v21 = vadd.f32 %v17569_v47, %v7108_v40  ;;  %v7732_v57 = vpop.f32.mrf.mxu3 }
 0x84a   :  { %8772 = vst [vmem:[#allocation2 + $0x1fc0] sm:$0xff] %v7732_v57  ;;  %v9625_v36 = vadd.f32 %v9624_v14, %v7732_v57  ;;  %v7317_v7 = vpop.f32.mrf.mxu1 }
 0x84b   :  { %8709 = vst [vmem:[#allocation2 + $0x1dc8] sm:$0xff] %v7317_v7  ;;  %v9654_v31 = vadd.f32 %v9653_v21, %v7317_v7 }
 0x84c   :  { %v18068_v27 = vmul.f32 0.1, %v9625_v36 }
 0x84e   :  { %v9899_v16 = vmul.f32 %v18068_v27, %v18068_v27 }
 0x84f   :  { %v7526_v30 = vpop.f32.mrf.mxu2 }
 0x850   :  { %8741 = vst [vmem:[#allocation2 + $0x1ec8] sm:$0xff] %v7526_v30  ;;  %v9655_v12 = vadd.f32 %v9654_v31, %v7526_v30  ;;  %v9918_v13 = vadd.f32 %v9917_v39, %v9899_v16  ;;  %v7111_v45 = vpop.f32.mrf.mxu0 }
 0x851   :  { %8678 = vst [vmem:[#allocation2 + $0x1cd0] sm:$0xff] %v7111_v45  ;;  %v9684_v24 = vadd.f32 %v17588_v60, %v7111_v45  ;;  %v7735_v47 = vpop.f32.mrf.mxu3 }
 0x852   :  { %8773 = vst [vmem:[#allocation2 + $0x1fc8] sm:$0xff] %v7735_v47  ;;  %v9656_v49 = vadd.f32 %v9655_v12, %v7735_v47  ;;  %v7320_v41 = vpop.f32.mrf.mxu1 }
 0x853   :  { %8710 = vst [vmem:[#allocation2 + $0x1dd0] sm:$0xff] %v7320_v41  ;;  %v9685_v53 = vadd.f32 %v9684_v24, %v7320_v41 }
 0x854   :  { %v18073_v51 = vmul.f32 0.1, %v9656_v49 }
 0x856   :  { %v9900_v35 = vmul.f32 %v18073_v51, %v18073_v51 }
 0x857   :  { %v7529_v50 = vpop.f32.mrf.mxu2 }
 0x858   :  { %8742 = vst [vmem:[#allocation2 + $0x1ed0] sm:$0xff] %v7529_v50  ;;  %v9686_v2 = vadd.f32 %v9685_v53, %v7529_v50  ;;  %v9933_v48 = vadd.f32 %v9932_v9, %v9900_v35  ;;  %v7114_v33 = vpop.f32.mrf.mxu0 }
 0x859   :  { %8679 = vst [vmem:[#allocation2 + $0x1cd8] sm:$0xff] %v7114_v33  ;;  %v9715_v39 = vadd.f32 %v17607_v62, %v7114_v33  ;;  %v7738_v60 = vpop.f32.mrf.mxu3 }
 0x85a   :  { %8774 = vst [vmem:[#allocation2 + $0x1fd0] sm:$0xff] %v7738_v60  ;;  %v9687_v58 = vadd.f32 %v9686_v2, %v7738_v60  ;;  %v7323_v17 = vpop.f32.mrf.mxu1 }
 0x85b   :  { %8711 = vst [vmem:[#allocation2 + $0x1dd8] sm:$0xff] %v7323_v17  ;;  %v9716_v37 = vadd.f32 %v9715_v39, %v7323_v17 }
 0x85c   :  { %v18078_v1 = vmul.f32 0.1, %v9687_v58 }
 0x85e   :  { %v9901_v61 = vmul.f32 %v18078_v1, %v18078_v1 }
 0x85f   :  { %v7532_v10 = vpop.f32.mrf.mxu2 }
 0x860   :  { %8743 = vst [vmem:[#allocation2 + $0x1ed8] sm:$0xff] %v7532_v10  ;;  %v9717_v3 = vadd.f32 %v9716_v37, %v7532_v10  ;;  %v9919_v6 = vadd.f32 %v9918_v13, %v9901_v61  ;;  %v7117_v14 = vpop.f32.mrf.mxu0 }
 0x861   :  { %8680 = vst [vmem:[#allocation2 + $0x1ce0] sm:$0xff] %v7117_v14  ;;  %v9746_v9 = vadd.f32 %v17626_v20, %v7117_v14  ;;  %v7741_v62 = vpop.f32.mrf.mxu3 }
 0x862   :  { %8775 = vst [vmem:[#allocation2 + $0x1fd8] sm:$0xff] %v7741_v62  ;;  %v9718_v40 = vadd.f32 %v9717_v3, %v7741_v62  ;;  %v7326_v21 = vpop.f32.mrf.mxu1 }
 0x863   :  { %8712 = vst [vmem:[#allocation2 + $0x1de0] sm:$0xff] %v7326_v21  ;;  %v9747_v57 = vadd.f32 %v9746_v9, %v7326_v21 }
 0x864   :  { %v18083_v36 = vmul.f32 0.1, %v9718_v40 }
 0x866   :  { %v9902_v7 = vmul.f32 %v18083_v36, %v18083_v36 }
 0x867   :  { %v7535_v31 = vpop.f32.mrf.mxu2 }
 0x868   :  { %8744 = vst [vmem:[#allocation2 + $0x1ee0] sm:$0xff] %v7535_v31  ;;  %v9748_v16 = vadd.f32 %v9747_v57, %v7535_v31  ;;  %v9934_v30 = vadd.f32 %v9933_v48, %v9902_v7  ;;  %v7120_v12 = vpop.f32.mrf.mxu0 }
 0x869   :  { %8681 = vst [vmem:[#allocation2 + $0x1ce8] sm:$0xff] %v7120_v12  ;;  %v9777_v13 = vadd.f32 %v17645_v26, %v7120_v12  ;;  %v7744_v20 = vpop.f32.mrf.mxu3 }
 0x86a   :  { %8776 = vst [vmem:[#allocation2 + $0x1fe0] sm:$0xff] %v7744_v20  ;;  %v9749_v45 = vadd.f32 %v9748_v16, %v7744_v20  ;;  %v7329_v24 = vpop.f32.mrf.mxu1 }
 0x86b   :  { %8713 = vst [vmem:[#allocation2 + $0x1de8] sm:$0xff] %v7329_v24  ;;  %v9778_v49 = vadd.f32 %v9777_v13, %v7329_v24 }
 0x86c   :  { %v18088_v47 = vmul.f32 0.1, %v9749_v45 }
 0x86e   :  { %v9903_v41 = vmul.f32 %v18088_v47, %v18088_v47 }
 0x86f   :  { %v7538_v53 = vpop.f32.mrf.mxu2 }
 0x870   :  { %8745 = vst [vmem:[#allocation2 + $0x1ee8] sm:$0xff] %v7538_v53  ;;  %v9779_v35 = vadd.f32 %v9778_v49, %v7538_v53  ;;  %v9920_v50 = vadd.f32 %v9919_v6, %v9903_v41  ;;  %v7123_v2 = vpop.f32.mrf.mxu0  ;;  %v8780_v49 = vlaneseq }
 0x871   :  { %8682 = vst [vmem:[#allocation2 + $0x1cf0] sm:$0xff] %v7123_v2  ;;  %v9808_v48 = vadd.f32 %v17664_v56, %v7123_v2  ;;  %v7747_v26 = vpop.f32.mrf.mxu3 }
 0x872   :  { %8777 = vst [vmem:[#allocation2 + $0x1fe8] sm:$0xff] %v7747_v26  ;;  %v9780_v33 = vadd.f32 %v9779_v35, %v7747_v26  ;;  %v7332_v39 = vpop.f32.mrf.mxu1  ;;  %v8781_v53 = vshrl.u32 %v8780_v49, 7 }
 0x873   :  { %8714 = vst [vmem:[#allocation2 + $0x1df0] sm:$0xff] %v7332_v39  ;;  %v9809_v58 = vadd.f32 %v9808_v48, %v7332_v39  ;;  %v13085_v39 = vmov -1e+09  }
 0x874   :  { %v18093_v60 = vmul.f32 0.1, %v9780_v33 }
 0x876   :  { %v9904_v17 = vmul.f32 %v18093_v60, %v18093_v60 }
 0x877   :  { %v7541_v37 = vpop.f32.mrf.mxu2 }
 0x878   :  { %8746 = vst [vmem:[#allocation2 + $0x1ef0] sm:$0xff] %v7541_v37  ;;  %v9810_v61 = vadd.f32 %v9809_v58, %v7541_v37  ;;  %v9935_v10 = vadd.f32 %v9934_v30, %v9904_v17  ;;  %v7126_v3 = vpop.f32.mrf.mxu0 }
 0x879   :  { %8683 = vst [vmem:[#allocation2 + $0x1cf8] sm:$0xff] %v7126_v3  ;;  %v9839_v6 = vadd.f32 %v17686_v63, %v7126_v3  ;;  %v7750_v56 = vpop.f32.mrf.mxu3 }
 0x87a   :  { %8778 = vst [vmem:[#allocation2 + $0x1ff0] sm:$0xff] %v7750_v56  ;;  %v9811_v14 = vadd.f32 %v9810_v61, %v7750_v56  ;;  %v7335_v9 = vpop.f32.mrf.mxu1  ;;  %v13086_v61 = vmov 0.0  }
 0x87b   :  { %8715 = vst [vmem:[#allocation2 + $0x1df8] sm:$0xff] %v7335_v9  ;;  %v9840_v40 = vadd.f32 %v9839_v6, %v7335_v9 }
 0x87c   :  { %v18098_v62 = vmul.f32 0.1, %v9811_v14  ;;  %8787 = vst [vmem:[#allocation3] sm:$0xff] %v13086_v61 }
 0x87d   :  { %8789 = vst [vmem:[#allocation3 + $0x10] sm:$0xff] %v13086_v61 }
 0x87e   :  { %v9905_v21 = vmul.f32 %v18098_v62, %v18098_v62  ;;  %8791 = vst [vmem:[#allocation3 + $0x20] sm:$0xff] %v13086_v61 }
 0x87f   :  { %v7544_v57 = vpop.f32.mrf.mxu2  ;;  %8793 = vst [vmem:[#allocation3 + $0x30] sm:$0xff] %v13086_v61 }
 0x880   :  { %8747 = vst [vmem:[#allocation2 + $0x1ef8] sm:$0xff] %v7544_v57  ;;  %v9841_v7 = vadd.f32 %v9840_v40, %v7544_v57  ;;  %v9921_v31 = vadd.f32 %v9920_v50, %v9905_v21  ;;  %v8782_v50 = vadd.s32 8, %v8781_v53 }
 0x881   :  { %v7753_v16 = vpop.f32.mrf.mxu3  ;;  %8795 = vst [vmem:[#allocation3 + $0x40] sm:$0xff] %v13086_v61 }
 0x882   :  { %12521 = vrsqrt.f32 %v9921_v31  ;;  %8779 = vst [vmem:[#allocation2 + $0x1ff8] sm:$0xff] %v7753_v16  ;;  %v9842_v30 = vadd.f32 %v9841_v7, %v7753_v16  ;;  %vm8784_vm1 = vcmp.lt.s32.totalorder %v8782_v50, 10  ;;  %vm9946_vm2 = vcmp.eq.f32.partialorder %v9921_v31, inf }
 0x883   :  { %v18110_v58 = vsel %vm8784_vm1, 0.0, %v13085_v39  ;;  %v9949_v17 = vand.u32 2147483648, %v9921_v31  ;;  %vm9948_vm3 = vcmp.eq.f32.partialorder %v9921_v31, 0.0  ;;  %v9937_v56 = vadd.f32 1.0, %v9921_v31  ;;  %8797 = vst [vmem:[#allocation3 + $0x50] sm:$0xff] %v13086_v61 }
 0x884   :  { %v18102_v63 = vmul.f32 0.1, %v9842_v30  ;;  %8788 = vst [vmem:[#allocation3 + $0x8] sm:$0xff] %v18110_v58  ;;  %v18295_v39 = vmov 0.0  }
 0x885   :  { %8790 = vst [vmem:[#allocation3 + $0x18] sm:$0xff] %v18110_v58 }
 0x886   :  { %v9906_v12 = vmul.f32 %v18102_v63, %v18102_v63  ;;  %8792 = vst [vmem:[#allocation3 + $0x28] sm:$0xff] %v18110_v58 }
 0x887   :  { %8794 = vst [vmem:[#allocation3 + $0x38] sm:$0xff] %v18110_v58 }
 0x888   :  { %v12522_v13 = vpop.eup %12521  ;;  %v18106_v45 = vadd.f32 %v9935_v10, %v9906_v12  ;;  %8796 = vst [vmem:[#allocation3 + $0x48] sm:$0xff] %v18110_v58 }
 0x889   :  { %v9940_v20 = vmul.f32 %v12522_v13, %v9921_v31  ;;  %8798 = vst [vmem:[#allocation3 + $0x58] sm:$0xff] %v18110_v58 }
 0x88a   :  { %12523 = vrsqrt.f32 %v18106_v45  ;;  %vm9958_vm4 = vcmp.eq.f32.partialorder %v18106_v45, inf  ;;  %v9961_v7 = vand.u32 2147483648, %v18106_v45  ;;  %vm9960_vm5 = vcmp.eq.f32.partialorder %v18106_v45, 0.0  ;;  %8799 = vst [vmem:[#allocation3 + $0x60] sm:$0xff] %v13086_v61 }
 0x88b   :  { %v9941_v24 = vmul.f32 %v12522_v13, %v9940_v20  ;;  %v9938_v20 = vadd.f32 1.0, %v18106_v45  ;;  %8800 = vst [vmem:[#allocation3 + $0x68] sm:$0xff] %v18110_v58 }
 0x88c   :  { %8801 = vst [vmem:[#allocation3 + $0x70] sm:$0xff] %v13086_v61 }
 0x88d   :  { %v9942_v41 = vmul.f32 0.5, %v9941_v24  ;;  %8802 = vst [vmem:[#allocation3 + $0x78] sm:$0xff] %v18110_v58 }
 0x88e   :  { %8803 = vst [vmem:[#allocation3 + $0x80] sm:$0xff] %v13086_v61 }
 0x88f   :  { %v9943_v35 = vsub.f32 1.5, %v9942_v41  ;;  %8804 = vst [vmem:[#allocation3 + $0x88] sm:$0xff] %v18110_v58 }
 0x890   :  { %v12524_v2 = vpop.eup %12523  ;;  %8805 = vst [vmem:[#allocation3 + $0x90] sm:$0xff] %v13086_v61 }
 0x891   :  { %v9944_v48 = vmul.f32 %v12522_v13, %v9943_v35  ;;  %v9952_v26 = vmul.f32 %v12524_v2, %v18106_v45  ;;  %8806 = vst [vmem:[#allocation3 + $0x98] sm:$0xff] %v18110_v58 }
 0x892   :  { %8807 = vst [vmem:[#allocation3 + $0xa0] sm:$0xff] %v13086_v61 }
 0x893   :  { %v9945_v33 = vmul.f32 %v9944_v48, %v9921_v31  ;;  %v9953_v37 = vmul.f32 %v12524_v2, %v9952_v26  ;;  %8808 = vst [vmem:[#allocation3 + $0xa8] sm:$0xff] %v18110_v58  ;;  %v18291_v26 = vmov 0.0  }
 0x894   :  { %8809 = vst [vmem:[#allocation3 + $0xb0] sm:$0xff] %v13086_v61 }
 0x895   :  { %v9947_v10 = vsel %vm9946_vm2, %v9921_v31, %v9945_v33  ;;  %v9954_v6 = vmul.f32 0.5, %v9953_v37  ;;  %8810 = vst [vmem:[#allocation3 + $0xb8] sm:$0xff] %v18110_v58  ;;  %v18293_v33 = vmov 0.0   ;;  %v18301_v37 = vmov 0.0  }
 0x896   :  { %v9950_v3 = vsel %vm9948_vm3, %v9949_v17, %v9947_v10  ;;  %8811 = vst [vmem:[#allocation3 + $0xc0] sm:$0xff] %v13086_v61  ;;  %v18297_v17 = vmov 0.0   ;;  %v18305_v10 = vmov 0.0  }
 0x897   :  { %v9963_v14 = vadd.f32 1e-08, %v9950_v3  ;;  %v9955_v9 = vsub.f32 1.5, %v9954_v6  ;;  %8812 = vst [vmem:[#allocation3 + $0xc8] sm:$0xff] %v18110_v58  ;;  %v18307_v3 = vmov 0.0   ;;  %v18309_v6 = vmov 0.0  }
 0x898   :  { %8813 = vst [vmem:[#allocation3 + $0xd0] sm:$0xff] %v13086_v61 }
 0x899   :  { %v9965_v40 = vmul.f32 %v9963_v14, %v9937_v56  ;;  %v9956_v21 = vmul.f32 %v12524_v2, %v9955_v9  ;;  %8814 = vst [vmem:[#allocation3 + $0xd8] sm:$0xff] %v18110_v58  ;;  %v18311_v56 = vmov 0.0   ;;  %v18313_v14 = vmov 0.0  }
 0x89a   :  { %8815 = vst [vmem:[#allocation3 + $0xe0] sm:$0xff] %v13086_v61  ;;  %v18315_v9 = vmov 0.0  }
 0x89b   :  { %12525 = vrcp.f32 %v9965_v40  ;;  %v9957_v57 = vmul.f32 %v9956_v21, %v18106_v45  ;;  %8816 = vst [vmem:[#allocation3 + $0xe8] sm:$0xff] %v18110_v58  ;;  %v18317_v40 = vmov 0.0   ;;  %v18319_v21 = vmov 0.0  }
 0x89c   :  { %8817 = vst [vmem:[#allocation3 + $0xf0] sm:$0xff] %v13086_v61 }
 0x89d   :  { %v9959_v16 = vsel %vm9958_vm4, %v18106_v45, %v9957_v57  ;;  %8818 = vst [vmem:[#allocation3 + $0xf8] sm:$0xff] %v18110_v58  ;;  %v18321_v57 = vmov 0.0  }
 0x89e   :  { %v9962_v30 = vsel %vm9960_vm5, %v9961_v7, %v9959_v16  ;;  %8819 = vst [vmem:[#allocation3 + $0x100] sm:$0xff] %v13086_v61  ;;  %v18323_v7 = vmov 0.0   ;;  %v18325_v16 = vmov 0.0  }
 0x89f   :  { %v9964_v12 = vadd.f32 1e-08, %v9962_v30  ;;  %8820 = vst [vmem:[#allocation3 + $0x108] sm:$0xff] %v18110_v58  ;;  %v18327_v30 = vmov 0.0  }
 0x8a0   :  { %8821 = vst [vmem:[#allocation3 + $0x110] sm:$0xff] %v13086_v61 }
 0x8a1   :  { %v12526_v13 = vpop.eup %12525  ;;  %v9966_v49 = vmul.f32 %v9964_v12, %v9938_v20  ;;  %8822 = vst [vmem:[#allocation3 + $0x118] sm:$0xff] %v18110_v58  ;;  %v18329_v12 = vmov 0.0   ;;  %v18333_v20 = vmov 0.0  }
 0x8a2   :  { %v9969_v24 = vmul.f32 %v12526_v13, %v9921_v31  ;;  %8823 = vst [vmem:[#allocation3 + $0x120] sm:$0xff] %v13086_v61  ;;  %v18331_v13 = vmov 0.0  }
 0x8a3   :  { %12527 = vrcp.f32 %v9966_v49  ;;  %8824 = vst [vmem:[#allocation3 + $0x128] sm:$0xff] %v18110_v58  ;;  %v18337_v49 = vmov 0.0  }
 0x8a4   :  { %v18135_v41 = vmul.f32 %v9969_v24, %v17808_v22  ;;  %v18138_v53 = vmul.f32 %v9969_v24, %v17804_v29  ;;  %v18141_v35 = vmul.f32 %v9969_v24, %v17810_v23  ;;  %v18144_v50 = vmul.f32 %v9969_v24, %v17837_v32  ;;  %8825 = vst [vmem:[#allocation3 + $0x130] sm:$0xff] %v13086_v61 }
 0x8a5   :  { %v18148_v31 = vmul.f32 %v9969_v24, %v17890_v34  ;;  %v18151_v2 = vmul.f32 %v9969_v24, %v17932_v46  ;;  %v18154_v22 = vmul.f32 %v9969_v24, %v17974_v11  ;;  %v18157_v29 = vmul.f32 %v9969_v24, %v18016_v54  ;;  %8826 = vst [vmem:[#allocation3 + $0x138] sm:$0xff] %v18110_v58 }
 0x8a6   :  { %19800 = vst [vmem:[#allocation4_spill] sm:$0xff] %v18135_v41  ;;  %v18161_v23 = vmul.f32 %v9969_v24, %v18028_v4  ;;  %v18164_v32 = vmul.f32 %v9969_v24, %v18038_v19  ;;  %v18167_v34 = vmul.f32 %v9969_v24, %v18048_v55  ;;  %v18170_v46 = vmul.f32 %v9969_v24, %v18058_v44 }
 0x8a7   :  { %19801 = vst [vmem:[#allocation5_spill] sm:$0xff] %v18138_v53  ;;  %v18174_v11 = vmul.f32 %v9969_v24, %v18068_v27  ;;  %v18177_v54 = vmul.f32 %v9969_v24, %v18078_v1  ;;  %v18180_v4 = vmul.f32 %v9969_v24, %v18088_v47  ;;  %v18183_v19 = vmul.f32 %v9969_v24, %v18098_v62 }
 0x8a8   :  { %19802 = vst [vmem:[#allocation6_spill] sm:$0xff] %v18141_v35  ;;  %v18335_v24 = vmov 0.0  }
 0x8a9   :  { %19803 = vst [vmem:[#allocation7_spill] sm:$0xff] %v18144_v50  ;;  %v12528_v55 = vpop.eup %12527 }
 0x8aa   :  { %19804 = vst [vmem:[#allocation8_spill] sm:$0xff] %v18148_v31  ;;  %v9970_v44 = vmul.f32 %v12528_v55, %v18106_v45  ;;  %v18339_v55 = vmov 0.0  }
 0x8ab   :  { %19805 = vst [vmem:[#allocation9_spill] sm:$0xff] %v18151_v2 }
 0x8ac   :  { %19806 = vst [vmem:[#allocation10_spill] sm:$0xff] %v18154_v22  ;;  %v18197_v27 = vmul.f32 %v9970_v44, %v17841_v38  ;;  %v18200_v1 = vmul.f32 %v9970_v44, %v17835_v59  ;;  %v18203_v47 = vmul.f32 %v9970_v44, %v17843_v52  ;;  %v18206_v62 = vmul.f32 %v9970_v44, %v17869_v28 }
 0x8ad   :  { %19807 = vst [vmem:[#allocation11_spill] sm:$0xff] %v18157_v29  ;;  %v18210_v45 = vmul.f32 %v9970_v44, %v17911_v8  ;;  %v18213_v48 = vmul.f32 %v9970_v44, %v17953_v43  ;;  %v18216_v38 = vmul.f32 %v9970_v44, %v17995_v42  ;;  %v18219_v59 = vmul.f32 %v9970_v44, %v18023_v25 }
 0x8ae   :  { %19808 = vst [vmem:[#allocation12_spill] sm:$0xff] %v18161_v23  ;;  %v18223_v52 = vmul.f32 %v9970_v44, %v18033_v0  ;;  %v18226_v28 = vmul.f32 %v9970_v44, %v18043_v18  ;;  %v18229_v8 = vmul.f32 %v9970_v44, %v18053_v15  ;;  %v18232_v43 = vmul.f32 %v9970_v44, %v18063_v5 }
 0x8af   :  { %19809 = vst [vmem:[#allocation13_spill] sm:$0xff] %v18164_v32  ;;  %v18236_v42 = vmul.f32 %v9970_v44, %v18073_v51  ;;  %v18239_v25 = vmul.f32 %v9970_v44, %v18083_v36  ;;  %v18242_v0 = vmul.f32 %v9970_v44, %v18093_v60  ;;  %v18245_v18 = vmul.f32 %v9970_v44, %v18102_v63 }
 0x8b0   :  { %19810 = vst [vmem:[#allocation14_spill] sm:$0xff] %v18167_v34  ;;  %v18279_v15 = vmov 0.0   ;;  %v18281_v5 = vmov 0.0   ;;  %v18283_v51 = vmov 0.0   ;;  %v18285_v36 = vmov 0.0  }
 0x8b1   :  { %19811 = vst [vmem:[#allocation15_spill] sm:$0xff] %v18170_v46  ;;  %v18287_v60 = vmov 0.0   ;;  %v18289_v63 = vmov 0.0   ;;  %v18341_v44 = vmov 0.0  }
 0x8b2   :  { %19812 = vst [vmem:[#allocation16_spill] sm:$0xff] %v18174_v11 }
 0x8b3   :  { %19813 = vst [vmem:[#allocation17_spill] sm:$0xff] %v18177_v54 }
 0x8b4   :  { %19814 = vst [vmem:[#allocation18_spill] sm:$0xff] %v18180_v4 }
 0x8b5   :  { %19815 = vst [vmem:[#allocation19_spill] sm:$0xff] %v18183_v19 }
 0x8b6   :  { %19816 = vst [vmem:[#allocation20_spill] sm:$0xff] %v18197_v27 }
 0x8b7   :  { %19817 = vst [vmem:[#allocation21_spill] sm:$0xff] %v18200_v1 }
 0x8b8   :  { %19818 = vst [vmem:[#allocation22_spill] sm:$0xff] %v18203_v47 }
 0x8b9   :  { %19819 = vst [vmem:[#allocation23_spill] sm:$0xff] %v18206_v62 }
 0x8ba   :  { %19820 = vst [vmem:[#allocation24_spill] sm:$0xff] %v18210_v45 }
 0x8bb   :  { %19821 = vst [vmem:[#allocation25_spill] sm:$0xff] %v18213_v48 }
 0x8bc   :  { %19822 = vst [vmem:[#allocation26_spill] sm:$0xff] %v18216_v38 }
 0x8bd   :  { %19823 = vst [vmem:[#allocation27_spill] sm:$0xff] %v18219_v59 }
 0x8be   :  { %19824 = vst [vmem:[#allocation28_spill] sm:$0xff] %v18223_v52 }
 0x8bf   :  { %19825 = vst [vmem:[#allocation29_spill] sm:$0xff] %v18226_v28 }
 0x8c0   :  { %19826 = vst [vmem:[#allocation30_spill] sm:$0xff] %v18229_v8 }
 0x8c1   :  { %19827 = vst [vmem:[#allocation31_spill] sm:$0xff] %v18232_v43 }
 0x8c2   :  { %19828 = vst [vmem:[#allocation32_spill] sm:$0xff] %v18236_v42 }
 0x8c3   :  { %19829 = vst [vmem:[#allocation33_spill] sm:$0xff] %v18239_v25 }
 0x8c4   :  { %19830 = vst [vmem:[#allocation34_spill] sm:$0xff] %v18242_v0 }
 0x8c5   :  { %19831 = vst [vmem:[#allocation35_spill] sm:$0xff] %v18245_v18 }
 0x8c6   :  { %8827 = vst [vmem:[#allocation3 + $0x140] sm:$0xff] %v13086_v61 }
 0x8c7   :  { %8828 = vst [vmem:[#allocation3 + $0x148] sm:$0xff] %v18110_v58 }
 0x8c8   :  { %8829 = vst [vmem:[#allocation3 + $0x150] sm:$0xff] %v13086_v61 }
 0x8c9   :  { %8830 = vst [vmem:[#allocation3 + $0x158] sm:$0xff] %v18110_v58 }
 0x8ca   :  { %8831 = vst [vmem:[#allocation3 + $0x160] sm:$0xff] %v13086_v61 }
 0x8cb   :  { %8832 = vst [vmem:[#allocation3 + $0x168] sm:$0xff] %v18110_v58 }
 0x8cc   :  { %8833 = vst [vmem:[#allocation3 + $0x170] sm:$0xff] %v13086_v61 }
 0x8cd   :  { %8834 = vst [vmem:[#allocation3 + $0x178] sm:$0xff] %v18110_v58 }
 0x8ce   :  { %8835 = vst [vmem:[#allocation3 + $0x180] sm:$0xff] %v13086_v61 }
 0x8cf   :  { %8836 = vst [vmem:[#allocation3 + $0x188] sm:$0xff] %v18110_v58 }
 0x8d0   :  { %8837 = vst [vmem:[#allocation3 + $0x190] sm:$0xff] %v13086_v61 }
 0x8d1   :  { %8838 = vst [vmem:[#allocation3 + $0x198] sm:$0xff] %v18110_v58 }
 0x8d2   :  { %8839 = vst [vmem:[#allocation3 + $0x1a0] sm:$0xff] %v13086_v61 }
 0x8d3   :  { %8840 = vst [vmem:[#allocation3 + $0x1a8] sm:$0xff] %v18110_v58 }
 0x8d4   :  { %8841 = vst [vmem:[#allocation3 + $0x1b0] sm:$0xff] %v13086_v61 }
 0x8d5   :  { %8842 = vst [vmem:[#allocation3 + $0x1b8] sm:$0xff] %v18110_v58 }
 0x8d6   :  { %8843 = vst [vmem:[#allocation3 + $0x1c0] sm:$0xff] %v13086_v61 }
 0x8d7   :  { %8844 = vst [vmem:[#allocation3 + $0x1c8] sm:$0xff] %v18110_v58 }
 0x8d8   :  { %8845 = vst [vmem:[#allocation3 + $0x1d0] sm:$0xff] %v13086_v61 }
 0x8d9   :  { %8846 = vst [vmem:[#allocation3 + $0x1d8] sm:$0xff] %v18110_v58 }
 0x8da   :  { %8847 = vst [vmem:[#allocation3 + $0x1e0] sm:$0xff] %v13086_v61 }
 0x8db   :  { %8848 = vst [vmem:[#allocation3 + $0x1e8] sm:$0xff] %v18110_v58 }
 0x8dc   :  { %8849 = vst [vmem:[#allocation3 + $0x1f0] sm:$0xff] %v13086_v61  ;;  %v18303_v61 = vmov 0.0  }
 0x8dd   :  { %8850 = vst [vmem:[#allocation3 + $0x1f8] sm:$0xff] %v18110_v58  ;;  %v18299_v58 = vmov 0.0  }
 0x8de LB: > { %19832 = vst [vmem:[#allocation36_spill] sm:$0xff] %v12823_v15  ;;  %s11987_s30 = sshll.u32 %s12951_s0, 8  ;;  %v19857_v41 = vld [vmem:[#allocation4_spill] sm:$0xff]  ;;  %v19859_v53 = vld [vmem:[#allocation5_spill] sm:$0xff]  ;;  %v19861_v35 = vld [vmem:[#allocation6_spill] sm:$0xff]  ;;  %s11988_s4 = sshll.u32 %s12951_s0, 4  ;;  %s12951_s0 = sphi %s18343_s0, %s19986_s0   ;;  %v12947_v44 = vphi %v18341_v44, %v19985_v44   ;;  %v12943_v55 = vphi %v18339_v55, %v19984_v55   ;;  %v12939_v49 = vphi %v18337_v49, %v19983_v49   ;;  %v12935_v24 = vphi %v18335_v24, %v19982_v24   ;;  %v12931_v20 = vphi %v18333_v20, %v19981_v20   ;;  %v12927_v13 = vphi %v18331_v13, %v19980_v13   ;;  %v12923_v12 = vphi %v18329_v12, %v19979_v12   ;;  %v12919_v30 = vphi %v18327_v30, %v19978_v30   ;;  %v12915_v16 = vphi %v18325_v16, %v19977_v16   ;;  %v12911_v7 = vphi %v18323_v7, %v19976_v7   ;;  %v12907_v57 = vphi %v18321_v57, %v19975_v57   ;;  %v12903_v21 = vphi %v18319_v21, %v19974_v21   ;;  %v12899_v40 = vphi %v18317_v40, %v19973_v40   ;;  %v12895_v9 = vphi %v18315_v9, %v19972_v9   ;;  %v12891_v14 = vphi %v18313_v14, %v19971_v14   ;;  %v12887_v56 = vphi %v18311_v56, %v19970_v56   ;;  %v12883_v6 = vphi %v18309_v6, %v19969_v6   ;;  %v12879_v3 = vphi %v18307_v3, %v19968_v3   ;;  %v12875_v10 = vphi %v18305_v10, %v19967_v10   ;;  %v12871_v61 = vphi %v18303_v61, %v19966_v61   ;;  %v12867_v37 = vphi %v18301_v37, %v19965_v37   ;;  %v12863_v58 = vphi %v18299_v58, %v19964_v58   ;;  %v12859_v17 = vphi %v18297_v17, %v19963_v17   ;;  %v12855_v39 = vphi %v18295_v39, %v19962_v39   ;;  %v12851_v33 = vphi %v18293_v33, %v19961_v33   ;;  %v12847_v26 = vphi %v18291_v26, %v19960_v26   ;;  %v12843_v63 = vphi %v18289_v63, %v19959_v63   ;;  %v12839_v60 = vphi %v18287_v60, %v19958_v60   ;;  %v12835_v36 = vphi %v18285_v36, %v19957_v36   ;;  %v12831_v51 = vphi %v18283_v51, %v19956_v51   ;;  %v12827_v5 = vphi %v18281_v5, %v19955_v5   ;;  %v12823_v15 = vphi %v18279_v15, %v19953_v15  }
 0x8df   : > { %19833 = vst [vmem:[#allocation37_spill] sm:$0xff] %v12827_v5  ;;  %s18445_s3 = scalar_lea.vmem [#allocation2], %s11987_s30  ;;  %v19858_v27 = vld [vmem:[#allocation20_spill] sm:$0xff]  ;;  %v19860_v1 = vld [vmem:[#allocation21_spill] sm:$0xff]  ;;  %v19862_v47 = vld [vmem:[#allocation22_spill] sm:$0xff]  ;;  %s10138_s5 = scalar_lea.vmem [#allocation3], %s11988_s4 }
 0x8e0   : > { %19834 = vst [vmem:[#allocation38_spill] sm:$0xff] %v12831_v51  ;;  %v18448_v15 = vld [vmem:[%s18445_s3] sm:$0xff]  ;;  %v18451_v5 = vld [vmem:[%s18445_s3 + $0x8] sm:$0xff]  ;;  %v18454_v51 = vld [vmem:[%s18445_s3 + $0x10] sm:$0xff]  ;;  %s10008_s6 = sadd.s32 1, %s12951_s0  }
 0x8e1   : > { %19835 = vst [vmem:[#allocation39_spill] sm:$0xff] %v12835_v36  ;;  %v18457_v36 = vld [vmem:[%s18445_s3 + $0x18] sm:$0xff]  ;;  %v19865_v31 = vld [vmem:[#allocation8_spill] sm:$0xff]  ;;  %v19867_v2 = vld [vmem:[#allocation9_spill] sm:$0xff]  ;;  %p18739_p0 = scmp.ge.s32.totalorder %s10008_s6, 32   ;;  %s19986_s0 = smov %s10008_s6 }
 0x8e2   : > { %19836 = vst [vmem:[#allocation40_spill] sm:$0xff] %v12839_v60  ;;  %v18460_v60 = vld [vmem:[%s18445_s3 + $0x20] sm:$0xff]  ;;  %v19863_v50 = vld [vmem:[#allocation7_spill] sm:$0xff]  ;;  %v19868_v48 = vld [vmem:[#allocation25_spill] sm:$0xff]  ;;  %s19069_s8 = smov (%p18739_p0), 0  }
 0x8e3   : > { %19837 = vst [vmem:[#allocation41_spill] sm:$0xff] %v12843_v63  ;;  %v18463_v63 = vld [vmem:[%s18445_s3 + $0x28] sm:$0xff]  ;;  %v19864_v62 = vld [vmem:[#allocation23_spill] sm:$0xff]  ;;  %v19866_v45 = vld [vmem:[#allocation24_spill] sm:$0xff] }
 0x8e4   : > { %19838 = vst [vmem:[#allocation42_spill] sm:$0xff] %v12847_v26  ;;  %v10075_v26 = vmul.f32 %v18448_v15, %v19857_v41  ;;  %v10080_v41 = vmul.f32 %v18463_v63, %v19862_v47  ;;  %v19869_v22 = vld [vmem:[#allocation10_spill] sm:$0xff]  ;;  %v19871_v29 = vld [vmem:[#allocation11_spill] sm:$0xff]  ;;  %v19873_v23 = vld [vmem:[#allocation12_spill] sm:$0xff] }
 0x8e5   : > { %19839 = vst [vmem:[#allocation43_spill] sm:$0xff] %v12851_v33  ;;  %v10076_v33 = vmul.f32 %v18451_v5, %v19858_v27  ;;  %v18487_v27 = vld [vmem:[%s18445_s3 + $0x48] sm:$0xff]  ;;  %v19870_v38 = vld [vmem:[#allocation26_spill] sm:$0xff]  ;;  %v19872_v59 = vld [vmem:[#allocation27_spill] sm:$0xff] }
 0x8e6   : > { %19840 = vst [vmem:[#allocation44_spill] sm:$0xff] %v12855_v39  ;;  %v10077_v39 = vmul.f32 %v18454_v51, %v19859_v53  ;;  %v19874_v52 = vld [vmem:[#allocation28_spill] sm:$0xff]  ;;  %v19875_v32 = vld [vmem:[#allocation13_spill] sm:$0xff]  ;;  %v19877_v34 = vld [vmem:[#allocation14_spill] sm:$0xff] }
 0x8e7   : > { %19841 = vst [vmem:[#allocation45_spill] sm:$0xff] %v12859_v17  ;;  %v10078_v17 = vmul.f32 %v18457_v36, %v19860_v1  ;;  %v19876_v28 = vld [vmem:[#allocation29_spill] sm:$0xff]  ;;  %v19878_v8 = vld [vmem:[#allocation30_spill] sm:$0xff]  ;;  %v19879_v46 = vld [vmem:[#allocation15_spill] sm:$0xff] }
 0x8e8   : > { %19842 = vst [vmem:[#allocation46_spill] sm:$0xff] %v12863_v58  ;;  %v18474_v58 = vld [vmem:[%s18445_s3 + $0x30] sm:$0xff]  ;;  %v19880_v43 = vld [vmem:[#allocation31_spill] sm:$0xff]  ;;  %v19881_v11 = vld [vmem:[#allocation16_spill] sm:$0xff] }
 0x8e9   : > { %19843 = vst [vmem:[#allocation47_spill] sm:$0xff] %v12867_v37  ;;  %v18477_v37 = vld [vmem:[%s18445_s3 + $0x38] sm:$0xff]  ;;  %v10081_v53 = vmul.f32 %v18474_v58, %v19863_v50  ;;  %v19882_v42 = vld [vmem:[#allocation32_spill] sm:$0xff]  ;;  %v19883_v54 = vld [vmem:[#allocation17_spill] sm:$0xff] }
 0x8ea   : > { %19844 = vst [vmem:[#allocation48_spill] sm:$0xff] %v12871_v61  ;;  %v10079_v61 = vmul.f32 %v18460_v60, %v19861_v35  ;;  %v10082_v1 = vmul.f32 %v18477_v37, %v19864_v62  ;;  %v18497_v35 = vld [vmem:[%s18445_s3 + $0x58] sm:$0xff]  ;;  %v18507_v62 = vld [vmem:[%s18445_s3 + $0x68] sm:$0xff]  ;;  %v19885_v4 = vld [vmem:[#allocation18_spill] sm:$0xff] }
 0x8eb   : > { %19845 = vst [vmem:[#allocation49_spill] sm:$0xff] %v12875_v10  ;;  %v18484_v10 = vld [vmem:[%s18445_s3 + $0x40] sm:$0xff]  ;;  %v19884_v25 = vld [vmem:[#allocation33_spill] sm:$0xff]  ;;  %v19886_v0 = vld [vmem:[#allocation34_spill] sm:$0xff] }
 0x8ec   : > { %19846 = vst [vmem:[#allocation50_spill] sm:$0xff] %v12879_v3  ;;  %v10107_v3 = vadd.f32 %v10077_v39, %v10075_v26  ;;  %v10083_v47 = vmul.f32 %v18484_v10, %v19865_v31  ;;  %v18514_v31 = vld [vmem:[%s18445_s3 + $0x70] sm:$0xff]  ;;  %v19887_v19 = vld [vmem:[#allocation19_spill] sm:$0xff] }
 0x8ed   : > { %19847 = vst [vmem:[#allocation51_spill] sm:$0xff] %v12883_v6  ;;  %v10122_v6 = vadd.f32 %v10078_v17, %v10076_v33  ;;  %v10086_v33 = vmul.f32 %v18497_v35, %v19868_v48  ;;  %v18527_v48 = vld [vmem:[%s18445_s3 + $0x88] sm:$0xff]  ;;  %v19888_v18 = vld [vmem:[#allocation35_spill] sm:$0xff] }
 0x8ee   : > { %19848 = vst [vmem:[#allocation52_spill] sm:$0xff] %v12887_v56  ;;  %v18494_v56 = vld [vmem:[%s18445_s3 + $0x50] sm:$0xff]  ;;  %v10108_v50 = vadd.f32 %v10107_v3, %v10079_v61  ;;  %v10088_v61 = vmul.f32 %v18507_v62, %v19870_v38  ;;  %v18537_v38 = vld [vmem:[%s18445_s3 + $0x98] sm:$0xff] }
 0x8ef   : > { %19849 = vst [vmem:[#allocation53_spill] sm:$0xff] %v12891_v14  ;;  %v10084_v14 = vmul.f32 %v18487_v27, %v19866_v45  ;;  %v10085_v26 = vmul.f32 %v18494_v56, %v19867_v2  ;;  %v18517_v45 = vld [vmem:[%s18445_s3 + $0x78] sm:$0xff]  ;;  %v18524_v2 = vld [vmem:[%s18445_s3 + $0x80] sm:$0xff] }
 0x8f0   : > { %19850 = vst [vmem:[#allocation54_spill] sm:$0xff] %v12895_v9  ;;  %v10123_v9 = vadd.f32 %v10122_v6, %v10080_v41  ;;  %v10109_v39 = vadd.f32 %v10108_v50, %v10081_v53  ;;  %v10089_v53 = vmul.f32 %v18514_v31, %v19871_v29  ;;  %v10090_v50 = vmul.f32 %v18517_v45, %v19872_v59  ;;  %v18544_v29 = vld [vmem:[%s18445_s3 + $0xa0] sm:$0xff]  ;;  %v18547_v59 = vld [vmem:[%s18445_s3 + $0xa8] sm:$0xff] }
 0x8f1   : > { %19851 = vst [vmem:[#allocation55_spill] sm:$0xff] %v12899_v40  ;;  %v18504_v40 = vld [vmem:[%s18445_s3 + $0x60] sm:$0xff] }
 0x8f2   : > { %19852 = vst [vmem:[#allocation56_spill] sm:$0xff] %v12903_v21  ;;  %v10124_v17 = vadd.f32 %v10123_v9, %v10082_v1  ;;  %v10087_v41 = vmul.f32 %v18504_v40, %v19869_v22  ;;  %v10110_v3 = vadd.f32 %v10109_v39, %v10083_v47  ;;  %v18534_v22 = vld [vmem:[%s18445_s3 + $0x90] sm:$0xff]  ;;  %v10091_v47 = vmul.f32 %v18524_v2, %v19873_v23  ;;  %v18587_v21 = vld [vmem:[%s18445_s3 + $0xe8] sm:$0xff] }
 0x8f3   : > { %19853 = vst [vmem:[#allocation57_spill] sm:$0xff] %v12907_v57  ;;  %v18554_v23 = vld [vmem:[%s18445_s3 + $0xb0] sm:$0xff]  ;;  %v10140_v57 = vld [vmem:[%s10138_s5 + $0x8] sm:$0xff] }
 0x8f4   : > { %19854 = vst [vmem:[#allocation58_spill] sm:$0xff] %v12911_v7  ;;  %v10125_v6 = vadd.f32 %v10124_v17, %v10084_v14  ;;  %v10111_v1 = vadd.f32 %v10110_v3, %v10085_v26  ;;  %v10092_v14 = vmul.f32 %v18527_v48, %v19874_v52  ;;  %v10093_v26 = vmul.f32 %v18534_v22, %v19875_v32  ;;  %v18557_v52 = vld [vmem:[%s18445_s3 + $0xb8] sm:$0xff]  ;;  %v18564_v32 = vld [vmem:[%s18445_s3 + $0xc0] sm:$0xff] }
 0x8f5   : > { %19855 = vst [vmem:[#allocation59_spill] sm:$0xff] %v12915_v16 }
 0x8f6   : > { %19856 = vst [vmem:[#allocation60_spill] sm:$0xff] %v12919_v30  ;;  %v10126_v9 = vadd.f32 %v10125_v6, %v10086_v33  ;;  %v10112_v39 = vadd.f32 %v10111_v1, %v10087_v41  ;;  %v10094_v33 = vmul.f32 %v18537_v38, %v19876_v28  ;;  %v10095_v41 = vmul.f32 %v18544_v29, %v19877_v34  ;;  %v18567_v28 = vld [vmem:[%s18445_s3 + $0xc8] sm:$0xff]  ;;  %v18574_v34 = vld [vmem:[%s18445_s3 + $0xd0] sm:$0xff] }
 0x8f8   : > { %v10127_v17 = vadd.f32 %v10126_v9, %v10088_v61  ;;  %v10113_v3 = vadd.f32 %v10112_v39, %v10089_v53  ;;  %v10096_v61 = vmul.f32 %v18547_v59, %v19878_v8  ;;  %v10097_v53 = vmul.f32 %v18554_v23, %v19879_v46  ;;  %v18577_v8 = vld [vmem:[%s18445_s3 + $0xd8] sm:$0xff]  ;;  %v18584_v46 = vld [vmem:[%s18445_s3 + $0xe0] sm:$0xff] }
 0x8fa   : > { %v10128_v6 = vadd.f32 %v10127_v17, %v10090_v50  ;;  %v10114_v1 = vadd.f32 %v10113_v3, %v10091_v47  ;;  %v10098_v50 = vmul.f32 %v18557_v52, %v19880_v43  ;;  %v10099_v47 = vmul.f32 %v18564_v32, %v19881_v11  ;;  %v18594_v43 = vld [vmem:[%s18445_s3 + $0xf0] sm:$0xff]  ;;  %v18597_v11 = vld [vmem:[%s18445_s3 + $0xf8] sm:$0xff] }
 0x8fc   : > { %v10129_v9 = vadd.f32 %v10128_v6, %v10092_v14  ;;  %v10115_v39 = vadd.f32 %v10114_v1, %v10093_v26  ;;  %v10100_v14 = vmul.f32 %v18567_v28, %v19882_v42  ;;  %v10101_v26 = vmul.f32 %v18574_v34, %v19883_v54  ;;  %v10139_v54 = vld [vmem:[%s10138_s5] sm:$0xff] }
 0x8fd   : > { %v10105_v42 = vmul.f32 %v18594_v43, %v19887_v19 }
 0x8fe   : > { %v10130_v17 = vadd.f32 %v10129_v9, %v10094_v33  ;;  %v10116_v3 = vadd.f32 %v10115_v39, %v10095_v41  ;;  %v10102_v33 = vmul.f32 %v18577_v8, %v19884_v25  ;;  %v10103_v41 = vmul.f32 %v18584_v46, %v19885_v4 }
 0x900   : > { %v10131_v6 = vadd.f32 %v10130_v17, %v10096_v61  ;;  %v10117_v1 = vadd.f32 %v10116_v3, %v10097_v53  ;;  %v10104_v61 = vmul.f32 %v18587_v21, %v19886_v0  ;;  %v10106_v53 = vmul.f32 %v18597_v11, %v19888_v18 }
 0x902   : > { %v10132_v9 = vadd.f32 %v10131_v6, %v10098_v50  ;;  %v10118_v39 = vadd.f32 %v10117_v1, %v10099_v47 }
 0x904   : > { %v10133_v17 = vadd.f32 %v10132_v9, %v10100_v14  ;;  %v10119_v50 = vadd.f32 %v10118_v39, %v10101_v26 }
 0x906   : > { %v10134_v3 = vadd.f32 %v10133_v17, %v10102_v33  ;;  %v10120_v6 = vadd.f32 %v10119_v50, %v10103_v41 }
 0x908   : > { %v10135_v25 = vadd.f32 %v10134_v3, %v10104_v61  ;;  %v10121_v7 = vadd.f32 %v10120_v6, %v10105_v42 }
 0x90a   : > { %v10136_v4 = vadd.f32 %v10135_v25, %v10106_v53  ;;  %v10141_v16 = vadd.f32 %v10139_v54, %v10121_v7 }
 0x90c   : > { %v10142_v30 = vadd.f32 %v10140_v57, %v10136_v4  ;;  %10143 = vst [vmem:[%s10138_s5] sm:$0xff] %v10141_v16 }
 0x90e   : > { %v10145_v47 = vmax.f32 %v10141_v16, %v10142_v30  ;;  %10144 = vst [vmem:[%s10138_s5 + $0x8] sm:$0xff] %v10142_v30 }
 0x910   : > { %v10146_v14 = vrot.slane %v10145_v47, 4 }
 0x912   : > { %v10147_v1 = vmax.f32 %v10145_v47, %v10146_v14 }
 0x914   : > { %v10148_v9 = vrot.slane %v10147_v1, 2 }
 0x916   : > { %v10149_v0 = vmax.f32 %v10147_v1, %v10148_v9 }
 0x918   : > { %v10150_v19 = vrot.slane %v10149_v0, 1 }
 0x91a   : > { %v10151_v18 = vmax.f32 %v10149_v0, %v10150_v19 }
 0x91c   : > { %v10152_v26 = vsub.f32 %v10141_v16, %v10151_v18  ;;  %v10153_v33 = vsub.f32 %v10142_v30, %v10151_v18 }
 0x91e   : > { %v10154_v41 = vmul.f32 1.442695, %v10152_v26  ;;  %v10156_v61 = vmul.f32 1.442695, %v10153_v33  ;;  %v19912_v33 = vld [vmem:[#allocation52_spill] sm:$0xff] }
 0x920   : > { %12529 = vpow2.f32 %v10154_v41 }
 0x921   : > { %12531 = vpow2.f32 %v10156_v61 }
 0x926   : > { %v12530_v39 = vpop.eup %12529 }
 0x927   : > { %v12532_v42 = vpop.eup %12531 }
 0x928   : > { %v10158_v25 = vadd.f32 %v12532_v42, %v12530_v39 }
 0x92a   : > { %v10159_v54 = vrot.slane %v10158_v25, 4 }
 0x92c   : > { %v10160_v4 = vadd.f32 %v10159_v54, %v10158_v25 }
 0x92e   : > { %v10161_v57 = vrot.slane %v10160_v4, 2 }
 0x930   : > { %v10162_v7 = vadd.f32 %v10161_v57, %v10160_v4 }
 0x932   : > { %v10163_v17 = vrot.slane %v10162_v7, 1 }
 0x934   : > { %v10164_v53 = vadd.f32 %v10163_v17, %v10162_v7  ;;  %v19920_v17 = vld [vmem:[#allocation48_spill] sm:$0xff] }
 0x936   : > { %12533 = vrcp.f32 %v10164_v53 }
 0x93c   : > { %v12534_v50 = vpop.eup %12533 }
 0x93d   : > { %v10166_v3 = vmul.f32 %v12534_v50, %v12530_v39  ;;  %v10167_v6 = vmul.f32 %v12534_v50, %v12532_v42  ;;  %v19914_v39 = vld [vmem:[#allocation51_spill] sm:$0xff] }
 0x93f   : > { %v10168_v19 = vmul.f32 %v10166_v3, %v18448_v15  ;;  %v10169_v0 = vmul.f32 %v10167_v6, %v18451_v5  ;;  %v10170_v18 = vmul.f32 %v10166_v3, %v18454_v51  ;;  %v10171_v16 = vmul.f32 %v10167_v6, %v18457_v36 }
 0x940   : > { %v10172_v30 = vmul.f32 %v10166_v3, %v18460_v60  ;;  %v10173_v47 = vmul.f32 %v10167_v6, %v18463_v63  ;;  %v10174_v14 = vmul.f32 %v10166_v3, %v18474_v58  ;;  %v10175_v1 = vmul.f32 %v10167_v6, %v18477_v37 }
 0x941   : > { %v10176_v9 = vmul.f32 %v10166_v3, %v18484_v10  ;;  %v10177_v26 = vmul.f32 %v10167_v6, %v18487_v27  ;;  %v10178_v15 = vmul.f32 %v10166_v3, %v18494_v56  ;;  %v10179_v5 = vmul.f32 %v10167_v6, %v18497_v35 }
 0x942   : > { %v10180_v51 = vmul.f32 %v10166_v3, %v18504_v40  ;;  %v10181_v36 = vmul.f32 %v10167_v6, %v18507_v62  ;;  %v10182_v60 = vmul.f32 %v10166_v3, %v18514_v31  ;;  %v10183_v63 = vmul.f32 %v10167_v6, %v18517_v45 }
 0x943   : > { %v10184_v58 = vmul.f32 %v10166_v3, %v18524_v2  ;;  %v10185_v37 = vmul.f32 %v10167_v6, %v18527_v48  ;;  %v10186_v10 = vmul.f32 %v10166_v3, %v18534_v22  ;;  %v10187_v27 = vmul.f32 %v10167_v6, %v18537_v38 }
 0x944   : > { %v10188_v56 = vmul.f32 %v10166_v3, %v18544_v29  ;;  %v10189_v35 = vmul.f32 %v10167_v6, %v18547_v59  ;;  %v10190_v40 = vmul.f32 %v10166_v3, %v18554_v23  ;;  %v10191_v62 = vmul.f32 %v10167_v6, %v18557_v52 }
 0x945   : > { %v10192_v31 = vmul.f32 %v10166_v3, %v18564_v32  ;;  %v10193_v45 = vmul.f32 %v10167_v6, %v18567_v28  ;;  %v10194_v2 = vmul.f32 %v10166_v3, %v18574_v34  ;;  %v10195_v48 = vmul.f32 %v10167_v6, %v18577_v8  ;;  %v19896_v8 = vld [vmem:[#allocation60_spill] sm:$0xff] }
 0x946   : > { %v10196_v22 = vmul.f32 %v10166_v3, %v18584_v46  ;;  %v10197_v38 = vmul.f32 %v10167_v6, %v18587_v21  ;;  %v10198_v29 = vmul.f32 %v10166_v3, %v18594_v43  ;;  %v10199_v59 = vmul.f32 %v10167_v6, %v18597_v11  ;;  %v19898_v21 = vld [vmem:[#allocation59_spill] sm:$0xff] }
 0x947   : > { %v18641_v44 = vadd.f32 %v12947_v44, %v10168_v19   ;;  %v18644_v55 = vadd.f32 %v12943_v55, %v10169_v0   ;;  %v18647_v49 = vadd.f32 %v12939_v49, %v10170_v18   ;;  %v18650_v24 = vadd.f32 %v12935_v24, %v10171_v16  }
 0x948   : > { %v18653_v20 = vadd.f32 %v12931_v20, %v10172_v30   ;;  %v18656_v13 = vadd.f32 %v12927_v13, %v10173_v47   ;;  %v18659_v12 = vadd.f32 %v12923_v12, %v10174_v14   ;;  %v18662_v30 = vadd.f32 %v19896_v8, %v10175_v1  }
 0x949   : > { %19889 = vst [vmem:[#allocation61_spill] sm:$0xff] %v18641_v44  ;;  %v18665_v16 = vadd.f32 %v19898_v21, %v10176_v9   ;;  %v19908_v44 = vld [vmem:[#allocation54_spill] sm:$0xff]  ;;  %v18686_v61 = vadd.f32 %v19912_v33, %v10183_v63   ;;  %v18689_v6 = vadd.f32 %v19914_v39, %v10184_v58  }
 0x94a   : > { %19890 = vst [vmem:[#allocation62_spill] sm:$0xff] %v18644_v55  ;;  %v19897_v43 = vmov %v18662_v30  ;;  %v19900_v55 = vld [vmem:[#allocation58_spill] sm:$0xff]  ;;  %v18680_v9 = vadd.f32 %v19908_v44, %v10181_v36  }
 0x94b   : > { %19891 = vst [vmem:[#allocation63_spill] sm:$0xff] %v18647_v49  ;;  %v19899_v41 = vmov %v18665_v16  ;;  %v18668_v7 = vadd.f32 %v19900_v55, %v10177_v26   ;;  %v19902_v49 = vld [vmem:[#allocation57_spill] sm:$0xff]  ;;  %v19913_v19 = vmov %v18686_v61  ;;  %v19915_v0 = vmov %v18689_v6  ;;  %v19922_v16 = vld [vmem:[#allocation47_spill] sm:$0xff]  ;;  %v19924_v30 = vld [vmem:[#allocation46_spill] sm:$0xff] }
 0x94c   : > { %19892 = vst [vmem:[#allocation64_spill] sm:$0xff] %v18650_v24  ;;  %v18671_v57 = vadd.f32 %v19902_v49, %v10178_v15   ;;  %v19904_v24 = vld [vmem:[#allocation56_spill] sm:$0xff]  ;;  %v19909_v53 = vmov %v18680_v9  ;;  %v18698_v61 = vadd.f32 %v19920_v17, %v10187_v27   ;;  %v18704_v58 = vadd.f32 %v19924_v30, %v10189_v35   ;;  %v19930_v6 = vld [vmem:[#allocation43_spill] sm:$0xff]  ;;  %v19934_v15 = vld [vmem:[#allocation41_spill] sm:$0xff] }
 0x94d   : > { %19893 = vst [vmem:[#allocation65_spill] sm:$0xff] %v18653_v20  ;;  %v19901_v42 = vmov %v18668_v7  ;;  %v18674_v21 = vadd.f32 %v19904_v24, %v10179_v5   ;;  %v19906_v20 = vld [vmem:[#allocation55_spill] sm:$0xff]  ;;  %v19916_v7 = vld [vmem:[#allocation50_spill] sm:$0xff]  ;;  %v19928_v9 = vld [vmem:[#allocation44_spill] sm:$0xff]  ;;  %v18713_v33 = vadd.f32 %v19930_v6, %v10192_v31   ;;  %v18719_v63 = vadd.f32 %v19934_v15, %v10194_v2  }
 0x94e   : > { %19894 = vst [vmem:[#allocation66_spill] sm:$0xff] %v18656_v13  ;;  %v19903_v25 = vmov %v18671_v57  ;;  %v18677_v13 = vadd.f32 %v19906_v20, %v10180_v51   ;;  %v18692_v3 = vadd.f32 %v19916_v7, %v10185_v37   ;;  %v19918_v57 = vld [vmem:[#allocation49_spill] sm:$0xff]  ;;  %v19921_v1 = vmov %v18698_v61  ;;  %v19936_v5 = vld [vmem:[#allocation40_spill] sm:$0xff]  ;;  %v19939_v51 = vld [vmem:[#allocation39_spill] sm:$0xff] }
 0x94f   : > { %19895 = vst [vmem:[#allocation67_spill] sm:$0xff] %v18659_v12  ;;  %v19905_v54 = vmov %v18674_v21  ;;  %v19910_v12 = vld [vmem:[#allocation53_spill] sm:$0xff]  ;;  %v18695_v10 = vadd.f32 %v19918_v57, %v10186_v10   ;;  %v18701_v37 = vadd.f32 %v19922_v16, %v10188_v56   ;;  %v19925_v23 = vmov %v18704_v58  ;;  %v19942_v58 = vld [vmem:[#allocation38_spill] sm:$0xff] }
 0x950   : > { %v19907_v4 = vmov %v18677_v13  ;;  %v18683_v14 = vadd.f32 %v19910_v12, %v10182_v60   ;;  %v19917_v18 = vmov %v18692_v3  ;;  %v18710_v39 = vadd.f32 %v19928_v9, %v10191_v62   ;;  %v19932_v3 = vld [vmem:[#allocation42_spill] sm:$0xff]  ;;  %v19985_v44 = vld [vmem:[#allocation61_spill] sm:$0xff] }
 0x951   : > { %v19919_v47 = vmov %v18695_v10  ;;  %v19923_v8 = vmov %v18701_v37  ;;  %v19931_v34 = vmov %v18713_v33  ;;  %v18716_v26 = vadd.f32 %v19932_v3, %v10193_v45   ;;  %v19945_v37 = vld [vmem:[#allocation37_spill] sm:$0xff]  ;;  %v19948_v10 = vld [vmem:[#allocation36_spill] sm:$0xff] }
 0x952   : > { %v19911_v50 = vmov %v18683_v14  ;;  %v19926_v14 = vld [vmem:[#allocation45_spill] sm:$0xff]  ;;  %v19929_v52 = vmov %v18710_v39  ;;  %v19935_v27 = vmov %v18719_v63  ;;  %v18722_v60 = vadd.f32 %v19936_v5, %v10195_v48   ;;  %v19983_v49 = vld [vmem:[#allocation63_spill] sm:$0xff]  ;;  %v19987_v45 = vld [vmem:[#allocation61_spill] sm:$0xff] (%p18739_p0) }
 0x953   : > { %v18707_v17 = vadd.f32 %v19926_v14, %v10190_v40   ;;  %v19933_v46 = vmov %v18716_v26  ;;  %v18725_v36 = vadd.f32 %v19939_v51, %v10196_v22   ;;  %v18728_v51 = vadd.f32 %v19942_v58, %v10197_v38   ;;  %v19982_v24 = vld [vmem:[#allocation64_spill] sm:$0xff]  ;;  %v19984_v55 = vld [vmem:[#allocation62_spill] sm:$0xff]  ;;  %v19989_v38 = vld [vmem:[#allocation63_spill] sm:$0xff] (%p18739_p0) }
 0x954   : > { %19937 = vst [vmem:[#allocation68_spill] sm:$0xff] %v18722_v60  ;;  %v19938_v28 = vmov %v18722_v60  ;;  %v18731_v5 = vadd.f32 %v19945_v37, %v10198_v29   ;;  %v18734_v15 = vadd.f32 %v19948_v10, %v10199_v59   ;;  %v19959_v63 = vmov %v19935_v27  ;;  %v19981_v20 = vld [vmem:[#allocation65_spill] sm:$0xff]  ;;  %v19988_v48 = vld [vmem:[#allocation62_spill] sm:$0xff] (%p18739_p0)  ;;  %v19990_v59 = vld [vmem:[#allocation64_spill] sm:$0xff] (%p18739_p0) }
 0x955   : > { %v19927_v32 = vmov %v18707_v17  ;;  %19940 = vst [vmem:[#allocation69_spill] sm:$0xff] %v18725_v36  ;;  %v19941_v35 = vmov %v18725_v36  ;;  %v19944_v11 = vmov %v18728_v51  ;;  %v19958_v60 = vmov %v19938_v28  ;;  %v19980_v13 = vld [vmem:[#allocation66_spill] sm:$0xff] }
 0x956   : > { %19943 = vst [vmem:[#allocation70_spill] sm:$0xff] %v18728_v51  ;;  %v19952_v31 = vmov %v18734_v15  ;;  %v19954_v62 = vmov %v18731_v5  ;;  %v19956_v51 = vmov %v19944_v11  ;;  %v19957_v36 = vmov %v19941_v35  ;;  %v19979_v12 = vld [vmem:[#allocation67_spill] sm:$0xff]  ;;  %v19992_v11 = vld [vmem:[#allocation66_spill] sm:$0xff] (%p18739_p0) }
 0x957   : > { %19946 = vst [vmem:[#allocation71_spill] sm:$0xff] %v18731_v5  ;;  %v19955_v5 = vmov %v19954_v62  ;;  %v19960_v26 = vmov %v19933_v46  ;;  %v19961_v33 = vmov %v19931_v34  ;;  %v19962_v39 = vmov %v19929_v52  ;;  %v19991_v62 = vld [vmem:[#allocation65_spill] sm:$0xff] (%p18739_p0)  ;;  %v19993_v28 = vld [vmem:[#allocation67_spill] sm:$0xff] (%p18739_p0) }
 0x958   : > { %19949 = vst [vmem:[#allocation72_spill] sm:$0xff] %v18734_v15  ;;  %v19953_v15 = vmov %v19952_v31  ;;  %v19963_v17 = vmov %v19927_v32  ;;  %v19964_v58 = vmov %v19925_v23  ;;  %v19965_v37 = vmov %v19923_v8  ;;  %10007 = sbr.rel (!%p18739_p0) target bundleno = 2270 (0x8de), region = 46 }
 0x959   : > { %v19966_v61 = vmov %v19921_v1  ;;  %v19967_v10 = vmov %v19919_v47  ;;  %v19968_v3 = vmov %v19917_v18  ;;  %v19969_v6 = vmov %v19915_v0 }
 0x95a   : > { %v19970_v56 = vmov %v19913_v19  ;;  %v19971_v14 = vmov %v19911_v50  ;;  %v19972_v9 = vmov %v19909_v53  ;;  %v19973_v40 = vmov %v19907_v4 }
 0x95b   : > { %v19974_v21 = vmov %v19905_v54  ;;  %v19975_v57 = vmov %v19903_v25  ;;  %v19976_v7 = vmov %v19901_v42  ;;  %v19977_v16 = vmov %v19899_v41 }
 0x95c   : > { %v19978_v30 = vmov %v19897_v43  ;;  %v10232_v2 = vmul.f32 (%p18739_p0), %v19987_v45, %v19987_v45  ;;  %v10233_v22 = vmul.f32 (%p18739_p0), %v19988_v48, %v19988_v48  ;;  %v10234_v29 = vmul.f32 (%p18739_p0), %v19989_v38, %v19989_v38 }
 0x95d   :  { %v10235_v31 = vmul.f32 %v19990_v59, %v19990_v59  ;;  %v10236_v44 = vmul.f32 %v19991_v62, %v19991_v62  ;;  %v10237_v35 = vmul.f32 %v19992_v11, %v19992_v11  ;;  %v10238_v26 = vmul.f32 %v19993_v28, %v19993_v28 }
 0x95e   :  { %v10239_v36 = vmul.f32 %v19897_v43, %v19897_v43  ;;  %v10264_v60 = vadd.f32 %v10234_v29, %v10232_v2  ;;  %v10240_v56 = vmul.f32 %v19899_v41, %v19899_v41  ;;  %v10241_v40 = vmul.f32 %v19901_v42, %v19901_v42 }
 0x95f   :  { %v10279_v63 = vadd.f32 %v10235_v31, %v10233_v22  ;;  %v10242_v49 = vmul.f32 %v19903_v25, %v19903_v25  ;;  %v10243_v24 = vmul.f32 %v19905_v54, %v19905_v54  ;;  %v10244_v12 = vmul.f32 %v19907_v4, %v19907_v4 }
 0x960   :  { %v10265_v21 = vadd.f32 %v10264_v60, %v10236_v44  ;;  %v10245_v33 = vmul.f32 %v19909_v53, %v19909_v53  ;;  %v10246_v7 = vmul.f32 %v19911_v50, %v19911_v50  ;;  %v10247_v57 = vmul.f32 %v19913_v19, %v19913_v19 }
 0x961   :  { %v10280_v55 = vadd.f32 %v10279_v63, %v10237_v35  ;;  %v10248_v30 = vmul.f32 %v19915_v0, %v19915_v0  ;;  %v10249_v14 = vmul.f32 %v19917_v18, %v19917_v18  ;;  %v10250_v3 = vmul.f32 %v19919_v47, %v19919_v47 }
 0x962   :  { %v10266_v20 = vadd.f32 %v10265_v21, %v10238_v26  ;;  %v10251_v15 = vmul.f32 %v19921_v1, %v19921_v1  ;;  %v10252_v35 = vmul.f32 %v19923_v8, %v19923_v8  ;;  %v10253_v58 = vmul.f32 %v19925_v23, %v19925_v23 }
 0x963   :  { %v10281_v13 = vadd.f32 %v10280_v55, %v10239_v36  ;;  %v10254_v31 = vmul.f32 %v19927_v32, %v19927_v32  ;;  %v10255_v2 = vmul.f32 %v19929_v52, %v19929_v52  ;;  %v10256_v44 = vmul.f32 %v19931_v34, %v19931_v34 }
 0x964   :  { %v10267_v61 = vadd.f32 %v10266_v20, %v10240_v56  ;;  %v10257_v26 = vmul.f32 %v19933_v46, %v19933_v46  ;;  %v10258_v63 = vmul.f32 %v19935_v27, %v19935_v27  ;;  %v19994_v56 = vld [vmem:[#allocation68_spill] sm:$0xff]  ;;  %v19996_v20 = vld [vmem:[#allocation70_spill] sm:$0xff] }
 0x965   :  { %v10282_v39 = vadd.f32 %v10281_v13, %v10241_v40  ;;  %v10259_v40 = vmul.f32 %v19994_v56, %v19994_v56  ;;  %v10261_v13 = vmul.f32 %v19996_v20, %v19996_v20 }
 0x966   :  { %v10268_v17 = vadd.f32 %v10267_v61, %v10242_v49  ;;  %v19995_v49 = vld [vmem:[#allocation69_spill] sm:$0xff]  ;;  %v19997_v61 = vld [vmem:[#allocation71_spill] sm:$0xff] }
 0x967   :  { %v10283_v16 = vadd.f32 %v10282_v39, %v10243_v24  ;;  %v10260_v24 = vmul.f32 %v19995_v49, %v19995_v49  ;;  %v10262_v39 = vmul.f32 %v19997_v61, %v19997_v61 }
 0x968   :  { %v10269_v9 = vadd.f32 %v10268_v17, %v10244_v12 }
 0x969   :  { %v10284_v6 = vadd.f32 %v10283_v16, %v10245_v33 }
 0x96a   :  { %v10270_v5 = vadd.f32 %v10269_v9, %v10246_v7  ;;  %v19998_v7 = vld [vmem:[#allocation72_spill] sm:$0xff] }
 0x96b   :  { %v10285_v51 = vadd.f32 %v10284_v6, %v10247_v57  ;;  %v10263_v57 = vmul.f32 %v19998_v7, %v19998_v7 }
 0x96c   :  { %v10271_v37 = vadd.f32 %v10270_v5, %v10248_v30 }
 0x96d   :  { %v10286_v10 = vadd.f32 %v10285_v51, %v10249_v14 }
 0x96e   :  { %v10272_v22 = vadd.f32 %v10271_v37, %v10250_v3 }
 0x96f   :  { %v10287_v29 = vadd.f32 %v10286_v10, %v10251_v15 }
 0x970   :  { %v10273_v36 = vadd.f32 %v10272_v22, %v10252_v35 }
 0x971   :  { %v10288_v60 = vadd.f32 %v10287_v29, %v10253_v58 }
 0x972   :  { %v10274_v21 = vadd.f32 %v10273_v36, %v10254_v31 }
 0x973   :  { %v10289_v55 = vadd.f32 %v10288_v60, %v10255_v2 }
 0x974   :  { %v10275_v12 = vadd.f32 %v10274_v21, %v10256_v44 }
 0x975   :  { %v10290_v33 = vadd.f32 %v10289_v55, %v10257_v26 }
 0x976   :  { %v10276_v17 = vadd.f32 %v10275_v12, %v10258_v63 }
 0x977   :  { %v10291_v16 = vadd.f32 %v10290_v33, %v10259_v40 }
 0x978   :  { %v10277_v30 = vadd.f32 %v10276_v17, %v10260_v24 }
 0x979   :  { %v10292_v14 = vadd.f32 %v10291_v16, %v10261_v13 }
 0x97a   :  { %v10278_v9 = vadd.f32 %v10277_v30, %v10262_v39 }
 0x97b   :  { %v10293_v6 = vadd.f32 %v10292_v14, %v10263_v57 }
 0x97c   :  { %12535 = vrsqrt.f32 %v10278_v9  ;;  %vm10303_vm6 = vcmp.eq.f32.partialorder %v10278_v9, inf  ;;  %v10306_v29 = vand.u32 2147483648, %v10278_v9  ;;  %vm10305_vm7 = vcmp.eq.f32.partialorder %v10278_v9, 0.0 }
 0x97d   :  { %12537 = vrsqrt.f32 %v10293_v6  ;;  %vm10315_vm8 = vcmp.eq.f32.partialorder %v10293_v6, inf  ;;  %v10318_v36 = vand.u32 2147483648, %v10293_v6  ;;  %vm10317_vm9 = vcmp.eq.f32.partialorder %v10293_v6, 0.0 }
 0x97e   :  { %v10294_v63 = vadd.f32 1.0, %v10278_v9  ;;  %v10295_v21 = vadd.f32 1.0, %v10293_v6 }
 0x982   :  { %v12536_v3 = vpop.eup %12535 }
 0x983   :  { %v12538_v15 = vpop.eup %12537  ;;  %v10297_v5 = vmul.f32 %v12536_v3, %v10278_v9 }
 0x984   :  { %v10309_v51 = vmul.f32 %v12538_v15, %v10293_v6 }
 0x985   :  { %v10298_v35 = vmul.f32 %v12536_v3, %v10297_v5 }
 0x986   :  { %v10310_v58 = vmul.f32 %v12538_v15, %v10309_v51 }
 0x987   :  { %v10299_v37 = vmul.f32 0.5, %v10298_v35 }
 0x988   :  { %v10311_v10 = vmul.f32 0.5, %v10310_v58 }
 0x989   :  { %v10300_v31 = vsub.f32 1.5, %v10299_v37  ;;  %v19013_v37 = vmov 0.0  }
 0x98a   :  { %v10312_v2 = vsub.f32 1.5, %v10311_v10  ;;  %v19019_v10 = vmov 0.0  }
 0x98b   :  { %v10301_v22 = vmul.f32 %v12536_v3, %v10300_v31  ;;  %v19025_v31 = vmov 0.0  }
 0x98c   :  { %v10313_v44 = vmul.f32 %v12538_v15, %v10312_v2  ;;  %v19027_v2 = vmov 0.0  }
 0x98d   :  { %v10302_v26 = vmul.f32 %v10301_v22, %v10278_v9  ;;  %v19029_v22 = vmov 0.0  }
 0x98e   :  { %v10314_v60 = vmul.f32 %v10313_v44, %v10293_v6  ;;  %v19033_v44 = vmov 0.0  }
 0x98f   :  { %v10304_v40 = vsel %vm10303_vm6, %v10278_v9, %v10302_v26  ;;  %v19035_v26 = vmov 0.0  }
 0x990   :  { %v10307_v55 = vsel %vm10305_vm7, %v10306_v29, %v10304_v40  ;;  %v10316_v24 = vsel %vm10315_vm8, %v10293_v6, %v10314_v60  ;;  %v19031_v29 = vmov 0.0   ;;  %v19039_v60 = vmov 0.0  }
 0x991   :  { %v10319_v13 = vsel %vm10317_vm9, %v10318_v36, %v10316_v24  ;;  %v10320_v12 = vadd.f32 1e-08, %v10307_v55  ;;  %v19037_v36 = vmov 0.0   ;;  %v19043_v40 = vmov 0.0  }
 0x992   :  { %v10321_v33 = vadd.f32 1e-08, %v10319_v13  ;;  %v19047_v55 = vmov 0.0   ;;  %v19049_v24 = vmov 0.0   ;;  %v19051_v13 = vmov 0.0  }
 0x993   :  { %v10322_v39 = vmul.f32 %v10320_v12, %v10294_v63  ;;  %v19041_v63 = vmov 0.0   ;;  %v19053_v12 = vmov 0.0  }
 0x994   :  { %v10323_v57 = vmul.f32 %v10321_v33, %v10295_v21  ;;  %v19045_v21 = vmov 0.0   ;;  %v19055_v33 = vmov 0.0  }
 0x995   :  { %12539 = vrcp.f32 %v10322_v39  ;;  %v19057_v39 = vmov 0.0  }
 0x996   :  { %12541 = vrcp.f32 %v10323_v57  ;;  %v19059_v57 = vmov 0.0  }
 0x99b   :  { %v12540_v17 = vpop.eup %12539 }
 0x99c   :  { %v12542_v16 = vpop.eup %12541  ;;  %v10326_v30 = vmul.f32 %v12540_v17, %v10278_v9  ;;  %v19061_v17 = vmov 0.0  }
 0x99d   :  { %v10327_v14 = vmul.f32 %v12542_v16, %v10293_v6  ;;  %v19007_v6 = vmov 0.0   ;;  %v19063_v16 = vmov 0.0  }
 0x99e   :  { %v18910_v3 = vmul.f32 %v10326_v30, %v19987_v45  ;;  %v18913_v15 = vmul.f32 %v10326_v30, %v19989_v38  ;;  %v18916_v5 = vmul.f32 %v10326_v30, %v19991_v62  ;;  %v18919_v51 = vmul.f32 %v10326_v30, %v19993_v28 }
 0x99f   :  { %v18922_v35 = vmul.f32 %v10327_v14, %v19988_v48  ;;  %v18925_v58 = vmul.f32 %v10327_v14, %v19990_v59  ;;  %v18928_v9 = vmul.f32 %v10327_v14, %v19992_v11  ;;  %v18931_v45 = vmul.f32 %v10327_v14, %v19897_v43 }
 0x9a0   :  { %19999 = vst [vmem:[#allocation4_spill] sm:$0xff] %v18910_v3  ;;  %v18934_v38 = vmul.f32 %v10326_v30, %v19899_v41  ;;  %v18937_v62 = vmul.f32 %v10327_v14, %v19901_v42  ;;  %v18940_v28 = vmul.f32 %v10326_v30, %v19903_v25  ;;  %v18943_v48 = vmul.f32 %v10327_v14, %v19905_v54 }
 0x9a1   :  { %20000 = vst [vmem:[#allocation5_spill] sm:$0xff] %v18913_v15  ;;  %v18946_v59 = vmul.f32 %v10326_v30, %v19907_v4  ;;  %v18949_v11 = vmul.f32 %v10327_v14, %v19909_v53  ;;  %v18952_v43 = vmul.f32 %v10326_v30, %v19911_v50  ;;  %v18955_v41 = vmul.f32 %v10327_v14, %v19913_v19 }
 0x9a2   :  { %20001 = vst [vmem:[#allocation6_spill] sm:$0xff] %v18916_v5  ;;  %v18958_v42 = vmul.f32 %v10326_v30, %v19915_v0  ;;  %v18961_v25 = vmul.f32 %v10327_v14, %v19917_v18  ;;  %v18964_v54 = vmul.f32 %v10326_v30, %v19919_v47  ;;  %v18967_v4 = vmul.f32 %v10327_v14, %v19921_v1 }
 0x9a3   :  { %20002 = vst [vmem:[#allocation7_spill] sm:$0xff] %v18919_v51  ;;  %v18970_v53 = vmul.f32 %v10326_v30, %v19923_v8  ;;  %v18973_v50 = vmul.f32 %v10327_v14, %v19925_v23  ;;  %v18976_v19 = vmul.f32 %v10326_v30, %v19927_v32  ;;  %v18979_v0 = vmul.f32 %v10327_v14, %v19929_v52 }
 0x9a4   :  { %20003 = vst [vmem:[#allocation8_spill] sm:$0xff] %v18922_v35  ;;  %v18982_v18 = vmul.f32 %v10326_v30, %v19931_v34  ;;  %v18985_v47 = vmul.f32 %v10327_v14, %v19933_v46  ;;  %v18988_v1 = vmul.f32 %v10326_v30, %v19935_v27  ;;  %v18991_v8 = vmul.f32 %v10327_v14, %v19994_v56 }
 0x9a5   :  { %20004 = vst [vmem:[#allocation9_spill] sm:$0xff] %v18925_v58  ;;  %v18994_v23 = vmul.f32 %v10326_v30, %v19995_v49  ;;  %v18997_v32 = vmul.f32 %v10327_v14, %v19996_v20  ;;  %v19000_v52 = vmul.f32 %v10326_v30, %v19997_v61  ;;  %v19003_v34 = vmul.f32 %v10327_v14, %v19998_v7 }
 0x9a6   :  { %20005 = vst [vmem:[#allocation10_spill] sm:$0xff] %v18928_v9  ;;  %v19005_v46 = vmov 0.0   ;;  %v19009_v27 = vmov 0.0   ;;  %v19011_v56 = vmov 0.0   ;;  %v19015_v49 = vmov 0.0  }
 0x9a7   :  { %20006 = vst [vmem:[#allocation11_spill] sm:$0xff] %v18931_v45  ;;  %v19017_v20 = vmov 0.0   ;;  %v19021_v61 = vmov 0.0   ;;  %v19023_v7 = vmov 0.0   ;;  %v19065_v30 = vmov 0.0  }
 0x9a8   :  { %20007 = vst [vmem:[#allocation12_spill] sm:$0xff] %v18934_v38  ;;  %v19067_v14 = vmov 0.0  }
 0x9a9   :  { %20008 = vst [vmem:[#allocation13_spill] sm:$0xff] %v18937_v62 }
 0x9aa   :  { %20009 = vst [vmem:[#allocation14_spill] sm:$0xff] %v18940_v28 }
 0x9ab   :  { %20010 = vst [vmem:[#allocation15_spill] sm:$0xff] %v18943_v48 }
 0x9ac   :  { %20011 = vst [vmem:[#allocation16_spill] sm:$0xff] %v18946_v59 }
 0x9ad   :  { %20012 = vst [vmem:[#allocation17_spill] sm:$0xff] %v18949_v11 }
 0x9ae   :  { %20013 = vst [vmem:[#allocation18_spill] sm:$0xff] %v18952_v43 }
 0x9af   :  { %20014 = vst [vmem:[#allocation19_spill] sm:$0xff] %v18955_v41 }
 0x9b0   :  { %20015 = vst [vmem:[#allocation20_spill] sm:$0xff] %v18958_v42 }
 0x9b1   :  { %20016 = vst [vmem:[#allocation21_spill] sm:$0xff] %v18961_v25 }
 0x9b2   :  { %20017 = vst [vmem:[#allocation22_spill] sm:$0xff] %v18964_v54 }
 0x9b3   :  { %20018 = vst [vmem:[#allocation23_spill] sm:$0xff] %v18967_v4 }
 0x9b4   :  { %20019 = vst [vmem:[#allocation24_spill] sm:$0xff] %v18970_v53 }
 0x9b5   :  { %20020 = vst [vmem:[#allocation25_spill] sm:$0xff] %v18973_v50 }
 0x9b6   :  { %20021 = vst [vmem:[#allocation26_spill] sm:$0xff] %v18976_v19 }
 0x9b7   :  { %20022 = vst [vmem:[#allocation27_spill] sm:$0xff] %v18979_v0 }
 0x9b8   :  { %20023 = vst [vmem:[#allocation28_spill] sm:$0xff] %v18982_v18 }
 0x9b9   :  { %20024 = vst [vmem:[#allocation29_spill] sm:$0xff] %v18985_v47 }
 0x9ba   :  { %20025 = vst [vmem:[#allocation30_spill] sm:$0xff] %v18988_v1 }
 0x9bb   :  { %20026 = vst [vmem:[#allocation31_spill] sm:$0xff] %v18991_v8 }
 0x9bc   :  { %20027 = vst [vmem:[#allocation32_spill] sm:$0xff] %v18994_v23 }
 0x9bd   :  { %20028 = vst [vmem:[#allocation33_spill] sm:$0xff] %v18997_v32 }
 0x9be   :  { %20029 = vst [vmem:[#allocation34_spill] sm:$0xff] %v19000_v52 }
 0x9bf   :  { %20030 = vst [vmem:[#allocation35_spill] sm:$0xff] %v19003_v34 }
 0x9c0 LB: > { %20031 = vst [vmem:[#allocation73_spill] sm:$0xff] %v12955_v46  ;;  %s11989_s9 = sshll.u32 %s13083_s8, 8  ;;  %v20056_v3 = vld [vmem:[#allocation4_spill] sm:$0xff]  ;;  %v20058_v15 = vld [vmem:[#allocation5_spill] sm:$0xff]  ;;  %v20060_v5 = vld [vmem:[#allocation6_spill] sm:$0xff]  ;;  %s11990_s11 = sshll.u32 %s13083_s8, 4  ;;  %s13083_s8 = sphi %s19069_s8, %s20186_s8   ;;  %v13079_v14 = vphi %v19067_v14, %v20185_v14   ;;  %v13075_v30 = vphi %v19065_v30, %v20184_v30   ;;  %v13071_v16 = vphi %v19063_v16, %v20183_v16   ;;  %v13067_v17 = vphi %v19061_v17, %v20182_v17   ;;  %v13063_v57 = vphi %v19059_v57, %v20181_v57   ;;  %v13059_v39 = vphi %v19057_v39, %v20180_v39   ;;  %v13055_v33 = vphi %v19055_v33, %v20179_v33   ;;  %v13051_v12 = vphi %v19053_v12, %v20178_v12   ;;  %v13047_v13 = vphi %v19051_v13, %v20177_v13   ;;  %v13043_v24 = vphi %v19049_v24, %v20176_v24   ;;  %v13039_v55 = vphi %v19047_v55, %v20175_v55   ;;  %v13035_v21 = vphi %v19045_v21, %v20174_v21   ;;  %v13031_v40 = vphi %v19043_v40, %v20173_v40   ;;  %v13027_v63 = vphi %v19041_v63, %v20172_v63   ;;  %v13023_v60 = vphi %v19039_v60, %v20171_v60   ;;  %v13019_v36 = vphi %v19037_v36, %v20170_v36   ;;  %v13015_v26 = vphi %v19035_v26, %v20169_v26   ;;  %v13011_v44 = vphi %v19033_v44, %v20168_v44   ;;  %v13007_v29 = vphi %v19031_v29, %v20167_v29   ;;  %v13003_v22 = vphi %v19029_v22, %v20166_v22   ;;  %v12999_v2 = vphi %v19027_v2, %v20165_v2   ;;  %v12995_v31 = vphi %v19025_v31, %v20164_v31   ;;  %v12991_v7 = vphi %v19023_v7, %v20163_v7   ;;  %v12987_v61 = vphi %v19021_v61, %v20162_v61   ;;  %v12983_v10 = vphi %v19019_v10, %v20161_v10   ;;  %v12979_v20 = vphi %v19017_v20, %v20160_v20   ;;  %v12975_v49 = vphi %v19015_v49, %v20158_v49   ;;  %v12971_v37 = vphi %v19013_v37, %v20157_v37   ;;  %v12967_v56 = vphi %v19011_v56, %v20155_v56   ;;  %v12963_v27 = vphi %v19009_v27, %v20154_v27   ;;  %v12959_v6 = vphi %v19007_v6, %v20153_v6   ;;  %v12955_v46 = vphi %v19005_v46, %v20151_v46  }
 0x9c1   : > { %20032 = vst [vmem:[#allocation74_spill] sm:$0xff] %v12959_v6  ;;  %s19171_s10 = scalar_lea.vmem [#allocation2], %s11989_s9  ;;  %v20057_v35 = vld [vmem:[#allocation8_spill] sm:$0xff]  ;;  %v20059_v58 = vld [vmem:[#allocation9_spill] sm:$0xff]  ;;  %v20061_v9 = vld [vmem:[#allocation10_spill] sm:$0xff]  ;;  %s10495_s12 = scalar_lea.vmem [#allocation3], %s11990_s11 }
 0x9c2   : > { %20033 = vst [vmem:[#allocation75_spill] sm:$0xff] %v12963_v27  ;;  %v19174_v46 = vld [vmem:[%s19171_s10] sm:$0xff]  ;;  %v19177_v6 = vld [vmem:[%s19171_s10 + $0x8] sm:$0xff]  ;;  %v19180_v27 = vld [vmem:[%s19171_s10 + $0x10] sm:$0xff]  ;;  %s10365_s13 = sadd.s32 1, %s13083_s8  }
 0x9c3   : > { %20034 = vst [vmem:[#allocation76_spill] sm:$0xff] %v12967_v56  ;;  %v19183_v56 = vld [vmem:[%s19171_s10 + $0x18] sm:$0xff]  ;;  %v20064_v38 = vld [vmem:[#allocation12_spill] sm:$0xff]  ;;  %v20065_v62 = vld [vmem:[#allocation13_spill] sm:$0xff]  ;;  %p19465_p1 = scmp.ge.s32.totalorder %s10365_s13, 32   ;;  %s20186_s8 = smov %s10365_s13 }
 0x9c4   : > { %20035 = vst [vmem:[#allocation77_spill] sm:$0xff] %v12971_v37  ;;  %v19186_v37 = vld [vmem:[%s19171_s10 + $0x20] sm:$0xff]  ;;  %v20062_v51 = vld [vmem:[#allocation7_spill] sm:$0xff]  ;;  %v20066_v28 = vld [vmem:[#allocation14_spill] sm:$0xff] }
 0x9c5   : > { %20036 = vst [vmem:[#allocation78_spill] sm:$0xff] %v12975_v49  ;;  %v19189_v49 = vld [vmem:[%s19171_s10 + $0x28] sm:$0xff]  ;;  %v20063_v45 = vld [vmem:[#allocation11_spill] sm:$0xff]  ;;  %v20068_v59 = vld [vmem:[#allocation16_spill] sm:$0xff] }
 0x9c6   : > { %20037 = vst [vmem:[#allocation79_spill] sm:$0xff] %v12979_v20  ;;  %v10432_v20 = vmul.f32 %v19174_v46, %v20056_v3  ;;  %v10437_v3 = vmul.f32 %v19189_v49, %v20061_v9  ;;  %v20067_v48 = vld [vmem:[#allocation15_spill] sm:$0xff]  ;;  %v20069_v11 = vld [vmem:[#allocation17_spill] sm:$0xff]  ;;  %v20070_v43 = vld [vmem:[#allocation18_spill] sm:$0xff] }
 0x9c7   : > { %20038 = vst [vmem:[#allocation80_spill] sm:$0xff] %v12983_v10  ;;  %v10433_v10 = vmul.f32 %v19177_v6, %v20057_v35  ;;  %v19213_v35 = vld [vmem:[%s19171_s10 + $0x48] sm:$0xff]  ;;  %v20071_v41 = vld [vmem:[#allocation19_spill] sm:$0xff]  ;;  %v20072_v42 = vld [vmem:[#allocation20_spill] sm:$0xff] }
 0x9c8   : > { %20039 = vst [vmem:[#allocation81_spill] sm:$0xff] %v12987_v61  ;;  %v10434_v61 = vmul.f32 %v19180_v27, %v20058_v15  ;;  %v20073_v25 = vld [vmem:[#allocation21_spill] sm:$0xff]  ;;  %v20074_v54 = vld [vmem:[#allocation22_spill] sm:$0xff]  ;;  %v20075_v4 = vld [vmem:[#allocation23_spill] sm:$0xff] }
 0x9c9   : > { %20040 = vst [vmem:[#allocation82_spill] sm:$0xff] %v12991_v7  ;;  %v10435_v7 = vmul.f32 %v19183_v56, %v20059_v58  ;;  %v20076_v53 = vld [vmem:[#allocation24_spill] sm:$0xff]  ;;  %v20077_v50 = vld [vmem:[#allocation25_spill] sm:$0xff]  ;;  %v20078_v19 = vld [vmem:[#allocation26_spill] sm:$0xff] }
 0x9ca   : > { %20041 = vst [vmem:[#allocation83_spill] sm:$0xff] %v12995_v31  ;;  %v19200_v31 = vld [vmem:[%s19171_s10 + $0x30] sm:$0xff]  ;;  %v20079_v0 = vld [vmem:[#allocation27_spill] sm:$0xff]  ;;  %v20080_v18 = vld [vmem:[#allocation28_spill] sm:$0xff] }
 0x9cb   : > { %20042 = vst [vmem:[#allocation84_spill] sm:$0xff] %v12999_v2  ;;  %v19203_v2 = vld [vmem:[%s19171_s10 + $0x38] sm:$0xff]  ;;  %v10438_v15 = vmul.f32 %v19200_v31, %v20062_v51  ;;  %v20081_v47 = vld [vmem:[#allocation29_spill] sm:$0xff]  ;;  %v20082_v1 = vld [vmem:[#allocation30_spill] sm:$0xff] }
 0x9cc   : > { %20043 = vst [vmem:[#allocation85_spill] sm:$0xff] %v13003_v22  ;;  %v10436_v22 = vmul.f32 %v19186_v37, %v20060_v5  ;;  %v10439_v58 = vmul.f32 %v19203_v2, %v20063_v45  ;;  %v19223_v5 = vld [vmem:[%s19171_s10 + $0x58] sm:$0xff]  ;;  %v19233_v45 = vld [vmem:[%s19171_s10 + $0x68] sm:$0xff]  ;;  %v20084_v23 = vld [vmem:[#allocation32_spill] sm:$0xff] }
 0x9cd   : > { %20044 = vst [vmem:[#allocation86_spill] sm:$0xff] %v13007_v29  ;;  %v19210_v29 = vld [vmem:[%s19171_s10 + $0x40] sm:$0xff]  ;;  %v20083_v8 = vld [vmem:[#allocation31_spill] sm:$0xff]  ;;  %v20085_v32 = vld [vmem:[#allocation33_spill] sm:$0xff] }
 0x9ce   : > { %20045 = vst [vmem:[#allocation87_spill] sm:$0xff] %v13011_v44  ;;  %v10464_v44 = vadd.f32 %v10434_v61, %v10432_v20  ;;  %v10440_v9 = vmul.f32 %v19210_v29, %v20064_v38  ;;  %v19240_v38 = vld [vmem:[%s19171_s10 + $0x70] sm:$0xff]  ;;  %v20087_v34 = vld [vmem:[#allocation35_spill] sm:$0xff] }
 0x9cf   : > { %20046 = vst [vmem:[#allocation88_spill] sm:$0xff] %v13015_v26  ;;  %v10479_v26 = vadd.f32 %v10435_v7, %v10433_v10  ;;  %v10443_v10 = vmul.f32 %v19223_v5, %v20067_v48  ;;  %v19253_v48 = vld [vmem:[%s19171_s10 + $0x88] sm:$0xff]  ;;  %v20086_v52 = vld [vmem:[#allocation34_spill] sm:$0xff] }
 0x9d0   : > { %20047 = vst [vmem:[#allocation89_spill] sm:$0xff] %v13019_v36  ;;  %v19220_v36 = vld [vmem:[%s19171_s10 + $0x50] sm:$0xff]  ;;  %v10465_v51 = vadd.f32 %v10464_v44, %v10436_v22  ;;  %v10445_v22 = vmul.f32 %v19233_v45, %v20069_v11  ;;  %v19263_v11 = vld [vmem:[%s19171_s10 + $0x98] sm:$0xff] }
 0x9d1   : > { %20048 = vst [vmem:[#allocation90_spill] sm:$0xff] %v13023_v60  ;;  %v10441_v60 = vmul.f32 %v19213_v35, %v20065_v62  ;;  %v10442_v20 = vmul.f32 %v19220_v36, %v20066_v28  ;;  %v19243_v62 = vld [vmem:[%s19171_s10 + $0x78] sm:$0xff]  ;;  %v19250_v28 = vld [vmem:[%s19171_s10 + $0x80] sm:$0xff] }
 0x9d2   : > { %20049 = vst [vmem:[#allocation91_spill] sm:$0xff] %v13027_v63  ;;  %v10480_v63 = vadd.f32 %v10479_v26, %v10437_v3  ;;  %v10466_v61 = vadd.f32 %v10465_v51, %v10438_v15  ;;  %v10446_v15 = vmul.f32 %v19240_v38, %v20070_v43  ;;  %v10447_v51 = vmul.f32 %v19243_v62, %v20071_v41  ;;  %v19270_v43 = vld [vmem:[%s19171_s10 + $0xa0] sm:$0xff]  ;;  %v19273_v41 = vld [vmem:[%s19171_s10 + $0xa8] sm:$0xff] }
 0x9d3   : > { %20050 = vst [vmem:[#allocation92_spill] sm:$0xff] %v13031_v40  ;;  %v19230_v40 = vld [vmem:[%s19171_s10 + $0x60] sm:$0xff] }
 0x9d4   : > { %20051 = vst [vmem:[#allocation93_spill] sm:$0xff] %v13035_v21  ;;  %v10481_v7 = vadd.f32 %v10480_v63, %v10439_v58  ;;  %v10444_v3 = vmul.f32 %v19230_v40, %v20068_v59  ;;  %v10467_v44 = vadd.f32 %v10466_v61, %v10440_v9  ;;  %v19260_v59 = vld [vmem:[%s19171_s10 + $0x90] sm:$0xff]  ;;  %v10448_v9 = vmul.f32 %v19250_v28, %v20072_v42  ;;  %v19313_v21 = vld [vmem:[%s19171_s10 + $0xe8] sm:$0xff] }
 0x9d5   : > { %20052 = vst [vmem:[#allocation94_spill] sm:$0xff] %v13039_v55  ;;  %v19280_v42 = vld [vmem:[%s19171_s10 + $0xb0] sm:$0xff]  ;;  %v10497_v55 = vld [vmem:[%s10495_s12 + $0x8] sm:$0xff] }
 0x9d6   : > { %20053 = vst [vmem:[#allocation95_spill] sm:$0xff] %v13043_v24  ;;  %v10482_v26 = vadd.f32 %v10481_v7, %v10441_v60  ;;  %v10468_v58 = vadd.f32 %v10467_v44, %v10442_v20  ;;  %v10449_v60 = vmul.f32 %v19253_v48, %v20073_v25  ;;  %v10450_v20 = vmul.f32 %v19260_v59, %v20074_v54  ;;  %v19283_v25 = vld [vmem:[%s19171_s10 + $0xb8] sm:$0xff]  ;;  %v19290_v54 = vld [vmem:[%s19171_s10 + $0xc0] sm:$0xff] }
 0x9d7   : > { %20054 = vst [vmem:[#allocation96_spill] sm:$0xff] %v13047_v13 }
 0x9d8   : > { %20055 = vst [vmem:[#allocation97_spill] sm:$0xff] %v13051_v12  ;;  %v10483_v63 = vadd.f32 %v10482_v26, %v10443_v10  ;;  %v10469_v61 = vadd.f32 %v10468_v58, %v10444_v3  ;;  %v10451_v10 = vmul.f32 %v19263_v11, %v20075_v4  ;;  %v10452_v3 = vmul.f32 %v19270_v43, %v20076_v53  ;;  %v19293_v4 = vld [vmem:[%s19171_s10 + $0xc8] sm:$0xff]  ;;  %v19300_v53 = vld [vmem:[%s19171_s10 + $0xd0] sm:$0xff] }
 0x9da   : > { %v10484_v7 = vadd.f32 %v10483_v63, %v10445_v22  ;;  %v10470_v44 = vadd.f32 %v10469_v61, %v10446_v15  ;;  %v10453_v22 = vmul.f32 %v19273_v41, %v20077_v50  ;;  %v10454_v15 = vmul.f32 %v19280_v42, %v20078_v19  ;;  %v19303_v50 = vld [vmem:[%s19171_s10 + $0xd8] sm:$0xff]  ;;  %v19310_v19 = vld [vmem:[%s19171_s10 + $0xe0] sm:$0xff] }
 0x9dc   : > { %v10485_v26 = vadd.f32 %v10484_v7, %v10447_v51  ;;  %v10471_v58 = vadd.f32 %v10470_v44, %v10448_v9  ;;  %v10455_v51 = vmul.f32 %v19283_v25, %v20079_v0  ;;  %v10456_v9 = vmul.f32 %v19290_v54, %v20080_v18  ;;  %v19320_v0 = vld [vmem:[%s19171_s10 + $0xf0] sm:$0xff]  ;;  %v19323_v18 = vld [vmem:[%s19171_s10 + $0xf8] sm:$0xff] }
 0x9de   : > { %v10486_v63 = vadd.f32 %v10485_v26, %v10449_v60  ;;  %v10472_v61 = vadd.f32 %v10471_v58, %v10450_v20  ;;  %v10457_v60 = vmul.f32 %v19293_v4, %v20081_v47  ;;  %v10458_v20 = vmul.f32 %v19300_v53, %v20082_v1  ;;  %v10496_v47 = vld [vmem:[%s10495_s12] sm:$0xff] }
 0x9df   : > { %v10462_v1 = vmul.f32 %v19320_v0, %v20086_v52 }
 0x9e0   : > { %v10487_v7 = vadd.f32 %v10486_v63, %v10451_v10  ;;  %v10473_v44 = vadd.f32 %v10472_v61, %v10452_v3  ;;  %v10459_v10 = vmul.f32 %v19303_v50, %v20083_v8  ;;  %v10460_v3 = vmul.f32 %v19310_v19, %v20084_v23 }
 0x9e2   : > { %v10488_v26 = vadd.f32 %v10487_v7, %v10453_v22  ;;  %v10474_v58 = vadd.f32 %v10473_v44, %v10454_v15  ;;  %v10461_v22 = vmul.f32 %v19313_v21, %v20085_v32  ;;  %v10463_v15 = vmul.f32 %v19323_v18, %v20087_v34 }
 0x9e4   : > { %v10489_v63 = vadd.f32 %v10488_v26, %v10455_v51  ;;  %v10475_v61 = vadd.f32 %v10474_v58, %v10456_v9 }
 0x9e6   : > { %v10490_v7 = vadd.f32 %v10489_v63, %v10457_v60  ;;  %v10476_v51 = vadd.f32 %v10475_v61, %v10458_v20 }
 0x9e8   : > { %v10491_v44 = vadd.f32 %v10490_v7, %v10459_v10  ;;  %v10477_v26 = vadd.f32 %v10476_v51, %v10460_v3 }
 0x9ea   : > { %v10492_v8 = vadd.f32 %v10491_v44, %v10461_v22  ;;  %v10478_v24 = vadd.f32 %v10477_v26, %v10462_v1 }
 0x9ec   : > { %v10493_v23 = vadd.f32 %v10492_v8, %v10463_v15  ;;  %v10498_v13 = vadd.f32 %v10496_v47, %v10478_v24 }
 0x9ee   : > { %v10499_v12 = vadd.f32 %v10497_v55, %v10493_v23  ;;  %10500 = vst [vmem:[%s10495_s12] sm:$0xff] %v10498_v13 }
 0x9f0   : > { %v10502_v9 = vmax.f32 %v10498_v13, %v10499_v12  ;;  %10501 = vst [vmem:[%s10495_s12 + $0x8] sm:$0xff] %v10499_v12 }
 0x9f2   : > { %v10503_v60 = vrot.slane %v10502_v9, 4 }
 0x9f4   : > { %v10504_v58 = vmax.f32 %v10502_v9, %v10503_v60 }
 0x9f6   : > { %v10505_v63 = vrot.slane %v10504_v58, 2 }
 0x9f8   : > { %v10506_v32 = vmax.f32 %v10504_v58, %v10505_v63 }
 0x9fa   : > { %v10507_v52 = vrot.slane %v10506_v32, 1 }
 0x9fc   : > { %v10508_v34 = vmax.f32 %v10506_v32, %v10507_v52 }
 0x9fe   : > { %v10509_v20 = vsub.f32 %v10498_v13, %v10508_v34  ;;  %v10510_v10 = vsub.f32 %v10499_v12, %v10508_v34 }
 0xa00   : > { %v10511_v3 = vmul.f32 1.442695, %v10509_v20  ;;  %v10513_v22 = vmul.f32 1.442695, %v10510_v10  ;;  %v20111_v10 = vld [vmem:[#allocation89_spill] sm:$0xff] }
 0xa02   : > { %12543 = vpow2.f32 %v10511_v3 }
 0xa03   : > { %12545 = vpow2.f32 %v10513_v22 }
 0xa08   : > { %v12544_v61 = vpop.eup %12543 }
 0xa09   : > { %v12546_v1 = vpop.eup %12545 }
 0xa0a   : > { %v10515_v8 = vadd.f32 %v12546_v1, %v12544_v61 }
 0xa0c   : > { %v10516_v47 = vrot.slane %v10515_v8, 4 }
 0xa0e   : > { %v10517_v23 = vadd.f32 %v10516_v47, %v10515_v8 }
 0xa10   : > { %v10518_v55 = vrot.slane %v10517_v23, 2 }
 0xa12   : > { %v10519_v24 = vadd.f32 %v10518_v55, %v10517_v23 }
 0xa14   : > { %v10520_v7 = vrot.slane %v10519_v24, 1 }
 0xa16   : > { %v10521_v15 = vadd.f32 %v10520_v7, %v10519_v24  ;;  %v20119_v7 = vld [vmem:[#allocation85_spill] sm:$0xff] }
 0xa18   : > { %12547 = vrcp.f32 %v10521_v15 }
 0xa1e   : > { %v12548_v51 = vpop.eup %12547 }
 0xa1f   : > { %v10523_v44 = vmul.f32 %v12548_v51, %v12544_v61  ;;  %v10524_v26 = vmul.f32 %v12548_v51, %v12546_v1  ;;  %v20113_v61 = vld [vmem:[#allocation88_spill] sm:$0xff] }
 0xa21   : > { %v10525_v32 = vmul.f32 %v10523_v44, %v19174_v46  ;;  %v10526_v52 = vmul.f32 %v10524_v26, %v19177_v6  ;;  %v10527_v34 = vmul.f32 %v10523_v44, %v19180_v27  ;;  %v10528_v13 = vmul.f32 %v10524_v26, %v19183_v56 }
 0xa22   : > { %v10529_v12 = vmul.f32 %v10523_v44, %v19186_v37  ;;  %v10530_v9 = vmul.f32 %v10524_v26, %v19189_v49  ;;  %v10531_v60 = vmul.f32 %v10523_v44, %v19200_v31  ;;  %v10532_v58 = vmul.f32 %v10524_v26, %v19203_v2 }
 0xa23   : > { %v10533_v63 = vmul.f32 %v10523_v44, %v19210_v29  ;;  %v10534_v20 = vmul.f32 %v10524_v26, %v19213_v35  ;;  %v10535_v46 = vmul.f32 %v10523_v44, %v19220_v36  ;;  %v10536_v6 = vmul.f32 %v10524_v26, %v19223_v5 }
 0xa24   : > { %v10537_v27 = vmul.f32 %v10523_v44, %v19230_v40  ;;  %v10538_v56 = vmul.f32 %v10524_v26, %v19233_v45  ;;  %v10539_v37 = vmul.f32 %v10523_v44, %v19240_v38  ;;  %v10540_v49 = vmul.f32 %v10524_v26, %v19243_v62 }
 0xa25   : > { %v10541_v31 = vmul.f32 %v10523_v44, %v19250_v28  ;;  %v10542_v2 = vmul.f32 %v10524_v26, %v19253_v48  ;;  %v10543_v29 = vmul.f32 %v10523_v44, %v19260_v59  ;;  %v10544_v35 = vmul.f32 %v10524_v26, %v19263_v11 }
 0xa26   : > { %v10545_v36 = vmul.f32 %v10523_v44, %v19270_v43  ;;  %v10546_v5 = vmul.f32 %v10524_v26, %v19273_v41  ;;  %v10547_v40 = vmul.f32 %v10523_v44, %v19280_v42  ;;  %v10548_v45 = vmul.f32 %v10524_v26, %v19283_v25 }
 0xa27   : > { %v10549_v38 = vmul.f32 %v10523_v44, %v19290_v54  ;;  %v10550_v62 = vmul.f32 %v10524_v26, %v19293_v4  ;;  %v10551_v28 = vmul.f32 %v10523_v44, %v19300_v53  ;;  %v10552_v48 = vmul.f32 %v10524_v26, %v19303_v50 }
 0xa28   : > { %v10553_v59 = vmul.f32 %v10523_v44, %v19310_v19  ;;  %v10554_v11 = vmul.f32 %v10524_v26, %v19313_v21  ;;  %v10555_v43 = vmul.f32 %v10523_v44, %v19320_v0  ;;  %v10556_v41 = vmul.f32 %v10524_v26, %v19323_v18  ;;  %v20095_v0 = vld [vmem:[#allocation97_spill] sm:$0xff]  ;;  %v20097_v21 = vld [vmem:[#allocation96_spill] sm:$0xff] }
 0xa29   : > { %v19367_v14 = vadd.f32 %v13079_v14, %v10525_v32   ;;  %v19370_v30 = vadd.f32 %v13075_v30, %v10526_v52   ;;  %v19373_v16 = vadd.f32 %v13071_v16, %v10527_v34   ;;  %v19376_v17 = vadd.f32 %v13067_v17, %v10528_v13  }
 0xa2a   : > { %v19379_v57 = vadd.f32 %v13063_v57, %v10529_v12   ;;  %v19382_v39 = vadd.f32 %v13059_v39, %v10530_v9   ;;  %v19385_v33 = vadd.f32 %v13055_v33, %v10531_v60   ;;  %v19388_v12 = vadd.f32 %v20095_v0, %v10532_v58  }
 0xa2b   : > { %20088 = vst [vmem:[#allocation61_spill] sm:$0xff] %v19367_v14  ;;  %v19391_v13 = vadd.f32 %v20097_v21, %v10533_v63   ;;  %v20107_v14 = vld [vmem:[#allocation91_spill] sm:$0xff]  ;;  %v19412_v22 = vadd.f32 %v20111_v10, %v10540_v49   ;;  %v19415_v26 = vadd.f32 %v20113_v61, %v10541_v31  }
 0xa2c   : > { %20089 = vst [vmem:[#allocation62_spill] sm:$0xff] %v19370_v30  ;;  %v20096_v18 = vmov %v19388_v12  ;;  %v20099_v30 = vld [vmem:[#allocation95_spill] sm:$0xff]  ;;  %v19406_v63 = vadd.f32 %v20107_v14, %v10538_v56  }
 0xa2d   : > { %20090 = vst [vmem:[#allocation63_spill] sm:$0xff] %v19373_v16  ;;  %v20098_v3 = vmov %v19391_v13  ;;  %v19394_v24 = vadd.f32 %v20099_v30, %v10534_v20   ;;  %v20101_v16 = vld [vmem:[#allocation94_spill] sm:$0xff]  ;;  %v20112_v32 = vmov %v19412_v22  ;;  %v20114_v52 = vmov %v19415_v26  ;;  %v20121_v13 = vld [vmem:[#allocation84_spill] sm:$0xff]  ;;  %v20123_v12 = vld [vmem:[#allocation83_spill] sm:$0xff] }
 0xa2e   : > { %20091 = vst [vmem:[#allocation64_spill] sm:$0xff] %v19376_v17  ;;  %v19397_v55 = vadd.f32 %v20101_v16, %v10535_v46   ;;  %v20103_v17 = vld [vmem:[#allocation93_spill] sm:$0xff]  ;;  %v20108_v15 = vmov %v19406_v63  ;;  %v19424_v22 = vadd.f32 %v20119_v7, %v10544_v35   ;;  %v19430_v31 = vadd.f32 %v20123_v12, %v10546_v5   ;;  %v20129_v26 = vld [vmem:[#allocation80_spill] sm:$0xff]  ;;  %v20134_v46 = vld [vmem:[#allocation78_spill] sm:$0xff] }
 0xa2f   : > { %20092 = vst [vmem:[#allocation65_spill] sm:$0xff] %v19379_v57  ;;  %v20100_v1 = vmov %v19394_v24  ;;  %v19400_v21 = vadd.f32 %v20103_v17, %v10536_v6   ;;  %v20105_v57 = vld [vmem:[#allocation92_spill] sm:$0xff]  ;;  %v20115_v24 = vld [vmem:[#allocation87_spill] sm:$0xff]  ;;  %v20127_v63 = vld [vmem:[#allocation81_spill] sm:$0xff]  ;;  %v19439_v10 = vadd.f32 %v20129_v26, %v10549_v38   ;;  %v19445_v49 = vadd.f32 %v20134_v46, %v10551_v28  }
 0xa30   : > { %20093 = vst [vmem:[#allocation66_spill] sm:$0xff] %v19382_v39  ;;  %v20102_v8 = vmov %v19397_v55  ;;  %v19403_v39 = vadd.f32 %v20105_v57, %v10537_v27   ;;  %v19418_v44 = vadd.f32 %v20115_v24, %v10542_v2   ;;  %v20117_v55 = vld [vmem:[#allocation86_spill] sm:$0xff]  ;;  %v20120_v58 = vmov %v19424_v22  ;;  %v20136_v6 = vld [vmem:[#allocation77_spill] sm:$0xff]  ;;  %v20139_v27 = vld [vmem:[#allocation76_spill] sm:$0xff] }
 0xa31   : > { %20094 = vst [vmem:[#allocation67_spill] sm:$0xff] %v19385_v33  ;;  %v20104_v47 = vmov %v19400_v21  ;;  %v20109_v33 = vld [vmem:[#allocation90_spill] sm:$0xff]  ;;  %v19421_v29 = vadd.f32 %v20117_v55, %v10543_v29   ;;  %v19427_v2 = vadd.f32 %v20121_v13, %v10545_v36   ;;  %v20124_v42 = vmov %v19430_v31  ;;  %v20141_v31 = vld [vmem:[#allocation75_spill] sm:$0xff] }
 0xa32   : > { %v20106_v23 = vmov %v19403_v39  ;;  %v19409_v60 = vadd.f32 %v20109_v33, %v10539_v37   ;;  %v20116_v34 = vmov %v19418_v44  ;;  %v19436_v61 = vadd.f32 %v20127_v63, %v10548_v45   ;;  %v20131_v44 = vld [vmem:[#allocation79_spill] sm:$0xff]  ;;  %v20185_v14 = vld [vmem:[#allocation61_spill] sm:$0xff] }
 0xa33   : > { %v20118_v9 = vmov %v19421_v29  ;;  %v20122_v0 = vmov %v19427_v2  ;;  %v20130_v4 = vmov %v19439_v10  ;;  %v19442_v20 = vadd.f32 %v20131_v44, %v10550_v62   ;;  %v20144_v2 = vld [vmem:[#allocation74_spill] sm:$0xff]  ;;  %v20147_v29 = vld [vmem:[#allocation73_spill] sm:$0xff] }
 0xa34   : > { %v20110_v51 = vmov %v19409_v60  ;;  %v20125_v60 = vld [vmem:[#allocation82_spill] sm:$0xff]  ;;  %v20128_v54 = vmov %v19436_v61  ;;  %v20135_v35 = vmov %v19445_v49  ;;  %v19448_v37 = vadd.f32 %v20136_v6, %v10552_v48   ;;  %v20183_v16 = vld [vmem:[#allocation63_spill] sm:$0xff]  ;;  %v20187_v62 = vld [vmem:[#allocation61_spill] sm:$0xff] (%p19465_p1) }
 0xa35   : > { %v19433_v7 = vadd.f32 %v20125_v60, %v10547_v40   ;;  %20132 = vst [vmem:[#allocation68_spill] sm:$0xff] %v19442_v20  ;;  %v19451_v56 = vadd.f32 %v20139_v27, %v10553_v59   ;;  %v19454_v27 = vadd.f32 %v20141_v31, %v10554_v11   ;;  %v19457_v6 = vadd.f32 %v20144_v2, %v10555_v43   ;;  %v20182_v17 = vld [vmem:[#allocation64_spill] sm:$0xff]  ;;  %v20184_v30 = vld [vmem:[#allocation62_spill] sm:$0xff]  ;;  %v20188_v48 = vld [vmem:[#allocation63_spill] sm:$0xff] (%p19465_p1) }
 0xa36   : > { %20137 = vst [vmem:[#allocation69_spill] sm:$0xff] %v19448_v37  ;;  %v19460_v46 = vadd.f32 %v20147_v29, %v10556_v41   ;;  %v20156_v50 = vmov %v19448_v37  ;;  %v20158_v49 = vmov %v20135_v35  ;;  %v20159_v53 = vmov %v19442_v20  ;;  %v20181_v57 = vld [vmem:[#allocation65_spill] sm:$0xff] }
 0xa37   : > { %v20126_v25 = vmov %v19433_v7  ;;  %v20140_v5 = vmov %v19451_v56  ;;  %20142 = vst [vmem:[#allocation70_spill] sm:$0xff] %v19454_v27  ;;  %v20143_v19 = vmov %v19454_v27  ;;  %v20152_v45 = vmov %v19457_v6  ;;  %v20180_v39 = vld [vmem:[#allocation66_spill] sm:$0xff]  ;;  %v20189_v11 = vld [vmem:[#allocation65_spill] sm:$0xff] (%p19465_p1) }
 0xa38   : > { %20145 = vst [vmem:[#allocation71_spill] sm:$0xff] %v19457_v6  ;;  %v20149_v38 = vmov %v19460_v46  ;;  %v20153_v6 = vmov %v20152_v45  ;;  %v20154_v27 = vmov %v20143_v19  ;;  %v20155_v56 = vmov %v20140_v5  ;;  %v20179_v33 = vld [vmem:[#allocation67_spill] sm:$0xff]  ;;  %v20192_v45 = vld [vmem:[#allocation64_spill] sm:$0xff] (%p19465_p1) }
 0xa39   : > { %20148 = vst [vmem:[#allocation72_spill] sm:$0xff] %v19460_v46  ;;  %v20151_v46 = vmov %v20149_v38  ;;  %v20157_v37 = vmov %v20156_v50  ;;  %v20160_v20 = vmov %v20159_v53  ;;  %v20161_v10 = vmov %v20130_v4  ;;  %v20190_v41 = vld [vmem:[#allocation67_spill] sm:$0xff] (%p19465_p1)  ;;  %v20191_v50 = vld [vmem:[#allocation62_spill] sm:$0xff] (%p19465_p1) }
 0xa3a   : > { %v20162_v61 = vmov %v20128_v54  ;;  %v20163_v7 = vmov %v20126_v25  ;;  %v20164_v31 = vmov %v20124_v42  ;;  %v20165_v2 = vmov %v20122_v0  ;;  %10364 = sbr.rel (!%p19465_p1) target bundleno = 2496 (0x9c0), region = 57  ;;  %v20193_v37 = vld [vmem:[#allocation66_spill] sm:$0xff] (%p19465_p1) }
 0xa3b   : > { %v20166_v22 = vmov %v20120_v58  ;;  %v20167_v29 = vmov %v20118_v9  ;;  %v20168_v44 = vmov %v20116_v34  ;;  %v20169_v26 = vmov %v20114_v52 }
 0xa3c   : > { %v20170_v36 = vmov %v20112_v32  ;;  %v20171_v60 = vmov %v20110_v51  ;;  %v20172_v63 = vmov %v20108_v15  ;;  %v20173_v40 = vmov %v20106_v23 }
 0xa3d   : > { %v20174_v21 = vmov %v20104_v47  ;;  %v20175_v55 = vmov %v20102_v8  ;;  %v20176_v24 = vmov %v20100_v1  ;;  %v20177_v13 = vmov %v20098_v3 }
 0xa3e   : > { %v20178_v12 = vmov %v20096_v18  ;;  %v10589_v28 = vmul.f32 (%p19465_p1), %v20187_v62, %v20187_v62  ;;  %v10591_v59 = vmul.f32 (%p19465_p1), %v20188_v48, %v20188_v48  ;;  %v10593_v43 = vmul.f32 (%p19465_p1), %v20189_v11, %v20189_v11 }
 0xa3f   :  { %v10595_v38 = vmul.f32 %v20190_v41, %v20190_v41  ;;  %v10590_v14 = vmul.f32 %v20191_v50, %v20191_v50  ;;  %v10592_v53 = vmul.f32 %v20192_v45, %v20192_v45  ;;  %v10597_v20 = vmul.f32 %v20098_v3, %v20098_v3 }
 0xa40   :  { %v10621_v19 = vadd.f32 %v10591_v59, %v10589_v28  ;;  %v10594_v49 = vmul.f32 %v20193_v37, %v20193_v37  ;;  %v10599_v36 = vmul.f32 %v20102_v8, %v20102_v8  ;;  %v10596_v21 = vmul.f32 %v20096_v18, %v20096_v18 }
 0xa41   :  { %v10636_v30 = vadd.f32 %v10592_v53, %v10590_v14  ;;  %v10601_v16 = vmul.f32 %v20106_v23, %v20106_v23  ;;  %v10598_v57 = vmul.f32 %v20100_v1, %v20100_v1  ;;  %v10600_v10 = vmul.f32 %v20104_v47, %v20104_v47 }
 0xa42   :  { %v10622_v56 = vadd.f32 %v10621_v19, %v10593_v43  ;;  %v10603_v19 = vmul.f32 %v20110_v51, %v20110_v51  ;;  %v10605_v61 = vmul.f32 %v20114_v52, %v20114_v52  ;;  %v10602_v24 = vmul.f32 %v20108_v15, %v20108_v15 }
 0xa43   :  { %v10637_v39 = vadd.f32 %v10636_v30, %v10594_v49  ;;  %v10607_v7 = vmul.f32 %v20118_v9, %v20118_v9  ;;  %v10604_v12 = vmul.f32 %v20112_v32, %v20112_v32  ;;  %v10609_v63 = vmul.f32 %v20122_v0, %v20122_v0 }
 0xa44   :  { %v10623_v40 = vadd.f32 %v10622_v56, %v10595_v38  ;;  %v10606_v44 = vmul.f32 %v20116_v34, %v20116_v34  ;;  %v10611_v6 = vmul.f32 %v20126_v25, %v20126_v25  ;;  %v10608_v31 = vmul.f32 %v20120_v58, %v20120_v58 }
 0xa45   :  { %v10638_v22 = vadd.f32 %v10637_v39, %v10596_v21  ;;  %v10613_v29 = vmul.f32 %v20130_v4, %v20130_v4  ;;  %v10610_v28 = vmul.f32 %v20124_v42, %v20124_v42  ;;  %v10615_v43 = vmul.f32 %v20135_v35, %v20135_v35  ;;  %v20196_v39 = vld [vmem:[#allocation69_spill] sm:$0xff] }
 0xa46   :  { %v10624_v17 = vadd.f32 %v10623_v40, %v10597_v20  ;;  %v10612_v20 = vmul.f32 %v20128_v54, %v20128_v54  ;;  %v10617_v49 = vmul.f32 %v20140_v5, %v20140_v5  ;;  %v20194_v40 = vld [vmem:[#allocation68_spill] sm:$0xff] }
 0xa47   :  { %v10639_v55 = vadd.f32 %v10638_v22, %v10598_v57  ;;  %v10614_v21 = vmul.f32 %v20194_v40, %v20194_v40 }
 0xa48   :  { %v10625_v33 = vadd.f32 %v10624_v17, %v10599_v36 }
 0xa49   :  { %v10640_v60 = vadd.f32 %v10639_v55, %v10600_v10 }
 0xa4a   :  { %v10626_v53 = vadd.f32 %v10625_v33, %v10601_v16  ;;  %v20195_v16 = vld [vmem:[#allocation71_spill] sm:$0xff] }
 0xa4b   :  { %v10641_v46 = vadd.f32 %v10640_v60, %v10602_v24  ;;  %v10619_v17 = vmul.f32 %v20195_v16, %v20195_v16 }
 0xa4c   :  { %v10627_v13 = vadd.f32 %v10626_v53, %v10603_v19  ;;  %v10616_v19 = vmul.f32 %v20196_v39, %v20196_v39 }
 0xa4d   :  { %v10642_v2 = vadd.f32 %v10641_v46, %v10604_v12 }
 0xa4e   :  { %v10628_v26 = vadd.f32 %v10627_v13, %v10605_v61  ;;  %v20197_v61 = vld [vmem:[#allocation70_spill] sm:$0xff] }
 0xa4f   :  { %v10643_v59 = vadd.f32 %v10642_v2, %v10606_v44  ;;  %v10618_v53 = vmul.f32 %v20197_v61, %v20197_v61 }
 0xa50   :  { %v10629_v27 = vadd.f32 %v10628_v26, %v10607_v7  ;;  %v20198_v7 = vld [vmem:[#allocation72_spill] sm:$0xff] }
 0xa51   :  { %v10644_v56 = vadd.f32 %v10643_v59, %v10608_v31  ;;  %v10620_v13 = vmul.f32 %v20198_v7, %v20198_v7 }
 0xa52   :  { %v10630_v38 = vadd.f32 %v10629_v27, %v10609_v63 }
 0xa53   :  { %v10645_v30 = vadd.f32 %v10644_v56, %v10610_v28 }
 0xa54   :  { %v10631_v14 = vadd.f32 %v10630_v38, %v10611_v6 }
 0xa55   :  { %v10646_v33 = vadd.f32 %v10645_v30, %v10612_v20 }
 0xa56   :  { %v10632_v36 = vadd.f32 %v10631_v14, %v10613_v29 }
 0xa57   :  { %v10647_v22 = vadd.f32 %v10646_v33, %v10614_v21 }
 0xa58   :  { %v10633_v57 = vadd.f32 %v10632_v36, %v10615_v43 }
 0xa59   :  { %v10648_v55 = vadd.f32 %v10647_v22, %v10616_v19 }
 0xa5a   :  { %v10634_v10 = vadd.f32 %v10633_v57, %v10617_v49 }
 0xa5b   :  { %v10649_v12 = vadd.f32 %v10648_v55, %v10618_v53 }
 0xa5c   :  { %v10635_v24 = vadd.f32 %v10634_v10, %v10619_v17 }
 0xa5d   :  { %v10650_v60 = vadd.f32 %v10649_v12, %v10620_v13 }
 0xa5e   :  { %12549 = vrsqrt.f32 %v10635_v24  ;;  %vm10660_vm10 = vcmp.eq.f32.partialorder %v10635_v24, inf  ;;  %v10663_v38 = vand.u32 2147483648, %v10635_v24  ;;  %vm10662_vm11 = vcmp.eq.f32.partialorder %v10635_v24, 0.0 }
 0xa5f   :  { %12551 = vrsqrt.f32 %v10650_v60  ;;  %v10651_v14 = vadd.f32 1.0, %v10635_v24  ;;  %vm10672_vm12 = vcmp.eq.f32.partialorder %v10650_v60, inf  ;;  %v10675_v21 = vand.u32 2147483648, %v10650_v60 }
 0xa60   :  { %vm10674_vm13 = vcmp.eq.f32.partialorder %v10650_v60, 0.0  ;;  %v10652_v57 = vadd.f32 1.0, %v10650_v60 }
 0xa64   :  { %v12550_v63 = vpop.eup %12549 }
 0xa65   :  { %v10654_v26 = vmul.f32 %v12550_v63, %v10635_v24  ;;  %v12552_v46 = vpop.eup %12551 }
 0xa66   :  { %v10666_v27 = vmul.f32 %v12552_v46, %v10650_v60 }
 0xa67   :  { %v10655_v44 = vmul.f32 %v12550_v63, %v10654_v26 }
 0xa68   :  { %v10667_v2 = vmul.f32 %v12552_v46, %v10666_v27 }
 0xa69   :  { %v10656_v6 = vmul.f32 0.5, %v10655_v44 }
 0xa6a   :  { %v10668_v28 = vmul.f32 0.5, %v10667_v2 }
 0xa6b   :  { %v10657_v31 = vsub.f32 1.5, %v10656_v6 }
 0xa6c   :  { %v10669_v43 = vsub.f32 1.5, %v10668_v28 }
 0xa6d   :  { %v10658_v29 = vmul.f32 %v12550_v63, %v10657_v31 }
 0xa6e   :  { %v10670_v49 = vmul.f32 %v12552_v46, %v10669_v43 }
 0xa6f   :  { %v10659_v59 = vmul.f32 %v10658_v29, %v10635_v24 }
 0xa70   :  { %v10671_v30 = vmul.f32 %v10670_v49, %v10650_v60 }
 0xa71   :  { %v10661_v20 = vsel %vm10660_vm10, %v10635_v24, %v10659_v59 }
 0xa72   :  { %v10664_v56 = vsel %vm10662_vm11, %v10663_v38, %v10661_v20  ;;  %v10673_v19 = vsel %vm10672_vm12, %v10650_v60, %v10671_v30 }
 0xa73   :  { %v10677_v36 = vadd.f32 1e-08, %v10664_v56  ;;  %v10676_v33 = vsel %vm10674_vm13, %v10675_v21, %v10673_v19 }
 0xa74   :  { %v10678_v10 = vadd.f32 1e-08, %v10676_v33 }
 0xa75   :  { %v10679_v17 = vmul.f32 %v10677_v36, %v10651_v14 }
 0xa76   :  { %v10680_v22 = vmul.f32 %v10678_v10, %v10652_v57 }
 0xa77   :  { %12553 = vrcp.f32 %v10679_v17 }
 0xa78   :  { %12555 = vrcp.f32 %v10680_v22 }
 0xa7d   :  { %v12554_v53 = vpop.eup %12553 }
 0xa7e   :  { %v10683_v55 = vmul.f32 %v12554_v53, %v10635_v24  ;;  %v12556_v44 = vpop.eup %12555 }
 0xa7f   :  { %v10684_v6 = vmul.f32 %v12556_v44, %v10650_v60 }
 0xa80   :  { %v10685_v13 = vmul.f32 %v10683_v55, %v20187_v62  ;;  %v10687_v12 = vmul.f32 %v10683_v55, %v20188_v48  ;;  %v10689_v63 = vmul.f32 %v10683_v55, %v20189_v11  ;;  %v10691_v26 = vmul.f32 %v10683_v55, %v20190_v41 }
 0xa81   :  { %v10693_v46 = vmul.f32 %v10683_v55, %v20098_v3  ;;  %v10686_v62 = vmul.f32 %v10684_v6, %v20191_v50  ;;  %v10688_v48 = vmul.f32 %v10684_v6, %v20192_v45  ;;  %v10690_v11 = vmul.f32 %v10684_v6, %v20193_v37 }
 0xa82   :  { %10717 = vst [vmem:[%s19764_s2] sm:$0xff] %v10685_v13  ;;  %v10692_v3 = vmul.f32 %v10684_v6, %v20096_v18  ;;  %v10694_v50 = vmul.f32 %v10684_v6, %v20100_v1  ;;  %v10695_v45 = vmul.f32 %v10683_v55, %v20102_v8  ;;  %v10696_v18 = vmul.f32 %v10684_v6, %v20104_v47 }
 0xa83   :  { %10719 = vst [vmem:[%s19764_s2 + $0x10] sm:$0xff] %v10687_v12  ;;  %v10697_v41 = vmul.f32 %v10683_v55, %v20106_v23  ;;  %v10698_v1 = vmul.f32 %v10684_v6, %v20108_v15  ;;  %v10699_v8 = vmul.f32 %v10683_v55, %v20110_v51  ;;  %v10700_v47 = vmul.f32 %v10684_v6, %v20112_v32 }
 0xa84   :  { %10721 = vst [vmem:[%s19764_s2 + $0x20] sm:$0xff] %v10689_v63  ;;  %v10701_v23 = vmul.f32 %v10683_v55, %v20114_v52  ;;  %v10702_v15 = vmul.f32 %v10684_v6, %v20116_v34  ;;  %v10703_v51 = vmul.f32 %v10683_v55, %v20118_v9  ;;  %v10704_v32 = vmul.f32 %v10684_v6, %v20120_v58 }
 0xa85   :  { %10723 = vst [vmem:[%s19764_s2 + $0x30] sm:$0xff] %v10691_v26  ;;  %v10705_v52 = vmul.f32 %v10683_v55, %v20122_v0  ;;  %v10706_v34 = vmul.f32 %v10684_v6, %v20124_v42  ;;  %v10707_v9 = vmul.f32 %v10683_v55, %v20126_v25  ;;  %v10708_v58 = vmul.f32 %v10684_v6, %v20128_v54 }
 0xa86   :  { %10725 = vst [vmem:[%s19764_s2 + $0x40] sm:$0xff] %v10693_v46  ;;  %v10709_v0 = vmul.f32 %v10683_v55, %v20130_v4  ;;  %v10710_v42 = vmul.f32 %v10684_v6, %v20194_v40  ;;  %v10711_v25 = vmul.f32 %v10683_v55, %v20135_v35  ;;  %v10712_v54 = vmul.f32 %v10684_v6, %v20196_v39 }
 0xa87   :  { %10718 = vst [vmem:[%s19764_s2 + $0x8] sm:$0xff] %v10686_v62  ;;  %v10713_v4 = vmul.f32 %v10683_v55, %v20140_v5  ;;  %v10714_v37 = vmul.f32 %v10684_v6, %v20197_v61  ;;  %v10715_v35 = vmul.f32 %v10683_v55, %v20195_v16  ;;  %v10716_v40 = vmul.f32 %v10684_v6, %v20198_v7 }
 0xa88   :  { %10720 = vst [vmem:[%s19764_s2 + $0x18] sm:$0xff] %v10688_v48 }
 0xa89   :  { %10722 = vst [vmem:[%s19764_s2 + $0x28] sm:$0xff] %v10690_v11 }
 0xa8a   :  { %10724 = vst [vmem:[%s19764_s2 + $0x38] sm:$0xff] %v10692_v3 }
 0xa8b   :  { %10726 = vst [vmem:[%s19764_s2 + $0x48] sm:$0xff] %v10694_v50 }
 0xa8c   :  { %10727 = vst [vmem:[%s19764_s2 + $0x50] sm:$0xff] %v10695_v45 }
 0xa8d   :  { %10728 = vst [vmem:[%s19764_s2 + $0x58] sm:$0xff] %v10696_v18 }
 0xa8e   :  { %10729 = vst [vmem:[%s19764_s2 + $0x60] sm:$0xff] %v10697_v41 }
 0xa8f   :  { %10730 = vst [vmem:[%s19764_s2 + $0x68] sm:$0xff] %v10698_v1 }
 0xa90   :  { %10731 = vst [vmem:[%s19764_s2 + $0x70] sm:$0xff] %v10699_v8 }
 0xa91   :  { %10732 = vst [vmem:[%s19764_s2 + $0x78] sm:$0xff] %v10700_v47 }
 0xa92   :  { %10733 = vst [vmem:[%s19764_s2 + $0x80] sm:$0xff] %v10701_v23 }
 0xa93   :  { %10734 = vst [vmem:[%s19764_s2 + $0x88] sm:$0xff] %v10702_v15 }
 0xa94   :  { %10735 = vst [vmem:[%s19764_s2 + $0x90] sm:$0xff] %v10703_v51 }
 0xa95   :  { %10736 = vst [vmem:[%s19764_s2 + $0x98] sm:$0xff] %v10704_v32 }
 0xa96   :  { %10737 = vst [vmem:[%s19764_s2 + $0xa0] sm:$0xff] %v10705_v52 }
 0xa97   :  { %10738 = vst [vmem:[%s19764_s2 + $0xa8] sm:$0xff] %v10706_v34 }
 0xa98   :  { %10739 = vst [vmem:[%s19764_s2 + $0xb0] sm:$0xff] %v10707_v9 }
 0xa99   :  { %10740 = vst [vmem:[%s19764_s2 + $0xb8] sm:$0xff] %v10708_v58 }
 0xa9a   :  { %10741 = vst [vmem:[%s19764_s2 + $0xc0] sm:$0xff] %v10709_v0 }
 0xa9b   :  { %10742 = vst [vmem:[%s19764_s2 + $0xc8] sm:$0xff] %v10710_v42 }
 0xa9c   :  { %10743 = vst [vmem:[%s19764_s2 + $0xd0] sm:$0xff] %v10711_v25 }
 0xa9d   :  { %10744 = vst [vmem:[%s19764_s2 + $0xd8] sm:$0xff] %v10712_v54 }
 0xa9e   :  { %10745 = vst [vmem:[%s19764_s2 + $0xe0] sm:$0xff] %v10713_v4 }
 0xa9f   :  { %10746 = vst [vmem:[%s19764_s2 + $0xe8] sm:$0xff] %v10714_v37 }
 0xaa0   :  { %10747 = vst [vmem:[%s19764_s2 + $0xf0] sm:$0xff] %v10715_v35 }
 0xaa1   :  { %10748 = vst [vmem:[%s19764_s2 + $0xf8] sm:$0xff] %v10716_v40 }

</bundles_post_ra>
